<compile_context>
chip_gen: v7x
topology: tpu7x:2x2x1
jax: 0.10.0
libtpu: 0.0.40
codegen_flags: <defaults>
</compile_context>

<pallas_src>
import jax
import jax.numpy as jnp
import numpy as np
from jax import lax
from jax.experimental import pallas as pl
from jax.experimental.pallas import tpu as pltpu

EPS = 1e-5
_VMEM_LIMIT = None


# ----------------------------------------------------------------------------
# small helpers
# ----------------------------------------------------------------------------
def _vmem_limit_bytes():
    """Per-generation scoped-VMEM limit."""
    global _VMEM_LIMIT
    if _VMEM_LIMIT is None:
        try:
            cap = int(pltpu.get_tpu_info().vmem_capacity_bytes)
            # v5e/v6e: 128 MiB -> 96 MiB; v7x: 64 MiB -> 48 MiB.
            _VMEM_LIMIT = min((cap * 3) // 4, 96 * 1024 * 1024)
        except Exception:
            _VMEM_LIMIT = 32 * 1024 * 1024
    return _VMEM_LIMIT


def _cparams():
    return pltpu.CompilerParams(
        dimension_semantics=("parallel",),
        vmem_limit_bytes=_vmem_limit_bytes(),
    )


def _rup(x, m):
    return ((x + m - 1) // m) * m


def _pad_lane(c):
    # Output / lane channel dims: keep 128-multiples for lane-dense stores and
    # 128-aligned im2col sub-slices.
    return _rup(c, 128)


def _pad_contract(c):
    # Contraction-only channel dims: only pad tiny counts to the bf16 sublane
    # tile instead of 128 (avoids 8-32x redundant MXU work / HBM bytes).
    return _rup(c, 128) if c >= 128 else _rup(c, 16)


def _row_tile(m):
    """Largest row tile <= 2048 that evenly divides m (keeps BN stats exact)."""
    for t in (2048, 1024, 512, 256, 128, 64, 32, 16, 8):
        if m % t == 0:
            return t
    return m   # TODO(synk): odd row counts fall back to a single block.


def _write_stats(st_ref, v):
    """v: (rows, C) f32.  st_ref block: (1, 2, C); row0 = sum, row1 = sum(v^2)."""
    st_ref[0, 0:1, :] = jnp.sum(v, axis=0, keepdims=True)
    st_ref[0, 1:2, :] = jnp.sum(v * v, axis=0, keepdims=True)


def _affine_from_stats(st, n_rows, gamma, beta):
    """Fold global batch stats + BN affine into per-channel (scale, shift)."""
    s = jnp.sum(st[:, 0, :], axis=0)
    ss = jnp.sum(st[:, 1, :], axis=0)
    mean = s / n_rows
    var = jnp.maximum(ss / n_rows - mean * mean, 0.0)
    scale = gamma * lax.rsqrt(var + EPS)
    shift = beta - mean * scale
    return jnp.stack([scale, shift]).astype(jnp.float32)   # (2, C)


# ----------------------------------------------------------------------------
# K1: 1x1 conv (bf16 MXU) + bn partial stats (row-tiled)
# ----------------------------------------------------------------------------
def _conv1x1_stats_kernel(x_ref, w_ref, y_ref, st_ref):
    y = jnp.dot(x_ref[...], w_ref[...], preferred_element_type=jnp.float32)
    _write_stats(st_ref, y)
    y_ref[...] = y.astype(jnp.bfloat16)


def _conv1x1_stats(x_rows, w, tile):
    M, Cin = x_rows.shape
    Cout = w.shape[1]
    n_tiles = M // tile
    cost = pl.CostEstimate(
        flops=2 * M * Cin * Cout,
        transcendentals=0,
        bytes_accessed=M * Cin * 2 + Cin * Cout * 2 + M * Cout * 2 + n_tiles * 2 * Cout * 4,
    )
    return pl.pallas_call(
        _conv1x1_stats_kernel,
        grid=(n_tiles,),
        in_specs=[
            pl.BlockSpec((tile, Cin), lambda i: (i, 0)),
            pl.BlockSpec((Cin, Cout), lambda i: (0, 0)),
        ],
        out_specs=(
            pl.BlockSpec((tile, Cout), lambda i: (i, 0)),
            pl.BlockSpec((1, 2, Cout), lambda i: (i, 0, 0)),
        ),
        out_shape=(
            jax.ShapeDtypeStruct((M, Cout), jnp.bfloat16),
            jax.ShapeDtypeStruct((n_tiles, 2, Cout), jnp.float32),
        ),
        compiler_params=_cparams(),
        cost_estimate=cost,
    )(x_rows, w)


# ----------------------------------------------------------------------------
# K2: bn1-apply + relu fused into the 3x3 conv (per-image, im2col, one matmul)
# ----------------------------------------------------------------------------
def _conv3x3_s1_kernel(y_ref, w2_ref, s1_ref, h_ref, st_ref, pad_ref, col_ref):
    _, H, W, C = y_ref.shape
    HW = H * W
    sc = s1_ref[0:1, :]
    sh = s1_ref[1:2, :]
    a1 = jnp.maximum(y_ref[0].astype(jnp.float32) * sc + sh, 0.0).astype(jnp.bfloat16)

    # Zero only the halo border, then write the interior once.
    zr = jnp.zeros((1, W + 2, C), jnp.bfloat16)
    zc = jnp.zeros((H + 2, 1, C), jnp.bfloat16)
    pad_ref[0:1, :, :] = zr
    pad_ref[H + 1:H + 2, :, :] = zr
    pad_ref[:, 0:1, :] = zc
    pad_ref[:, W + 1:W + 2, :] = zc
    pad_ref[1:H + 1, 1:W + 1, :] = a1

    # im2col: 9 lane-aligned patch copies, then ONE K=9*C MXU matmul.
    for di in range(3):
        for dj in range(3):
            t = di * 3 + dj
            col_ref[:, t * C:(t + 1) * C] = pad_ref[di:di + H, dj:dj + W, :].reshape(HW, C)
    h = jnp.dot(col_ref[...], w2_ref[...], preferred_element_type=jnp.float32)
    _write_stats(st_ref, h)
    h_ref[...] = h.reshape(1, H, W, C).astype(jnp.bfloat16)


def _conv3x3_s2_kernel(y00_ref, y01_ref, y10_ref, y11_ref, w2_ref, s1_ref,
                       h_ref, st_ref, p00, p01, p10, p11, col_ref):
    # Stride-2 conv computed directly from the four (row-parity, col-parity)
    # planes of the conv1 output (already contiguous slabs thanks to the
    # parity-major row order produced by K1).  Only contiguous slices are used.
    _, Ho, Wo, C = h_ref.shape
    HW = Ho * Wo
    sc = s1_ref[0:1, :]
    sh = s1_ref[1:2, :]

    def act(yref):
        return jnp.maximum(yref[0].astype(jnp.float32) * sc + sh, 0.0).astype(jnp.bfloat16)

    planes = ((p00, p01), (p10, p11))
    srcs = ((y00_ref, y01_ref), (y10_ref, y11_ref))
    zr = jnp.zeros((1, Wo + 1, C), jnp.bfloat16)
    zc = jnp.zeros((Ho + 1, 1, C), jnp.bfloat16)
    for rp in range(2):
        for cp in range(2):
            pr = planes[rp][cp]
            pr[0:1, :, :] = zr                 # zero-pad row (original row -1)
            pr[:, 0:1, :] = zc                 # zero-pad col (original col -1)
            pr[1:Ho + 1, 1:Wo + 1, :] = act(srcs[rp][cp])

    # Output (oh, ow), tap (di, dj) reads original pixel (2*oh + di - 1, 2*ow + dj - 1):
    #   row parity = (di + 1) % 2, plane-row start = 0 if di == 0 else 1 (same for cols).
    for di in range(3):
        for dj in range(3):
            t = di * 3 + dj
            rp, cp = (di + 1) % 2, (dj + 1) % 2
            qs = 0 if di == 0 else 1
            ss = 0 if dj == 0 else 1
            pr = planes[rp][cp]
            col_ref[:, t * C:(t + 1) * C] = pr[qs:qs + Ho, ss:ss + Wo, :].reshape(HW, C)
    h = jnp.dot(col_ref[...], w2_ref[...], preferred_element_type=jnp.float32)
    _write_stats(st_ref, h)
    h_ref[...] = h.reshape(1, Ho, Wo, C).astype(jnp.bfloat16)


def _conv3x3_stage(y1_rows, w2r, s1, N, H, W, C, stride):
    Ho, Wo = H // stride, W // stride
    cost = pl.CostEstimate(
        flops=2 * 9 * N * Ho * Wo * C * C,
        transcendentals=0,
        bytes_accessed=N * H * W * C * 2 + 9 * C * C * 2 + N * Ho * Wo * C * 2 + N * 2 * C * 4,
    )
    out_shape = (
        jax.ShapeDtypeStruct((N, Ho, Wo, C), jnp.bfloat16),
        jax.ShapeDtypeStruct((N, 2, C), jnp.float32),
    )
    out_specs = (
        pl.BlockSpec((1, Ho, Wo, C), lambda n: (n, 0, 0, 0)),
        pl.BlockSpec((1, 2, C), lambda n: (n, 0, 0)),
    )
    w2_spec = pl.BlockSpec((9 * C, C), lambda n: (0, 0))
    s1_spec = pl.BlockSpec((2, C), lambda n: (0, 0))
    col = pltpu.VMEM((Ho * Wo, 9 * C), jnp.bfloat16)

    if stride == 1:
        y1_img = y1_rows.reshape(N, H, W, C)
        return pl.pallas_call(
            _conv3x3_s1_kernel,
            grid=(N,),
            in_specs=[pl.BlockSpec((1, H, W, C), lambda n: (n, 0, 0, 0)), w2_spec, s1_spec],
            out_specs=out_specs,
            out_shape=out_shape,
            scratch_shapes=[pltpu.VMEM((H + 2, W + 2, C), jnp.bfloat16), col],
            compiler_params=_cparams(),
            cost_estimate=cost,
        )(y1_img, w2r, s1)

    # stride == 2: K1 already produced y1 rows in (n, row-parity, col-parity,
    # oh, ow) order, so the four parity planes are contiguous slabs of the same
    # array (free reshape, no strided XLA gather of the conv1 output).
    y1_par = y1_rows.reshape(N * 4, Ho, Wo, C)

    def par_spec(k):
        return pl.BlockSpec((1, Ho, Wo, C), lambda n, k=k: (4 * n + k, 0, 0, 0))

    return pl.pallas_call(
        _conv3x3_s2_kernel,
        grid=(N,),
        in_specs=[par_spec(0), par_spec(1), par_spec(2), par_spec(3), w2_spec, s1_spec],
        out_specs=out_specs,
        out_shape=out_shape,
        scratch_shapes=[pltpu.VMEM((Ho + 1, Wo + 1, C), jnp.bfloat16) for _ in range(4)] + [col],
        compiler_params=_cparams(),
        cost_estimate=cost,
    )(y1_par, y1_par, y1_par, y1_par, w2r, s1)


# ----------------------------------------------------------------------------
# K3: bn2-apply + relu -> conv3 (1x1) [+ projection shortcut conv] + stats
# ----------------------------------------------------------------------------
def _tail1_proj_kernel(h_ref, s2_ref, w3_ref, xs_ref, ws_ref,
                       y3_ref, ysc_ref, st3_ref, sts_ref):
    a2 = jnp.maximum(h_ref[...].astype(jnp.float32) * s2_ref[0:1, :] + s2_ref[1:2, :],
                     0.0).astype(jnp.bfloat16)
    y3 = jnp.dot(a2, w3_ref[...], preferred_element_type=jnp.float32)
    _write_stats(st3_ref, y3)
    y3_ref[...] = y3.astype(jnp.bfloat16)
    ysc = jnp.dot(xs_ref[...], ws_ref[...], preferred_element_type=jnp.float32)
    _write_stats(sts_ref, ysc)
    ysc_ref[...] = ysc.astype(jnp.bfloat16)


def _tail1_id_kernel(h_ref, s2_ref, w3_ref, y3_ref, st3_ref):
    a2 = jnp.maximum(h_ref[...].astype(jnp.float32) * s2_ref[0:1, :] + s2_ref[1:2, :],
                     0.0).astype(jnp.bfloat16)
    y3 = jnp.dot(a2, w3_ref[...], preferred_element_type=jnp.float32)
    _write_stats(st3_ref, y3)
    y3_ref[...] = y3.astype(jnp.bfloat16)


def _tail_conv_proj(h2_rows, s2, w3, xs_rows, ws, tile):
    M2, C = h2_rows.shape
    E = w3.shape[1]
    Cin = xs_rows.shape[1]
    n_tiles = M2 // tile
    cost = pl.CostEstimate(
        flops=2 * M2 * C * E + 2 * M2 * Cin * E,
        transcendentals=0,
        bytes_accessed=M2 * (C + Cin) * 2 + (C + Cin) * E * 2 + 2 * M2 * E * 2,
    )
    return pl.pallas_call(
        _tail1_proj_kernel,
        grid=(n_tiles,),
        in_specs=[
            pl.BlockSpec((tile, C), lambda i: (i, 0)),
            pl.BlockSpec((2, C), lambda i: (0, 0)),
            pl.BlockSpec((C, E), lambda i: (0, 0)),
            pl.BlockSpec((tile, Cin), lambda i: (i, 0)),
            pl.BlockSpec((Cin, E), lambda i: (0, 0)),
        ],
        out_specs=(
            pl.BlockSpec((tile, E), lambda i: (i, 0)),
            pl.BlockSpec((tile, E), lambda i: (i, 0)),
            pl.BlockSpec((1, 2, E), lambda i: (i, 0, 0)),
            pl.BlockSpec((1, 2, E), lambda i: (i, 0, 0)),
        ),
        out_shape=(
            jax.ShapeDtypeStruct((M2, E), jnp.bfloat16),
            jax.ShapeDtypeStruct((M2, E), jnp.bfloat16),
            jax.ShapeDtypeStruct((n_tiles, 2, E), jnp.float32),
            jax.ShapeDtypeStruct((n_tiles, 2, E), jnp.float32),
        ),
        compiler_params=_cparams(),
        cost_estimate=cost,
    )(h2_rows, s2, w3, xs_rows, ws)


def _tail_conv_id(h2_rows, s2, w3, tile):
    M2, C = h2_rows.shape
    E = w3.shape[1]
    n_tiles = M2 // tile
    cost = pl.CostEstimate(
        flops=2 * M2 * C * E,
        transcendentals=0,
        bytes_accessed=M2 * C * 2 + C * E * 2 + M2 * E * 2,
    )
    return pl.pallas_call(
        _tail1_id_kernel,
        grid=(n_tiles,),
        in_specs=[
            pl.BlockSpec((tile, C), lambda i: (i, 0)),
            pl.BlockSpec((2, C), lambda i: (0, 0)),
            pl.BlockSpec((C, E), lambda i: (0, 0)),
        ],
        out_specs=(
            pl.BlockSpec((tile, E), lambda i: (i, 0)),
            pl.BlockSpec((1, 2, E), lambda i: (i, 0, 0)),
        ),
        out_shape=(
            jax.ShapeDtypeStruct((M2, E), jnp.bfloat16),
            jax.ShapeDtypeStruct((n_tiles, 2, E), jnp.float32),
        ),
        compiler_params=_cparams(),
        cost_estimate=cost,
    )(h2_rows, s2, w3)


# ----------------------------------------------------------------------------
# K4: bn3-apply (+ shortcut bn-apply) + residual add + relu
# ----------------------------------------------------------------------------
def _tail2_proj_kernel(y3_ref, s3_ref, ysc_ref, ss_ref, o_ref):
    o = (y3_ref[...].astype(jnp.float32) * s3_ref[0:1, :] + s3_ref[1:2, :]
         + ysc_ref[...].astype(jnp.float32) * ss_ref[0:1, :] + ss_ref[1:2, :])
    o_ref[...] = jnp.maximum(o, 0.0)


def _tail2_id_kernel(y3_ref, s3_ref, xid_ref, o_ref):
    o = (y3_ref[...].astype(jnp.float32) * s3_ref[0:1, :] + s3_ref[1:2, :]
         + xid_ref[...].astype(jnp.float32))
    o_ref[...] = jnp.maximum(o, 0.0)


def _apply_proj(y3, s3, ysc, ssc, tile):
    M2, E = y3.shape
    n_tiles = M2 // tile
    cost = pl.CostEstimate(flops=6 * M2 * E, transcendentals=0,
                           bytes_accessed=2 * M2 * E * 2 + M2 * E * 4)
    return pl.pallas_call(
        _tail2_proj_kernel,
        grid=(n_tiles,),
        in_specs=[
            pl.BlockSpec((tile, E), lambda i: (i, 0)),
            pl.BlockSpec((2, E), lambda i: (0, 0)),
            pl.BlockSpec((tile, E), lambda i: (i, 0)),
            pl.BlockSpec((2, E), lambda i: (0, 0)),
        ],
        out_specs=pl.BlockSpec((tile, E), lambda i: (i, 0)),
        out_shape=jax.ShapeDtypeStruct((M2, E), jnp.float32),
        compiler_params=_cparams(),
        cost_estimate=cost,
    )(y3, s3, ysc, ssc)


def _apply_id(y3, s3, xid_rows, tile):
    M2, E = y3.shape
    n_tiles = M2 // tile
    cost = pl.CostEstimate(flops=4 * M2 * E, transcendentals=0,
                           bytes_accessed=2 * M2 * E * 2 + M2 * E * 4)
    return pl.pallas_call(
        _tail2_id_kernel,
        grid=(n_tiles,),
        in_specs=[
            pl.BlockSpec((tile, E), lambda i: (i, 0)),
            pl.BlockSpec((2, E), lambda i: (0, 0)),
            pl.BlockSpec((tile, E), lambda i: (i, 0)),
        ],
        out_specs=pl.BlockSpec((tile, E), lambda i: (i, 0)),
        out_shape=jax.ShapeDtypeStruct((M2, E), jnp.float32),
        compiler_params=_cparams(),
        cost_estimate=cost,
    )(y3, s3, xid_rows)


# ----------------------------------------------------------------------------
# wrapper
# ----------------------------------------------------------------------------
def _bottleneck_forward(x_nchw, p, stride, in_planes, planes):
    assert stride in (1, 2), "ResNet Bottleneck only uses stride 1 or 2"
    E = 4 * planes
    has_proj = (stride != 1) or (in_planes != E)
    N, Cin, H, W = x_nchw.shape
    assert Cin == in_planes
    if stride == 2:
        assert H % 2 == 0 and W % 2 == 0
    Ho, Wo = H // stride, W // stride

    Pp, Ep = _pad_lane(planes), _pad_lane(E)
    # identity residual add requires the padded input channels to match Ep
    Cin_p = _pad_contract(in_planes) if has_proj else Ep

    def pad2(w, r, c):
        return jnp.pad(w.astype(jnp.float32),
                       ((0, r - w.shape[0]), (0, c - w.shape[1]))).astype(jnp.bfloat16)

    def pad_vec(v, c, fill):
        return jnp.pad(v.astype(jnp.float32), (0, c - v.shape[0]), constant_values=fill)

    # NCHW -> NHWC, channel-pad, cast to bf16 (halves the x HBM stream).  For
    # stride 2 the SAME XLA pass also permutes pixels into (row-parity,
    # col-parity)-major order so K2 and the strided shortcut read contiguous
    # slabs and the big conv1 output never needs a strided re-gather.
    x_nhwc = jnp.transpose(x_nchw.astype(jnp.float32), (0, 2, 3, 1))
    x_pad = jnp.pad(x_nhwc, ((0, 0), (0, 0), (0, 0),
                             (0, Cin_p - in_planes))).astype(jnp.bfloat16)
    if stride == 2:
        x_par = jnp.transpose(x_pad.reshape(N, Ho, 2, Wo, 2, Cin_p),
                              (0, 2, 4, 1, 3, 5))          # (N, 2, 2, Ho, Wo, C)
        x_rows = x_par.reshape(N * H * W, Cin_p)
    else:
        x_par = None
        x_rows = x_pad.reshape(N * H * W, Cin_p)

    M = N * H * W
    M2 = N * Ho * Wo
    tile1 = _row_tile(M)
    tile2 = _row_tile(M2)

    # ---- stage 1: conv1 (1x1) + bn1 partial stats ---------------------------
    w1 = pad2(p['w1'], Cin_p, Pp)
    y1_rows, st1 = _conv1x1_stats(x_rows, w1, tile1)
    s1 = _affine_from_stats(st1, M, pad_vec(p['g1'], Pp, 1.0), pad_vec(p['b1'], Pp, 0.0))

    # ---- stage 2: bn1-apply + relu + 3x3 conv (im2col, direct stride) -------
    w2r = jnp.pad(p['w2'].astype(jnp.float32),
                  ((0, 0), (0, 0), (0, Pp - planes), (0, Pp - planes))
                  ).reshape(9 * Pp, Pp).astype(jnp.bfloat16)
    h2_img, st2 = _conv3x3_stage(y1_rows, w2r, s1, N, H, W, Pp, stride)
    s2 = _affine_from_stats(st2, M2, pad_vec(p['g2'], Pp, 1.0), pad_vec(p['b2'], Pp, 0.0))

    # ---- stage 3: bn2-apply + relu -> conv3 (+ shortcut conv) + stats -------
    h2_rows = h2_img.reshape(M2, Pp)
    w3 = pad2(p['w3'], Pp, Ep)
    g3 = pad_vec(p['g3'], Ep, 1.0)
    b3 = pad_vec(p['b3'], Ep, 0.0)

    if has_proj:
        ws = pad2(p['ws'], Cin_p, Ep)
        xs_rows = x_rows if stride == 1 else x_par[:, 0, 0].reshape(M2, Cin_p)
        y3, ysc, st3, sts = _tail_conv_proj(h2_rows, s2, w3, xs_rows, ws, tile2)
        s3 = _affine_from_stats(st3, M2, g3, b3)
        ssc = _affine_from_stats(sts, M2, pad_vec(p['gs'], Ep, 1.0), pad_vec(p['bs'], Ep, 0.0))
        out_rows = _apply_proj(y3, s3, ysc, ssc, tile2)
    else:
        # identity shortcut (stride == 1 and Cin == E, hence Cin_p == Ep, M == M2)
        y3, st3 = _tail_conv_id(h2_rows, s2, w3, tile2)
        s3 = _affine_from_stats(st3, M2, g3, b3)
        out_rows = _apply_id(y3, s3, x_rows, tile2)

    out = out_rows.reshape(N, Ho, Wo, Ep)[..., :E]
    return jnp.transpose(out, (0, 3, 1, 2))          # back to NCHW, f32


bottleneck_forward = jax.jit(_bottleneck_forward, static_argnums=(2, 3, 4))


# ----------------------------------------------------------------------------
# pure-JAX f32 reference
# ----------------------------------------------------------------------------
def bottleneck_ref(x_nchw, p, stride, in_planes, planes):
    E = 4 * planes
    has_proj = (stride != 1) or (in_planes != E)
    x = jnp.transpose(x_nchw, (0, 2, 3, 1)).astype(jnp.float32)

    def bn(y, g, b):
        m = jnp.mean(y, axis=(0, 1, 2), keepdims=True)
        v = jnp.mean(jnp.square(y - m), axis=(0, 1, 2), keepdims=True)
        return (y - m) / jnp.sqrt(v + EPS) * g + b

    hi = lax.Precision.HIGHEST
    out1 = jax.nn.relu(bn(jnp.einsum('nhwc,cd->nhwd', x, p['w1'], precision=hi),
                          p['g1'], p['b1']))
    out2 = lax.conv_general_dilated(out1, p['w2'], (stride, stride),
                                    ((1, 1), (1, 1)),
                                    dimension_numbers=('NHWC', 'HWIO', 'NHWC'),
                                    precision=hi)
    out2 = jax.nn.relu(bn(out2, p['g2'], p['b2']))
    out3 = bn(jnp.einsum('nhwc,cd->nhwd', out2, p['w3'], precision=hi),
              p['g3'], p['b3'])
    xs = x[:, ::stride, ::stride, :]
    if has_proj:
        sc = bn(jnp.einsum('nhwc,cd->nhwd', xs, p['ws'], precision=hi),
                p['gs'], p['bs'])
    else:
        sc = xs
    return jnp.transpose(jax.nn.relu(out3 + sc), (0, 3, 1, 2))


def init_params(key, in_planes, planes, stride):
    E = 4 * planes
    has_proj = (stride != 1) or (in_planes != E)
    ks = jax.random.split(key, 12)
    nrm = lambda k, s, sc=0.1: (sc * jax.random.normal(k, s)).astype(jnp.float32)
    p = {
        'w1': nrm(ks[0], (in_planes, planes), 0.3),
        'g1': 1.0 + nrm(ks[1], (planes,)), 'b1': nrm(ks[2], (planes,)),
        'w2': nrm(ks[3], (3, 3, planes, planes), 0.3),          # HWIO
        'g2': 1.0 + nrm(ks[4], (planes,)), 'b2': nrm(ks[5], (planes,)),
        'w3': nrm(ks[6], (planes, E), 0.3),
        'g3': 1.0 + nrm(ks[7], (E,)), 'b3': nrm(ks[8], (E,)),
    }
    if has_proj:
        p['ws'] = nrm(ks[9], (in_planes, E), 0.3)
        p['gs'] = 1.0 + nrm(ks[10], (E,))
        p['bs'] = nrm(ks[11], (E,))
    return p


if __name__ == "__main__":
    key = jax.random.PRNGKey(0)
    N, H, W = 2, 16, 16
    configs = [
        (16, 4, 1),   # identity shortcut (in_planes == 4*planes, stride 1)
        (4, 4, 2),    # projection shortcut + stride-2 downsampling
    ]
    for in_planes, planes, stride in configs:
        k_x, k_p, key = jax.random.split(key, 3)
        x = jax.random.normal(k_x, (N, in_planes, H, W), jnp.float32)   # NCHW
        params = init_params(k_p, in_planes, planes, stride)

        out = jax.block_until_ready(
            bottleneck_forward(x, params, stride, in_planes, planes))
        ref = jax.block_until_ready(
            bottleneck_ref(x, params, stride, in_planes, planes))

        Ho, Wo = H // stride, W // stride
        assert out.shape == (N, 4 * planes, Ho, Wo), out.shape
        # bf16 MXU matmuls + bf16 intermediates vs. f32 HIGHEST-precision reference
        np.testing.assert_allclose(np.asarray(out), np.asarray(ref),
                                   rtol=5e-2, atol=5e-2)
    print("KERNEL_OK")
</pallas_src>

<mosaic_0001>
module attributes {stable_mosaic.version = 11 : i64} {
  func.func @_conv1x1_stats_kernel(%arg0: i32, %arg1: memref<512x128xbf16, #tpu.memory_space<vmem>>, %arg2: memref<128x128xbf16, #tpu.memory_space<vmem>>, %arg3: memref<512x128xbf16, #tpu.memory_space<vmem>>, %arg4: memref<1x2x128xf32, #tpu.memory_space<vmem>>) attributes {dimension_semantics = [#tpu.dimension_semantics<parallel>], iteration_bounds = array<i64: 1>, scalar_prefetch = 0 : i64, scratch_operands = 0 : i64, tpu.core_type = #tpu.core_type<tc>, window_params = [{transform_indices = @transform_0, window_bounds = array<i64: 512, 128>}, {pipeline_mode = #tpu.pipeline_mode<synchronous>, transform_indices = @transform_1, window_bounds = array<i64: 128, 128>}, {transform_indices = @transform_2, window_bounds = array<i64: 512, 128>}, {transform_indices = @transform_3, window_bounds = array<i64: 1, 2, 128>}]} {
    %c0 = arith.constant 0 : index
    %c0_0 = arith.constant 0 : index
    %0 = vector.load %arg1[%c0, %c0_0] : memref<512x128xbf16, #tpu.memory_space<vmem>>, vector<512x128xbf16>
    %c0_1 = arith.constant 0 : index
    %c0_2 = arith.constant 0 : index
    %1 = vector.load %arg2[%c0_1, %c0_2] : memref<128x128xbf16, #tpu.memory_space<vmem>>, vector<128x128xbf16>
    %cst = arith.constant dense<0.000000e+00> : vector<512x128xf32>
    %2 = tpu.matmul %0, %1, %cst {dimension_numbers = #tpu.dot_dimension_numbers<[1], [0], [0], [1], [0, 0, 1, 1], [], []>} : vector<512x128xbf16>, vector<128x128xbf16>, vector<512x128xf32> -> vector<512x128xf32>
    %cst_3 = arith.constant dense<0.000000e+00> : vector<128xf32>
    %3 = vector.multi_reduction <add>, %2, %cst_3 [0] : vector<512x128xf32> to vector<128xf32>
    %4 = vector.shape_cast %3 : vector<128xf32> to vector<1x128xf32>
    %c0_4 = arith.constant 0 : index
    %c0_5 = arith.constant 0 : index
    %c0_6 = arith.constant 0 : index
    %5 = vector.load %arg4[%c0_4, %c0_5, %c0_6] : memref<1x2x128xf32, #tpu.memory_space<vmem>>, vector<1x1x128xf32>
    %6 = vector.shape_cast %5 : vector<1x1x128xf32> to vector<1x128xf32>
    %7 = vector.shape_cast %4 : vector<1x128xf32> to vector<1x1x128xf32>
    tpu.vector_store %arg4[%c0_4, %c0_5, %c0_6], %7 {strides = array<i32>} : memref<1x2x128xf32, #tpu.memory_space<vmem>>, vector<1x1x128xf32>,
    %8 = arith.mulf %2, %2 : vector<512x128xf32>
    %cst_7 = arith.constant dense<0.000000e+00> : vector<128xf32>
    %9 = vector.multi_reduction <add>, %8, %cst_7 [0] : vector<512x128xf32> to vector<128xf32>
    %10 = vector.shape_cast %9 : vector<128xf32> to vector<1x128xf32>
    %c0_8 = arith.constant 0 : index
    %c1 = arith.constant 1 : index
    %c0_9 = arith.constant 0 : index
    %11 = vector.load %arg4[%c0_8, %c1, %c0_9] : memref<1x2x128xf32, #tpu.memory_space<vmem>>, vector<1x1x128xf32>
    %12 = vector.shape_cast %11 : vector<1x1x128xf32> to vector<1x128xf32>
    %13 = vector.shape_cast %10 : vector<1x128xf32> to vector<1x1x128xf32>
    tpu.vector_store %arg4[%c0_8, %c1, %c0_9], %13 {strides = array<i32>} : memref<1x2x128xf32, #tpu.memory_space<vmem>>, vector<1x1x128xf32>,
    %14 = arith.truncf %2 : vector<512x128xf32> to vector<512x128xbf16>
    %c0_10 = arith.constant 0 : index
    %c0_11 = arith.constant 0 : index
    %15 = vector.load %arg3[%c0_10, %c0_11] : memref<512x128xbf16, #tpu.memory_space<vmem>>, vector<512x128xbf16>
    tpu.vector_store %arg3[%c0_10, %c0_11], %14 {strides = array<i32>} : memref<512x128xbf16, #tpu.memory_space<vmem>>, vector<512x128xbf16>,
    return
  }
  func.func @transform_0(%arg0: i32) -> (i32, i32) {
    %c0_i32 = arith.constant 0 : i32
    %c0_i32_0 = arith.constant 0 : i32
    return %arg0, %c0_i32 : i32, i32
  }
  func.func @transform_1(%arg0: i32) -> (i32, i32) {
    %c0_i32 = arith.constant 0 : i32
    %c0_i32_0 = arith.constant 0 : i32
    %c0_i32_1 = arith.constant 0 : i32
    return %c0_i32, %c0_i32_0 : i32, i32
  }
  func.func @transform_2(%arg0: i32) -> (i32, i32) {
    %c0_i32 = arith.constant 0 : i32
    %c0_i32_0 = arith.constant 0 : i32
    return %arg0, %c0_i32 : i32, i32
  }
  func.func @transform_3(%arg0: i32) -> (i32, i32, i32) {
    %c0_i32 = arith.constant 0 : i32
    %c0_i32_0 = arith.constant 0 : i32
    %c0_i32_1 = arith.constant 0 : i32
    return %arg0, %c0_i32, %c0_i32_0 : i32, i32, i32
  }
}

module attributes {stable_mosaic.version = 11 : i64} {
  func.func @_conv3x3_s1_kernel(%arg0: i32, %arg1: memref<1x16x16x128xbf16, #tpu.memory_space<vmem>>, %arg2: memref<1152x128xbf16, #tpu.memory_space<vmem>>, %arg3: memref<2x128xf32, #tpu.memory_space<vmem>>, %arg4: memref<1x16x16x128xbf16, #tpu.memory_space<vmem>>, %arg5: memref<1x2x128xf32, #tpu.memory_space<vmem>>, %arg6: memref<18x18x128xbf16, #tpu.memory_space<vmem>>, %arg7: memref<256x1152xbf16, #tpu.memory_space<vmem>>) attributes {dimension_semantics = [#tpu.dimension_semantics<parallel>], iteration_bounds = array<i64: 2>, scalar_prefetch = 0 : i64, scratch_operands = 2 : i64, tpu.core_type = #tpu.core_type<tc>, window_params = [{transform_indices = @transform_0, window_bounds = array<i64: 1, 16, 16, 128>}, {pipeline_mode = #tpu.pipeline_mode<synchronous>, transform_indices = @transform_1, window_bounds = array<i64: 1152, 128>}, {pipeline_mode = #tpu.pipeline_mode<synchronous>, transform_indices = @transform_2, window_bounds = array<i64: 2, 128>}, {transform_indices = @transform_3, window_bounds = array<i64: 1, 16, 16, 128>}, {transform_indices = @transform_4, window_bounds = array<i64: 1, 2, 128>}]} {
    %c0 = arith.constant 0 : index
    %c0_0 = arith.constant 0 : index
    %0 = vector.load %arg3[%c0, %c0_0] : memref<2x128xf32, #tpu.memory_space<vmem>>, vector<1x128xf32>
    %c1 = arith.constant 1 : index
    %c0_1 = arith.constant 0 : index
    %1 = vector.load %arg3[%c1, %c0_1] : memref<2x128xf32, #tpu.memory_space<vmem>>, vector<1x128xf32>
    %c0_2 = arith.constant 0 : index
    %c0_3 = arith.constant 0 : index
    %c0_4 = arith.constant 0 : index
    %c0_5 = arith.constant 0 : index
    %2 = vector.load %arg1[%c0_2, %c0_3, %c0_4, %c0_5] : memref<1x16x16x128xbf16, #tpu.memory_space<vmem>>, vector<1x16x16x128xbf16>
    %3 = vector.shape_cast %2 : vector<1x16x16x128xbf16> to vector<16x16x128xbf16>
    %4 = arith.extf %3 : vector<16x16x128xbf16> to vector<16x16x128xf32>
    %5 = vector.shape_cast %0 : vector<1x128xf32> to vector<1x1x128xf32>
    %6 = vector.broadcast %5 : vector<1x1x128xf32> to vector<16x16x128xf32>
    %7 = arith.mulf %4, %6 : vector<16x16x128xf32>
    %8 = vector.shape_cast %1 : vector<1x128xf32> to vector<1x1x128xf32>
    %9 = vector.broadcast %8 : vector<1x1x128xf32> to vector<16x16x128xf32>
    %10 = arith.addf %7, %9 : vector<16x16x128xf32>
    %cst = arith.constant 0.000000e+00 : f32
    %11 = vector.broadcast %cst : f32 to vector<16x16x128xf32>
    %12 = arith.maximumf %10, %11 : vector<16x16x128xf32>
    %13 = arith.truncf %12 : vector<16x16x128xf32> to vector<16x16x128xbf16>
    %cst_6 = arith.constant 0.000000e+00 : bf16
    %14 = vector.broadcast %cst_6 : bf16 to vector<1x18x128xbf16>
    %cst_7 = arith.constant 0.000000e+00 : bf16
    %15 = vector.broadcast %cst_7 : bf16 to vector<18x1x128xbf16>
    %c0_8 = arith.constant 0 : index
    %c0_9 = arith.constant 0 : index
    %c0_10 = arith.constant 0 : index
    %16 = vector.load %arg6[%c0_8, %c0_9, %c0_10] : memref<18x18x128xbf16, #tpu.memory_space<vmem>>, vector<1x18x128xbf16>
    tpu.vector_store %arg6[%c0_8, %c0_9, %c0_10], %14 {strides = array<i32>} : memref<18x18x128xbf16, #tpu.memory_space<vmem>>, vector<1x18x128xbf16>,
    %c17 = arith.constant 17 : index
    %c0_11 = arith.constant 0 : index
    %c0_12 = arith.constant 0 : index
    %17 = vector.load %arg6[%c17, %c0_11, %c0_12] : memref<18x18x128xbf16, #tpu.memory_space<vmem>>, vector<1x18x128xbf16>
    tpu.vector_store %arg6[%c17, %c0_11, %c0_12], %14 {strides = array<i32>} : memref<18x18x128xbf16, #tpu.memory_space<vmem>>, vector<1x18x128xbf16>,
    %c0_13 = arith.constant 0 : index
    %c0_14 = arith.constant 0 : index
    %c0_15 = arith.constant 0 : index
    %18 = vector.load %arg6[%c0_13, %c0_14, %c0_15] : memref<18x18x128xbf16, #tpu.memory_space<vmem>>, vector<18x1x128xbf16>
    tpu.vector_store %arg6[%c0_13, %c0_14, %c0_15], %15 {strides = array<i32>} : memref<18x18x128xbf16, #tpu.memory_space<vmem>>, vector<18x1x128xbf16>,
    %c0_16 = arith.constant 0 : index
    %c17_17 = arith.constant 17 : index
    %c0_18 = arith.constant 0 : index
    %19 = vector.load %arg6[%c0_16, %c17_17, %c0_18] : memref<18x18x128xbf16, #tpu.memory_space<vmem>>, vector<18x1x128xbf16>
    tpu.vector_store %arg6[%c0_16, %c17_17, %c0_18], %15 {strides = array<i32>} : memref<18x18x128xbf16, #tpu.memory_space<vmem>>, vector<18x1x128xbf16>,
    %c1_19 = arith.constant 1 : index
    %c1_20 = arith.constant 1 : index
    %c0_21 = arith.constant 0 : index
    %20 = vector.load %arg6[%c1_19, %c1_20, %c0_21] : memref<18x18x128xbf16, #tpu.memory_space<vmem>>, vector<16x16x128xbf16>
    tpu.vector_store %arg6[%c1_19, %c1_20, %c0_21], %13 {strides = array<i32>} : memref<18x18x128xbf16, #tpu.memory_space<vmem>>, vector<16x16x128xbf16>,
    %c0_22 = arith.constant 0 : index
    %c0_23 = arith.constant 0 : index
    %c0_24 = arith.constant 0 : index
    %21 = vector.load %arg6[%c0_22, %c0_23, %c0_24] : memref<18x18x128xbf16, #tpu.memory_space<vmem>>, vector<16x16x128xbf16>
    %22 = vector.shape_cast %21 : vector<16x16x128xbf16> to vector<256x128xbf16>
    %c0_25 = arith.constant 0 : index
    %c0_26 = arith.constant 0 : index
    %23 = vector.load %arg7[%c0_25, %c0_26] : memref<256x1152xbf16, #tpu.memory_space<vmem>>, vector<256x128xbf16>
    tpu.vector_store %arg7[%c0_25, %c0_26], %22 {strides = array<i32>} : memref<256x1152xbf16, #tpu.memory_space<vmem>>, vector<256x128xbf16>,
    %c0_27 = arith.constant 0 : index
    %c1_28 = arith.constant 1 : index
    %c0_29 = arith.constant 0 : index
    %24 = vector.load %arg6[%c0_27, %c1_28, %c0_29] : memref<18x18x128xbf16, #tpu.memory_space<vmem>>, vector<16x16x128xbf16>
    %25 = vector.shape_cast %24 : vector<16x16x128xbf16> to vector<256x128xbf16>
    %c0_30 = arith.constant 0 : index
    %c128 = arith.constant 128 : index
    %26 = vector.load %arg7[%c0_30, %c128] : memref<256x1152xbf16, #tpu.memory_space<vmem>>, vector<256x128xbf16>
    tpu.vector_store %arg7[%c0_30, %c128], %25 {strides = array<i32>} : memref<256x1152xbf16, #tpu.memory_space<vmem>>, vector<256x128xbf16>,
    %c0_31 = arith.constant 0 : index
    %c2 = arith.constant 2 : index
    %c0_32 = arith.constant 0 : index
    %27 = vector.load %arg6[%c0_31, %c2, %c0_32] : memref<18x18x128xbf16, #tpu.memory_space<vmem>>, vector<16x16x128xbf16>
    %28 = vector.shape_cast %27 : vector<16x16x128xbf16> to vector<256x128xbf16>
    %c0_33 = arith.constant 0 : index
    %c256 = arith.constant 256 : index
    %29 = vector.load %arg7[%c0_33, %c256] : memref<256x1152xbf16, #tpu.memory_space<vmem>>, vector<256x128xbf16>
    tpu.vector_store %arg7[%c0_33, %c256], %28 {strides = array<i32>} : memref<256x1152xbf16, #tpu.memory_space<vmem>>, vector<256x128xbf16>,
    %c1_34 = arith.constant 1 : index
    %c0_35 = arith.constant 0 : index
    %c0_36 = arith.constant 0 : index
    %30 = vector.load %arg6[%c1_34, %c0_35, %c0_36] : memref<18x18x128xbf16, #tpu.memory_space<vmem>>, vector<16x16x128xbf16>
    %31 = vector.shape_cast %30 : vector<16x16x128xbf16> to vector<256x128xbf16>
    %c0_37 = arith.constant 0 : index
    %c384 = arith.constant 384 : index
    %32 = vector.load %arg7[%c0_37, %c384] : memref<256x1152xbf16, #tpu.memory_space<vmem>>, vector<256x128xbf16>
    tpu.vector_store %arg7[%c0_37, %c384], %31 {strides = array<i32>} : memref<256x1152xbf16, #tpu.memory_space<vmem>>, vector<256x128xbf16>,
    %c1_38 = arith.constant 1 : index
    %c1_39 = arith.constant 1 : index
    %c0_40 = arith.constant 0 : index
    %33 = vector.load %arg6[%c1_38, %c1_39, %c0_40] : memref<18x18x128xbf16, #tpu.memory_space<vmem>>, vector<16x16x128xbf16>
    %34 = vector.shape_cast %33 : vector<16x16x128xbf16> to vector<256x128xbf16>
    %c0_41 = arith.constant 0 : index
    %c512 = arith.constant 512 : index
    %35 = vector.load %arg7[%c0_41, %c512] : memref<256x1152xbf16, #tpu.memory_space<vmem>>, vector<256x128xbf16>
    tpu.vector_store %arg7[%c0_41, %c512], %34 {strides = array<i32>} : memref<256x1152xbf16, #tpu.memory_space<vmem>>, vector<256x128xbf16>,
    %c1_42 = arith.constant 1 : index
    %c2_43 = arith.constant 2 : index
    %c0_44 = arith.constant 0 : index
    %36 = vector.load %arg6[%c1_42, %c2_43, %c0_44] : memref<18x18x128xbf16, #tpu.memory_space<vmem>>, vector<16x16x128xbf16>
    %37 = vector.shape_cast %36 : vector<16x16x128xbf16> to vector<256x128xbf16>
    %c0_45 = arith.constant 0 : index
    %c640 = arith.constant 640 : index
    %38 = vector.load %arg7[%c0_45, %c640] : memref<256x1152xbf16, #tpu.memory_space<vmem>>, vector<256x128xbf16>
    tpu.vector_store %arg7[%c0_45, %c640], %37 {strides = array<i32>} : memref<256x1152xbf16, #tpu.memory_space<vmem>>, vector<256x128xbf16>,
    %c2_46 = arith.constant 2 : index
    %c0_47 = arith.constant 0 : index
    %c0_48 = arith.constant 0 : index
    %39 = vector.load %arg6[%c2_46, %c0_47, %c0_48] : memref<18x18x128xbf16, #tpu.memory_space<vmem>>, vector<16x16x128xbf16>
    %40 = vector.shape_cast %39 : vector<16x16x128xbf16> to vector<256x128xbf16>
    %c0_49 = arith.constant 0 : index
    %c768 = arith.constant 768 : index
    %41 = vector.load %arg7[%c0_49, %c768] : memref<256x1152xbf16, #tpu.memory_space<vmem>>, vector<256x128xbf16>
    tpu.vector_store %arg7[%c0_49, %c768], %40 {strides = array<i32>} : memref<256x1152xbf16, #tpu.memory_space<vmem>>, vector<256x128xbf16>,
    %c2_50 = arith.constant 2 : index
    %c1_51 = arith.constant 1 : index
    %c0_52 = arith.constant 0 : index
    %42 = vector.load %arg6[%c2_50, %c1_51, %c0_52] : memref<18x18x128xbf16, #tpu.memory_space<vmem>>, vector<16x16x128xbf16>
    %43 = vector.shape_cast %42 : vector<16x16x128xbf16> to vector<256x128xbf16>
    %c0_53 = arith.constant 0 : index
    %c896 = arith.constant 896 : index
    %44 = vector.load %arg7[%c0_53, %c896] : memref<256x1152xbf16, #tpu.memory_space<vmem>>, vector<256x128xbf16>
    tpu.vector_store %arg7[%c0_53, %c896], %43 {strides = array<i32>} : memref<256x1152xbf16, #tpu.memory_space<vmem>>, vector<256x128xbf16>,
    %c2_54 = arith.constant 2 : index
    %c2_55 = arith.constant 2 : index
    %c0_56 = arith.constant 0 : index
    %45 = vector.load %arg6[%c2_54, %c2_55, %c0_56] : memref<18x18x128xbf16, #tpu.memory_space<vmem>>, vector<16x16x128xbf16>
    %46 = vector.shape_cast %45 : vector<16x16x128xbf16> to vector<256x128xbf16>
    %c0_57 = arith.constant 0 : index
    %c1024 = arith.constant 1024 : index
    %47 = vector.load %arg7[%c0_57, %c1024] : memref<256x1152xbf16, #tpu.memory_space<vmem>>, vector<256x128xbf16>
    tpu.vector_store %arg7[%c0_57, %c1024], %46 {strides = array<i32>} : memref<256x1152xbf16, #tpu.memory_space<vmem>>, vector<256x128xbf16>,
    %c0_58 = arith.constant 0 : index
    %c0_59 = arith.constant 0 : index
    %48 = vector.load %arg7[%c0_58, %c0_59] : memref<256x1152xbf16, #tpu.memory_space<vmem>>, vector<256x1152xbf16>
    %c0_60 = arith.constant 0 : index
    %c0_61 = arith.constant 0 : index
    %49 = vector.load %arg2[%c0_60, %c0_61] : memref<1152x128xbf16, #tpu.memory_space<vmem>>, vector<1152x128xbf16>
    %cst_62 = arith.constant dense<0.000000e+00> : vector<256x128xf32>
    %50 = tpu.matmul %48, %49, %cst_62 {dimension_numbers = #tpu.dot_dimension_numbers<[1], [0], [0], [1], [0, 0, 1, 1], [], []>} : vector<256x1152xbf16>, vector<1152x128xbf16>, vector<256x128xf32> -> vector<256x128xf32>
    %cst_63 = arith.constant dense<0.000000e+00> : vector<128xf32>
    %51 = vector.multi_reduction <add>, %50, %cst_63 [0] : vector<256x128xf32> to vector<128xf32>
    %52 = vector.shape_cast %51 : vector<128xf32> to vector<1x128xf32>
    %c0_64 = arith.constant 0 : index
    %c0_65 = arith.constant 0 : index
    %c0_66 = arith.constant 0 : index
    %53 = vector.load %arg5[%c0_64, %c0_65, %c0_66] : memref<1x2x128xf32, #tpu.memory_space<vmem>>, vector<1x1x128xf32>
    %54 = vector.shape_cast %53 : vector<1x1x128xf32> to vector<1x128xf32>
    %55 = vector.shape_cast %52 : vector<1x128xf32> to vector<1x1x128xf32>
    tpu.vector_store %arg5[%c0_64, %c0_65, %c0_66], %55 {strides = array<i32>} : memref<1x2x128xf32, #tpu.memory_space<vmem>>, vector<1x1x128xf32>,
    %56 = arith.mulf %50, %50 : vector<256x128xf32>
    %cst_67 = arith.constant dense<0.000000e+00> : vector<128xf32>
    %57 = vector.multi_reduction <add>, %56, %cst_67 [0] : vector<256x128xf32> to vector<128xf32>
    %58 = vector.shape_cast %57 : vector<128xf32> to vector<1x128xf32>
    %c0_68 = arith.constant 0 : index
    %c1_69 = arith.constant 1 : index
    %c0_70 = arith.constant 0 : index
    %59 = vector.load %arg5[%c0_68, %c1_69, %c0_70] : memref<1x2x128xf32, #tpu.memory_space<vmem>>, vector<1x1x128xf32>
    %60 = vector.shape_cast %59 : vector<1x1x128xf32> to vector<1x128xf32>
    %61 = vector.shape_cast %58 : vector<1x128xf32> to vector<1x1x128xf32>
    tpu.vector_store %arg5[%c0_68, %c1_69, %c0_70], %61 {strides = array<i32>} : memref<1x2x128xf32, #tpu.memory_space<vmem>>, vector<1x1x128xf32>,
    %62 = vector.shape_cast %50 : vector<256x128xf32> to vector<1x16x16x128xf32>
    %63 = arith.truncf %62 : vector<1x16x16x128xf32> to vector<1x16x16x128xbf16>
    %c0_71 = arith.constant 0 : index
    %c0_72 = arith.constant 0 : index
    %c0_73 = arith.constant 0 : index
    %c0_74 = arith.constant 0 : index
    %64 = vector.load %arg4[%c0_71, %c0_72, %c0_73, %c0_74] : memref<1x16x16x128xbf16, #tpu.memory_space<vmem>>, vector<1x16x16x128xbf16>
    tpu.vector_store %arg4[%c0_71, %c0_72, %c0_73, %c0_74], %63 {strides = array<i32>} : memref<1x16x16x128xbf16, #tpu.memory_space<vmem>>, vector<1x16x16x128xbf16>,
    return
  }
  func.func @transform_0(%arg0: i32) -> (i32, i32, i32, i32) {
    %c0_i32 = arith.constant 0 : i32
    %c0_i32_0 = arith.constant 0 : i32
    %c0_i32_1 = arith.constant 0 : i32
    %c0_i32_2 = arith.constant 0 : i32
    return %arg0, %c0_i32, %c0_i32_0, %c0_i32_1 : i32, i32, i32, i32
  }
  func.func @transform_1(%arg0: i32) -> (i32, i32) {
    %c0_i32 = arith.constant 0 : i32
    %c0_i32_0 = arith.constant 0 : i32
    %c0_i32_1 = arith.constant 0 : i32
    return %c0_i32, %c0_i32_0 : i32, i32
  }
  func.func @transform_2(%arg0: i32) -> (i32, i32) {
    %c0_i32 = arith.constant 0 : i32
    %c0_i32_0 = arith.constant 0 : i32
    %c0_i32_1 = arith.constant 0 : i32
    return %c0_i32, %c0_i32_0 : i32, i32
  }
  func.func @transform_3(%arg0: i32) -> (i32, i32, i32, i32) {
    %c0_i32 = arith.constant 0 : i32
    %c0_i32_0 = arith.constant 0 : i32
    %c0_i32_1 = arith.constant 0 : i32
    %c0_i32_2 = arith.constant 0 : i32
    return %arg0, %c0_i32, %c0_i32_0, %c0_i32_1 : i32, i32, i32, i32
  }
  func.func @transform_4(%arg0: i32) -> (i32, i32, i32) {
    %c0_i32 = arith.constant 0 : i32
    %c0_i32_0 = arith.constant 0 : i32
    %c0_i32_1 = arith.constant 0 : i32
    return %arg0, %c0_i32, %c0_i32_0 : i32, i32, i32
  }
}

module attributes {stable_mosaic.version = 11 : i64} {
  func.func @_tail1_id_kernel(%arg0: i32, %arg1: memref<512x128xbf16, #tpu.memory_space<vmem>>, %arg2: memref<2x128xf32, #tpu.memory_space<vmem>>, %arg3: memref<128x128xbf16, #tpu.memory_space<vmem>>, %arg4: memref<512x128xbf16, #tpu.memory_space<vmem>>, %arg5: memref<1x2x128xf32, #tpu.memory_space<vmem>>) attributes {dimension_semantics = [#tpu.dimension_semantics<parallel>], iteration_bounds = array<i64: 1>, scalar_prefetch = 0 : i64, scratch_operands = 0 : i64, tpu.core_type = #tpu.core_type<tc>, window_params = [{transform_indices = @transform_0, window_bounds = array<i64: 512, 128>}, {pipeline_mode = #tpu.pipeline_mode<synchronous>, transform_indices = @transform_1, window_bounds = array<i64: 2, 128>}, {pipeline_mode = #tpu.pipeline_mode<synchronous>, transform_indices = @transform_2, window_bounds = array<i64: 128, 128>}, {transform_indices = @transform_3, window_bounds = array<i64: 512, 128>}, {transform_indices = @transform_4, window_bounds = array<i64: 1, 2, 128>}]} {
    %c0 = arith.constant 0 : index
    %c0_0 = arith.constant 0 : index
    %0 = vector.load %arg1[%c0, %c0_0] : memref<512x128xbf16, #tpu.memory_space<vmem>>, vector<512x128xbf16>
    %1 = arith.extf %0 : vector<512x128xbf16> to vector<512x128xf32>
    %c0_1 = arith.constant 0 : index
    %c0_2 = arith.constant 0 : index
    %2 = vector.load %arg2[%c0_1, %c0_2] : memref<2x128xf32, #tpu.memory_space<vmem>>, vector<1x128xf32>
    %3 = vector.broadcast %2 : vector<1x128xf32> to vector<512x128xf32>
    %4 = arith.mulf %1, %3 : vector<512x128xf32>
    %c1 = arith.constant 1 : index
    %c0_3 = arith.constant 0 : index
    %5 = vector.load %arg2[%c1, %c0_3] : memref<2x128xf32, #tpu.memory_space<vmem>>, vector<1x128xf32>
    %6 = vector.broadcast %5 : vector<1x128xf32> to vector<512x128xf32>
    %7 = arith.addf %4, %6 : vector<512x128xf32>
    %cst = arith.constant 0.000000e+00 : f32
    %8 = vector.broadcast %cst : f32 to vector<512x128xf32>
    %9 = arith.maximumf %7, %8 : vector<512x128xf32>
    %10 = arith.truncf %9 : vector<512x128xf32> to vector<512x128xbf16>
    %c0_4 = arith.constant 0 : index
    %c0_5 = arith.constant 0 : index
    %11 = vector.load %arg3[%c0_4, %c0_5] : memref<128x128xbf16, #tpu.memory_space<vmem>>, vector<128x128xbf16>
    %cst_6 = arith.constant dense<0.000000e+00> : vector<512x128xf32>
    %12 = tpu.matmul %10, %11, %cst_6 {dimension_numbers = #tpu.dot_dimension_numbers<[1], [0], [0], [1], [0, 0, 1, 1], [], []>} : vector<512x128xbf16>, vector<128x128xbf16>, vector<512x128xf32> -> vector<512x128xf32>
    %cst_7 = arith.constant dense<0.000000e+00> : vector<128xf32>
    %13 = vector.multi_reduction <add>, %12, %cst_7 [0] : vector<512x128xf32> to vector<128xf32>
    %14 = vector.shape_cast %13 : vector<128xf32> to vector<1x128xf32>
    %c0_8 = arith.constant 0 : index
    %c0_9 = arith.constant 0 : index
    %c0_10 = arith.constant 0 : index
    %15 = vector.load %arg5[%c0_8, %c0_9, %c0_10] : memref<1x2x128xf32, #tpu.memory_space<vmem>>, vector<1x1x128xf32>
    %16 = vector.shape_cast %15 : vector<1x1x128xf32> to vector<1x128xf32>
    %17 = vector.shape_cast %14 : vector<1x128xf32> to vector<1x1x128xf32>
    tpu.vector_store %arg5[%c0_8, %c0_9, %c0_10], %17 {strides = array<i32>} : memref<1x2x128xf32, #tpu.memory_space<vmem>>, vector<1x1x128xf32>,
    %18 = arith.mulf %12, %12 : vector<512x128xf32>
    %cst_11 = arith.constant dense<0.000000e+00> : vector<128xf32>
    %19 = vector.multi_reduction <add>, %18, %cst_11 [0] : vector<512x128xf32> to vector<128xf32>
    %20 = vector.shape_cast %19 : vector<128xf32> to vector<1x128xf32>
    %c0_12 = arith.constant 0 : index
    %c1_13 = arith.constant 1 : index
    %c0_14 = arith.constant 0 : index
    %21 = vector.load %arg5[%c0_12, %c1_13, %c0_14] : memref<1x2x128xf32, #tpu.memory_space<vmem>>, vector<1x1x128xf32>
    %22 = vector.shape_cast %21 : vector<1x1x128xf32> to vector<1x128xf32>
    %23 = vector.shape_cast %20 : vector<1x128xf32> to vector<1x1x128xf32>
    tpu.vector_store %arg5[%c0_12, %c1_13, %c0_14], %23 {strides = array<i32>} : memref<1x2x128xf32, #tpu.memory_space<vmem>>, vector<1x1x128xf32>,
    %24 = arith.truncf %12 : vector<512x128xf32> to vector<512x128xbf16>
    %c0_15 = arith.constant 0 : index
    %c0_16 = arith.constant 0 : index
    %25 = vector.load %arg4[%c0_15, %c0_16] : memref<512x128xbf16, #tpu.memory_space<vmem>>, vector<512x128xbf16>
    tpu.vector_store %arg4[%c0_15, %c0_16], %24 {strides = array<i32>} : memref<512x128xbf16, #tpu.memory_space<vmem>>, vector<512x128xbf16>,
    return
  }
  func.func @transform_0(%arg0: i32) -> (i32, i32) {
    %c0_i32 = arith.constant 0 : i32
    %c0_i32_0 = arith.constant 0 : i32
    return %arg0, %c0_i32 : i32, i32
  }
  func.func @transform_1(%arg0: i32) -> (i32, i32) {
    %c0_i32 = arith.constant 0 : i32
    %c0_i32_0 = arith.constant 0 : i32
    %c0_i32_1 = arith.constant 0 : i32
    return %c0_i32, %c0_i32_0 : i32, i32
  }
  func.func @transform_2(%arg0: i32) -> (i32, i32) {
    %c0_i32 = arith.constant 0 : i32
    %c0_i32_0 = arith.constant 0 : i32
    %c0_i32_1 = arith.constant 0 : i32
    return %c0_i32, %c0_i32_0 : i32, i32
  }
  func.func @transform_3(%arg0: i32) -> (i32, i32) {
    %c0_i32 = arith.constant 0 : i32
    %c0_i32_0 = arith.constant 0 : i32
    return %arg0, %c0_i32 : i32, i32
  }
  func.func @transform_4(%arg0: i32) -> (i32, i32, i32) {
    %c0_i32 = arith.constant 0 : i32
    %c0_i32_0 = arith.constant 0 : i32
    %c0_i32_1 = arith.constant 0 : i32
    return %arg0, %c0_i32, %c0_i32_0 : i32, i32, i32
  }
}

module attributes {stable_mosaic.version = 11 : i64} {
  func.func @_tail2_id_kernel(%arg0: i32, %arg1: memref<512x128xbf16, #tpu.memory_space<vmem>>, %arg2: memref<2x128xf32, #tpu.memory_space<vmem>>, %arg3: memref<512x128xbf16, #tpu.memory_space<vmem>>, %arg4: memref<512x128xf32, #tpu.memory_space<vmem>>) attributes {dimension_semantics = [#tpu.dimension_semantics<parallel>], iteration_bounds = array<i64: 1>, scalar_prefetch = 0 : i64, scratch_operands = 0 : i64, tpu.core_type = #tpu.core_type<tc>, window_params = [{transform_indices = @transform_0, window_bounds = array<i64: 512, 128>}, {pipeline_mode = #tpu.pipeline_mode<synchronous>, transform_indices = @transform_1, window_bounds = array<i64: 2, 128>}, {transform_indices = @transform_2, window_bounds = array<i64: 512, 128>}, {transform_indices = @transform_3, window_bounds = array<i64: 512, 128>}]} {
    %c0 = arith.constant 0 : index
    %c0_0 = arith.constant 0 : index
    %0 = vector.load %arg1[%c0, %c0_0] : memref<512x128xbf16, #tpu.memory_space<vmem>>, vector<512x128xbf16>
    %1 = arith.extf %0 : vector<512x128xbf16> to vector<512x128xf32>
    %c0_1 = arith.constant 0 : index
    %c0_2 = arith.constant 0 : index
    %2 = vector.load %arg2[%c0_1, %c0_2] : memref<2x128xf32, #tpu.memory_space<vmem>>, vector<1x128xf32>
    %3 = vector.broadcast %2 : vector<1x128xf32> to vector<512x128xf32>
    %4 = arith.mulf %1, %3 : vector<512x128xf32>
    %c1 = arith.constant 1 : index
    %c0_3 = arith.constant 0 : index
    %5 = vector.load %arg2[%c1, %c0_3] : memref<2x128xf32, #tpu.memory_space<vmem>>, vector<1x128xf32>
    %6 = vector.broadcast %5 : vector<1x128xf32> to vector<512x128xf32>
    %7 = arith.addf %4, %6 : vector<512x128xf32>
    %c0_4 = arith.constant 0 : index
    %c0_5 = arith.constant 0 : index
    %8 = vector.load %arg3[%c0_4, %c0_5] : memref<512x128xbf16, #tpu.memory_space<vmem>>, vector<512x128xbf16>
    %9 = arith.extf %8 : vector<512x128xbf16> to vector<512x128xf32>
    %10 = arith.addf %7, %9 : vector<512x128xf32>
    %cst = arith.constant 0.000000e+00 : f32
    %11 = vector.broadcast %cst : f32 to vector<512x128xf32>
    %12 = arith.maximumf %10, %11 : vector<512x128xf32>
    %c0_6 = arith.constant 0 : index
    %c0_7 = arith.constant 0 : index
    %13 = vector.load %arg4[%c0_6, %c0_7] : memref<512x128xf32, #tpu.memory_space<vmem>>, vector<512x128xf32>
    tpu.vector_store %arg4[%c0_6, %c0_7], %12 {strides = array<i32>} : memref<512x128xf32, #tpu.memory_space<vmem>>, vector<512x128xf32>,
    return
  }
  func.func @transform_0(%arg0: i32) -> (i32, i32) {
    %c0_i32 = arith.constant 0 : i32
    %c0_i32_0 = arith.constant 0 : i32
    return %arg0, %c0_i32 : i32, i32
  }
  func.func @transform_1(%arg0: i32) -> (i32, i32) {
    %c0_i32 = arith.constant 0 : i32
    %c0_i32_0 = arith.constant 0 : i32
    %c0_i32_1 = arith.constant 0 : i32
    return %c0_i32, %c0_i32_0 : i32, i32
  }
  func.func @transform_2(%arg0: i32) -> (i32, i32) {
    %c0_i32 = arith.constant 0 : i32
    %c0_i32_0 = arith.constant 0 : i32
    return %arg0, %c0_i32 : i32, i32
  }
  func.func @transform_3(%arg0: i32) -> (i32, i32) {
    %c0_i32 = arith.constant 0 : i32
    %c0_i32_0 = arith.constant 0 : i32
    return %arg0, %c0_i32 : i32, i32
  }
}

</mosaic_0001>

<bundles_post_ra>
// kernel: _bottleneck_forward.6
= control target key start
LH: loop header
LB: loop body
LE: loop exit
PB: predicated region body
PF: predicated region fallthrough
CT: control target
= control target key end

     0   :  { %s2507_s2 = inlined_call_operand.vmem [shape: bf16[128,128], index: 2, kind: input, shape index: {}]   ;;  %s2508_s0 = inlined_call_operand.vmem [shape: bf16[512,128], index: 0, kind: input, shape index: {}]   ;;  %s2509_s1 = inlined_call_operand.vmem [shape: f32[2,128], index: 1, kind: input, shape index: {}]   ;;  %s2510_s3 = inlined_call_operand.vmem [shape: bf16[512,128], index: 3, kind: output, shape index: {0}]   ;;  %s2511_s4 = inlined_call_operand.vmem [shape: f32[1,2,128], index: 4, kind: output, shape index: {1}]  }
   0x1   :  { %v1888_v0 = vld [vmem:[%s2507_s2] sm:$0xff]   ;;  %v1889_v1 = vld [vmem:[%s2507_s2 + $0x8] sm:$0xff]   ;;  %v1890_v2 = vld [vmem:[%s2507_s2 + $0x10] sm:$0xff]  }
   0x2   :  { %1792 = vmatprep.subr.bf16.mxu0 %v1888_v0  ;;  %1872 = vmatprep.subr.bf16.mxu1 %v1888_v0  ;;  %v1891_v3 = vld [vmem:[%s2507_s2 + $0x18] sm:$0xff]   ;;  %v1403_v4 = vld [vmem:[%s2508_s0] sm:$0xff]   ;;  %v1690_v8 = vld [vmem:[%s2508_s0 + $0x8] sm:$0xff]  }
   0x3   :  { %1793 = vmatpush3.bf16.msra.mxu0 %v1888_v0  ;;  %1880 = vmatpush3.bf16.msra.mxu1 %v1888_v0  ;;  %v1939_v5 = vld [vmem:[%s2509_s1] ss:$0 sm:$0xff]  ;;  %v1404_v6 = vunpack.c.l.bf16 %v1403_v4  ;;  %v1405_v7 = vunpack.c.h.bf16 %v1403_v4  ;;  %v1691_v9 = vld [vmem:[%s2508_s0 + $0x10] sm:$0xff]   ;;  %v1950_v10 = vld [vmem:[%s2509_s1 + $0x1] ss:$0 sm:$0xff]  ;;  %v1408_v14 = vunpack.c.l.bf16 %v1690_v8  ;;  %v1409_v15 = vunpack.c.h.bf16 %v1690_v8 }
   0x4   :  { %1794 = vmatprep.subr.bf16.mxu0 %v1889_v1  ;;  %1873 = vmatprep.subr.bf16.mxu1 %v1889_v1  ;;  %v1892_v13 = vld [vmem:[%s2507_s2 + $0x20] sm:$0xff]   ;;  %v1412_v16 = vunpack.c.l.bf16 %v1691_v9  ;;  %v1413_v19 = vunpack.c.h.bf16 %v1691_v9  ;;  %v1893_v22 = vld [vmem:[%s2507_s2 + $0x28] sm:$0xff]   ;;  %v1692_v26 = vld [vmem:[%s2508_s0 + $0x18] sm:$0xff]  }
   0x5   :  { %v150_v11 = vmul.f32 %v1404_v6, %v1939_v5  ;;  %v151_v12 = vmul.f32 %v1405_v7, %v1939_v5  ;;  %v152_v23 = vmul.f32 %v1408_v14, %v1939_v5  ;;  %v153_v24 = vmul.f32 %v1409_v15, %v1939_v5  ;;  %v1693_v29 = vld [vmem:[%s2508_s0 + $0x20] sm:$0xff]   ;;  %v1894_v31 = vld [vmem:[%s2507_s2 + $0x30] sm:$0xff]   ;;  %v1694_v38 = vld [vmem:[%s2508_s0 + $0x28] sm:$0xff]  }
   0x6   :  { %v154_v25 = vmul.f32 %v1412_v16, %v1939_v5  ;;  %v155_v28 = vmul.f32 %v1413_v19, %v1939_v5  ;;  %v1416_v30 = vunpack.c.l.bf16 %v1692_v26  ;;  %v1417_v35 = vunpack.c.h.bf16 %v1692_v26  ;;  %v1695_v41 = vld [vmem:[%s2508_s0 + $0x30] sm:$0xff]   ;;  %v1696_v42 = vld [vmem:[%s2508_s0 + $0x38] sm:$0xff]   ;;  %v1697_v48 = vld [vmem:[%s2508_s0 + $0x40] sm:$0xff]  }
   0x7   :  { %1795 = vmatpush3.bf16.msra.mxu0 %v1889_v1  ;;  %1881 = vmatpush3.bf16.msra.mxu1 %v1889_v1  ;;  %v219_v17 = vadd.f32 %v1950_v10, %v150_v11  ;;  %v220_v18 = vadd.f32 %v1950_v10, %v151_v12  ;;  %v221_v32 = vadd.f32 %v1950_v10, %v152_v23  ;;  %v1420_v37 = vunpack.c.l.bf16 %v1693_v29  ;;  %v1895_v43 = vld [vmem:[%s2507_s2 + $0x38] sm:$0xff]   ;;  %v1698_v63 = vld [vmem:[%s2508_s0 + $0x48] sm:$0xff]   ;;  %v1699_v4 = vld [vmem:[%s2508_s0 + $0x50] sm:$0xff]  }
   0x8   :  { %1796 = vmatprep.subr.bf16.mxu0 %v1890_v2  ;;  %1874 = vmatprep.subr.bf16.mxu1 %v1890_v2  ;;  %v222_v33 = vadd.f32 %v1950_v10, %v153_v24  ;;  %v223_v34 = vadd.f32 %v1950_v10, %v154_v25  ;;  %v224_v36 = vadd.f32 %v1950_v10, %v155_v28  ;;  %v1421_v40 = vunpack.c.h.bf16 %v1693_v29  ;;  %v1700_v23 = vld [vmem:[%s2508_s0 + $0x58] sm:$0xff]  }
   0x9   :  { %v283_v20 = vmax.f32 %v219_v17, 0.0  ;;  %v284_v21 = vmax.f32 %v220_v18, 0.0  ;;  %v156_v39 = vmul.f32 %v1416_v30, %v1939_v5  ;;  %v285_v44 = vmax.f32 %v221_v32, 0.0 }
   0xa   :  { %v286_v45 = vmax.f32 %v222_v33, 0.0  ;;  %v287_v46 = vmax.f32 %v223_v34, 0.0  ;;  %v157_v47 = vmul.f32 %v1417_v35, %v1939_v5  ;;  %v288_v49 = vmax.f32 %v224_v36, 0.0 }
   0xb   :  { %1797 = vmatpush3.bf16.msra.mxu0 %v1890_v2  ;;  %1882 = vmatpush3.bf16.msra.mxu1 %v1890_v2  ;;  %v347_v27 = vpack.c.bf16 %v284_v21, %v283_v20  ;;  %v158_v50 = vmul.f32 %v1420_v37, %v1939_v5  ;;  %v1424_v51 = vunpack.c.l.bf16 %v1694_v38  ;;  %v1425_v52 = vunpack.c.h.bf16 %v1694_v38 }
   0xc   :  { %1798 = vmatprep.subr.bf16.mxu0 %v1891_v3  ;;  %1875 = vmatprep.subr.bf16.mxu1 %v1891_v3  ;;  %v1428_v53 = vunpack.c.l.bf16 %v1695_v41  ;;  %v1429_v54 = vunpack.c.h.bf16 %v1695_v41  ;;  %v1432_v55 = vunpack.c.l.bf16 %v1696_v42  ;;  %v1433_v56 = vunpack.c.h.bf16 %v1696_v42 }
   0xd   :  { %1808 = vmatprep.mubr.bf16.mxu0 %v347_v27  ;;  %v159_v57 = vmul.f32 %v1421_v40, %v1939_v5  ;;  %v1436_v58 = vunpack.c.l.bf16 %v1697_v48  ;;  %v1437_v59 = vunpack.c.h.bf16 %v1697_v48  ;;  %v348_v60 = vpack.c.bf16 %v286_v45, %v285_v44  ;;  %v1705_v44 = vld [vmem:[%s2508_s0 + $0x80] sm:$0xff]  }
   0xe   :  { %v225_v61 = vadd.f32 %v1950_v10, %v156_v39  ;;  %v226_v62 = vadd.f32 %v1950_v10, %v157_v47  ;;  %v349_v0 = vpack.c.bf16 %v288_v49, %v287_v46  ;;  %v227_v1 = vadd.f32 %v1950_v10, %v158_v50 }
   0xf   :  { %1799 = vmatpush3.bf16.msra.mxu0 %v1891_v3  ;;  %1883 = vmatpush3.bf16.msra.mxu1 %v1891_v3  ;;  %v160_v2 = vmul.f32 %v1424_v51, %v1939_v5  ;;  %v161_v3 = vmul.f32 %v1425_v52, %v1939_v5  ;;  %v162_v6 = vmul.f32 %v1428_v53, %v1939_v5  ;;  %v1440_v14 = vunpack.c.l.bf16 %v1698_v63  ;;  %v2043_v52 = vld [vmem:[%s2508_s0 + $0x60] sm:$0xff]  }
  0x10   :  { %1800 = vmatprep.subr.bf16.mxu0 %v1892_v13  ;;  %1876 = vmatprep.subr.bf16.mxu1 %v1892_v13  ;;  %v163_v7 = vmul.f32 %v1429_v54, %v1939_v5  ;;  %v164_v8 = vmul.f32 %v1432_v55, %v1939_v5  ;;  %v165_v9 = vmul.f32 %v1433_v56, %v1939_v5  ;;  %v289_v15 = vmax.f32 %v225_v61, 0.0 }
  0x11   :  { %v228_v11 = vadd.f32 %v1950_v10, %v159_v57  ;;  %v166_v12 = vmul.f32 %v1436_v58, %v1939_v5  ;;  %v290_v16 = vmax.f32 %v226_v62, 0.0  ;;  %v1441_v17 = vunpack.c.h.bf16 %v1698_v63 }
  0x12   :  { %v1444_v18 = vunpack.c.l.bf16 %v1699_v4  ;;  %v291_v19 = vmax.f32 %v227_v1, 0.0  ;;  %v229_v20 = vadd.f32 %v1950_v10, %v160_v2  ;;  %v230_v21 = vadd.f32 %v1950_v10, %v161_v3 }
  0x13   :  { %1801 = vmatpush3.bf16.msra.mxu0 %v1892_v13  ;;  %1884 = vmatpush3.bf16.msra.mxu1 %v1892_v13  ;;  %v167_v13 = vmul.f32 %v1437_v59, %v1939_v5  ;;  %v231_v24 = vadd.f32 %v1950_v10, %v162_v6  ;;  %v232_v25 = vadd.f32 %v1950_v10, %v163_v7  ;;  %v292_v28 = vmax.f32 %v228_v11, 0.0  ;;  %v1706_v59 = vld [vmem:[%s2508_s0 + $0x88] sm:$0xff]   ;;  %v1708_v11 = vld [vmem:[%s2508_s0 + $0x98] sm:$0xff]  }
  0x14   :  { %1802 = vmatprep.subr.bf16.mxu0 %v1893_v22  ;;  %1877 = vmatprep.subr.bf16.mxu1 %v1893_v22  ;;  %v233_v26 = vadd.f32 %v1950_v10, %v164_v8  ;;  %v234_v27 = vadd.f32 %v1950_v10, %v165_v9  ;;  %v235_v29 = vadd.f32 %v1950_v10, %v166_v12  ;;  %v1448_v35 = vunpack.c.l.bf16 %v1700_v23 }
  0x15   :  { %v236_v30 = vadd.f32 %v1950_v10, %v167_v13  ;;  %v350_v32 = vpack.c.bf16 %v290_v16, %v289_v15  ;;  %v169_v33 = vmul.f32 %v1441_v17, %v1939_v5  ;;  %v170_v34 = vmul.f32 %v1444_v18, %v1939_v5 }
  0x16   :  { %v293_v36 = vmax.f32 %v229_v20, 0.0  ;;  %v294_v37 = vmax.f32 %v230_v21, 0.0  ;;  %v1449_v39 = vunpack.c.h.bf16 %v1700_v23  ;;  %v295_v40 = vmax.f32 %v231_v24, 0.0  ;;  %v1709_v24 = vld [vmem:[%s2508_s0 + $0xa0] sm:$0xff]  }
  0x17   :  { %1803 = vmatpush3.bf16.msra.mxu0 %v1893_v22  ;;  %1885 = vmatpush3.bf16.msra.mxu1 %v1893_v22  ;;  %v1445_v22 = vunpack.c.h.bf16 %v1699_v4  ;;  %v296_v41 = vmax.f32 %v232_v25, 0.0  ;;  %v297_v42 = vmax.f32 %v233_v26, 0.0  ;;  %v351_v45 = vpack.c.bf16 %v292_v28, %v291_v19 }
  0x18   :  { %1804 = vmatprep.subr.bf16.mxu0 %v1894_v31  ;;  %1878 = vmatprep.subr.bf16.mxu1 %v1894_v31  ;;  %v299_v46 = vmax.f32 %v235_v29, 0.0  ;;  %v300_v47 = vmax.f32 %v236_v30, 0.0  ;;  %v238_v49 = vadd.f32 %v1950_v10, %v169_v33  ;;  %v2037_v50 = vadd.f32 %v1950_v10, %v170_v34  ;;  %v1710_v33 = vld [vmem:[%s2508_s0 + $0xa8] sm:$0xff]  }
  0x19   :  { %v171_v38 = vmul.f32 %v1445_v22, %v1939_v5  ;;  %v172_v51 = vmul.f32 %v1448_v35, %v1939_v5  ;;  %v173_v54 = vmul.f32 %v1449_v39, %v1939_v5  ;;  %v1468_v55 = vunpack.c.l.bf16 %v1705_v44 }
  0x1a   :  { %v352_v56 = vpack.c.bf16 %v294_v37, %v293_v36  ;;  %v353_v57 = vpack.c.bf16 %v296_v41, %v295_v40  ;;  %v1452_v62 = vunpack.c.l.bf16 %v2043_v52  ;;  %v1469_v63 = vunpack.c.h.bf16 %v1705_v44 }
  0x1b   :  { %1805 = vmatpush3.bf16.msra.mxu0 %v1894_v31  ;;  %1886 = vmatpush3.bf16.msra.mxu1 %v1894_v31  ;;  %v168_v31 = vmul.f32 %v1440_v14, %v1939_v5  ;;  %v2046_v53 = vadd.f32 %v1950_v10, %v171_v38  ;;  %v302_v1 = vmax.f32 %v238_v49, 0.0  ;;  %v303_v2 = vmax.f32 %v2037_v50, 0.0 }
  0x1c   :  { %1806 = vmatprep.subr.bf16.mxu0 %v1895_v43  ;;  %1879 = vmatprep.subr.bf16.mxu1 %v1895_v43  ;;  %v2062_v3 = vadd.f32 %v1950_v10, %v172_v51  ;;  %v182_v4 = vmul.f32 %v1468_v55, %v1939_v5  ;;  %v2067_v7 = vadd.f32 %v1950_v10, %v173_v54  ;;  %v1472_v9 = vunpack.c.l.bf16 %v1706_v59 }
  0x1d   :  { %v237_v48 = vadd.f32 %v1950_v10, %v168_v31  ;;  %v304_v6 = vmax.f32 %v2046_v53, 0.0  ;;  %v183_v8 = vmul.f32 %v1469_v63, %v1939_v5  ;;  %v1453_v12 = vunpack.c.h.bf16 %v2043_v52 }
  0x1e   :  { %v251_v13 = vadd.f32 %v1950_v10, %v182_v4  ;;  %v1473_v14 = vunpack.c.h.bf16 %v1706_v59  ;;  %v2076_v16 = vmul.f32 %v1452_v62, %v1939_v5  ;;  %v184_v18 = vmul.f32 %v1472_v9, %v1939_v5 }
  0x1f   :  { %1807 = vmatpush3.bf16.msra.mxu0 %v1895_v43  ;;  %1887 = vmatpush3.bf16.msra.mxu1 %v1895_v43  ;;  %v298_v43 = vmax.f32 %v234_v27, 0.0  ;;  %v301_v61 = vmax.f32 %v237_v48, 0.0  ;;  %v252_v17 = vadd.f32 %v1950_v10, %v183_v8  ;;  %v1480_v23 = vunpack.c.l.bf16 %v1708_v11 }
  0x20   :  { %v315_v20 = vmax.f32 %v251_v13, 0.0  ;;  %v185_v21 = vmul.f32 %v1473_v14, %v1939_v5  ;;  %v253_v27 = vadd.f32 %v1950_v10, %v184_v18  ;;  %v1481_v31 = vunpack.c.h.bf16 %v1708_v11  ;;  %v1713_v18 = vld [vmem:[%s2508_s0 + $0xc0] sm:$0xff]  }
  0x21   :  { %v2049_v58 = vpack.c.bf16 %v298_v43, %v297_v42  ;;  %v2085_v25 = vpack.c.bf16 %v302_v1, %v301_v61  ;;  %v316_v26 = vmax.f32 %v252_v17, 0.0  ;;  %v1484_v37 = vunpack.c.l.bf16 %v1709_v24  ;;  %v1712_v1 = vld [vmem:[%s2508_s0 + $0xb8] sm:$0xff]  }
  0x22   :  { %1809 = vmatmul.mubr.bf16.vlgmr.msra.gmra.mrb[0].mxu0 %v348_v60  ;;  %v2054_v60 = vpack.c.bf16 %v300_v47, %v299_v46  ;;  %v254_v29 = vadd.f32 %v1950_v10, %v185_v21  ;;  %v317_v35 = vmax.f32 %v253_v27, 0.0  ;;  %v189_v40 = vmul.f32 %v1481_v31, %v1939_v5  ;;  %v1711_v46 = vld [vmem:[%s2508_s0 + $0xb0] sm:$0xff]   ;;  %v1702_v47 = vld [vmem:[%s2508_s0 + $0x68] sm:$0xff]  }
  0x23   :  { %1812 = vmatprep.mubr.bf16.mxu0 %v349_v0  ;;  %v1707_v0 = vld [vmem:[%s2508_s0 + $0x90] sm:$0xff]   ;;  %v363_v34 = vpack.c.bf16 %v316_v26, %v315_v20  ;;  %v1485_v43 = vunpack.c.h.bf16 %v1709_v24  ;;  %v190_v44 = vmul.f32 %v1484_v37, %v1939_v5  ;;  %v1489_v54 = vunpack.c.h.bf16 %v1710_v33 }
  0x24   :  { %v1476_v15 = vunpack.c.l.bf16 %v1707_v0  ;;  %v1477_v19 = vunpack.c.h.bf16 %v1707_v0  ;;  %v318_v38 = vmax.f32 %v254_v29, 0.0  ;;  %v258_v49 = vadd.f32 %v1950_v10, %v189_v40  ;;  %v1715_v40 = vld [vmem:[%s2508_s0 + $0xd0] sm:$0xff]  }
  0x25   :  { %1840 = vmatprep.mubr.bf16.mxu1 %v363_v34  ;;  %v193_v62 = vmul.f32 %v1489_v54, %v1939_v5  ;;  %v1492_v63 = vunpack.c.l.bf16 %v1711_v46  ;;  %v1493_v0 = vunpack.c.h.bf16 %v1711_v46  ;;  %v305_v4 = vmax.f32 %v2062_v3, 0.0 }
  0x26   :  { %v186_v22 = vmul.f32 %v1476_v15, %v1939_v5  ;;  %v187_v28 = vmul.f32 %v1477_v19, %v1939_v5  ;;  %v364_v48 = vpack.c.bf16 %v318_v38, %v317_v35  ;;  %v322_v61 = vmax.f32 %v258_v49, 0.0 }
  0x27   :  { %v1456_v8 = vunpack.c.l.bf16 %v1702_v47  ;;  %v306_v13 = vmax.f32 %v2067_v7, 0.0  ;;  %v1457_v14 = vunpack.c.h.bf16 %v1702_v47  ;;  %v194_v15 = vmul.f32 %v1492_v63, %v1939_v5 }
  0x28   :  { %v255_v30 = vadd.f32 %v1950_v10, %v186_v22  ;;  %v256_v36 = vadd.f32 %v1950_v10, %v187_v28  ;;  %1841 = vmatmul.mubr.bf16.vlgmr.msra.gmra.mrb[0].mxu1 %v364_v48  ;;  %v195_v17 = vmul.f32 %v1493_v0, %v1939_v5  ;;  %v175_v3 = vmul.f32 %v1453_v12, %v1939_v5 }
  0x29   :  { %v1496_v19 = vunpack.c.l.bf16 %v1712_v1  ;;  %v1497_v20 = vunpack.c.h.bf16 %v1712_v1  ;;  %v263_v24 = vadd.f32 %v1950_v10, %v194_v15  ;;  %v1500_v27 = vunpack.c.l.bf16 %v1713_v18  ;;  %v1716_v15 = vld [vmem:[%s2508_s0 + $0xd8] sm:$0xff]  }
  0x2a   :  { %1813 = vmatmul.mubr.bf16.gmra.mrb[4].mxu0 %v350_v32  ;;  %v188_v32 = vmul.f32 %v1480_v23, %v1939_v5  ;;  %v319_v39 = vmax.f32 %v255_v30, 0.0  ;;  %v320_v42 = vmax.f32 %v256_v36, 0.0  ;;  %v262_v23 = vadd.f32 %v1950_v10, %v193_v62 }
  0x2b   :  { %1816 = vmatprep.mubr.bf16.mxu0 %v351_v45  ;;  %v1488_v45 = vunpack.c.l.bf16 %v1710_v33  ;;  %v1501_v52 = vunpack.c.h.bf16 %v1713_v18  ;;  %v357_v12 = vpack.c.bf16 %v304_v6, %v303_v2  ;;  %v243_v28 = vadd.f32 %v1950_v10, %v2076_v16  ;;  %v1704_v33 = vld [vmem:[%s2508_s0 + $0x78] sm:$0xff]   ;;  %v1714_v16 = vld [vmem:[%s2508_s0 + $0xc8] sm:$0xff]  }
  0x2c   :  { %v257_v41 = vadd.f32 %v1950_v10, %v188_v32  ;;  %v365_v55 = vpack.c.bf16 %v320_v42, %v319_v39  ;;  %v244_v31 = vadd.f32 %v1950_v10, %v175_v3  ;;  %v176_v32 = vmul.f32 %v1456_v8, %v1939_v5 }
  0x2d   :  { %v192_v59 = vmul.f32 %v1488_v45, %v1939_v5  ;;  %v196_v34 = vmul.f32 %v1496_v19, %v1939_v5  ;;  %v197_v50 = vmul.f32 %v1497_v20, %v1939_v5  ;;  %v358_v35 = vpack.c.bf16 %v306_v13, %v305_v4 }
  0x2e   :  { %v321_v51 = vmax.f32 %v257_v41, 0.0  ;;  %1844 = vmatprep.mubr.bf16.mxu1 %v365_v55  ;;  %v177_v53 = vmul.f32 %v1457_v14, %v1939_v5  ;;  %v326_v6 = vmax.f32 %v262_v23, 0.0  ;;  %v327_v36 = vmax.f32 %v263_v24, 0.0 }
  0x2f   :  { %v261_v22 = vadd.f32 %v1950_v10, %v192_v59  ;;  %v198_v38 = vmul.f32 %v1500_v27, %v1939_v5  ;;  %v199_v39 = vmul.f32 %v1501_v52, %v1939_v5  ;;  %v307_v41 = vmax.f32 %v243_v28, 0.0 }
  0x30   :  { %v366_v21 = vpack.c.bf16 %v322_v61, %v321_v51  ;;  %v308_v45 = vmax.f32 %v244_v31, 0.0  ;;  %v265_v46 = vadd.f32 %v1950_v10, %v196_v34  ;;  %v266_v47 = vadd.f32 %v1950_v10, %v197_v50 }
  0x31   :  { %v325_v2 = vmax.f32 %v261_v22, 0.0  ;;  %v1504_v48 = vunpack.c.l.bf16 %v1714_v16  ;;  %v1505_v51 = vunpack.c.h.bf16 %v1714_v16  ;;  %v1508_v54 = vunpack.c.l.bf16 %v1715_v40 }
  0x32   :  { %1817 = vmatmul.mubr.bf16.gmra.mrb[8].mxu0 %v352_v56  ;;  %v191_v56 = vmul.f32 %v1485_v43, %v1939_v5  ;;  %1845 = vmatmul.mubr.bf16.gmra.mrb[4].mxu1 %v366_v21  ;;  %v1509_v55 = vunpack.c.h.bf16 %v1715_v40  ;;  %v268_v59 = vadd.f32 %v1950_v10, %v199_v39  ;;  %v246_v61 = vadd.f32 %v1950_v10, %v177_v53  ;;  %v1717_v21 = vld [vmem:[%s2508_s0 + $0xe0] sm:$0xff]  }
  0x33   :  { %1820 = vmatprep.mubr.bf16.mxu0 %v353_v57  ;;  %v259_v57 = vadd.f32 %v1950_v10, %v190_v44  ;;  %v1464_v44 = vunpack.c.l.bf16 %v1704_v33  ;;  %v368_v49 = vpack.c.bf16 %v326_v6, %v325_v2  ;;  %v1465_v0 = vunpack.c.h.bf16 %v1704_v33 }
  0x34   :  { %v260_v9 = vadd.f32 %v1950_v10, %v191_v56  ;;  %v245_v56 = vadd.f32 %v1950_v10, %v176_v32  ;;  %v359_v1 = vpack.c.bf16 %v308_v45, %v307_v41  ;;  %v329_v4 = vmax.f32 %v265_v46, 0.0  ;;  %v1719_v41 = vld [vmem:[%s2508_s0 + $0xf0] sm:$0xff]  }
  0x35   :  { %v323_v11 = vmax.f32 %v259_v57, 0.0  ;;  %v267_v57 = vadd.f32 %v1950_v10, %v198_v38  ;;  %v330_v8 = vmax.f32 %v266_v47, 0.0  ;;  %v202_v13 = vmul.f32 %v1508_v54, %v1939_v5 }
  0x36   :  { %v324_v7 = vmax.f32 %v260_v9, 0.0  ;;  %v200_v9 = vmul.f32 %v1504_v48, %v1939_v5  ;;  %v203_v14 = vmul.f32 %v1509_v55, %v1939_v5  ;;  %v332_v3 = vmax.f32 %v268_v59, 0.0 }
  0x37   :  { %v331_v18 = vmax.f32 %v267_v57, 0.0  ;;  %v181_v20 = vmul.f32 %v1465_v0, %v1939_v5  ;;  %v370_v23 = vpack.c.bf16 %v330_v8, %v329_v4  ;;  %v271_v27 = vadd.f32 %v1950_v10, %v202_v13 }
  0x38   :  { %v367_v26 = vpack.c.bf16 %v324_v7, %v323_v11  ;;  %v201_v11 = vmul.f32 %v1505_v51, %v1939_v5  ;;  %v310_v7 = vmax.f32 %v246_v61, 0.0  ;;  %v269_v24 = vadd.f32 %v1950_v10, %v200_v9 }
  0x39   :  { %v272_v52 = vadd.f32 %v1950_v10, %v203_v14  ;;  %v371_v28 = vpack.c.bf16 %v332_v3, %v331_v18  ;;  %v250_v33 = vadd.f32 %v1950_v10, %v181_v20  ;;  %v335_v2 = vmax.f32 %v271_v27, 0.0 }
  0x3a   :  { %1821 = vmatmul.mubr.bf16.gmra.mrb[12].mxu0 %v2049_v58  ;;  %v1703_v58 = vld [vmem:[%s2508_s0 + $0x70] sm:$0xff]   ;;  %1848 = vmatprep.mubr.bf16.mxu1 %v367_v26  ;;  %v1512_v26 = vunpack.c.l.bf16 %v1716_v15  ;;  %v333_v50 = vmax.f32 %v269_v24, 0.0  ;;  %v1524_v51 = vunpack.c.l.bf16 %v1719_v41  ;;  %v1525_v54 = vunpack.c.h.bf16 %v1719_v41 }
  0x3b   :  { %1824 = vmatprep.mubr.bf16.mxu0 %v2054_v60  ;;  %v264_v60 = vadd.f32 %v1950_v10, %v195_v17  ;;  %v1460_v29 = vunpack.c.l.bf16 %v1703_v58  ;;  %v1461_v30 = vunpack.c.h.bf16 %v1703_v58  ;;  %1849 = vmatmul.mubr.bf16.gmra.mrb[8].mxu1 %v368_v49  ;;  %v180_v17 = vmul.f32 %v1464_v44, %v1939_v5 }
  0x3c   :  { %v309_v58 = vmax.f32 %v245_v56, 0.0  ;;  %v336_v6 = vmax.f32 %v272_v52, 0.0  ;;  %v314_v40 = vmax.f32 %v250_v33, 0.0  ;;  %v211_v0 = vmul.f32 %v1525_v54, %v1939_v5 }
  0x3d   :  { %v328_v37 = vmax.f32 %v264_v60, 0.0  ;;  %v178_v42 = vmul.f32 %v1460_v29, %v1939_v5  ;;  %v179_v43 = vmul.f32 %v1461_v30, %v1939_v5  ;;  %v270_v60 = vadd.f32 %v1950_v10, %v201_v11 }
  0x3e   :  { %v1516_v29 = vunpack.c.l.bf16 %v1717_v21  ;;  %v1517_v30 = vunpack.c.h.bf16 %v1717_v21  ;;  %v360_v31 = vpack.c.bf16 %v310_v7, %v309_v58  ;;  %v249_v32 = vadd.f32 %v1950_v10, %v180_v17 }
  0x3f   :  { %v247_v62 = vadd.f32 %v1950_v10, %v178_v42  ;;  %v248_v63 = vadd.f32 %v1950_v10, %v179_v43  ;;  %v334_v53 = vmax.f32 %v270_v60, 0.0  ;;  %v373_v45 = vpack.c.bf16 %v336_v6, %v335_v2 }
  0x40   :  { %v207_v38 = vmul.f32 %v1517_v30, %v1939_v5  ;;  %v313_v39 = vmax.f32 %v249_v32, 0.0  ;;  %v280_v17 = vadd.f32 %v1950_v10, %v211_v0 }
  0x41   :  { %v311_v19 = vmax.f32 %v247_v62, 0.0  ;;  %v312_v22 = vmax.f32 %v248_v63, 0.0  ;;  %v372_v44 = vpack.c.bf16 %v334_v53, %v333_v50  ;;  %v210_v63 = vmul.f32 %v1524_v51, %v1939_v5 }
  0x42   :  { %1825 = vmatmul.mubr.bf16.gmra.mrb[16].mxu0 %v2085_v25  ;;  %v369_v25 = vpack.c.bf16 %v328_v37, %v327_v36  ;;  %v1718_v36 = vld [vmem:[%s2508_s0 + $0xe8] sm:$0xff]   ;;  %v206_v37 = vmul.f32 %v1516_v29, %v1939_v5  ;;  %v276_v49 = vadd.f32 %v1950_v10, %v207_v38  ;;  %v362_v55 = vpack.c.bf16 %v314_v40, %v313_v39 }
  0x43   :  { %1828 = vmatprep.mubr.bf16.mxu0 %v357_v12  ;;  %v1513_v12 = vunpack.c.h.bf16 %v1716_v15  ;;  %v361_v34 = vpack.c.bf16 %v312_v22, %v311_v19  ;;  %v1520_v43 = vunpack.c.l.bf16 %v1718_v36  ;;  %v1521_v47 = vunpack.c.h.bf16 %v1718_v36 }
  0x44   :  { %1852 = vmatprep.mubr.bf16.mxu1 %v369_v25  ;;  %v275_v48 = vadd.f32 %v1950_v10, %v206_v37  ;;  %v340_v62 = vmax.f32 %v276_v49, 0.0  ;;  %v279_v15 = vadd.f32 %v1950_v10, %v210_v63  ;;  %v344_v20 = vmax.f32 %v280_v17, 0.0 }
  0x45   :  { %1853 = vmatmul.mubr.bf16.gmra.mrb[12].mxu1 %v370_v23  ;;  %v205_v16 = vmul.f32 %v1513_v12, %v1939_v5  ;;  %v208_v56 = vmul.f32 %v1520_v43, %v1939_v5  ;;  %v209_v59 = vmul.f32 %v1521_v47, %v1939_v5 }
  0x46   :  { %1856 = vmatprep.mubr.bf16.mxu1 %v371_v28  ;;  %v339_v61 = vmax.f32 %v275_v48, 0.0  ;;  %v343_v19 = vmax.f32 %v279_v15, 0.0 }
  0x47   :  { %v274_v46 = vadd.f32 %v1950_v10, %v205_v16  ;;  %v277_v4 = vadd.f32 %v1950_v10, %v208_v56  ;;  %v278_v9 = vadd.f32 %v1950_v10, %v209_v59 }
  0x48   :  { %v375_v14 = vpack.c.bf16 %v340_v62, %v339_v61  ;;  %v377_v24 = vpack.c.bf16 %v344_v20, %v343_v19 }
  0x49   :  { %v338_v57 = vmax.f32 %v274_v46, 0.0  ;;  %v341_v18 = vmax.f32 %v277_v4, 0.0  ;;  %v342_v3 = vmax.f32 %v278_v9, 0.0 }
  0x4a   :  { %1829 = vmatmul.mubr.bf16.gmra.mrb[20].mxu0 %v358_v35  ;;  %v204_v35 = vmul.f32 %v1512_v26, %v1939_v5 }
  0x4b   :  { %1832 = vmatprep.mubr.bf16.mxu0 %v359_v1  ;;  %v1720_v1 = vld [vmem:[%s2508_s0 + $0xf8] sm:$0xff]   ;;  %v376_v21 = vpack.c.bf16 %v342_v3, %v341_v18 }
  0x4c   :  { %v273_v42 = vadd.f32 %v1950_v10, %v204_v35  ;;  %v1528_v11 = vunpack.c.l.bf16 %v1720_v1  ;;  %v1529_v13 = vunpack.c.h.bf16 %v1720_v1 }
  0x4d   :  { %1857 = vmatmul.mubr.bf16.gmra.mrb[16].mxu1 %v372_v44 }
  0x4e   :  { %v337_v25 = vmax.f32 %v273_v42, 0.0  ;;  %1860 = vmatprep.mubr.bf16.mxu1 %v373_v45  ;;  %v212_v58 = vmul.f32 %v1528_v11, %v1939_v5  ;;  %v213_v7 = vmul.f32 %v1529_v13, %v1939_v5 }
  0x50   :  { %v374_v8 = vpack.c.bf16 %v338_v57, %v337_v25  ;;  %v281_v22 = vadd.f32 %v1950_v10, %v212_v58  ;;  %v282_v23 = vadd.f32 %v1950_v10, %v213_v7 }
  0x52   :  { %1833 = vmatmul.mubr.bf16.gmra.mrb[24].mxu0 %v360_v31  ;;  %v345_v26 = vmax.f32 %v281_v22, 0.0  ;;  %v346_v60 = vmax.f32 %v282_v23, 0.0 }
  0x53   :  { %1836 = vmatprep.mubr.bf16.mxu0 %v361_v34 }
  0x54   :  { %v378_v27 = vpack.c.bf16 %v346_v60, %v345_v26 }
  0x55   :  { %1861 = vmatmul.mubr.bf16.gmra.mrb[20].mxu1 %v374_v8 }
  0x56   :  { %1864 = vmatprep.mubr.bf16.mxu1 %v375_v14 }
  0x5a   :  { %1837 = vmatmul.mubr.bf16.gmra.mrb[28].mxu0 %v362_v55 }
  0x5d   :  { %1865 = vmatmul.mubr.bf16.gmra.mrb[24].mxu1 %v376_v21 }
  0x5e   :  { %1868 = vmatprep.mubr.bf16.mxu1 %v377_v24 }
  0x65   :  { %1869 = vmatmul.mubr.bf16.gmra.mrb[28].mxu1 %v378_v27 }
  0xf5   :  { %v1810_v52 = vpop.f32.mrb[0].mxu0 }
  0xf6   :  { %v477_v12 = vpop.f32.mrb[1].mxu0  ;;  %v804_v10 = vmul.f32 %v1810_v52, %v1810_v52 }
  0xf7   :  { %v1811_v28 = vpop.f32.mrb[2].mxu0  ;;  %v802_v30 = vmul.f32 %v477_v12, %v477_v12 }
  0xf8   :  { %v1538_v29 = vpack.c.bf16 %v1811_v28, %v1810_v52  ;;  %v480_v5 = vpop.f32.mrb[3].mxu0  ;;  %v805_v35 = vmul.f32 %v1811_v28, %v1811_v28 }
  0xf9   :  { %v732_v31 = vadd.f32 %v480_v5, %v477_v12  ;;  %v803_v32 = vmul.f32 %v480_v5, %v480_v5  ;;  %v1533_v33 = vpack.c.bf16 %v480_v5, %v477_v12 }
  0xfa   :  { %1721 = vst [vmem:[%s2510_s3 + $0x8] sm:$0xff] %v1538_v29  }
  0xfb   :  { %v733_v34 = vadd.f32 %v1810_v52, %v732_v31  ;;  %v866_v50 = vadd.f32 %v803_v32, %v802_v30  ;;  %1534 = vst [vmem:[%s2510_s3] sm:$0xff] %v1533_v33   ;;  %v2231_v14 = vpop.f32.mrb[0].mxu1 }
  0xfc   :  { %v2233_v15 = vpop.f32.mrb[1].mxu1 }
  0xfd   :  { %v867_v53 = vadd.f32 %v866_v50, %v804_v10  ;;  %v1814_v2 = vpop.f32.mrb[4].mxu0  ;;  %v734_v6 = vadd.f32 %v1811_v28, %v733_v34  ;;  %v2235_v7 = vpop.f32.mrb[2].mxu1 }
  0xfe   :  { %v493_v16 = vpop.f32.mrb[5].mxu0  ;;  %v808_v46 = vmul.f32 %v1814_v2, %v1814_v2  ;;  %v1618_v20 = vpack.c.bf16 %v2235_v7, %v2231_v14  ;;  %v2239_v21 = vpop.f32.mrb[3].mxu1 }
  0xff   :  { %v735_v36 = vadd.f32 %v734_v6, %v493_v16  ;;  %v806_v37 = vmul.f32 %v493_v16, %v493_v16  ;;  %v868_v38 = vadd.f32 %v867_v53, %v805_v35  ;;  %v1815_v39 = vpop.f32.mrb[6].mxu0  ;;  %v1613_v52 = vpack.c.bf16 %v2239_v21, %v2233_v15 }
 0x100   :  { %v1548_v40 = vpack.c.bf16 %v1815_v39, %v1814_v2  ;;  %v496_v41 = vpop.f32.mrb[7].mxu0  ;;  %v809_v49 = vmul.f32 %v1815_v39, %v1815_v39  ;;  %1737 = vst [vmem:[%s2510_s3 + $0x88] sm:$0xff] %v1618_v20  }
 0x101   :  { %v869_v42 = vadd.f32 %v868_v38, %v806_v37  ;;  %v736_v43 = vadd.f32 %v735_v36, %v496_v41  ;;  %v807_v44 = vmul.f32 %v496_v41, %v496_v41  ;;  %v1543_v45 = vpack.c.bf16 %v496_v41, %v493_v16  ;;  %1736 = vst [vmem:[%s2510_s3 + $0x80] sm:$0xff] %v1613_v52  }
 0x102   :  { %1723 = vst [vmem:[%s2510_s3 + $0x18] sm:$0xff] %v1548_v40  }
 0x103   :  { %v737_v47 = vadd.f32 %v1814_v2, %v736_v43  ;;  %v870_v48 = vadd.f32 %v869_v42, %v807_v44  ;;  %1722 = vst [vmem:[%s2510_s3 + $0x10] sm:$0xff] %v1543_v45  }
 0x105   :  { %v871_v51 = vadd.f32 %v870_v48, %v808_v46  ;;  %v1818_v54 = vpop.f32.mrb[8].mxu0  ;;  %v738_v55 = vadd.f32 %v1815_v39, %v737_v47  ;;  %v2255_v33 = vpop.f32.mrb[4].mxu1 }
 0x106   :  { %v509_v56 = vpop.f32.mrb[9].mxu0  ;;  %v812_v9 = vmul.f32 %v1818_v54, %v1818_v54  ;;  %v2257_v10 = vpop.f32.mrb[5].mxu1 }
 0x107   :  { %v739_v25 = vadd.f32 %v738_v55, %v509_v56  ;;  %v810_v57 = vmul.f32 %v509_v56, %v509_v56  ;;  %v872_v59 = vadd.f32 %v871_v51, %v809_v49  ;;  %v1819_v61 = vpop.f32.mrb[10].mxu0  ;;  %v2259_v2 = vpop.f32.mrb[6].mxu1 }
 0x108   :  { %v1558_v62 = vpack.c.bf16 %v1819_v61, %v1818_v54  ;;  %v512_v63 = vpop.f32.mrb[11].mxu0  ;;  %v813_v17 = vmul.f32 %v1819_v61, %v1819_v61  ;;  %v1628_v16 = vpack.c.bf16 %v2259_v2, %v2255_v33  ;;  %v2263_v36 = vpop.f32.mrb[7].mxu1 }
 0x109   :  { %v873_v0 = vadd.f32 %v872_v59, %v810_v57  ;;  %v740_v1 = vadd.f32 %v739_v25, %v512_v63  ;;  %v811_v4 = vmul.f32 %v512_v63, %v512_v63  ;;  %v1553_v8 = vpack.c.bf16 %v512_v63, %v509_v56 }
 0x10a   :  { %1725 = vst [vmem:[%s2510_s3 + $0x28] sm:$0xff] %v1558_v62   ;;  %1739 = vst [vmem:[%s2510_s3 + $0x98] sm:$0xff] %v1628_v16   ;;  %v1623_v43 = vpack.c.bf16 %v2263_v36, %v2257_v10 }
 0x10b   :  { %v741_v11 = vadd.f32 %v1818_v54, %v740_v1  ;;  %v874_v13 = vadd.f32 %v873_v0, %v811_v4  ;;  %1724 = vst [vmem:[%s2510_s3 + $0x20] sm:$0xff] %v1553_v8  }
 0x10c   :  { %1738 = vst [vmem:[%s2510_s3 + $0x90] sm:$0xff] %v1623_v43  }
 0x10d   :  { %v875_v18 = vadd.f32 %v874_v13, %v812_v9  ;;  %v1822_v3 = vpop.f32.mrb[12].mxu0  ;;  %v742_v58 = vadd.f32 %v1819_v61, %v741_v11 }
 0x10e   :  { %v525_v19 = vpop.f32.mrb[13].mxu0  ;;  %v816_v30 = vmul.f32 %v1822_v3, %v1822_v3  ;;  %v2279_v54 = vpop.f32.mrb[8].mxu1 }
 0x10f   :  { %v743_v22 = vadd.f32 %v742_v58, %v525_v19  ;;  %v814_v23 = vmul.f32 %v525_v19, %v525_v19  ;;  %v876_v24 = vadd.f32 %v875_v18, %v813_v17  ;;  %v1823_v26 = vpop.f32.mrb[14].mxu0  ;;  %v2281_v55 = vpop.f32.mrb[9].mxu1 }
 0x110   :  { %v1568_v60 = vpack.c.bf16 %v1823_v26, %v1822_v3  ;;  %v528_v27 = vpop.f32.mrb[15].mxu0  ;;  %v817_v34 = vmul.f32 %v1823_v26, %v1823_v26  ;;  %v2283_v61 = vpop.f32.mrb[10].mxu1 }
 0x111   :  { %v877_v12 = vadd.f32 %v876_v24, %v814_v23  ;;  %v744_v28 = vadd.f32 %v743_v22, %v528_v27  ;;  %v815_v29 = vmul.f32 %v528_v27, %v528_v27  ;;  %v1563_v5 = vpack.c.bf16 %v528_v27, %v525_v19  ;;  %v2287_v0 = vpop.f32.mrb[11].mxu1 }
 0x112   :  { %1727 = vst [vmem:[%s2510_s3 + $0x38] sm:$0xff] %v1568_v60   ;;  %v1638_v63 = vpack.c.bf16 %v2283_v61, %v2279_v54  ;;  %v1633_v17 = vpack.c.bf16 %v2287_v0, %v2281_v55 }
 0x113   :  { %v745_v31 = vadd.f32 %v1822_v3, %v744_v28  ;;  %v878_v32 = vadd.f32 %v877_v12, %v815_v29  ;;  %1726 = vst [vmem:[%s2510_s3 + $0x30] sm:$0xff] %v1563_v5  }
 0x114   :  { %1741 = vst [vmem:[%s2510_s3 + $0xa8] sm:$0xff] %v1638_v63   ;;  %1740 = vst [vmem:[%s2510_s3 + $0xa0] sm:$0xff] %v1633_v17  }
 0x115   :  { %v879_v50 = vadd.f32 %v878_v32, %v816_v30  ;;  %v1826_v35 = vpop.f32.mrb[16].mxu0  ;;  %v746_v53 = vadd.f32 %v1823_v26, %v745_v31 }
 0x116   :  { %v541_v6 = vpop.f32.mrb[17].mxu0  ;;  %v820_v48 = vmul.f32 %v1826_v35, %v1826_v35 }
 0x117   :  { %v747_v37 = vadd.f32 %v746_v53, %v541_v6  ;;  %v818_v38 = vmul.f32 %v541_v6, %v541_v6  ;;  %v880_v39 = vadd.f32 %v879_v50, %v817_v34  ;;  %v1827_v40 = vpop.f32.mrb[18].mxu0 }
 0x118   :  { %v1578_v41 = vpack.c.bf16 %v1827_v40, %v1826_v35  ;;  %v544_v42 = vpop.f32.mrb[19].mxu0  ;;  %v821_v56 = vmul.f32 %v1827_v40, %v1827_v40  ;;  %v2303_v24 = vpop.f32.mrb[12].mxu1 }
 0x119   :  { %v881_v44 = vadd.f32 %v880_v39, %v818_v38  ;;  %v748_v45 = vadd.f32 %v747_v37, %v544_v42  ;;  %v819_v46 = vmul.f32 %v544_v42, %v544_v42  ;;  %v1573_v47 = vpack.c.bf16 %v544_v42, %v541_v6  ;;  %v2305_v26 = vpop.f32.mrb[13].mxu1 }
 0x11a   :  { %1729 = vst [vmem:[%s2510_s3 + $0x48] sm:$0xff] %v1578_v41   ;;  %v2307_v28 = vpop.f32.mrb[14].mxu1 }
 0x11b   :  { %v749_v49 = vadd.f32 %v1826_v35, %v748_v45  ;;  %v882_v51 = vadd.f32 %v881_v44, %v819_v46  ;;  %1728 = vst [vmem:[%s2510_s3 + $0x40] sm:$0xff] %v1573_v47   ;;  %v1648_v5 = vpack.c.bf16 %v2307_v28, %v2303_v24  ;;  %v2311_v30 = vpop.f32.mrb[15].mxu1 }
 0x11c   :  { %v1643_v6 = vpack.c.bf16 %v2311_v30, %v2305_v26 }
 0x11d   :  { %v883_v25 = vadd.f32 %v882_v51, %v820_v48  ;;  %v1830_v57 = vpop.f32.mrb[20].mxu0  ;;  %v750_v59 = vadd.f32 %v1827_v40, %v749_v49  ;;  %1743 = vst [vmem:[%s2510_s3 + $0xb8] sm:$0xff] %v1648_v5  }
 0x11e   :  { %v557_v62 = vpop.f32.mrb[21].mxu0  ;;  %v824_v20 = vmul.f32 %v1830_v57, %v1830_v57  ;;  %1742 = vst [vmem:[%s2510_s3 + $0xb0] sm:$0xff] %v1643_v6  }
 0x11f   :  { %v751_v1 = vadd.f32 %v750_v59, %v557_v62  ;;  %v822_v4 = vmul.f32 %v557_v62, %v557_v62  ;;  %v884_v8 = vadd.f32 %v883_v25, %v821_v56  ;;  %v1831_v9 = vpop.f32.mrb[22].mxu0 }
 0x120   :  { %v1588_v11 = vpack.c.bf16 %v1831_v9, %v1830_v57  ;;  %v560_v13 = vpop.f32.mrb[23].mxu0  ;;  %v825_v60 = vmul.f32 %v1831_v9, %v1831_v9  ;;  %v2327_v43 = vpop.f32.mrb[16].mxu1 }
 0x121   :  { %v885_v18 = vadd.f32 %v884_v8, %v822_v4  ;;  %v752_v3 = vadd.f32 %v751_v1, %v560_v13  ;;  %v823_v58 = vmul.f32 %v560_v13, %v560_v13  ;;  %v1583_v19 = vpack.c.bf16 %v560_v13, %v557_v62  ;;  %v2329_v44 = vpop.f32.mrb[17].mxu1 }
 0x122   :  { %1731 = vst [vmem:[%s2510_s3 + $0x58] sm:$0xff] %v1588_v11   ;;  %v2331_v49 = vpop.f32.mrb[18].mxu1 }
 0x123   :  { %v753_v22 = vadd.f32 %v1830_v57, %v752_v3  ;;  %v886_v23 = vadd.f32 %v885_v18, %v823_v58  ;;  %1730 = vst [vmem:[%s2510_s3 + $0x50] sm:$0xff] %v1583_v19   ;;  %v1658_v56 = vpack.c.bf16 %v2331_v49, %v2327_v43  ;;  %v2335_v25 = vpop.f32.mrb[19].mxu1 }
 0x124   :  { %v1653_v8 = vpack.c.bf16 %v2335_v25, %v2329_v44 }
 0x125   :  { %v887_v27 = vadd.f32 %v886_v23, %v824_v20  ;;  %v1834_v52 = vpop.f32.mrb[24].mxu0  ;;  %v754_v12 = vadd.f32 %v1831_v9, %v753_v22  ;;  %1745 = vst [vmem:[%s2510_s3 + $0xc8] sm:$0xff] %v1658_v56  }
 0x126   :  { %v573_v29 = vpop.f32.mrb[25].mxu0  ;;  %v828_v40 = vmul.f32 %v1834_v52, %v1834_v52  ;;  %1744 = vst [vmem:[%s2510_s3 + $0xc0] sm:$0xff] %v1653_v8  }
 0x127   :  { %v755_v31 = vadd.f32 %v754_v12, %v573_v29  ;;  %v826_v32 = vmul.f32 %v573_v29, %v573_v29  ;;  %v888_v34 = vadd.f32 %v887_v27, %v825_v60  ;;  %v1835_v50 = vpop.f32.mrb[26].mxu0  ;;  %v834_v27 = vmul.f32 %v2233_v15, %v2233_v15 }
 0x128   :  { %v1598_v35 = vpack.c.bf16 %v1835_v50, %v1834_v52  ;;  %v576_v53 = vpop.f32.mrb[27].mxu0  ;;  %v829_v45 = vmul.f32 %v1835_v50, %v1835_v50  ;;  %v2351_v19 = vpop.f32.mrb[20].mxu1 }
 0x129   :  { %v889_v16 = vadd.f32 %v888_v34, %v826_v32  ;;  %v756_v37 = vadd.f32 %v755_v31, %v576_v53  ;;  %v827_v38 = vmul.f32 %v576_v53, %v576_v53  ;;  %v1593_v39 = vpack.c.bf16 %v576_v53, %v573_v29  ;;  %v2353_v20 = vpop.f32.mrb[21].mxu1 }
 0x12a   :  { %1733 = vst [vmem:[%s2510_s3 + $0x68] sm:$0xff] %v1598_v35   ;;  %v835_v35 = vmul.f32 %v2239_v21, %v2239_v21 }
 0x12b   :  { %v757_v41 = vadd.f32 %v1834_v52, %v756_v37  ;;  %v890_v42 = vadd.f32 %v889_v16, %v827_v38  ;;  %1732 = vst [vmem:[%s2510_s3 + $0x60] sm:$0xff] %v1593_v39   ;;  %v2357_v52 = vpop.f32.mrb[22].mxu1  ;;  %v837_v38 = vmul.f32 %v2235_v7, %v2235_v7 }
 0x12c   :  { %v1668_v12 = vpack.c.bf16 %v2357_v52, %v2351_v19  ;;  %v2361_v29 = vpop.f32.mrb[23].mxu1 }
 0x12d   :  { %v891_v46 = vadd.f32 %v890_v42, %v828_v40  ;;  %v1838_v47 = vpop.f32.mrb[28].mxu0  ;;  %v758_v48 = vadd.f32 %v1835_v50, %v757_v41  ;;  %v1663_v32 = vpack.c.bf16 %v2361_v29, %v2353_v20  ;;  %v838_v40 = vmul.f32 %v2257_v10, %v2257_v10 }
 0x12e   :  { %v589_v51 = vpop.f32.mrb[29].mxu0  ;;  %v832_v18 = vmul.f32 %v1838_v47, %v1838_v47  ;;  %1747 = vst [vmem:[%s2510_s3 + $0xd8] sm:$0xff] %v1668_v12   ;;  %v846_v12 = vmul.f32 %v2305_v26, %v2305_v26 }
 0x12f   :  { %v759_v57 = vadd.f32 %v758_v48, %v589_v51  ;;  %v830_v59 = vmul.f32 %v589_v51, %v589_v51  ;;  %v892_v62 = vadd.f32 %v891_v46, %v829_v45  ;;  %v1839_v63 = vpop.f32.mrb[30].mxu0  ;;  %1746 = vst [vmem:[%s2510_s3 + $0xd0] sm:$0xff] %v1663_v32  }
 0x130   :  { %v1608_v1 = vpack.c.bf16 %v1839_v63, %v1838_v47  ;;  %v592_v4 = vpop.f32.mrb[31].mxu0  ;;  %v833_v22 = vmul.f32 %v1839_v63, %v1839_v63  ;;  %v2378_v16 = vpop.f32.mrb[24].mxu1 }
 0x131   :  { %v893_v9 = vadd.f32 %v892_v62, %v830_v59  ;;  %v760_v11 = vadd.f32 %v759_v57, %v592_v4  ;;  %v831_v13 = vmul.f32 %v592_v4, %v592_v4  ;;  %v1603_v17 = vpack.c.bf16 %v592_v4, %v589_v51  ;;  %v2380_v37 = vpop.f32.mrb[25].mxu1 }
 0x132   :  { %1735 = vst [vmem:[%s2510_s3 + $0x78] sm:$0xff] %v1608_v1   ;;  %v2387_v41 = vpop.f32.mrb[26].mxu1  ;;  %v839_v51 = vmul.f32 %v2263_v36, %v2263_v36  ;;  %v842_v4 = vmul.f32 %v2281_v55, %v2281_v55 }
 0x133   :  { %v761_v3 = vadd.f32 %v1838_v47, %v760_v11  ;;  %v894_v58 = vadd.f32 %v893_v9, %v831_v13  ;;  %1734 = vst [vmem:[%s2510_s3 + $0x70] sm:$0xff] %v1603_v17   ;;  %v1678_v42 = vpack.c.bf16 %v2387_v41, %v2378_v16 }
 0x135   :  { %v895_v23 = vadd.f32 %v894_v58, %v832_v18  ;;  %v762_v60 = vadd.f32 %v1839_v63, %v761_v3  ;;  %1749 = vst [vmem:[%s2510_s3 + $0xe8] sm:$0xff] %v1678_v42   ;;  %v841_v63 = vmul.f32 %v2259_v2, %v2259_v2  ;;  %v843_v3 = vmul.f32 %v2287_v0, %v2287_v0 }
 0x137   :  { %v763_v5 = vadd.f32 %v762_v60, %v2233_v15  ;;  %v896_v31 = vadd.f32 %v895_v23, %v833_v22  ;;  %v836_v15 = vmul.f32 %v2231_v14, %v2231_v14  ;;  %v845_v23 = vmul.f32 %v2283_v61, %v2283_v61 }
 0x139   :  { %v897_v34 = vadd.f32 %v896_v31, %v834_v27  ;;  %v764_v50 = vadd.f32 %v763_v5, %v2239_v21 }
 0x13b   :  { %v765_v53 = vadd.f32 %v2231_v14, %v764_v50  ;;  %v898_v6 = vadd.f32 %v897_v34, %v835_v35  ;;  %v2391_v14 = vpop.f32.mrb[27].mxu1  ;;  %v847_v34 = vmul.f32 %v2311_v30, %v2311_v30 }
 0x13c   :  { %v1673_v47 = vpack.c.bf16 %v2391_v14, %v2380_v37  ;;  %v2408_v59 = vpop.f32.mrb[28].mxu1 }
 0x13d   :  { %v899_v39 = vadd.f32 %v898_v6, %v836_v15  ;;  %v766_v21 = vadd.f32 %v2235_v7, %v765_v53  ;;  %v2410_v62 = vpop.f32.mrb[29].mxu1 }
 0x13e   :  { %1748 = vst [vmem:[%s2510_s3 + $0xe0] sm:$0xff] %v1673_v47   ;;  %v2417_v8 = vpop.f32.mrb[30].mxu1 }
 0x13f   :  { %v767_v45 = vadd.f32 %v766_v21, %v2257_v10  ;;  %v900_v46 = vadd.f32 %v899_v39, %v837_v38  ;;  %v840_v10 = vmul.f32 %v2255_v33, %v2255_v33  ;;  %v1688_v9 = vpack.c.bf16 %v2417_v8, %v2408_v59 }
 0x140   :  { %v851_v21 = vmul.f32 %v2335_v25, %v2335_v25 }
 0x141   :  { %v901_v7 = vadd.f32 %v900_v46, %v838_v40  ;;  %v768_v48 = vadd.f32 %v767_v45, %v2263_v36  ;;  %1751 = vst [vmem:[%s2510_s3 + $0xf8] sm:$0xff] %v1688_v9   ;;  %v859_v9 = vmul.f32 %v2391_v14, %v2391_v14 }
 0x143   :  { %v769_v56 = vadd.f32 %v2255_v33, %v768_v48  ;;  %v902_v57 = vadd.f32 %v901_v7, %v839_v51  ;;  %v2421_v33 = vpop.f32.mrb[31].mxu1  ;;  %v855_v51 = vmul.f32 %v2361_v29, %v2361_v29 }
 0x144   :  { %v1683_v17 = vpack.c.bf16 %v2421_v33, %v2410_v62 }
 0x145   :  { %v903_v1 = vadd.f32 %v902_v57, %v840_v10  ;;  %v770_v36 = vadd.f32 %v2259_v2, %v769_v56 }
 0x146   :  { %1750 = vst [vmem:[%s2510_s3 + $0xf0] sm:$0xff] %v1683_v17  }
 0x147   :  { %v771_v11 = vadd.f32 %v770_v36, %v2281_v55  ;;  %v904_v13 = vadd.f32 %v903_v1, %v841_v63  ;;  %v844_v55 = vmul.f32 %v2279_v54, %v2279_v54 }
 0x149   :  { %v905_v2 = vadd.f32 %v904_v13, %v842_v4  ;;  %v772_v18 = vadd.f32 %v771_v11, %v2287_v0 }
 0x14b   :  { %v773_v58 = vadd.f32 %v2279_v54, %v772_v18  ;;  %v906_v22 = vadd.f32 %v905_v2, %v843_v3  ;;  %v848_v54 = vmul.f32 %v2303_v24, %v2303_v24 }
 0x14d   :  { %v907_v60 = vadd.f32 %v906_v22, %v844_v55  ;;  %v774_v27 = vadd.f32 %v2283_v61, %v773_v58  ;;  %v849_v61 = vmul.f32 %v2307_v28, %v2307_v28  ;;  %v863_v58 = vmul.f32 %v2421_v33, %v2421_v33 }
 0x14f   :  { %v775_v0 = vadd.f32 %v774_v27, %v2305_v26  ;;  %v908_v5 = vadd.f32 %v907_v60, %v845_v23  ;;  %v850_v26 = vmul.f32 %v2329_v44, %v2329_v44 }
 0x151   :  { %v909_v31 = vadd.f32 %v908_v5, %v846_v12  ;;  %v776_v32 = vadd.f32 %v775_v0, %v2311_v30 }
 0x153   :  { %v777_v50 = vadd.f32 %v2303_v24, %v776_v32  ;;  %v910_v35 = vadd.f32 %v909_v31, %v847_v34  ;;  %v852_v24 = vmul.f32 %v2327_v43, %v2327_v43 }
 0x155   :  { %v911_v15 = vadd.f32 %v910_v35, %v848_v54  ;;  %v778_v53 = vadd.f32 %v2307_v28, %v777_v50  ;;  %v853_v28 = vmul.f32 %v2331_v49, %v2331_v49 }
 0x157   :  { %v779_v6 = vadd.f32 %v778_v53, %v2329_v44  ;;  %v912_v38 = vadd.f32 %v911_v15, %v849_v61  ;;  %v854_v44 = vmul.f32 %v2353_v20, %v2353_v20 }
 0x159   :  { %v913_v39 = vadd.f32 %v912_v38, %v850_v26  ;;  %v780_v30 = vadd.f32 %v779_v6, %v2335_v25 }
 0x15b   :  { %v781_v40 = vadd.f32 %v2327_v43, %v780_v30  ;;  %v914_v42 = vadd.f32 %v913_v39, %v851_v21  ;;  %v856_v43 = vmul.f32 %v2351_v19, %v2351_v19 }
 0x15d   :  { %v915_v45 = vadd.f32 %v914_v42, %v852_v24  ;;  %v782_v46 = vadd.f32 %v2331_v49, %v781_v40  ;;  %v857_v49 = vmul.f32 %v2357_v52, %v2357_v52 }
 0x15f   :  { %v783_v47 = vadd.f32 %v782_v46, %v2353_v20  ;;  %v916_v7 = vadd.f32 %v915_v45, %v853_v28  ;;  %v858_v20 = vmul.f32 %v2380_v37, %v2380_v37 }
 0x161   :  { %v917_v48 = vadd.f32 %v916_v7, %v854_v44  ;;  %v784_v25 = vadd.f32 %v783_v47, %v2361_v29 }
 0x163   :  { %v785_v10 = vadd.f32 %v2351_v19, %v784_v25  ;;  %v918_v56 = vadd.f32 %v917_v48, %v855_v51  ;;  %v860_v19 = vmul.f32 %v2378_v16, %v2378_v16 }
 0x165   :  { %v919_v57 = vadd.f32 %v918_v56, %v856_v43  ;;  %v786_v63 = vadd.f32 %v2357_v52, %v785_v10  ;;  %v861_v52 = vmul.f32 %v2387_v41, %v2387_v41 }
 0x167   :  { %v787_v1 = vadd.f32 %v786_v63, %v2380_v37  ;;  %v920_v36 = vadd.f32 %v919_v57, %v857_v49  ;;  %v862_v37 = vmul.f32 %v2410_v62, %v2410_v62 }
 0x169   :  { %v921_v4 = vadd.f32 %v920_v36, %v858_v20  ;;  %v788_v29 = vadd.f32 %v787_v1, %v2391_v14 }
 0x16b   :  { %v789_v11 = vadd.f32 %v2378_v16, %v788_v29  ;;  %v922_v13 = vadd.f32 %v921_v4, %v859_v9  ;;  %v864_v16 = vmul.f32 %v2408_v59, %v2408_v59 }
 0x16d   :  { %v923_v17 = vadd.f32 %v922_v13, %v860_v19  ;;  %v790_v2 = vadd.f32 %v2387_v41, %v789_v11  ;;  %v865_v41 = vmul.f32 %v2417_v8, %v2417_v8 }
 0x16f   :  { %v791_v18 = vadd.f32 %v790_v2, %v2410_v62  ;;  %v924_v3 = vadd.f32 %v923_v17, %v861_v52 }
 0x171   :  { %v925_v55 = vadd.f32 %v924_v3, %v862_v37  ;;  %v792_v14 = vadd.f32 %v791_v18, %v2421_v33 }
 0x173   :  { %v793_v22 = vadd.f32 %v2408_v59, %v792_v14  ;;  %v926_v23 = vadd.f32 %v925_v55, %v863_v58 }
 0x175   :  { %v794_v60 = vadd.f32 %v2417_v8, %v793_v22  ;;  %v927_v27 = vadd.f32 %v926_v23, %v864_v16 }
 0x177   :  { %v795_v62 = vrot.slane %v794_v60, 4  ;;  %v928_v12 = vadd.f32 %v927_v27, %v865_v41 }
 0x179   :  { %v796_v0 = vadd.f32 %v795_v62, %v794_v60  ;;  %v929_v5 = vrot.slane %v928_v12, 4 }
 0x17b   :  { %v797_v31 = vrot.slane %v796_v0, 2  ;;  %v930_v32 = vadd.f32 %v929_v5, %v928_v12 }
 0x17d   :  { %v798_v34 = vadd.f32 %v797_v31, %v796_v0  ;;  %v931_v33 = vrot.slane %v930_v32, 2 }
 0x17f   :  { %v799_v54 = vrot.slane %v798_v34, 1  ;;  %v932_v50 = vadd.f32 %v931_v33, %v930_v32 }
 0x181   :  { %v800_v35 = vadd.f32 %v799_v54, %v798_v34  ;;  %v933_v61 = vrot.slane %v932_v50, 1 }
 0x183   :  { %801 = vst [vmem:[%s2511_s4] sm:$0x1] %v800_v35  ;;  %v934_v59 = vadd.f32 %v933_v61, %v932_v50 }
 0x185   :  { %935 = vst [vmem:[%s2511_s4 + $0x1] sm:$0x1] %v934_v59 }

// kernel: _bottleneck_forward.7
= control target key start
LH: loop header
LB: loop body
LE: loop exit
PB: predicated region body
PF: predicated region fallthrough
CT: control target
= control target key end

     0   :  { %s1466_s0 = inlined_call_operand.vmem [shape: bf16[512,128], index: 0, kind: input, shape index: {}]   ;;  %s1467_s1 = inlined_call_operand.vmem [shape: f32[2,128], index: 1, kind: input, shape index: {}]   ;;  %s1468_s2 = inlined_call_operand.vmem [shape: bf16[512,128], index: 2, kind: input, shape index: {}]   ;;  %s1469_s3 = inlined_call_operand.vmem [shape: f32[512,128], index: 3, kind: output, shape index: {}]  }
   0x1   :  { %v607_v0 = vld [vmem:[%s1466_s0] sm:$0xff]   ;;  %v862_v5 = vld [vmem:[%s1466_s0 + $0x8] sm:$0xff]   ;;  %v863_v12 = vld [vmem:[%s1466_s0 + $0x10] sm:$0xff]  }
   0x2   :  { %v950_v1 = vld [vmem:[%s1467_s1] ss:$0 sm:$0xff]  ;;  %v608_v2 = vunpack.c.l.bf16 %v607_v0  ;;  %v609_v4 = vunpack.c.h.bf16 %v607_v0  ;;  %v893_v6 = vld [vmem:[%s1468_s2 + $0x8] sm:$0xff]   ;;  %v964_v7 = vld [vmem:[%s1467_s1 + $0x1] ss:$0 sm:$0xff]  ;;  %v612_v10 = vunpack.c.l.bf16 %v862_v5  ;;  %v613_v16 = vunpack.c.h.bf16 %v862_v5 }
   0x3   :  { %v735_v3 = vld [vmem:[%s1468_s2] sm:$0xff]   ;;  %v740_v11 = vunpack.c.l.bf16 %v893_v6  ;;  %v894_v13 = vld [vmem:[%s1468_s2 + $0x10] sm:$0xff]   ;;  %v741_v17 = vunpack.c.h.bf16 %v893_v6  ;;  %v864_v18 = vld [vmem:[%s1466_s0 + $0x18] sm:$0xff]   ;;  %v616_v20 = vunpack.c.l.bf16 %v863_v12  ;;  %v617_v22 = vunpack.c.h.bf16 %v863_v12 }
   0x4   :  { %v736_v8 = vunpack.c.l.bf16 %v735_v3  ;;  %v737_v9 = vunpack.c.h.bf16 %v735_v3  ;;  %v147_v14 = vmul.f32 %v608_v2, %v950_v1  ;;  %v148_v15 = vmul.f32 %v609_v4, %v950_v1  ;;  %v895_v23 = vld [vmem:[%s1468_s2 + $0x18] sm:$0xff]   ;;  %v865_v40 = vld [vmem:[%s1466_s0 + $0x20] sm:$0xff]   ;;  %v866_v54 = vld [vmem:[%s1466_s0 + $0x28] sm:$0xff]  }
   0x5   :  { %v149_v19 = vmul.f32 %v612_v10, %v950_v1  ;;  %v744_v21 = vunpack.c.l.bf16 %v894_v13  ;;  %v150_v26 = vmul.f32 %v613_v16, %v950_v1  ;;  %v745_v27 = vunpack.c.h.bf16 %v894_v13  ;;  %v896_v45 = vld [vmem:[%s1468_s2 + $0x20] sm:$0xff]   ;;  %v897_v55 = vld [vmem:[%s1468_s2 + $0x28] sm:$0xff]   ;;  %v867_v0 = vld [vmem:[%s1466_s0 + $0x30] sm:$0xff]  }
   0x6   :  { %v216_v24 = vadd.f32 %v964_v7, %v147_v14  ;;  %v217_v25 = vadd.f32 %v964_v7, %v148_v15  ;;  %v151_v29 = vmul.f32 %v616_v20, %v950_v1  ;;  %v152_v30 = vmul.f32 %v617_v22, %v950_v1  ;;  %v898_v2 = vld [vmem:[%s1468_s2 + $0x30] sm:$0xff]   ;;  %v868_v16 = vld [vmem:[%s1466_s0 + $0x38] sm:$0xff]  }
   0x7   :  { %v218_v28 = vadd.f32 %v964_v7, %v149_v19  ;;  %v620_v31 = vunpack.c.l.bf16 %v864_v18  ;;  %v219_v34 = vadd.f32 %v964_v7, %v150_v26  ;;  %v748_v35 = vunpack.c.l.bf16 %v895_v23 }
   0x8   :  { %v408_v32 = vadd.f32 %v736_v8, %v216_v24  ;;  %v409_v33 = vadd.f32 %v737_v9, %v217_v25  ;;  %v220_v37 = vadd.f32 %v964_v7, %v151_v29  ;;  %v221_v38 = vadd.f32 %v964_v7, %v152_v30 }
   0x9   :  { %v410_v36 = vadd.f32 %v740_v11, %v218_v28  ;;  %v153_v39 = vmul.f32 %v620_v31, %v950_v1  ;;  %v411_v43 = vadd.f32 %v741_v17, %v219_v34  ;;  %v621_v44 = vunpack.c.h.bf16 %v864_v18  ;;  %v869_v34 = vld [vmem:[%s1466_s0 + $0x40] sm:$0xff]  }
   0xa   :  { %v472_v41 = vmax.f32 %v408_v32, 0.0  ;;  %v473_v42 = vmax.f32 %v409_v33, 0.0  ;;  %v412_v47 = vadd.f32 %v744_v21, %v220_v37  ;;  %v413_v48 = vadd.f32 %v745_v27, %v221_v38  ;;  %v899_v21 = vld [vmem:[%s1468_s2 + $0x38] sm:$0xff]  }
   0xb   :  { %v474_v46 = vmax.f32 %v410_v36, 0.0  ;;  %v222_v49 = vadd.f32 %v964_v7, %v153_v39  ;;  %v475_v50 = vmax.f32 %v411_v43, 0.0  ;;  %v154_v51 = vmul.f32 %v621_v44, %v950_v1  ;;  %v900_v39 = vld [vmem:[%s1468_s2 + $0x40] sm:$0xff]  }
   0xc   :  { %536 = vst [vmem:[%s1469_s3] sm:$0xff] %v472_v41  ;;  %537 = vst [vmem:[%s1469_s3 + $0x8] sm:$0xff] %v473_v42  ;;  %v749_v52 = vunpack.c.h.bf16 %v895_v23  ;;  %v624_v53 = vunpack.c.l.bf16 %v865_v40  ;;  %v476_v56 = vmax.f32 %v412_v47, 0.0  ;;  %v477_v57 = vmax.f32 %v413_v48, 0.0  ;;  %v870_v48 = vld [vmem:[%s1466_s0 + $0x48] sm:$0xff]  }
   0xd   :  { %538 = vst [vmem:[%s1469_s3 + $0x10] sm:$0xff] %v474_v46  ;;  %v414_v58 = vadd.f32 %v748_v35, %v222_v49  ;;  %v752_v59 = vunpack.c.l.bf16 %v896_v45  ;;  %539 = vst [vmem:[%s1469_s3 + $0x18] sm:$0xff] %v475_v50  ;;  %v223_v60 = vadd.f32 %v964_v7, %v154_v51  ;;  %v625_v62 = vunpack.c.h.bf16 %v865_v40  ;;  %v901_v49 = vld [vmem:[%s1468_s2 + $0x48] sm:$0xff]  }
   0xe   :  { %v155_v61 = vmul.f32 %v624_v53, %v950_v1  ;;  %v753_v63 = vunpack.c.h.bf16 %v896_v45  ;;  %540 = vst [vmem:[%s1469_s3 + $0x20] sm:$0xff] %v476_v56  ;;  %541 = vst [vmem:[%s1469_s3 + $0x28] sm:$0xff] %v477_v57  ;;  %v628_v4 = vunpack.c.l.bf16 %v866_v54  ;;  %v756_v5 = vunpack.c.l.bf16 %v897_v55 }
   0xf   :  { %v478_v3 = vmax.f32 %v414_v58, 0.0  ;;  %v629_v6 = vunpack.c.h.bf16 %v866_v54  ;;  %v415_v8 = vadd.f32 %v749_v52, %v223_v60  ;;  %v156_v10 = vmul.f32 %v625_v62, %v950_v1  ;;  %v871_v58 = vld [vmem:[%s1466_s0 + $0x50] sm:$0xff]  }
  0x10   :  { %v224_v9 = vadd.f32 %v964_v7, %v155_v61  ;;  %v757_v11 = vunpack.c.h.bf16 %v897_v55  ;;  %v157_v12 = vmul.f32 %v628_v4, %v950_v1  ;;  %v632_v14 = vunpack.c.l.bf16 %v867_v0 }
  0x11   :  { %542 = vst [vmem:[%s1469_s3 + $0x30] sm:$0xff] %v478_v3  ;;  %v158_v13 = vmul.f32 %v629_v6, %v950_v1  ;;  %v760_v15 = vunpack.c.l.bf16 %v898_v2  ;;  %v479_v17 = vmax.f32 %v415_v8, 0.0  ;;  %v225_v19 = vadd.f32 %v964_v7, %v156_v10  ;;  %v872_v10 = vld [vmem:[%s1466_s0 + $0x58] sm:$0xff]  }
  0x12   :  { %v416_v18 = vadd.f32 %v752_v59, %v224_v9  ;;  %v633_v20 = vunpack.c.h.bf16 %v867_v0  ;;  %v226_v22 = vadd.f32 %v964_v7, %v157_v12  ;;  %v159_v24 = vmul.f32 %v632_v14, %v950_v1 }
  0x13   :  { %v227_v23 = vadd.f32 %v964_v7, %v158_v13  ;;  %v761_v25 = vunpack.c.h.bf16 %v898_v2  ;;  %543 = vst [vmem:[%s1469_s3 + $0x38] sm:$0xff] %v479_v17  ;;  %v417_v27 = vadd.f32 %v753_v63, %v225_v19  ;;  %v636_v29 = vunpack.c.l.bf16 %v868_v16  ;;  %v902_v63 = vld [vmem:[%s1468_s2 + $0x50] sm:$0xff]   ;;  %v903_v19 = vld [vmem:[%s1468_s2 + $0x58] sm:$0xff]  }
  0x14   :  { %v480_v26 = vmax.f32 %v416_v18, 0.0  ;;  %v160_v28 = vmul.f32 %v633_v20, %v950_v1  ;;  %v418_v30 = vadd.f32 %v756_v5, %v226_v22  ;;  %v228_v32 = vadd.f32 %v964_v7, %v159_v24 }
  0x15   :  { %v419_v31 = vadd.f32 %v757_v11, %v227_v23  ;;  %v764_v33 = vunpack.c.l.bf16 %v899_v21  ;;  %v481_v35 = vmax.f32 %v417_v27, 0.0  ;;  %v161_v37 = vmul.f32 %v636_v29, %v950_v1 }
  0x16   :  { %544 = vst [vmem:[%s1469_s3 + $0x40] sm:$0xff] %v480_v26  ;;  %v229_v36 = vadd.f32 %v964_v7, %v160_v28  ;;  %v637_v38 = vunpack.c.h.bf16 %v868_v16  ;;  %v482_v40 = vmax.f32 %v418_v30, 0.0  ;;  %v420_v42 = vadd.f32 %v760_v15, %v228_v32  ;;  %v873_v28 = vld [vmem:[%s1466_s0 + $0x60] sm:$0xff]  }
  0x17   :  { %v483_v41 = vmax.f32 %v419_v31, 0.0  ;;  %v765_v43 = vunpack.c.h.bf16 %v899_v21  ;;  %545 = vst [vmem:[%s1469_s3 + $0x48] sm:$0xff] %v481_v35  ;;  %v230_v45 = vadd.f32 %v964_v7, %v161_v37  ;;  %v640_v47 = vunpack.c.l.bf16 %v869_v34 }
  0x18   :  { %v421_v44 = vadd.f32 %v761_v25, %v229_v36  ;;  %v162_v46 = vmul.f32 %v637_v38, %v950_v1  ;;  %546 = vst [vmem:[%s1469_s3 + $0x50] sm:$0xff] %v482_v40  ;;  %v484_v50 = vmax.f32 %v420_v42, 0.0  ;;  %v768_v51 = vunpack.c.l.bf16 %v900_v39  ;;  %v874_v42 = vld [vmem:[%s1466_s0 + $0x68] sm:$0xff]  }
  0x19   :  { %547 = vst [vmem:[%s1469_s3 + $0x58] sm:$0xff] %v483_v41  ;;  %v641_v52 = vunpack.c.h.bf16 %v869_v34  ;;  %v769_v53 = vunpack.c.h.bf16 %v900_v39  ;;  %v422_v55 = vadd.f32 %v764_v33, %v230_v45  ;;  %v163_v57 = vmul.f32 %v640_v47, %v950_v1  ;;  %v904_v33 = vld [vmem:[%s1468_s2 + $0x60] sm:$0xff]  }
  0x1a   :  { %v485_v54 = vmax.f32 %v421_v44, 0.0  ;;  %v231_v56 = vadd.f32 %v964_v7, %v162_v46  ;;  %548 = vst [vmem:[%s1469_s3 + $0x60] sm:$0xff] %v484_v50  ;;  %v644_v60 = vunpack.c.l.bf16 %v870_v48  ;;  %v772_v61 = vunpack.c.l.bf16 %v901_v49 }
  0x1b   :  { %v164_v59 = vmul.f32 %v641_v52, %v950_v1  ;;  %v645_v62 = vunpack.c.h.bf16 %v870_v48  ;;  %v486_v0 = vmax.f32 %v422_v55, 0.0  ;;  %v232_v3 = vadd.f32 %v964_v7, %v163_v57  ;;  %v875_v52 = vld [vmem:[%s1466_s0 + $0x70] sm:$0xff]  }
  0x1c   :  { %549 = vst [vmem:[%s1469_s3 + $0x68] sm:$0xff] %v485_v54  ;;  %v423_v2 = vadd.f32 %v765_v43, %v231_v56  ;;  %v773_v4 = vunpack.c.h.bf16 %v901_v49  ;;  %v165_v6 = vmul.f32 %v644_v60, %v950_v1  ;;  %v648_v9 = vunpack.c.l.bf16 %v871_v58  ;;  %v905_v43 = vld [vmem:[%s1468_s2 + $0x68] sm:$0xff]   ;;  %v906_v57 = vld [vmem:[%s1468_s2 + $0x70] sm:$0xff]  }
  0x1d   :  { %v233_v5 = vadd.f32 %v964_v7, %v164_v59  ;;  %v166_v8 = vmul.f32 %v645_v62, %v950_v1  ;;  %550 = vst [vmem:[%s1469_s3 + $0x70] sm:$0xff] %v486_v0  ;;  %v424_v12 = vadd.f32 %v768_v51, %v232_v3  ;;  %v776_v13 = vunpack.c.l.bf16 %v902_v63  ;;  %v876_v3 = vld [vmem:[%s1466_s0 + $0x78] sm:$0xff]  }
  0x1e   :  { %v487_v11 = vmax.f32 %v423_v2, 0.0  ;;  %v649_v14 = vunpack.c.h.bf16 %v871_v58  ;;  %v234_v16 = vadd.f32 %v964_v7, %v165_v6  ;;  %v167_v18 = vmul.f32 %v648_v9, %v950_v1 }
  0x1f   :  { %v425_v15 = vadd.f32 %v769_v53, %v233_v5  ;;  %v235_v17 = vadd.f32 %v964_v7, %v166_v8  ;;  %v488_v20 = vmax.f32 %v424_v12, 0.0  ;;  %v777_v22 = vunpack.c.h.bf16 %v902_v63 }
  0x20   :  { %551 = vst [vmem:[%s1469_s3 + $0x78] sm:$0xff] %v487_v11  ;;  %v168_v21 = vmul.f32 %v649_v14, %v950_v1  ;;  %v652_v23 = vunpack.c.l.bf16 %v872_v10  ;;  %v426_v25 = vadd.f32 %v772_v61, %v234_v16  ;;  %v236_v27 = vadd.f32 %v964_v7, %v167_v18 }
  0x21   :  { %v489_v24 = vmax.f32 %v425_v15, 0.0  ;;  %v427_v26 = vadd.f32 %v773_v4, %v235_v17  ;;  %552 = vst [vmem:[%s1469_s3 + $0x80] sm:$0xff] %v488_v20  ;;  %v780_v31 = vunpack.c.l.bf16 %v903_v19  ;;  %v653_v32 = vunpack.c.h.bf16 %v872_v10 }
  0x22   :  { %v237_v29 = vadd.f32 %v964_v7, %v168_v21  ;;  %v169_v30 = vmul.f32 %v652_v23, %v950_v1  ;;  %v490_v34 = vmax.f32 %v426_v25, 0.0  ;;  %v428_v36 = vadd.f32 %v776_v13, %v236_v27  ;;  %v907_v13 = vld [vmem:[%s1468_s2 + $0x78] sm:$0xff]   ;;  %v908_v27 = vld [vmem:[%s1468_s2 + $0x80] sm:$0xff]  }
  0x23   :  { %553 = vst [vmem:[%s1469_s3 + $0x88] sm:$0xff] %v489_v24  ;;  %v491_v35 = vmax.f32 %v427_v26, 0.0  ;;  %v781_v37 = vunpack.c.h.bf16 %v903_v19  ;;  %v170_v40 = vmul.f32 %v653_v32, %v950_v1  ;;  %v656_v41 = vunpack.c.l.bf16 %v873_v28 }
  0x24   :  { %v429_v38 = vadd.f32 %v777_v22, %v237_v29  ;;  %v238_v39 = vadd.f32 %v964_v7, %v169_v30  ;;  %554 = vst [vmem:[%s1469_s3 + $0x90] sm:$0xff] %v490_v34  ;;  %v492_v44 = vmax.f32 %v428_v36, 0.0  ;;  %v784_v45 = vunpack.c.l.bf16 %v904_v33  ;;  %v877_v22 = vld [vmem:[%s1466_s0 + $0x80] sm:$0xff]   ;;  %v878_v36 = vld [vmem:[%s1466_s0 + $0x88] sm:$0xff]  }
  0x25   :  { %555 = vst [vmem:[%s1469_s3 + $0x98] sm:$0xff] %v491_v35  ;;  %v657_v46 = vunpack.c.h.bf16 %v873_v28  ;;  %v785_v47 = vunpack.c.h.bf16 %v904_v33  ;;  %v239_v50 = vadd.f32 %v964_v7, %v170_v40  ;;  %v171_v51 = vmul.f32 %v656_v41, %v950_v1 }
  0x26   :  { %v493_v48 = vmax.f32 %v429_v38, 0.0  ;;  %v430_v49 = vadd.f32 %v780_v31, %v238_v39  ;;  %556 = vst [vmem:[%s1469_s3 + $0xa0] sm:$0xff] %v492_v44  ;;  %v660_v54 = vunpack.c.l.bf16 %v874_v42  ;;  %v788_v55 = vunpack.c.l.bf16 %v905_v43 }
  0x27   :  { %v172_v53 = vmul.f32 %v657_v46, %v950_v1  ;;  %v661_v56 = vunpack.c.h.bf16 %v874_v42  ;;  %v431_v59 = vadd.f32 %v781_v37, %v239_v50  ;;  %v240_v60 = vadd.f32 %v964_v7, %v171_v51  ;;  %v909_v37 = vld [vmem:[%s1468_s2 + $0x88] sm:$0xff]   ;;  %v879_v46 = vld [vmem:[%s1466_s0 + $0x90] sm:$0xff]  }
  0x28   :  { %557 = vst [vmem:[%s1469_s3 + $0xa8] sm:$0xff] %v493_v48  ;;  %v494_v58 = vmax.f32 %v430_v49, 0.0  ;;  %v789_v61 = vunpack.c.h.bf16 %v905_v43  ;;  %v173_v63 = vmul.f32 %v660_v54, %v950_v1  ;;  %v664_v2 = vunpack.c.l.bf16 %v875_v52  ;;  %v910_v51 = vld [vmem:[%s1468_s2 + $0x90] sm:$0xff]  }
  0x29   :  { %v241_v62 = vadd.f32 %v964_v7, %v172_v53  ;;  %v174_v0 = vmul.f32 %v661_v56, %v950_v1  ;;  %v495_v4 = vmax.f32 %v431_v59, 0.0  ;;  %v432_v5 = vadd.f32 %v784_v45, %v240_v60  ;;  %v880_v60 = vld [vmem:[%s1466_s0 + $0x98] sm:$0xff]  }
  0x2a   :  { %558 = vst [vmem:[%s1469_s3 + $0xb0] sm:$0xff] %v494_v58  ;;  %v792_v6 = vunpack.c.l.bf16 %v906_v57  ;;  %v665_v8 = vunpack.c.h.bf16 %v875_v52  ;;  %v242_v10 = vadd.f32 %v964_v7, %v173_v63  ;;  %v175_v12 = vmul.f32 %v664_v2, %v950_v1 }
  0x2b   :  { %v433_v9 = vadd.f32 %v785_v47, %v241_v62  ;;  %v243_v11 = vadd.f32 %v964_v7, %v174_v0  ;;  %559 = vst [vmem:[%s1469_s3 + $0xb8] sm:$0xff] %v495_v4  ;;  %v496_v14 = vmax.f32 %v432_v5, 0.0  ;;  %v793_v16 = vunpack.c.h.bf16 %v906_v57 }
  0x2c   :  { %v176_v15 = vmul.f32 %v665_v8, %v950_v1  ;;  %v668_v17 = vunpack.c.l.bf16 %v876_v3  ;;  %v434_v19 = vadd.f32 %v788_v55, %v242_v10  ;;  %v244_v21 = vadd.f32 %v964_v7, %v175_v12 }
  0x2d   :  { %v497_v18 = vmax.f32 %v433_v9, 0.0  ;;  %v435_v20 = vadd.f32 %v789_v61, %v243_v11  ;;  %560 = vst [vmem:[%s1469_s3 + $0xc0] sm:$0xff] %v496_v14  ;;  %v796_v25 = vunpack.c.l.bf16 %v907_v13  ;;  %v669_v26 = vunpack.c.h.bf16 %v876_v3 }
  0x2e   :  { %v245_v23 = vadd.f32 %v964_v7, %v176_v15  ;;  %v177_v24 = vmul.f32 %v668_v17, %v950_v1  ;;  %v498_v28 = vmax.f32 %v434_v19, 0.0  ;;  %v436_v30 = vadd.f32 %v792_v6, %v244_v21  ;;  %v911_v6 = vld [vmem:[%s1468_s2 + $0x98] sm:$0xff]   ;;  %v912_v21 = vld [vmem:[%s1468_s2 + $0xa0] sm:$0xff]  }
  0x2f   :  { %561 = vst [vmem:[%s1469_s3 + $0xc8] sm:$0xff] %v497_v18  ;;  %v499_v29 = vmax.f32 %v435_v20, 0.0  ;;  %v797_v31 = vunpack.c.h.bf16 %v907_v13  ;;  %v178_v34 = vmul.f32 %v669_v26, %v950_v1  ;;  %v672_v35 = vunpack.c.l.bf16 %v877_v22 }
  0x30   :  { %v437_v32 = vadd.f32 %v793_v16, %v245_v23  ;;  %v246_v33 = vadd.f32 %v964_v7, %v177_v24  ;;  %562 = vst [vmem:[%s1469_s3 + $0xd0] sm:$0xff] %v498_v28  ;;  %v500_v38 = vmax.f32 %v436_v30, 0.0  ;;  %v800_v39 = vunpack.c.l.bf16 %v908_v27  ;;  %v881_v16 = vld [vmem:[%s1466_s0 + $0xa0] sm:$0xff]   ;;  %v882_v30 = vld [vmem:[%s1466_s0 + $0xa8] sm:$0xff]  }
  0x31   :  { %563 = vst [vmem:[%s1469_s3 + $0xd8] sm:$0xff] %v499_v29  ;;  %v673_v40 = vunpack.c.h.bf16 %v877_v22  ;;  %v801_v41 = vunpack.c.h.bf16 %v908_v27  ;;  %v247_v44 = vadd.f32 %v964_v7, %v178_v34  ;;  %v179_v45 = vmul.f32 %v672_v35, %v950_v1 }
  0x32   :  { %v501_v42 = vmax.f32 %v437_v32, 0.0  ;;  %v438_v43 = vadd.f32 %v796_v25, %v246_v33  ;;  %564 = vst [vmem:[%s1469_s3 + $0xe0] sm:$0xff] %v500_v38  ;;  %v676_v48 = vunpack.c.l.bf16 %v878_v36  ;;  %v804_v49 = vunpack.c.l.bf16 %v909_v37 }
  0x33   :  { %v180_v47 = vmul.f32 %v673_v40, %v950_v1  ;;  %v677_v50 = vunpack.c.h.bf16 %v878_v36  ;;  %v439_v53 = vadd.f32 %v797_v31, %v247_v44  ;;  %v248_v54 = vadd.f32 %v964_v7, %v179_v45  ;;  %v913_v31 = vld [vmem:[%s1468_s2 + $0xa8] sm:$0xff]   ;;  %v883_v40 = vld [vmem:[%s1466_s0 + $0xb0] sm:$0xff]  }
  0x34   :  { %565 = vst [vmem:[%s1469_s3 + $0xe8] sm:$0xff] %v501_v42  ;;  %v502_v52 = vmax.f32 %v438_v43, 0.0  ;;  %v805_v55 = vunpack.c.h.bf16 %v909_v37  ;;  %v181_v57 = vmul.f32 %v676_v48, %v950_v1  ;;  %v680_v59 = vunpack.c.l.bf16 %v879_v46  ;;  %v914_v45 = vld [vmem:[%s1468_s2 + $0xb0] sm:$0xff]  }
  0x35   :  { %v249_v56 = vadd.f32 %v964_v7, %v180_v47  ;;  %v182_v58 = vmul.f32 %v677_v50, %v950_v1  ;;  %v503_v61 = vmax.f32 %v439_v53, 0.0  ;;  %v440_v62 = vadd.f32 %v800_v39, %v248_v54  ;;  %v884_v54 = vld [vmem:[%s1466_s0 + $0xb8] sm:$0xff]  }
  0x36   :  { %566 = vst [vmem:[%s1469_s3 + $0xf0] sm:$0xff] %v502_v52  ;;  %v808_v63 = vunpack.c.l.bf16 %v910_v51  ;;  %v681_v0 = vunpack.c.h.bf16 %v879_v46  ;;  %v250_v3 = vadd.f32 %v964_v7, %v181_v57  ;;  %v183_v5 = vmul.f32 %v680_v59, %v950_v1 }
  0x37   :  { %v441_v2 = vadd.f32 %v801_v41, %v249_v56  ;;  %v251_v4 = vadd.f32 %v964_v7, %v182_v58  ;;  %567 = vst [vmem:[%s1469_s3 + $0xf8] sm:$0xff] %v503_v61  ;;  %v504_v8 = vmax.f32 %v440_v62, 0.0  ;;  %v809_v10 = vunpack.c.h.bf16 %v910_v51 }
  0x38   :  { %v184_v9 = vmul.f32 %v681_v0, %v950_v1  ;;  %v684_v11 = vunpack.c.l.bf16 %v880_v60  ;;  %v442_v13 = vadd.f32 %v804_v49, %v250_v3  ;;  %v252_v15 = vadd.f32 %v964_v7, %v183_v5 }
  0x39   :  { %v505_v12 = vmax.f32 %v441_v2, 0.0  ;;  %v443_v14 = vadd.f32 %v805_v55, %v251_v4  ;;  %568 = vst [vmem:[%s1469_s3 + $0x100] sm:$0xff] %v504_v8  ;;  %v812_v19 = vunpack.c.l.bf16 %v911_v6  ;;  %v685_v20 = vunpack.c.h.bf16 %v880_v60 }
  0x3a   :  { %v253_v17 = vadd.f32 %v964_v7, %v184_v9  ;;  %v185_v18 = vmul.f32 %v684_v11, %v950_v1  ;;  %v506_v22 = vmax.f32 %v442_v13, 0.0  ;;  %v444_v24 = vadd.f32 %v808_v63, %v252_v15  ;;  %v915_v63 = vld [vmem:[%s1468_s2 + $0xb8] sm:$0xff]   ;;  %v916_v15 = vld [vmem:[%s1468_s2 + $0xc0] sm:$0xff]  }
  0x3b   :  { %569 = vst [vmem:[%s1469_s3 + $0x108] sm:$0xff] %v505_v12  ;;  %v507_v23 = vmax.f32 %v443_v14, 0.0  ;;  %v813_v25 = vunpack.c.h.bf16 %v911_v6  ;;  %v186_v28 = vmul.f32 %v685_v20, %v950_v1  ;;  %v688_v29 = vunpack.c.l.bf16 %v881_v16 }
  0x3c   :  { %v445_v26 = vadd.f32 %v809_v10, %v253_v17  ;;  %v254_v27 = vadd.f32 %v964_v7, %v185_v18  ;;  %570 = vst [vmem:[%s1469_s3 + $0x110] sm:$0xff] %v506_v22  ;;  %v508_v32 = vmax.f32 %v444_v24, 0.0  ;;  %v816_v33 = vunpack.c.l.bf16 %v912_v21  ;;  %v885_v10 = vld [vmem:[%s1466_s0 + $0xc0] sm:$0xff]   ;;  %v886_v24 = vld [vmem:[%s1466_s0 + $0xc8] sm:$0xff]  }
  0x3d   :  { %571 = vst [vmem:[%s1469_s3 + $0x118] sm:$0xff] %v507_v23  ;;  %v689_v34 = vunpack.c.h.bf16 %v881_v16  ;;  %v817_v35 = vunpack.c.h.bf16 %v912_v21  ;;  %v255_v38 = vadd.f32 %v964_v7, %v186_v28  ;;  %v187_v39 = vmul.f32 %v688_v29, %v950_v1 }
  0x3e   :  { %v509_v36 = vmax.f32 %v445_v26, 0.0  ;;  %v446_v37 = vadd.f32 %v812_v19, %v254_v27  ;;  %572 = vst [vmem:[%s1469_s3 + $0x120] sm:$0xff] %v508_v32  ;;  %v692_v42 = vunpack.c.l.bf16 %v882_v30  ;;  %v820_v43 = vunpack.c.l.bf16 %v913_v31 }
  0x3f   :  { %v188_v41 = vmul.f32 %v689_v34, %v950_v1  ;;  %v693_v44 = vunpack.c.h.bf16 %v882_v30  ;;  %v447_v47 = vadd.f32 %v813_v25, %v255_v38  ;;  %v256_v48 = vadd.f32 %v964_v7, %v187_v39  ;;  %v917_v25 = vld [vmem:[%s1468_s2 + $0xc8] sm:$0xff]   ;;  %v887_v34 = vld [vmem:[%s1466_s0 + $0xd0] sm:$0xff]  }
  0x40   :  { %573 = vst [vmem:[%s1469_s3 + $0x128] sm:$0xff] %v509_v36  ;;  %v510_v46 = vmax.f32 %v446_v37, 0.0  ;;  %v821_v49 = vunpack.c.h.bf16 %v913_v31  ;;  %v189_v51 = vmul.f32 %v692_v42, %v950_v1  ;;  %v696_v53 = vunpack.c.l.bf16 %v883_v40  ;;  %v918_v39 = vld [vmem:[%s1468_s2 + $0xd0] sm:$0xff]  }
  0x41   :  { %v257_v50 = vadd.f32 %v964_v7, %v188_v41  ;;  %v190_v52 = vmul.f32 %v693_v44, %v950_v1  ;;  %v511_v55 = vmax.f32 %v447_v47, 0.0  ;;  %v448_v56 = vadd.f32 %v816_v33, %v256_v48  ;;  %v888_v48 = vld [vmem:[%s1466_s0 + $0xd8] sm:$0xff]  }
  0x42   :  { %574 = vst [vmem:[%s1469_s3 + $0x130] sm:$0xff] %v510_v46  ;;  %v824_v57 = vunpack.c.l.bf16 %v914_v45  ;;  %v697_v58 = vunpack.c.h.bf16 %v883_v40  ;;  %v258_v60 = vadd.f32 %v964_v7, %v189_v51  ;;  %v191_v62 = vmul.f32 %v696_v53, %v950_v1 }
  0x43   :  { %v449_v59 = vadd.f32 %v817_v35, %v257_v50  ;;  %v259_v61 = vadd.f32 %v964_v7, %v190_v52  ;;  %575 = vst [vmem:[%s1469_s3 + $0x138] sm:$0xff] %v511_v55  ;;  %v512_v0 = vmax.f32 %v448_v56, 0.0  ;;  %v825_v3 = vunpack.c.h.bf16 %v914_v45 }
  0x44   :  { %v192_v2 = vmul.f32 %v697_v58, %v950_v1  ;;  %v700_v4 = vunpack.c.l.bf16 %v884_v54  ;;  %v450_v6 = vadd.f32 %v820_v43, %v258_v60  ;;  %v260_v9 = vadd.f32 %v964_v7, %v191_v62 }
  0x45   :  { %v513_v5 = vmax.f32 %v449_v59, 0.0  ;;  %v451_v8 = vadd.f32 %v821_v49, %v259_v61  ;;  %576 = vst [vmem:[%s1469_s3 + $0x140] sm:$0xff] %v512_v0  ;;  %v828_v13 = vunpack.c.l.bf16 %v915_v63  ;;  %v701_v14 = vunpack.c.h.bf16 %v884_v54 }
  0x46   :  { %v261_v11 = vadd.f32 %v964_v7, %v192_v2  ;;  %v193_v12 = vmul.f32 %v700_v4, %v950_v1  ;;  %v514_v16 = vmax.f32 %v450_v6, 0.0  ;;  %v452_v18 = vadd.f32 %v824_v57, %v260_v9  ;;  %v919_v57 = vld [vmem:[%s1468_s2 + $0xd8] sm:$0xff]   ;;  %v920_v9 = vld [vmem:[%s1468_s2 + $0xe0] sm:$0xff]  }
  0x47   :  { %577 = vst [vmem:[%s1469_s3 + $0x148] sm:$0xff] %v513_v5  ;;  %v515_v17 = vmax.f32 %v451_v8, 0.0  ;;  %v829_v19 = vunpack.c.h.bf16 %v915_v63  ;;  %v194_v22 = vmul.f32 %v701_v14, %v950_v1  ;;  %v704_v23 = vunpack.c.l.bf16 %v885_v10 }
  0x48   :  { %v453_v20 = vadd.f32 %v825_v3, %v261_v11  ;;  %v262_v21 = vadd.f32 %v964_v7, %v193_v12  ;;  %578 = vst [vmem:[%s1469_s3 + $0x150] sm:$0xff] %v514_v16  ;;  %v516_v26 = vmax.f32 %v452_v18, 0.0  ;;  %v832_v27 = vunpack.c.l.bf16 %v916_v15  ;;  %v889_v3 = vld [vmem:[%s1466_s0 + $0xe0] sm:$0xff]   ;;  %v890_v18 = vld [vmem:[%s1466_s0 + $0xe8] sm:$0xff]  }
  0x49   :  { %579 = vst [vmem:[%s1469_s3 + $0x158] sm:$0xff] %v515_v17  ;;  %v705_v28 = vunpack.c.h.bf16 %v885_v10  ;;  %v833_v29 = vunpack.c.h.bf16 %v916_v15  ;;  %v263_v32 = vadd.f32 %v964_v7, %v194_v22  ;;  %v195_v33 = vmul.f32 %v704_v23, %v950_v1 }
  0x4a   :  { %v517_v30 = vmax.f32 %v453_v20, 0.0  ;;  %v454_v31 = vadd.f32 %v828_v13, %v262_v21  ;;  %580 = vst [vmem:[%s1469_s3 + $0x160] sm:$0xff] %v516_v26  ;;  %v708_v36 = vunpack.c.l.bf16 %v886_v24  ;;  %v836_v37 = vunpack.c.l.bf16 %v917_v25 }
  0x4b   :  { %v196_v35 = vmul.f32 %v705_v28, %v950_v1  ;;  %v709_v38 = vunpack.c.h.bf16 %v886_v24  ;;  %v455_v41 = vadd.f32 %v829_v19, %v263_v32  ;;  %v264_v42 = vadd.f32 %v964_v7, %v195_v33  ;;  %v921_v19 = vld [vmem:[%s1468_s2 + $0xe8] sm:$0xff]   ;;  %v891_v28 = vld [vmem:[%s1466_s0 + $0xf0] sm:$0xff]  }
  0x4c   :  { %581 = vst [vmem:[%s1469_s3 + $0x168] sm:$0xff] %v517_v30  ;;  %v518_v40 = vmax.f32 %v454_v31, 0.0  ;;  %v837_v43 = vunpack.c.h.bf16 %v917_v25  ;;  %v197_v45 = vmul.f32 %v708_v36, %v950_v1  ;;  %v712_v47 = vunpack.c.l.bf16 %v887_v34  ;;  %v922_v33 = vld [vmem:[%s1468_s2 + $0xf0] sm:$0xff]  }
  0x4d   :  { %v265_v44 = vadd.f32 %v964_v7, %v196_v35  ;;  %v198_v46 = vmul.f32 %v709_v38, %v950_v1  ;;  %v519_v49 = vmax.f32 %v455_v41, 0.0  ;;  %v456_v50 = vadd.f32 %v832_v27, %v264_v42  ;;  %v892_v42 = vld [vmem:[%s1466_s0 + $0xf8] sm:$0xff]  }
  0x4e   :  { %582 = vst [vmem:[%s1469_s3 + $0x170] sm:$0xff] %v518_v40  ;;  %v840_v51 = vunpack.c.l.bf16 %v918_v39  ;;  %v713_v52 = vunpack.c.h.bf16 %v887_v34  ;;  %v266_v54 = vadd.f32 %v964_v7, %v197_v45  ;;  %v199_v56 = vmul.f32 %v712_v47, %v950_v1 }
  0x4f   :  { %v457_v53 = vadd.f32 %v833_v29, %v265_v44  ;;  %v267_v55 = vadd.f32 %v964_v7, %v198_v46  ;;  %583 = vst [vmem:[%s1469_s3 + $0x178] sm:$0xff] %v519_v49  ;;  %v520_v58 = vmax.f32 %v456_v50, 0.0  ;;  %v841_v60 = vunpack.c.h.bf16 %v918_v39 }
  0x50   :  { %v200_v59 = vmul.f32 %v713_v52, %v950_v1  ;;  %v716_v61 = vunpack.c.l.bf16 %v888_v48  ;;  %v458_v63 = vadd.f32 %v836_v37, %v266_v54  ;;  %v268_v2 = vadd.f32 %v964_v7, %v199_v56 }
  0x51   :  { %v521_v62 = vmax.f32 %v457_v53, 0.0  ;;  %v459_v0 = vadd.f32 %v837_v43, %v267_v55  ;;  %584 = vst [vmem:[%s1469_s3 + $0x180] sm:$0xff] %v520_v58  ;;  %v844_v6 = vunpack.c.l.bf16 %v919_v57  ;;  %v717_v8 = vunpack.c.h.bf16 %v888_v48 }
  0x52   :  { %v269_v4 = vadd.f32 %v964_v7, %v200_v59  ;;  %v201_v5 = vmul.f32 %v716_v61, %v950_v1  ;;  %v522_v10 = vmax.f32 %v458_v63, 0.0  ;;  %v460_v12 = vadd.f32 %v840_v51, %v268_v2  ;;  %v923_v51 = vld [vmem:[%s1468_s2 + $0xf8] sm:$0xff]  }
  0x53   :  { %585 = vst [vmem:[%s1469_s3 + $0x188] sm:$0xff] %v521_v62  ;;  %v523_v11 = vmax.f32 %v459_v0, 0.0  ;;  %v845_v13 = vunpack.c.h.bf16 %v919_v57  ;;  %v202_v16 = vmul.f32 %v717_v8, %v950_v1  ;;  %v720_v17 = vunpack.c.l.bf16 %v889_v3 }
  0x54   :  { %v461_v14 = vadd.f32 %v841_v60, %v269_v4  ;;  %v270_v15 = vadd.f32 %v964_v7, %v201_v5  ;;  %586 = vst [vmem:[%s1469_s3 + $0x190] sm:$0xff] %v522_v10  ;;  %v524_v20 = vmax.f32 %v460_v12, 0.0  ;;  %v848_v21 = vunpack.c.l.bf16 %v920_v9 }
  0x55   :  { %587 = vst [vmem:[%s1469_s3 + $0x198] sm:$0xff] %v523_v11  ;;  %v721_v22 = vunpack.c.h.bf16 %v889_v3  ;;  %v849_v23 = vunpack.c.h.bf16 %v920_v9  ;;  %v271_v26 = vadd.f32 %v964_v7, %v202_v16  ;;  %v203_v27 = vmul.f32 %v720_v17, %v950_v1 }
  0x56   :  { %v525_v24 = vmax.f32 %v461_v14, 0.0  ;;  %v462_v25 = vadd.f32 %v844_v6, %v270_v15  ;;  %588 = vst [vmem:[%s1469_s3 + $0x1a0] sm:$0xff] %v524_v20  ;;  %v724_v30 = vunpack.c.l.bf16 %v890_v18  ;;  %v852_v31 = vunpack.c.l.bf16 %v921_v19 }
  0x57   :  { %v204_v29 = vmul.f32 %v721_v22, %v950_v1  ;;  %v725_v32 = vunpack.c.h.bf16 %v890_v18  ;;  %v463_v35 = vadd.f32 %v845_v13, %v271_v26  ;;  %v272_v36 = vadd.f32 %v964_v7, %v203_v27 }
  0x58   :  { %589 = vst [vmem:[%s1469_s3 + $0x1a8] sm:$0xff] %v525_v24  ;;  %v526_v34 = vmax.f32 %v462_v25, 0.0  ;;  %v853_v37 = vunpack.c.h.bf16 %v921_v19  ;;  %v205_v39 = vmul.f32 %v724_v30, %v950_v1  ;;  %v728_v41 = vunpack.c.l.bf16 %v891_v28 }
  0x59   :  { %v273_v38 = vadd.f32 %v964_v7, %v204_v29  ;;  %v206_v40 = vmul.f32 %v725_v32, %v950_v1  ;;  %v527_v43 = vmax.f32 %v463_v35, 0.0  ;;  %v464_v44 = vadd.f32 %v848_v21, %v272_v36 }
  0x5a   :  { %590 = vst [vmem:[%s1469_s3 + $0x1b0] sm:$0xff] %v526_v34  ;;  %v856_v45 = vunpack.c.l.bf16 %v922_v33  ;;  %v729_v46 = vunpack.c.h.bf16 %v891_v28  ;;  %v274_v48 = vadd.f32 %v964_v7, %v205_v39  ;;  %v207_v50 = vmul.f32 %v728_v41, %v950_v1 }
  0x5b   :  { %v465_v47 = vadd.f32 %v849_v23, %v273_v38  ;;  %v275_v49 = vadd.f32 %v964_v7, %v206_v40  ;;  %591 = vst [vmem:[%s1469_s3 + $0x1b8] sm:$0xff] %v527_v43  ;;  %v528_v52 = vmax.f32 %v464_v44, 0.0  ;;  %v857_v54 = vunpack.c.h.bf16 %v922_v33 }
  0x5c   :  { %v208_v53 = vmul.f32 %v729_v46, %v950_v1  ;;  %v732_v55 = vunpack.c.l.bf16 %v892_v42  ;;  %v466_v57 = vadd.f32 %v852_v31, %v274_v48  ;;  %v276_v59 = vadd.f32 %v964_v7, %v207_v50 }
  0x5d   :  { %v529_v56 = vmax.f32 %v465_v47, 0.0  ;;  %v467_v58 = vadd.f32 %v853_v37, %v275_v49  ;;  %592 = vst [vmem:[%s1469_s3 + $0x1c0] sm:$0xff] %v528_v52  ;;  %v860_v62 = vunpack.c.l.bf16 %v923_v51  ;;  %v733_v63 = vunpack.c.h.bf16 %v892_v42 }
  0x5e   :  { %v277_v60 = vadd.f32 %v964_v7, %v208_v53  ;;  %v209_v61 = vmul.f32 %v732_v55, %v950_v1  ;;  %v530_v0 = vmax.f32 %v466_v57, 0.0  ;;  %v468_v3 = vadd.f32 %v856_v45, %v276_v59 }
  0x5f   :  { %593 = vst [vmem:[%s1469_s3 + $0x1c8] sm:$0xff] %v529_v56  ;;  %v531_v2 = vmax.f32 %v467_v58, 0.0  ;;  %v210_v6 = vmul.f32 %v733_v63, %v950_v1  ;;  %v861_v8 = vunpack.c.h.bf16 %v923_v51 }
  0x60   :  { %v469_v4 = vadd.f32 %v857_v54, %v277_v60  ;;  %v278_v5 = vadd.f32 %v964_v7, %v209_v61  ;;  %594 = vst [vmem:[%s1469_s3 + $0x1d0] sm:$0xff] %v530_v0  ;;  %v532_v9 = vmax.f32 %v468_v3, 0.0 }
  0x61   :  { %595 = vst [vmem:[%s1469_s3 + $0x1d8] sm:$0xff] %v531_v2  ;;  %v279_v12 = vadd.f32 %v964_v7, %v210_v6 }
  0x62   :  { %v533_v10 = vmax.f32 %v469_v4, 0.0  ;;  %v470_v11 = vadd.f32 %v860_v62, %v278_v5  ;;  %596 = vst [vmem:[%s1469_s3 + $0x1e0] sm:$0xff] %v532_v9 }
  0x63   :  { %v471_v13 = vadd.f32 %v861_v8, %v279_v12 }
  0x64   :  { %597 = vst [vmem:[%s1469_s3 + $0x1e8] sm:$0xff] %v533_v10  ;;  %v534_v1 = vmax.f32 %v470_v11, 0.0 }
  0x65   :  { %v535_v14 = vmax.f32 %v471_v13, 0.0 }
  0x66   :  { %598 = vst [vmem:[%s1469_s3 + $0x1f0] sm:$0xff] %v534_v1 }
  0x67   :  { %599 = vst [vmem:[%s1469_s3 + $0x1f8] sm:$0xff] %v535_v14 }

// kernel: _bottleneck_forward.4
= control target key start
LH: loop header
LB: loop body
LE: loop exit
PB: predicated region body
PF: predicated region fallthrough
CT: control target
= control target key end

     0   :  { %s2124_s1 = inlined_call_operand.vmem [shape: bf16[128,128], index: 1, kind: input, shape index: {}]   ;;  %s2125_s0 = inlined_call_operand.vmem [shape: bf16[512,128], index: 0, kind: input, shape index: {}]   ;;  %s2126_s2 = inlined_call_operand.vmem [shape: bf16[512,128], index: 2, kind: output, shape index: {0}]   ;;  %s2127_s3 = inlined_call_operand.vmem [shape: f32[1,2,128], index: 3, kind: output, shape index: {1}]  }
   0x1   :  { %v1650_v0 = vld [vmem:[%s2124_s1] sm:$0xff]   ;;  %v1651_v1 = vld [vmem:[%s2124_s1 + $0x8] sm:$0xff]   ;;  %v1652_v2 = vld [vmem:[%s2124_s1 + $0x10] sm:$0xff]  }
   0x2   :  { %1554 = vmatprep.subr.bf16.mxu0 %v1650_v0  ;;  %1634 = vmatprep.subr.bf16.mxu1 %v1650_v0  ;;  %v1653_v3 = vld [vmem:[%s2124_s1 + $0x18] sm:$0xff]   ;;  %v1658_v4 = vld [vmem:[%s2125_s0] sm:$0xff]   ;;  %v1655_v6 = vld [vmem:[%s2124_s1 + $0x28] sm:$0xff]  }
   0x3   :  { %1555 = vmatpush3.bf16.msra.mxu0 %v1650_v0  ;;  %1642 = vmatpush3.bf16.msra.mxu1 %v1650_v0  ;;  %v1654_v5 = vld [vmem:[%s2124_s1 + $0x20] sm:$0xff]   ;;  %v1656_v7 = vld [vmem:[%s2124_s1 + $0x30] sm:$0xff]   ;;  %v1657_v8 = vld [vmem:[%s2124_s1 + $0x38] sm:$0xff]  }
   0x4   :  { %1556 = vmatprep.subr.bf16.mxu0 %v1651_v1  ;;  %1635 = vmatprep.subr.bf16.mxu1 %v1651_v1  ;;  %v1674_v9 = vld [vmem:[%s2125_s0 + $0x80] sm:$0xff]   ;;  %v1659_v10 = vld [vmem:[%s2125_s0 + $0x8] sm:$0xff]   ;;  %v1660_v11 = vld [vmem:[%s2125_s0 + $0x10] sm:$0xff]  }
   0x5   :  { %1570 = vmatprep.mubr.bf16.mxu0 %v1658_v4  ;;  %1602 = vmatprep.mubr.bf16.mxu1 %v1674_v9  ;;  %v1675_v12 = vld [vmem:[%s2125_s0 + $0x88] sm:$0xff]   ;;  %v1676_v13 = vld [vmem:[%s2125_s0 + $0x90] sm:$0xff]   ;;  %v1661_v14 = vld [vmem:[%s2125_s0 + $0x18] sm:$0xff]  }
   0x6   :  { %v1662_v15 = vld [vmem:[%s2125_s0 + $0x20] sm:$0xff]   ;;  %v1677_v16 = vld [vmem:[%s2125_s0 + $0x98] sm:$0xff]   ;;  %v1663_v18 = vld [vmem:[%s2125_s0 + $0x28] sm:$0xff]  }
   0x7   :  { %1557 = vmatpush3.bf16.msra.mxu0 %v1651_v1  ;;  %1643 = vmatpush3.bf16.msra.mxu1 %v1651_v1  ;;  %v1678_v17 = vld [vmem:[%s2125_s0 + $0xa0] sm:$0xff]   ;;  %v1679_v19 = vld [vmem:[%s2125_s0 + $0xa8] sm:$0xff]   ;;  %v1664_v20 = vld [vmem:[%s2125_s0 + $0x30] sm:$0xff]  }
   0x8   :  { %1558 = vmatprep.subr.bf16.mxu0 %v1652_v2  ;;  %1636 = vmatprep.subr.bf16.mxu1 %v1652_v2  ;;  %v1680_v21 = vld [vmem:[%s2125_s0 + $0xb0] sm:$0xff]   ;;  %v1665_v22 = vld [vmem:[%s2125_s0 + $0x38] sm:$0xff]   ;;  %v1666_v24 = vld [vmem:[%s2125_s0 + $0x40] sm:$0xff]  }
   0x9   :  { %v1681_v23 = vld [vmem:[%s2125_s0 + $0xb8] sm:$0xff]   ;;  %v1682_v25 = vld [vmem:[%s2125_s0 + $0xc0] sm:$0xff]   ;;  %v1667_v26 = vld [vmem:[%s2125_s0 + $0x48] sm:$0xff]  }
   0xa   :  { %v1683_v27 = vld [vmem:[%s2125_s0 + $0xc8] sm:$0xff]   ;;  %v1668_v28 = vld [vmem:[%s2125_s0 + $0x50] sm:$0xff]   ;;  %v1669_v30 = vld [vmem:[%s2125_s0 + $0x58] sm:$0xff]  }
   0xb   :  { %1559 = vmatpush3.bf16.msra.mxu0 %v1652_v2  ;;  %1644 = vmatpush3.bf16.msra.mxu1 %v1652_v2  ;;  %v1684_v29 = vld [vmem:[%s2125_s0 + $0xd0] sm:$0xff]   ;;  %v1685_v31 = vld [vmem:[%s2125_s0 + $0xd8] sm:$0xff]   ;;  %v1670_v32 = vld [vmem:[%s2125_s0 + $0x60] sm:$0xff]  }
   0xc   :  { %1560 = vmatprep.subr.bf16.mxu0 %v1653_v3  ;;  %1637 = vmatprep.subr.bf16.mxu1 %v1653_v3  ;;  %v1686_v33 = vld [vmem:[%s2125_s0 + $0xe0] sm:$0xff]   ;;  %v1671_v34 = vld [vmem:[%s2125_s0 + $0x68] sm:$0xff]   ;;  %v1672_v36 = vld [vmem:[%s2125_s0 + $0x70] sm:$0xff]  }
   0xd   :  { %v1687_v35 = vld [vmem:[%s2125_s0 + $0xe8] sm:$0xff]   ;;  %v1688_v37 = vld [vmem:[%s2125_s0 + $0xf0] sm:$0xff]   ;;  %v1673_v38 = vld [vmem:[%s2125_s0 + $0x78] sm:$0xff]  }
   0xe   :  { %v1689_v39 = vld [vmem:[%s2125_s0 + $0xf8] sm:$0xff]  }
   0xf   :  { %1561 = vmatpush3.bf16.msra.mxu0 %v1653_v3  ;;  %1645 = vmatpush3.bf16.msra.mxu1 %v1653_v3 }
  0x10   :  { %1562 = vmatprep.subr.bf16.mxu0 %v1654_v5  ;;  %1638 = vmatprep.subr.bf16.mxu1 %v1654_v5 }
  0x13   :  { %1563 = vmatpush3.bf16.msra.mxu0 %v1654_v5  ;;  %1646 = vmatpush3.bf16.msra.mxu1 %v1654_v5 }
  0x14   :  { %1564 = vmatprep.subr.bf16.mxu0 %v1655_v6  ;;  %1639 = vmatprep.subr.bf16.mxu1 %v1655_v6 }
  0x17   :  { %1565 = vmatpush3.bf16.msra.mxu0 %v1655_v6  ;;  %1647 = vmatpush3.bf16.msra.mxu1 %v1655_v6 }
  0x18   :  { %1566 = vmatprep.subr.bf16.mxu0 %v1656_v7  ;;  %1640 = vmatprep.subr.bf16.mxu1 %v1656_v7 }
  0x1b   :  { %1567 = vmatpush3.bf16.msra.mxu0 %v1656_v7  ;;  %1648 = vmatpush3.bf16.msra.mxu1 %v1656_v7 }
  0x1c   :  { %1568 = vmatprep.subr.bf16.mxu0 %v1657_v8  ;;  %1641 = vmatprep.subr.bf16.mxu1 %v1657_v8 }
  0x1f   :  { %1569 = vmatpush3.bf16.msra.mxu0 %v1657_v8  ;;  %1649 = vmatpush3.bf16.msra.mxu1 %v1657_v8 }
  0x22   :  { %1571 = vmatmul.mubr.bf16.vlgmr.msra.gmra.mrb[0].mxu0 %v1659_v10  ;;  %1603 = vmatmul.mubr.bf16.vlgmr.msra.gmra.mrb[0].mxu1 %v1675_v12 }
  0x23   :  { %1574 = vmatprep.mubr.bf16.mxu0 %v1660_v11  ;;  %1606 = vmatprep.mubr.bf16.mxu1 %v1676_v13 }
  0x2a   :  { %1575 = vmatmul.mubr.bf16.gmra.mrb[4].mxu0 %v1661_v14  ;;  %1607 = vmatmul.mubr.bf16.gmra.mrb[4].mxu1 %v1677_v16 }
  0x2b   :  { %1578 = vmatprep.mubr.bf16.mxu0 %v1662_v15  ;;  %1610 = vmatprep.mubr.bf16.mxu1 %v1678_v17 }
  0x32   :  { %1579 = vmatmul.mubr.bf16.gmra.mrb[8].mxu0 %v1663_v18  ;;  %1611 = vmatmul.mubr.bf16.gmra.mrb[8].mxu1 %v1679_v19 }
  0x33   :  { %1582 = vmatprep.mubr.bf16.mxu0 %v1664_v20  ;;  %1614 = vmatprep.mubr.bf16.mxu1 %v1680_v21 }
  0x3a   :  { %1583 = vmatmul.mubr.bf16.gmra.mrb[12].mxu0 %v1665_v22  ;;  %1615 = vmatmul.mubr.bf16.gmra.mrb[12].mxu1 %v1681_v23 }
  0x3b   :  { %1586 = vmatprep.mubr.bf16.mxu0 %v1666_v24  ;;  %1618 = vmatprep.mubr.bf16.mxu1 %v1682_v25 }
  0x42   :  { %1587 = vmatmul.mubr.bf16.gmra.mrb[16].mxu0 %v1667_v26  ;;  %1619 = vmatmul.mubr.bf16.gmra.mrb[16].mxu1 %v1683_v27 }
  0x43   :  { %1590 = vmatprep.mubr.bf16.mxu0 %v1668_v28  ;;  %1622 = vmatprep.mubr.bf16.mxu1 %v1684_v29 }
  0x4a   :  { %1591 = vmatmul.mubr.bf16.gmra.mrb[20].mxu0 %v1669_v30  ;;  %1623 = vmatmul.mubr.bf16.gmra.mrb[20].mxu1 %v1685_v31 }
  0x4b   :  { %1594 = vmatprep.mubr.bf16.mxu0 %v1670_v32  ;;  %1626 = vmatprep.mubr.bf16.mxu1 %v1686_v33 }
  0x52   :  { %1595 = vmatmul.mubr.bf16.gmra.mrb[24].mxu0 %v1671_v34  ;;  %1627 = vmatmul.mubr.bf16.gmra.mrb[24].mxu1 %v1687_v35 }
  0x53   :  { %1598 = vmatprep.mubr.bf16.mxu0 %v1672_v36  ;;  %1630 = vmatprep.mubr.bf16.mxu1 %v1688_v37 }
  0x5a   :  { %1599 = vmatmul.mubr.bf16.gmra.mrb[28].mxu0 %v1673_v38  ;;  %1631 = vmatmul.mubr.bf16.gmra.mrb[28].mxu1 %v1689_v39 }
  0xf5   :  { %v1572_v40 = vpop.f32.mrb[0].mxu0  ;;  %v1830_v41 = vpop.f32.mrb[0].mxu1 }
  0xf6   :  { %v368_v42 = vpop.f32.mrb[1].mxu0  ;;  %v1832_v43 = vpop.f32.mrb[1].mxu1  ;;  %v695_v55 = vmul.f32 %v1572_v40, %v1572_v40 }
  0xf7   :  { %v1573_v44 = vpop.f32.mrb[2].mxu0  ;;  %v1834_v45 = vpop.f32.mrb[2].mxu1  ;;  %v693_v50 = vmul.f32 %v368_v42, %v368_v42 }
  0xf8   :  { %v1331_v46 = vpack.c.bf16 %v1573_v44, %v1572_v40  ;;  %v371_v47 = vpop.f32.mrb[3].mxu0  ;;  %v1411_v48 = vpack.c.bf16 %v1834_v45, %v1830_v41  ;;  %v1838_v49 = vpop.f32.mrb[3].mxu1  ;;  %v696_v58 = vmul.f32 %v1573_v44, %v1573_v44 }
  0xf9   :  { %v623_v51 = vadd.f32 %v371_v47, %v368_v42  ;;  %v694_v52 = vmul.f32 %v371_v47, %v371_v47  ;;  %v1326_v53 = vpack.c.bf16 %v371_v47, %v368_v42  ;;  %v1406_v54 = vpack.c.bf16 %v1838_v49, %v1832_v43 }
  0xfa   :  { %1483 = vst [vmem:[%s2126_s2 + $0x8] sm:$0xff] %v1331_v46   ;;  %1499 = vst [vmem:[%s2126_s2 + $0x88] sm:$0xff] %v1411_v48  }
  0xfb   :  { %v624_v56 = vadd.f32 %v1572_v40, %v623_v51  ;;  %v757_v57 = vadd.f32 %v694_v52, %v693_v50  ;;  %1327 = vst [vmem:[%s2126_s2] sm:$0xff] %v1326_v53   ;;  %1498 = vst [vmem:[%s2126_s2 + $0x80] sm:$0xff] %v1406_v54  }
  0xfd   :  { %v758_v59 = vadd.f32 %v757_v57, %v695_v55  ;;  %v1576_v60 = vpop.f32.mrb[4].mxu0  ;;  %v625_v61 = vadd.f32 %v1573_v44, %v624_v56  ;;  %v1854_v62 = vpop.f32.mrb[4].mxu1 }
  0xfe   :  { %v384_v63 = vpop.f32.mrb[5].mxu0  ;;  %v1856_v0 = vpop.f32.mrb[5].mxu1  ;;  %v699_v15 = vmul.f32 %v1576_v60, %v1576_v60 }
  0xff   :  { %v626_v1 = vadd.f32 %v625_v61, %v384_v63  ;;  %v697_v2 = vmul.f32 %v384_v63, %v384_v63  ;;  %v759_v3 = vadd.f32 %v758_v59, %v696_v58  ;;  %v1577_v4 = vpop.f32.mrb[6].mxu0  ;;  %v1858_v5 = vpop.f32.mrb[6].mxu1 }
 0x100   :  { %v1341_v6 = vpack.c.bf16 %v1577_v4, %v1576_v60  ;;  %v387_v7 = vpop.f32.mrb[7].mxu0  ;;  %v1421_v8 = vpack.c.bf16 %v1858_v5, %v1854_v62  ;;  %v1862_v9 = vpop.f32.mrb[7].mxu1  ;;  %v700_v18 = vmul.f32 %v1577_v4, %v1577_v4 }
 0x101   :  { %v760_v10 = vadd.f32 %v759_v3, %v697_v2  ;;  %v627_v11 = vadd.f32 %v626_v1, %v387_v7  ;;  %v698_v12 = vmul.f32 %v387_v7, %v387_v7  ;;  %v1336_v13 = vpack.c.bf16 %v387_v7, %v384_v63 }
 0x102   :  { %1485 = vst [vmem:[%s2126_s2 + $0x18] sm:$0xff] %v1341_v6   ;;  %1501 = vst [vmem:[%s2126_s2 + $0x98] sm:$0xff] %v1421_v8   ;;  %v1416_v14 = vpack.c.bf16 %v1862_v9, %v1856_v0 }
 0x103   :  { %v628_v16 = vadd.f32 %v1576_v60, %v627_v11  ;;  %v761_v17 = vadd.f32 %v760_v10, %v698_v12  ;;  %1484 = vst [vmem:[%s2126_s2 + $0x10] sm:$0xff] %v1336_v13  }
 0x104   :  { %1500 = vst [vmem:[%s2126_s2 + $0x90] sm:$0xff] %v1416_v14  }
 0x105   :  { %v762_v19 = vadd.f32 %v761_v17, %v699_v15  ;;  %v1580_v20 = vpop.f32.mrb[8].mxu0  ;;  %v629_v21 = vadd.f32 %v1577_v4, %v628_v16  ;;  %v1878_v22 = vpop.f32.mrb[8].mxu1 }
 0x106   :  { %v400_v23 = vpop.f32.mrb[9].mxu0  ;;  %v1880_v24 = vpop.f32.mrb[9].mxu1  ;;  %v703_v39 = vmul.f32 %v1580_v20, %v1580_v20 }
 0x107   :  { %v630_v25 = vadd.f32 %v629_v21, %v400_v23  ;;  %v701_v26 = vmul.f32 %v400_v23, %v400_v23  ;;  %v763_v27 = vadd.f32 %v762_v19, %v700_v18  ;;  %v1581_v28 = vpop.f32.mrb[10].mxu0  ;;  %v1882_v29 = vpop.f32.mrb[10].mxu1 }
 0x108   :  { %v1351_v30 = vpack.c.bf16 %v1581_v28, %v1580_v20  ;;  %v403_v31 = vpop.f32.mrb[11].mxu0  ;;  %v1431_v32 = vpack.c.bf16 %v1882_v29, %v1878_v22  ;;  %v1886_v33 = vpop.f32.mrb[11].mxu1  ;;  %v704_v44 = vmul.f32 %v1581_v28, %v1581_v28 }
 0x109   :  { %v764_v34 = vadd.f32 %v763_v27, %v701_v26  ;;  %v631_v35 = vadd.f32 %v630_v25, %v403_v31  ;;  %v702_v36 = vmul.f32 %v403_v31, %v403_v31  ;;  %v1346_v37 = vpack.c.bf16 %v403_v31, %v400_v23 }
 0x10a   :  { %1487 = vst [vmem:[%s2126_s2 + $0x28] sm:$0xff] %v1351_v30   ;;  %1503 = vst [vmem:[%s2126_s2 + $0xa8] sm:$0xff] %v1431_v32   ;;  %v1426_v38 = vpack.c.bf16 %v1886_v33, %v1880_v24 }
 0x10b   :  { %v632_v40 = vadd.f32 %v1580_v20, %v631_v35  ;;  %v765_v42 = vadd.f32 %v764_v34, %v702_v36  ;;  %1486 = vst [vmem:[%s2126_s2 + $0x20] sm:$0xff] %v1346_v37  }
 0x10c   :  { %1502 = vst [vmem:[%s2126_s2 + $0xa0] sm:$0xff] %v1426_v38  }
 0x10d   :  { %v766_v46 = vadd.f32 %v765_v42, %v703_v39  ;;  %v1584_v47 = vpop.f32.mrb[12].mxu0  ;;  %v633_v48 = vadd.f32 %v1581_v28, %v632_v40  ;;  %v1902_v50 = vpop.f32.mrb[12].mxu1 }
 0x10e   :  { %v416_v51 = vpop.f32.mrb[13].mxu0  ;;  %v1904_v52 = vpop.f32.mrb[13].mxu1  ;;  %v707_v6 = vmul.f32 %v1584_v47, %v1584_v47 }
 0x10f   :  { %v634_v53 = vadd.f32 %v633_v48, %v416_v51  ;;  %v705_v54 = vmul.f32 %v416_v51, %v416_v51  ;;  %v767_v55 = vadd.f32 %v766_v46, %v704_v44  ;;  %v1585_v56 = vpop.f32.mrb[14].mxu0  ;;  %v1906_v57 = vpop.f32.mrb[14].mxu1 }
 0x110   :  { %v1361_v58 = vpack.c.bf16 %v1585_v56, %v1584_v47  ;;  %v419_v59 = vpop.f32.mrb[15].mxu0  ;;  %v1441_v60 = vpack.c.bf16 %v1906_v57, %v1902_v50  ;;  %v1910_v61 = vpop.f32.mrb[15].mxu1  ;;  %v708_v10 = vmul.f32 %v1585_v56, %v1585_v56 }
 0x111   :  { %v768_v63 = vadd.f32 %v767_v55, %v705_v54  ;;  %v635_v1 = vadd.f32 %v634_v53, %v419_v59  ;;  %v706_v2 = vmul.f32 %v419_v59, %v419_v59  ;;  %v1356_v3 = vpack.c.bf16 %v419_v59, %v416_v51 }
 0x112   :  { %1489 = vst [vmem:[%s2126_s2 + $0x38] sm:$0xff] %v1361_v58   ;;  %1505 = vst [vmem:[%s2126_s2 + $0xb8] sm:$0xff] %v1441_v60   ;;  %v1436_v4 = vpack.c.bf16 %v1910_v61, %v1904_v52 }
 0x113   :  { %v636_v7 = vadd.f32 %v1584_v47, %v635_v1  ;;  %v769_v8 = vadd.f32 %v768_v63, %v706_v2  ;;  %1488 = vst [vmem:[%s2126_s2 + $0x30] sm:$0xff] %v1356_v3  }
 0x114   :  { %1504 = vst [vmem:[%s2126_s2 + $0xb0] sm:$0xff] %v1436_v4  }
 0x115   :  { %v770_v11 = vadd.f32 %v769_v8, %v707_v6  ;;  %v1588_v12 = vpop.f32.mrb[16].mxu0  ;;  %v637_v13 = vadd.f32 %v1585_v56, %v636_v7  ;;  %v1926_v14 = vpop.f32.mrb[16].mxu1 }
 0x116   :  { %v432_v15 = vpop.f32.mrb[17].mxu0  ;;  %v1928_v16 = vpop.f32.mrb[17].mxu1  ;;  %v711_v35 = vmul.f32 %v1588_v12, %v1588_v12 }
 0x117   :  { %v638_v17 = vadd.f32 %v637_v13, %v432_v15  ;;  %v709_v18 = vmul.f32 %v432_v15, %v432_v15  ;;  %v771_v19 = vadd.f32 %v770_v11, %v708_v10  ;;  %v1589_v20 = vpop.f32.mrb[18].mxu0  ;;  %v1930_v21 = vpop.f32.mrb[18].mxu1 }
 0x118   :  { %v1371_v23 = vpack.c.bf16 %v1589_v20, %v1588_v12  ;;  %v435_v25 = vpop.f32.mrb[19].mxu0  ;;  %v1451_v26 = vpack.c.bf16 %v1930_v21, %v1926_v14  ;;  %v1934_v27 = vpop.f32.mrb[19].mxu1  ;;  %v712_v38 = vmul.f32 %v1589_v20, %v1589_v20 }
 0x119   :  { %v772_v28 = vadd.f32 %v771_v19, %v709_v18  ;;  %v639_v30 = vadd.f32 %v638_v17, %v435_v25  ;;  %v710_v31 = vmul.f32 %v435_v25, %v435_v25  ;;  %v1366_v32 = vpack.c.bf16 %v435_v25, %v432_v15 }
 0x11a   :  { %1491 = vst [vmem:[%s2126_s2 + $0x48] sm:$0xff] %v1371_v23   ;;  %1507 = vst [vmem:[%s2126_s2 + $0xc8] sm:$0xff] %v1451_v26   ;;  %v1446_v34 = vpack.c.bf16 %v1934_v27, %v1928_v16 }
 0x11b   :  { %v640_v36 = vadd.f32 %v1588_v12, %v639_v30  ;;  %v773_v37 = vadd.f32 %v772_v28, %v710_v31  ;;  %1490 = vst [vmem:[%s2126_s2 + $0x40] sm:$0xff] %v1366_v32  }
 0x11c   :  { %1506 = vst [vmem:[%s2126_s2 + $0xc0] sm:$0xff] %v1446_v34  }
 0x11d   :  { %v774_v39 = vadd.f32 %v773_v37, %v711_v35  ;;  %v1592_v40 = vpop.f32.mrb[20].mxu0  ;;  %v641_v42 = vadd.f32 %v1589_v20, %v640_v36  ;;  %v1950_v44 = vpop.f32.mrb[20].mxu1 }
 0x11e   :  { %v448_v46 = vpop.f32.mrb[21].mxu0  ;;  %v1952_v47 = vpop.f32.mrb[21].mxu1  ;;  %v715_v6 = vmul.f32 %v1592_v40, %v1592_v40 }
 0x11f   :  { %v642_v48 = vadd.f32 %v641_v42, %v448_v46  ;;  %v713_v51 = vmul.f32 %v448_v46, %v448_v46  ;;  %v775_v53 = vadd.f32 %v774_v39, %v712_v38  ;;  %v1593_v54 = vpop.f32.mrb[22].mxu0  ;;  %v1954_v55 = vpop.f32.mrb[22].mxu1 }
 0x120   :  { %v1381_v56 = vpack.c.bf16 %v1593_v54, %v1592_v40  ;;  %v451_v58 = vpop.f32.mrb[23].mxu0  ;;  %v1461_v59 = vpack.c.bf16 %v1954_v55, %v1950_v44  ;;  %v1958_v60 = vpop.f32.mrb[23].mxu1  ;;  %v716_v10 = vmul.f32 %v1593_v54, %v1593_v54 }
 0x121   :  { %v776_v63 = vadd.f32 %v775_v53, %v713_v51  ;;  %v643_v1 = vadd.f32 %v642_v48, %v451_v58  ;;  %v714_v2 = vmul.f32 %v451_v58, %v451_v58  ;;  %v1376_v3 = vpack.c.bf16 %v451_v58, %v448_v46 }
 0x122   :  { %1493 = vst [vmem:[%s2126_s2 + $0x58] sm:$0xff] %v1381_v56   ;;  %1509 = vst [vmem:[%s2126_s2 + $0xd8] sm:$0xff] %v1461_v59   ;;  %v1456_v4 = vpack.c.bf16 %v1958_v60, %v1952_v47 }
 0x123   :  { %v644_v7 = vadd.f32 %v1592_v40, %v643_v1  ;;  %v777_v8 = vadd.f32 %v776_v63, %v714_v2  ;;  %1492 = vst [vmem:[%s2126_s2 + $0x50] sm:$0xff] %v1376_v3  }
 0x124   :  { %1508 = vst [vmem:[%s2126_s2 + $0xd0] sm:$0xff] %v1456_v4  }
 0x125   :  { %v778_v11 = vadd.f32 %v777_v8, %v715_v6  ;;  %v1596_v12 = vpop.f32.mrb[24].mxu0  ;;  %v645_v13 = vadd.f32 %v1593_v54, %v644_v7  ;;  %v1974_v15 = vpop.f32.mrb[24].mxu1 }
 0x126   :  { %v464_v17 = vpop.f32.mrb[25].mxu0  ;;  %v1976_v18 = vpop.f32.mrb[25].mxu1  ;;  %v719_v39 = vmul.f32 %v1596_v12, %v1596_v12 }
 0x127   :  { %v646_v19 = vadd.f32 %v645_v13, %v464_v17  ;;  %v717_v20 = vmul.f32 %v464_v17, %v464_v17  ;;  %v779_v23 = vadd.f32 %v778_v11, %v716_v10  ;;  %v1597_v25 = vpop.f32.mrb[26].mxu0  ;;  %v1978_v26 = vpop.f32.mrb[26].mxu1 }
 0x128   :  { %v1391_v28 = vpack.c.bf16 %v1597_v25, %v1596_v12  ;;  %v467_v30 = vpop.f32.mrb[27].mxu0  ;;  %v1471_v31 = vpack.c.bf16 %v1978_v26, %v1974_v15  ;;  %v1982_v32 = vpop.f32.mrb[27].mxu1  ;;  %v720_v46 = vmul.f32 %v1597_v25, %v1597_v25 }
 0x129   :  { %v780_v34 = vadd.f32 %v779_v23, %v717_v20  ;;  %v647_v35 = vadd.f32 %v646_v19, %v467_v30  ;;  %v718_v36 = vmul.f32 %v467_v30, %v467_v30  ;;  %v1386_v37 = vpack.c.bf16 %v467_v30, %v464_v17 }
 0x12a   :  { %1495 = vst [vmem:[%s2126_s2 + $0x68] sm:$0xff] %v1391_v28   ;;  %1511 = vst [vmem:[%s2126_s2 + $0xe8] sm:$0xff] %v1471_v31   ;;  %v1466_v38 = vpack.c.bf16 %v1982_v32, %v1976_v18  ;;  %v725_v31 = vmul.f32 %v1832_v43, %v1832_v43 }
 0x12b   :  { %v648_v40 = vadd.f32 %v1596_v12, %v647_v35  ;;  %v781_v42 = vadd.f32 %v780_v34, %v718_v36  ;;  %1494 = vst [vmem:[%s2126_s2 + $0x60] sm:$0xff] %v1386_v37  }
 0x12c   :  { %1510 = vst [vmem:[%s2126_s2 + $0xe0] sm:$0xff] %v1466_v38   ;;  %v726_v38 = vmul.f32 %v1838_v49, %v1838_v49 }
 0x12d   :  { %v782_v48 = vadd.f32 %v781_v42, %v719_v39  ;;  %v1600_v51 = vpop.f32.mrb[28].mxu0  ;;  %v649_v53 = vadd.f32 %v1597_v25, %v648_v40  ;;  %v1998_v54 = vpop.f32.mrb[28].mxu1  ;;  %v727_v39 = vmul.f32 %v1830_v41, %v1830_v41 }
 0x12e   :  { %v480_v56 = vpop.f32.mrb[29].mxu0  ;;  %v2000_v58 = vpop.f32.mrb[29].mxu1  ;;  %v723_v19 = vmul.f32 %v1600_v51, %v1600_v51 }
 0x12f   :  { %v650_v59 = vadd.f32 %v649_v53, %v480_v56  ;;  %v721_v63 = vmul.f32 %v480_v56, %v480_v56  ;;  %v783_v1 = vadd.f32 %v782_v48, %v720_v46  ;;  %v1601_v2 = vpop.f32.mrb[30].mxu0  ;;  %v2002_v3 = vpop.f32.mrb[30].mxu1  ;;  %v728_v46 = vmul.f32 %v1834_v45, %v1834_v45 }
 0x130   :  { %v1401_v4 = vpack.c.bf16 %v1601_v2, %v1600_v51  ;;  %v483_v6 = vpop.f32.mrb[31].mxu0  ;;  %v1481_v7 = vpack.c.bf16 %v2002_v3, %v1998_v54  ;;  %v2006_v8 = vpop.f32.mrb[31].mxu1  ;;  %v724_v25 = vmul.f32 %v1601_v2, %v1601_v2 }
 0x131   :  { %v784_v10 = vadd.f32 %v783_v1, %v721_v63  ;;  %v651_v11 = vadd.f32 %v650_v59, %v483_v6  ;;  %v722_v12 = vmul.f32 %v483_v6, %v483_v6  ;;  %v1396_v13 = vpack.c.bf16 %v483_v6, %v480_v56 }
 0x132   :  { %1497 = vst [vmem:[%s2126_s2 + $0x78] sm:$0xff] %v1401_v4   ;;  %1513 = vst [vmem:[%s2126_s2 + $0xf8] sm:$0xff] %v1481_v7   ;;  %v1476_v17 = vpack.c.bf16 %v2006_v8, %v2000_v58  ;;  %v730_v63 = vmul.f32 %v1862_v9, %v1862_v9 }
 0x133   :  { %v652_v20 = vadd.f32 %v1600_v51, %v651_v11  ;;  %v785_v23 = vadd.f32 %v784_v10, %v722_v12  ;;  %1496 = vst [vmem:[%s2126_s2 + $0x70] sm:$0xff] %v1396_v13   ;;  %v734_v12 = vmul.f32 %v1886_v33, %v1886_v33 }
 0x134   :  { %1512 = vst [vmem:[%s2126_s2 + $0xf0] sm:$0xff] %v1476_v17  }
 0x135   :  { %v786_v28 = vadd.f32 %v785_v23, %v723_v19  ;;  %v653_v30 = vadd.f32 %v1601_v2, %v652_v20 }
 0x137   :  { %v654_v34 = vadd.f32 %v653_v30, %v1832_v43  ;;  %v787_v35 = vadd.f32 %v786_v28, %v724_v25  ;;  %v729_v43 = vmul.f32 %v1856_v0, %v1856_v0  ;;  %v738_v30 = vmul.f32 %v1910_v61, %v1910_v61 }
 0x139   :  { %v788_v36 = vadd.f32 %v787_v35, %v725_v31  ;;  %v655_v37 = vadd.f32 %v654_v34, %v1838_v49 }
 0x13b   :  { %v656_v40 = vadd.f32 %v1830_v41, %v655_v37  ;;  %v789_v42 = vadd.f32 %v788_v36, %v726_v38  ;;  %v731_v41 = vmul.f32 %v1854_v62, %v1854_v62 }
 0x13d   :  { %v790_v48 = vadd.f32 %v789_v42, %v727_v39  ;;  %v657_v51 = vadd.f32 %v1834_v45, %v656_v40  ;;  %v732_v45 = vmul.f32 %v1858_v5, %v1858_v5  ;;  %v742_v40 = vmul.f32 %v1934_v27, %v1934_v27 }
 0x13f   :  { %v658_v53 = vadd.f32 %v657_v51, %v1856_v0  ;;  %v791_v56 = vadd.f32 %v790_v48, %v728_v46  ;;  %v733_v0 = vmul.f32 %v1880_v24, %v1880_v24 }
 0x141   :  { %v792_v59 = vadd.f32 %v791_v56, %v729_v43  ;;  %v659_v49 = vadd.f32 %v658_v53, %v1862_v9 }
 0x143   :  { %v660_v1 = vadd.f32 %v1854_v62, %v659_v49  ;;  %v793_v2 = vadd.f32 %v792_v59, %v730_v63  ;;  %v735_v62 = vmul.f32 %v1878_v22, %v1878_v22  ;;  %v746_v59 = vmul.f32 %v1958_v60, %v1958_v60 }
 0x145   :  { %v794_v4 = vadd.f32 %v793_v2, %v731_v41  ;;  %v661_v6 = vadd.f32 %v1858_v5, %v660_v1  ;;  %v736_v5 = vmul.f32 %v1882_v29, %v1882_v29 }
 0x147   :  { %v662_v7 = vadd.f32 %v661_v6, %v1880_v24  ;;  %v795_v10 = vadd.f32 %v794_v4, %v732_v45  ;;  %v737_v24 = vmul.f32 %v1904_v52, %v1904_v52  ;;  %v750_v6 = vmul.f32 %v1982_v32, %v1982_v32 }
 0x149   :  { %v796_v11 = vadd.f32 %v795_v10, %v733_v0  ;;  %v663_v9 = vadd.f32 %v662_v7, %v1886_v33 }
 0x14b   :  { %v664_v13 = vadd.f32 %v1878_v22, %v663_v9  ;;  %v797_v17 = vadd.f32 %v796_v11, %v734_v12  ;;  %v739_v22 = vmul.f32 %v1902_v50, %v1902_v50 }
 0x14d   :  { %v798_v19 = vadd.f32 %v797_v17, %v735_v62  ;;  %v665_v20 = vadd.f32 %v1882_v29, %v664_v13  ;;  %v740_v29 = vmul.f32 %v1906_v57, %v1906_v57  ;;  %v754_v13 = vmul.f32 %v2006_v8, %v2006_v8 }
 0x14f   :  { %v666_v23 = vadd.f32 %v665_v20, %v1904_v52  ;;  %v799_v25 = vadd.f32 %v798_v19, %v736_v5  ;;  %v741_v52 = vmul.f32 %v1928_v16, %v1928_v16 }
 0x151   :  { %v800_v28 = vadd.f32 %v799_v25, %v737_v24  ;;  %v667_v33 = vadd.f32 %v666_v23, %v1910_v61 }
 0x153   :  { %v668_v31 = vadd.f32 %v1902_v50, %v667_v33  ;;  %v801_v34 = vadd.f32 %v800_v28, %v738_v30  ;;  %v743_v50 = vmul.f32 %v1926_v14, %v1926_v14 }
 0x155   :  { %v802_v35 = vadd.f32 %v801_v34, %v739_v22  ;;  %v669_v36 = vadd.f32 %v1906_v57, %v668_v31  ;;  %v744_v57 = vmul.f32 %v1930_v21, %v1930_v21 }
 0x157   :  { %v670_v37 = vadd.f32 %v669_v36, %v1928_v16  ;;  %v803_v38 = vadd.f32 %v802_v35, %v740_v29  ;;  %v745_v16 = vmul.f32 %v1952_v47, %v1952_v47 }
 0x159   :  { %v804_v39 = vadd.f32 %v803_v38, %v741_v52  ;;  %v671_v61 = vadd.f32 %v670_v37, %v1934_v27 }
 0x15b   :  { %v672_v42 = vadd.f32 %v1926_v14, %v671_v61  ;;  %v805_v46 = vadd.f32 %v804_v39, %v742_v40  ;;  %v747_v14 = vmul.f32 %v1950_v44, %v1950_v44 }
 0x15d   :  { %v806_v48 = vadd.f32 %v805_v46, %v743_v50  ;;  %v673_v51 = vadd.f32 %v1930_v21, %v672_v42  ;;  %v748_v21 = vmul.f32 %v1954_v55, %v1954_v55 }
 0x15f   :  { %v674_v43 = vadd.f32 %v673_v51, %v1952_v47  ;;  %v807_v53 = vadd.f32 %v806_v48, %v744_v57  ;;  %v749_v47 = vmul.f32 %v1976_v18, %v1976_v18 }
 0x161   :  { %v808_v56 = vadd.f32 %v807_v53, %v745_v16  ;;  %v675_v27 = vadd.f32 %v674_v43, %v1958_v60 }
 0x163   :  { %v676_v49 = vadd.f32 %v1950_v44, %v675_v27  ;;  %v809_v63 = vadd.f32 %v808_v56, %v746_v59  ;;  %v751_v44 = vmul.f32 %v1974_v15, %v1974_v15 }
 0x165   :  { %v810_v41 = vadd.f32 %v809_v63, %v747_v14  ;;  %v677_v1 = vadd.f32 %v1954_v55, %v676_v49  ;;  %v752_v55 = vmul.f32 %v1978_v26, %v1978_v26 }
 0x167   :  { %v678_v2 = vadd.f32 %v677_v1, %v1976_v18  ;;  %v811_v45 = vadd.f32 %v810_v41, %v748_v21  ;;  %v753_v18 = vmul.f32 %v2000_v58, %v2000_v58 }
 0x169   :  { %v812_v4 = vadd.f32 %v811_v45, %v749_v47  ;;  %v679_v60 = vadd.f32 %v678_v2, %v1982_v32 }
 0x16b   :  { %v680_v0 = vadd.f32 %v1974_v15, %v679_v60  ;;  %v813_v7 = vadd.f32 %v812_v4, %v750_v6  ;;  %v755_v15 = vmul.f32 %v1998_v54, %v1998_v54 }
 0x16d   :  { %v814_v10 = vadd.f32 %v813_v7, %v751_v44  ;;  %v681_v11 = vadd.f32 %v1978_v26, %v680_v0  ;;  %v756_v26 = vmul.f32 %v2002_v3, %v2002_v3 }
 0x16f   :  { %v682_v9 = vadd.f32 %v681_v11, %v2000_v58  ;;  %v815_v12 = vadd.f32 %v814_v10, %v752_v55 }
 0x171   :  { %v816_v62 = vadd.f32 %v815_v12, %v753_v18  ;;  %v683_v32 = vadd.f32 %v682_v9, %v2006_v8 }
 0x173   :  { %v684_v17 = vadd.f32 %v1998_v54, %v683_v32  ;;  %v817_v5 = vadd.f32 %v816_v62, %v754_v13 }
 0x175   :  { %v685_v19 = vadd.f32 %v2002_v3, %v684_v17  ;;  %v818_v20 = vadd.f32 %v817_v5, %v755_v15 }
 0x177   :  { %v686_v58 = vrot.slane %v685_v19, 4  ;;  %v819_v24 = vadd.f32 %v818_v20, %v756_v26 }
 0x179   :  { %v687_v23 = vadd.f32 %v686_v58, %v685_v19  ;;  %v820_v25 = vrot.slane %v819_v24, 4 }
 0x17b   :  { %v688_v28 = vrot.slane %v687_v23, 2  ;;  %v821_v33 = vadd.f32 %v820_v25, %v819_v24 }
 0x17d   :  { %v689_v30 = vadd.f32 %v688_v28, %v687_v23  ;;  %v822_v8 = vrot.slane %v821_v33, 2 }
 0x17f   :  { %v690_v22 = vrot.slane %v689_v30, 1  ;;  %v823_v31 = vadd.f32 %v822_v8, %v821_v33 }
 0x181   :  { %v691_v34 = vadd.f32 %v690_v22, %v689_v30  ;;  %v824_v29 = vrot.slane %v823_v31, 1 }
 0x183   :  { %692 = vst [vmem:[%s2127_s3] sm:$0x1] %v691_v34  ;;  %v825_v54 = vadd.f32 %v824_v29, %v823_v31 }
 0x185   :  { %826 = vst [vmem:[%s2127_s3 + $0x1] sm:$0x1] %v825_v54 }

// kernel: _bottleneck_forward.5
= control target key start
LH: loop header
LB: loop body
LE: loop exit
PB: predicated region body
PF: predicated region fallthrough
CT: control target
= control target key end

     0   :  { %s7038_s15 = smov 0   ;;  %s8856_s0 = inlined_call_operand.vmem [shape: bf16[2,16,16,128], index: 0, kind: input, shape index: {}]   ;;  %s8857_s1 = inlined_call_operand.vmem [shape: bf16[1152,128], index: 1, kind: input, shape index: {}]   ;;  %s8858_s2 = inlined_call_operand.vmem [shape: f32[2,128], index: 2, kind: input, shape index: {}]   ;;  %s8859_s3 = inlined_call_operand.vmem [shape: bf16[2,16,16,128], index: 3, kind: output, shape index: {0}]   ;;  %s8860_s4 = inlined_call_operand.vmem [shape: f32[2,2,128], index: 4, kind: output, shape index: {1}]  }
   0x1 LB: > { %s5751_s16 = sadd.s32 4294967295, %s7010_s15   ;;  %p5755_p0 = scmp.ge.s32.totalorder %s7010_s15, 1  ;;  %s7010_s15 = sphi %s7038_s15, %s15_s15  }
   0x2   : > { %p165_p1 = scmp.lt.s32.totalorder %s7010_s15, 3 }
   0x4   : > { %p166_p2 = pnand %p5755_p0, %p165_p1 }
   0x6   : > { %169 = sbr.rel (%p166_p2) target bundleno = 678 (0x2a6), region = 32 }
   0xd   : > { %v6878_v0 = vld [vmem:[%s8857_s1 + $0x40] sm:$0xff]   ;;  %v7012_v2 = vmov 0   ;;  %v6880_v3 = vld [vmem:[%s8857_s1 + $0x48] sm:$0xff]   ;;  %v6882_v5 = vld [vmem:[%s8857_s1 + $0x50] sm:$0xff]   ;;  %p195_p3 = scmp.lt.s32.totalorder %s5751_s16, 1  ;;  %vm403_vm0 = vcmask 1040384  }
   0xe   : > { %v6879_v1 = vld [vmem:[%s8857_s1] sm:$0xff]   ;;  %396 = vst [vmem:[#allocation2] sm:$0xf] %v7012_v2  ;;  %397 = vst [vmem:[#allocation2 + $0x4] sm:$0xf] %v7012_v2  ;;  %6333 = vmatprep.subr.bf16.mxu0 %v6878_v0  ;;  %6853 = vmatprep.subr.bf16.mxu1 %v6878_v0  ;;  %v6881_v4 = vld [vmem:[%s8857_s1 + $0x8] sm:$0xff]  }
   0xf   : > { %398 = vst [vmem:[#allocation2 + $0x8] sm:$0x1] %v7012_v2  ;;  %400 = vst [vmem:[#allocation2 + $0xcc] sm:$0xf] %v7012_v2  ;;  %6334 = vmatpush3.bf16.msra.mxu0 %v6879_v1  ;;  %6861 = vmatpush3.bf16.msra.mxu1 %v6879_v1  ;;  %v6883_v6 = vld [vmem:[%s8857_s1 + $0x10] sm:$0xff]   ;;  %v6884_v7 = vld [vmem:[%s8857_s1 + $0x58] sm:$0xff]  }
  0x10   : > { %401 = vst [vmem:[#allocation2 + $0xd0] sm:$0xf] %v7012_v2  ;;  %402 = vst [vmem:[#allocation2 + $0xd4] sm:$0x1] %v7012_v2  ;;  %6335 = vmatprep.subr.bf16.mxu0 %v6880_v3  ;;  %6854 = vmatprep.subr.bf16.mxu1 %v6880_v3  ;;  %s8902_s16 = smov (!%p195_p3, %s5751_s16), 1  ;;  %v6885_v8 = vld [vmem:[%s8857_s1 + $0x18] sm:$0xff]  }
  0x11   : > { %v6886_v9 = vld [vmem:[%s8857_s1 + $0x60] sm:$0xff]   ;;  %s6093_s9 = sshll.u32 %s8902_s16, 7  ;;  %v6888_v11 = vld [vmem:[%s8857_s1 + $0x68] sm:$0xff]   ;;  %vm404_vm1 = vsmask.f32 256  ;;  %v8864_v18 = vmov 0 }
  0x12   : > { %v6887_v10 = vld [vmem:[%s8857_s1 + $0x20] sm:$0xff]   ;;  %s7091_s18 = scalar_lea.vmem %s8856_s0, %s6093_s9  ;;  %vm460_vm2 = vsmask.f32 7938  ;;  %vm7095_vm3 = vmand %vm403_vm0, %vm404_vm1  ;;  %v6889_v16 = vld [vmem:[%s8857_s1 + $0x28] sm:$0xff]   ;;  %vm1225_vm5 = vsmask.f32 3328  ;;  %s8796_s26 = scalar_lea.vmem %s8859_s3, %s6093_s9 }
  0x13   : > { %6336 = vmatpush3.bf16.msra.mxu0 %v6881_v4  ;;  %6862 = vmatpush3.bf16.msra.mxu1 %v6881_v4  ;;  %vm7106_vm4 = vmand %vm403_vm0, %vm460_vm2  ;;  %v6160_v21 = vld [vmem:[%s7091_s18] sm:$0xff]   ;;  %v6890_v22 = vld [vmem:[%s8857_s1 + $0x70] sm:$0xff]   ;;  %vm919_vm6 = vcmask 1043456   ;;  %vm1226_vm7 = vsmask.f32 7440  ;;  %vm1788_vm12 = vcmask 1042432  }
  0x14   : > { %6337 = vmatprep.subr.bf16.mxu0 %v6882_v5  ;;  %6855 = vmatprep.subr.bf16.mxu1 %v6882_v5  ;;  %v8865_v18 = vsel %vm7106_vm4, 4294967295, %v8864_v18  ;;  %v7119_v24 = vld [vmem:[%s8858_s2] ss:$0 sm:$0xff]  ;;  %v6161_v25 = vunpack.c.l.bf16 %v6160_v21  ;;  %v6162_v26 = vunpack.c.h.bf16 %v6160_v21  ;;  %v7126_v29 = vld [vmem:[%s8858_s2 + $0x1] ss:$0 sm:$0xff]  ;;  %v6891_v31 = vld [vmem:[%s8857_s1 + $0x30] sm:$0xff]  }
  0x15   : > { %v406_v12 = vld [vmem:[#allocation2] sm:$0x1]  ;;  %v1178_v15 = vld [vmem:[#allocation2 + $0x4] sm:$0xf]  ;;  %8866 = vst [vmem:[#allocation4_spill] sm:$0xff] %v8865_v18  ;;  %v6313_v36 = vld [vmem:[%s7091_s18 + $0x58] sm:$0xff]  }
  0x16   : > { %v462_v14 = vld [vmem:[#allocation2 + $0x8] sm:$0x1]  ;;  %v407_v17 = vsel %vm7095_vm3, 0, %v406_v12  ;;  %v1238_v19 = vshll.u32 %v1178_v15, 16  ;;  %v1242_v20 = vshrl.u32 %v1178_v15, 16  ;;  %v280_v32 = vmul.f32 %v6161_v25, %v7119_v24  ;;  %v6892_v37 = vld [vmem:[%s8857_s1 + $0x78] sm:$0xff]   ;;  %vm7163_vm9 = vmor %vm1225_vm5, %vm1226_vm7 }
  0x17   : > { %6338 = vmatpush3.bf16.msra.mxu0 %v6883_v6  ;;  %6863 = vmatpush3.bf16.msra.mxu1 %v6883_v6  ;;  %408 = vst [vmem:[#allocation2] sm:$0x1] %v407_v17  ;;  %v463_v23 = vsel %vm7106_vm4, 0, %v462_v14  ;;  %v409_v30 = vld [vmem:[#allocation2 + $0xc] sm:$0x1]  ;;  %v281_v33 = vmul.f32 %v6162_v26, %v7119_v24  ;;  %v6205_v40 = vunpack.c.l.bf16 %v6313_v36  ;;  %v6206_v41 = vunpack.c.h.bf16 %v6313_v36  ;;  %v6893_v50 = vld [vmem:[%s8857_s1 + $0x38] sm:$0xff]   ;;  %vm7171_vm10 = vmand %vm919_vm6, %vm460_vm2 }
  0x18   : > { %6339 = vmatprep.subr.bf16.mxu0 %v6884_v7  ;;  %6856 = vmatprep.subr.bf16.mxu1 %v6884_v7  ;;  %464 = vst [vmem:[#allocation2 + $0x8] sm:$0x1] %v463_v23  ;;  %v7121_v27 = vrot.slane %v1238_v19, 5  ;;  %v1244_v28 = vrot.slane %v1242_v20, 4  ;;  %v410_v34 = vsel %vm7095_vm3, 0, %v409_v30  ;;  %v316_v44 = vadd.f32 %v7126_v29, %v280_v32  ;;  %v6895_v57 = vld [vmem:[%s8857_s1 + $0xc0] sm:$0xff]  }
  0x19   : > { %v465_v35 = vld [vmem:[#allocation2 + $0x14] sm:$0x1]  ;;  %411 = vst [vmem:[#allocation2 + $0xc] sm:$0x1] %v410_v34  ;;  %v442_v42 = vld [vmem:[#allocation2 + $0x90] sm:$0x1]  ;;  %v317_v45 = vadd.f32 %v7126_v29, %v281_v33  ;;  %v302_v48 = vmul.f32 %v6205_v40, %v7119_v24  ;;  %v303_v49 = vmul.f32 %v6206_v41, %v7119_v24 }
  0x1a   : > { %v1245_v38 = vor.u32 %v1244_v28, %v7121_v27  ;;  %v466_v39 = vsel %vm7106_vm4, 0, %v465_v35  ;;  %v498_v43 = vld [vmem:[#allocation2 + $0x98] sm:$0x1]  ;;  %v443_v46 = vsel %vm7095_vm3, 0, %v442_v42  ;;  %v348_v51 = vmax.f32 %v316_v44, 0.0  ;;  %v6896_v2 = vld [vmem:[%s8857_s1 + $0x140] sm:$0xff]  }
  0x1b   : > { %6340 = vmatpush3.bf16.msra.mxu0 %v6885_v8  ;;  %6864 = vmatpush3.bf16.msra.mxu1 %v6885_v8  ;;  %467 = vst [vmem:[#allocation2 + $0x14] sm:$0x1] %v466_v39  ;;  %v499_v47 = vsel %vm7106_vm4, 0, %v498_v43  ;;  %444 = vst [vmem:[#allocation2 + $0x90] sm:$0x1] %v443_v46  ;;  %v349_v52 = vmax.f32 %v317_v45, 0.0  ;;  %v338_v55 = vadd.f32 %v7126_v29, %v302_v48 }
  0x1c   : > { %6341 = vmatprep.subr.bf16.mxu0 %v6886_v9  ;;  %6857 = vmatprep.subr.bf16.mxu1 %v6886_v9  ;;  %500 = vst [vmem:[#allocation2 + $0x98] sm:$0x1] %v499_v47  ;;  %vm596_vm8 = vsmask.f32 4368  ;;  %v1246_v54 = vrot.slane %v1245_v38, 4  ;;  %v339_v56 = vadd.f32 %v7126_v29, %v303_v49  ;;  %v6095_v61 = vpack.c.bf16 %v348_v51, %v348_v51  ;;  %v6303_v25 = vld [vmem:[%s7091_s18 + $0x8] sm:$0xff]  }
  0x1d   : > { %v6096_v62 = vpack.c.bf16 %v349_v52, %v349_v52  ;;  %v370_v0 = vmax.f32 %v338_v55, 0.0  ;;  %vm7178_vm11 = vmor %vm404_vm1, %vm596_vm8  ;;  %v6900_v40 = vld [vmem:[%s8857_s1 + $0x100] sm:$0xff]   ;;  %v6165_v44 = vunpack.c.l.bf16 %v6303_v25  ;;  %v445_v52 = vld [vmem:[#allocation2 + $0x9c] sm:$0x1]  ;;  %v6166_v55 = vunpack.c.h.bf16 %v6303_v25  ;;  %s5760_s9 = sshll.u32 %s8902_s16, 1 }
  0x1e   : > { %v1177_v53 = vld [vmem:[#allocation2] sm:$0xf]  ;;  %v371_v1 = vmax.f32 %v339_v56, 0.0  ;;  %v599_v6 = vshrl.u32 %v6095_v61, 16  ;;  %v602_v7 = vshll.u32 %v6095_v61, 16  ;;  %vm1789_vm13 = vcmask 1046532  }
  0x1f   : > { %6342 = vmatpush3.bf16.msra.mxu0 %v6887_v10  ;;  %6865 = vmatpush3.bf16.msra.mxu1 %v6887_v10  ;;  %v1179_v58 = vld [vmem:[#allocation2 + $0x8] sm:$0x1]  ;;  %v1229_v59 = vshrl.u32 %v1177_v53, 16  ;;  %v1232_v60 = vshll.u32 %v1177_v53, 16  ;;  %v607_v9 = vshrl.u32 %v6096_v62, 16  ;;  %v610_v10 = vshll.u32 %v6096_v62, 16  ;;  %vm7413_vm14 = vmor %vm1788_vm12, %vm1789_vm13 }
  0x20   : > { %6343 = vmatprep.subr.bf16.mxu0 %v6888_v11  ;;  %6858 = vmatprep.subr.bf16.mxu1 %v6888_v11  ;;  %v1248_v63 = vshll.u32 %v1179_v58, 16  ;;  %v6117_v11 = vpack.c.bf16 %v370_v0, %v370_v0  ;;  %v601_v14 = vrot.slane %v599_v6, 7  ;;  %v921_v15 = vld [vmem:[#allocation2 + $0xc] sm:$0xf]  ;;  %v6118_v17 = vpack.c.bf16 %v371_v1, %v371_v1  ;;  %v6894_v28 = vld [vmem:[#allocation2] sm:$0xff]  }
  0x21   : > { %v1231_v4 = vrot.slane %v1229_v59, 4  ;;  %v1234_v5 = vrot.slane %v1232_v60, 5  ;;  %v609_v20 = vrot.slane %v607_v9, 7  ;;  %v6314_v45 = vld [vmem:[%s7091_s18 + $0x60] sm:$0xff]   ;;  %v282_v58 = vmul.f32 %v6165_v44, %v7119_v24  ;;  %v6908_v6 = vld [vmem:[%s8857_s1 + $0x148] sm:$0xff]  }
  0x22   : > { %v1250_v8 = vrot.slane %v1248_v63, 5  ;;  %v789_v23 = vshll.u32 %v6117_v11, 16  ;;  %v605_v32 = vrot.slane %v601_v14, 4  ;;  %v794_v33 = vshrl.u32 %v6118_v17, 16  ;;  %v998_v34 = vld [vmem:[#allocation2 + $0x90] sm:$0xf] }
  0x23   : > { %6344 = vmatpush3.bf16.msra.mxu0 %v6889_v16  ;;  %6866 = vmatpush3.bf16.msra.mxu1 %v6889_v16  ;;  %v1235_v12 = vor.u32 %v1234_v5, %v1231_v4  ;;  %v925_v16 = vld [vmem:[#allocation2 + $0x14] sm:$0x1]  ;;  %v612_v35 = vor.u32 %v610_v10, %v609_v20  ;;  %v614_v36 = vrot.slane %v609_v20, 4  ;;  %v797_v38 = vshll.u32 %v6118_v17, 16  ;;  %v1002_v39 = vld [vmem:[#allocation2 + $0x98] sm:$0x1] }
  0x24   : > { %6345 = vmatprep.subr.bf16.mxu0 %v6890_v22  ;;  %6859 = vmatprep.subr.bf16.mxu1 %v6890_v22  ;;  %v1251_v19 = vsel %vm7163_vm9, %v1246_v54, %v1250_v8  ;;  %v786_v22 = vshrl.u32 %v6117_v11, 16  ;;  %v796_v43 = vrot.slane %v794_v33, 7  ;;  %v468_v51 = vld [vmem:[#allocation2 + $0x20] sm:$0x1]  ;;  %v501_v56 = vld [vmem:[#allocation2 + $0xa4] sm:$0x1]  ;;  %v283_v63 = vmul.f32 %v6166_v55, %v7119_v24 }
  0x25   : > { %v1236_v26 = vrot.slane %v1235_v12, 4  ;;  %v613_v47 = vsel %vm7178_vm11, %v605_v32, %v612_v35  ;;  %v926_v48 = vsel %vm7095_vm3, %v614_v36, %v925_v16  ;;  %v469_v60 = vsel %vm7106_vm4, 0, %v468_v51 }
  0x26   : > { %924 = vst [vmem:[#allocation2 + $0x10] sm:$0xf] %v613_v47  ;;  %927 = vst [vmem:[#allocation2 + $0x14] sm:$0x1] %v926_v48  ;;  %v799_v53 = vor.u32 %v797_v38, %v796_v43  ;;  %v801_v54 = vrot.slane %v796_v43, 4  ;;  %v6209_v0 = vunpack.c.l.bf16 %v6314_v45  ;;  %v318_v1 = vadd.f32 %v7126_v29, %v282_v58 }
  0x27   : > { %6346 = vmatpush3.bf16.msra.mxu0 %v6891_v31  ;;  %6867 = vmatpush3.bf16.msra.mxu1 %v6891_v31  ;;  %v604_v31 = vor.u32 %v602_v7, %v601_v14  ;;  %v1241_v41 = vsel %vm7163_vm9, %v1236_v26, %v7121_v27  ;;  %470 = vst [vmem:[#allocation2 + $0x20] sm:$0x1] %v469_v60  ;;  %v446_v4 = vsel %vm7095_vm3, 0, %v445_v52  ;;  %v502_v5 = vsel %vm7106_vm4, 0, %v501_v56  ;;  %v6910_v14 = vld [vmem:[%s8857_s1 + $0x108] sm:$0xff]  }
  0x28   : > { %6347 = vmatprep.subr.bf16.mxu0 %v6892_v37  ;;  %6860 = vmatprep.subr.bf16.mxu1 %v6892_v37  ;;  %v788_v37 = vrot.slane %v786_v22, 7  ;;  %v5811_v46 = vcombine.low %v1241_v41, %v1251_v19  ;;  %v1003_v62 = vsel %vm7095_vm3, %v801_v54, %v1002_v39  ;;  %v319_v7 = vadd.f32 %v7126_v29, %v283_v63 }
  0x29   : > { %v922_v42 = vsel %vm7171_vm10, %v604_v31, %v921_v15  ;;  %1004 = vst [vmem:[#allocation2 + $0x98] sm:$0x1] %v1003_v62  ;;  %v304_v8 = vmul.f32 %v6209_v0, %v7119_v24  ;;  %447 = vst [vmem:[#allocation2 + $0x9c] sm:$0x1] %v446_v4  ;;  %v350_v9 = vmax.f32 %v318_v1, 0.0 }
  0x2a   : > { %923 = vst [vmem:[#allocation2 + $0xc] sm:$0xf] %v922_v42  ;;  %v791_v49 = vor.u32 %v789_v23, %v788_v37  ;;  %v792_v27 = vrot.slane %v788_v37, 4  ;;  %4624 = vmatprep.mubr.bf16.mxu0 %v5811_v46  ;;  %503 = vst [vmem:[#allocation2 + $0xa4] sm:$0x1] %v502_v5  ;;  %v351_v12 = vmax.f32 %v319_v7, 0.0 }
  0x2b   : > { %6348 = vmatpush3.bf16.msra.mxu0 %v6893_v50  ;;  %6868 = vmatpush3.bf16.msra.mxu1 %v6893_v50  ;;  %v412_v50 = vld [vmem:[#allocation2 + $0x18] sm:$0x1]  ;;  %v7222_v20 = vadd.f32 %v7126_v29, %v304_v8  ;;  %v6097_v26 = vpack.c.bf16 %v350_v9, %v350_v9 }
  0x2c   : > { %6445 = vmatprep.subr.bf16.mxu1 %v6895_v57  ;;  %6557 = vmatprep.subr.bf16.mxu0 %v6896_v2  ;;  %v999_v57 = vsel %vm7171_vm10, %v791_v49, %v998_v34  ;;  %v413_v59 = vsel %vm7095_vm3, 0, %v412_v50  ;;  %v800_v61 = vsel %vm7178_vm11, %v792_v27, %v799_v53  ;;  %v6210_v2 = vunpack.c.h.bf16 %v6314_v45 }
  0x2d   : > { %1000 = vst [vmem:[#allocation2 + $0x90] sm:$0xf] %v999_v57  ;;  %414 = vst [vmem:[#allocation2 + $0x18] sm:$0x1] %v413_v59  ;;  %v1181_v15 = vld [vmem:[#allocation2 + $0x10] sm:$0xf]  ;;  %v6098_v33 = vpack.c.bf16 %v351_v12, %v351_v12 }
  0x2e   : > { %4625 = vmatmul.mubr.bf16.vlgmr.msra.gmra.mrb[0].mxu0 %v6894_v28  ;;  %1001 = vst [vmem:[#allocation2 + $0x94] sm:$0xf] %v800_v61  ;;  %v305_v10 = vmul.f32 %v6210_v2, %v7119_v24  ;;  %v1182_v16 = vld [vmem:[#allocation2 + $0x14] sm:$0x1]  ;;  %v1262_v22 = vshll.u32 %v1181_v15, 16  ;;  %v1266_v23 = vshrl.u32 %v1181_v15, 16 }
  0x2f   : > { %6558 = vmatpush3.bf16.msra.mxu0 %v6900_v40  ;;  %v1272_v25 = vshll.u32 %v1182_v16, 16  ;;  %v616_v48 = vshrl.u32 %v6097_v26, 16  ;;  %v619_v55 = vshll.u32 %v6097_v26, 16  ;;  %v624_v59 = vshrl.u32 %v6098_v33, 16  ;;  %v6304_v61 = vld [vmem:[%s7091_s18 + $0x10] sm:$0xff]   ;;  %v6315_v26 = vld [vmem:[%s7091_s18 + $0x68] sm:$0xff]  }
  0x30   : > { %6559 = vmatprep.subr.bf16.mxu0 %v6908_v6  ;;  %v341_v34 = vadd.f32 %v7126_v29, %v305_v10  ;;  %v1264_v35 = vrot.slane %v1262_v22, 5  ;;  %v1268_v36 = vrot.slane %v1266_v23, 4  ;;  %v1215_v41 = vld [vmem:[#allocation2 + $0x98] sm:$0x1]  ;;  %v627_v2 = vshll.u32 %v6098_v33, 16 }
  0x31   : > { %v1180_v11 = vld [vmem:[#allocation2 + $0xc] sm:$0xf]  ;;  %v1274_v37 = vrot.slane %v1272_v25, 5  ;;  %v1536_v47 = vshll.u32 %v1215_v41, 16  ;;  %v618_v54 = vrot.slane %v616_v48, 7  ;;  %v626_v9 = vrot.slane %v624_v59, 7 }
  0x32   : > { %v1253_v17 = vshrl.u32 %v1180_v11, 16  ;;  %v1256_v19 = vshll.u32 %v1180_v11, 16  ;;  %v1269_v45 = vor.u32 %v1268_v36, %v1264_v35  ;;  %v6897_v63 = vld [vmem:[#allocation2 + $0xc] sm:$0xff]   ;;  %v932_v4 = vld [vmem:[#allocation2 + $0x20] sm:$0x1]  ;;  %v373_v15 = vmax.f32 %v341_v34, 0.0 }
  0x33   : > { %6560 = vmatpush3.bf16.msra.mxu0 %v6910_v14  ;;  %v1538_v53 = vrot.slane %v1536_v47, 5  ;;  %v621_v0 = vor.u32 %v619_v55, %v618_v54  ;;  %v622_v1 = vrot.slane %v618_v54, 4  ;;  %v415_v10 = vld [vmem:[#allocation2 + $0x24] sm:$0x1]  ;;  %v372_v14 = vmax.f32 %v7222_v20, 0.0  ;;  %v6901_v34 = vld [vmem:[%s8857_s1 + $0xc8] sm:$0xff]  }
  0x34   : > { %v1255_v28 = vrot.slane %v1253_v17, 4  ;;  %v1258_v31 = vrot.slane %v1256_v19, 5  ;;  %v1213_v32 = vld [vmem:[#allocation2 + $0x90] sm:$0xf]  ;;  %v1270_v27 = vrot.slane %v1269_v45, 4  ;;  %v6899_v11 = vld [vmem:[%s8857_s1 + $0x80] sm:$0xff]   ;;  %v6169_v16 = vunpack.c.l.bf16 %v6304_v61 }
  0x35   : > { %v1214_v38 = vld [vmem:[#allocation2 + $0x94] sm:$0xf]  ;;  %v1517_v39 = vshrl.u32 %v1213_v32, 16  ;;  %v1520_v42 = vshll.u32 %v1213_v32, 16  ;;  %v928_v60 = vld [vmem:[#allocation2 + $0x18] sm:$0xf]  ;;  %v629_v23 = vor.u32 %v627_v2, %v626_v9  ;;  %v6119_v32 = vpack.c.bf16 %v372_v14, %v372_v14 }
  0x36   : > { %v1259_v40 = vor.u32 %v1258_v31, %v1255_v28  ;;  %v1526_v43 = vshll.u32 %v1214_v38, 16  ;;  %v1530_v44 = vshrl.u32 %v1214_v38, 16  ;;  %v1275_v62 = vsel %vm7163_vm9, %v1270_v27, %v1274_v37  ;;  %v6898_v8 = vld [vmem:[#allocation2 + $0x90] sm:$0xff]   ;;  %v471_v17 = vld [vmem:[#allocation2 + $0x2c] sm:$0x1] }
  0x37   : > { %v1519_v46 = vrot.slane %v1517_v39, 4  ;;  %v1522_v50 = vrot.slane %v1520_v42, 5  ;;  %v929_v12 = vsel %vm7171_vm10, %v621_v0, %v928_v60  ;;  %v631_v25 = vrot.slane %v626_v9, 4  ;;  %v448_v28 = vld [vmem:[#allocation2 + $0xa8] sm:$0x1]  ;;  %v6906_v0 = vld [vmem:[%s8857_s1 + $0x90] sm:$0xff]  }
  0x38   : > { %v1260_v49 = vrot.slane %v1259_v40, 4  ;;  %v1528_v51 = vrot.slane %v1526_v43, 5  ;;  %v1532_v52 = vrot.slane %v1530_v44, 4  ;;  %930 = vst [vmem:[#allocation2 + $0x18] sm:$0xf] %v929_v12  ;;  %v6120_v33 = vpack.c.bf16 %v373_v15, %v373_v15  ;;  %v6902_v44 = vld [vmem:[%s8857_s1 + $0x88] sm:$0xff]  }
  0x39   : > { %v1523_v57 = vor.u32 %v1522_v50, %v1519_v46  ;;  %v6170_v20 = vunpack.c.h.bf16 %v6304_v61  ;;  %v933_v36 = vsel %vm7095_vm3, %v631_v25, %v932_v4  ;;  %v284_v37 = vmul.f32 %v6169_v16, %v7119_v24  ;;  %v504_v43 = vld [vmem:[#allocation2 + $0xb0] sm:$0x1]  ;;  %v1009_v54 = vld [vmem:[#allocation2 + $0xa4] sm:$0x1]  ;;  %v6907_v4 = vld [vmem:[%s8857_s1 + $0xd8] sm:$0xff]  }
  0x3a   : > { %v1265_v56 = vsel %vm7163_vm9, %v1260_v49, %v1264_v35  ;;  %v1533_v58 = vor.u32 %v1532_v52, %v1528_v51  ;;  %v630_v35 = vsel %vm7178_vm11, %v622_v1, %v629_v23  ;;  %v416_v38 = vsel %vm7095_vm3, 0, %v415_v10  ;;  %934 = vst [vmem:[#allocation2 + $0x20] sm:$0x1] %v933_v36  ;;  %v6903_v52 = vld [vmem:[%s8857_s1 + $0xd0] sm:$0xff]  }
  0x3b   : > { %v5812_v5 = vcombine.low %v1265_v56, %v1275_v62  ;;  %v1524_v6 = vrot.slane %v1523_v57, 4  ;;  %931 = vst [vmem:[#allocation2 + $0x1c] sm:$0xf] %v630_v35  ;;  %v803_v39 = vshrl.u32 %v6119_v32, 16  ;;  %v806_v40 = vshll.u32 %v6119_v32, 16 }
  0x3c   : > { %v1534_v7 = vrot.slane %v1533_v58, 4  ;;  %v811_v41 = vshrl.u32 %v6120_v33, 16  ;;  %v814_v42 = vshll.u32 %v6120_v33, 16  ;;  %417 = vst [vmem:[#allocation2 + $0x24] sm:$0x1] %v416_v38  ;;  %v285_v45 = vmul.f32 %v6170_v20, %v7119_v24  ;;  %v7286_v20 = vld [vmem:[%s7091_s18 + $0x18] sm:$0xff]  }
  0x3d   : > { %4632 = vmatprep.mubr.bf16.mxu0 %v5812_v5  ;;  %v1529_v19 = vsel %vm7163_vm9, %v1524_v6, %v1528_v51  ;;  %v320_v46 = vadd.f32 %v7126_v29, %v284_v37  ;;  %v472_v47 = vsel %vm7106_vm4, 0, %v471_v17  ;;  %v6213_v48 = vunpack.c.l.bf16 %v6315_v26  ;;  %v1005_v51 = vld [vmem:[#allocation2 + $0x9c] sm:$0xf] }
  0x3e   : > { %v1539_v22 = vsel %vm7163_vm9, %v1534_v7, %v1538_v53  ;;  %4633 = vmatmul.mubr.bf16.gmra.mrb[4].mxu0 %v6897_v63  ;;  %v805_v49 = vrot.slane %v803_v39, 7  ;;  %v813_v50 = vrot.slane %v811_v41, 7  ;;  %473 = vst [vmem:[#allocation2 + $0x2c] sm:$0x1] %v472_v47  ;;  %v6214_v27 = vunpack.c.h.bf16 %v6315_v26  ;;  %v6918_v7 = vld [vmem:[%s8857_s1 + $0x150] sm:$0xff]   ;;  %v6909_v37 = vld [vmem:[%s8857_s1 + $0x98] sm:$0xff]  }
  0x3f   : > { %v5823_v31 = vcombine.low %v1529_v19, %v1539_v22  ;;  %v449_v53 = vsel %vm7095_vm3, 0, %v448_v28  ;;  %v321_v55 = vadd.f32 %v7126_v29, %v285_v45  ;;  %v352_v56 = vmax.f32 %v320_v46, 0.0  ;;  %v1183_v59 = vld [vmem:[#allocation2 + $0x18] sm:$0xf]  ;;  %6561 = vmatprep.subr.bf16.mxu0 %v6918_v7  ;;  %v6914_v46 = vld [vmem:[%s8857_s1 + $0xa0] sm:$0xff]  }
  0x40   : > { %v306_v57 = vmul.f32 %v6213_v48, %v7119_v24  ;;  %450 = vst [vmem:[#allocation2 + $0xa8] sm:$0x1] %v449_v53  ;;  %v505_v58 = vsel %vm7106_vm4, 0, %v504_v43  ;;  %v808_v60 = vor.u32 %v806_v40, %v805_v49  ;;  %v809_v61 = vrot.slane %v805_v49, 4  ;;  %v6911_v43 = vld [vmem:[%s8857_s1 + $0xe0] sm:$0xff]   ;;  %v6922_v49 = vld [vmem:[%s8857_s1 + $0x110] sm:$0xff]  }
  0x41   : > { %4720 = vmatprep.mubr.bf16.mxu1 %v5823_v31  ;;  %v816_v62 = vor.u32 %v814_v42, %v813_v50  ;;  %v818_v63 = vrot.slane %v813_v50, 4  ;;  %506 = vst [vmem:[#allocation2 + $0xb0] sm:$0x1] %v505_v58  ;;  %v1277_v1 = vshrl.u32 %v1183_v59, 16  ;;  %v1280_v2 = vshll.u32 %v1183_v59, 16  ;;  %6562 = vmatpush3.bf16.msra.mxu0 %v6922_v49 }
  0x42   : > { %4721 = vmatmul.mubr.bf16.vlgmr.msra.gmra.mrb[0].mxu1 %v6898_v8  ;;  %v353_v5 = vmax.f32 %v321_v55, 0.0  ;;  %v6099_v6 = vpack.c.bf16 %v352_v56, %v352_v56  ;;  %v1006_v9 = vsel %vm7171_vm10, %v808_v60, %v1005_v51  ;;  %v1184_v12 = vld [vmem:[#allocation2 + $0x1c] sm:$0xf]  ;;  %v1185_v14 = vld [vmem:[#allocation2 + $0x20] sm:$0x1]  ;;  %v342_v19 = vadd.f32 %v7126_v29, %v306_v57  ;;  %v6915_v55 = vld [vmem:[%s8857_s1 + $0xe8] sm:$0xff]  }
  0x43   : > { %6446 = vmatpush3.bf16.msra.mxu1 %v6899_v11  ;;  %v817_v8 = vsel %vm7178_vm11, %v809_v61, %v816_v62  ;;  %v1010_v10 = vsel %vm7095_vm3, %v818_v63, %v1009_v54  ;;  %v307_v11 = vmul.f32 %v6214_v27, %v7119_v24  ;;  %v1279_v15 = vrot.slane %v1277_v1, 4  ;;  %1007 = vst [vmem:[#allocation2 + $0x9c] sm:$0xf] %v1006_v9  ;;  %v935_v53 = vld [vmem:[#allocation2 + $0x24] sm:$0xf]  ;;  %v6904_v59 = vld [vmem:[#allocation2 + $0x18] sm:$0xff]  }
  0x44   : > { %6447 = vmatprep.subr.bf16.mxu1 %v6901_v34  ;;  %v1282_v16 = vrot.slane %v1280_v2, 5  ;;  %1008 = vst [vmem:[#allocation2 + $0xa0] sm:$0xf] %v817_v8  ;;  %1011 = vst [vmem:[#allocation2 + $0xa4] sm:$0x1] %v1010_v10  ;;  %v6100_v17 = vpack.c.bf16 %v353_v5, %v353_v5  ;;  %v1286_v22 = vshll.u32 %v1184_v12, 16  ;;  %v6173_v47 = vunpack.c.l.bf16 %v7286_v20 }
  0x45   : > { %v1290_v23 = vshrl.u32 %v1184_v12, 16  ;;  %v1296_v25 = vshll.u32 %v1185_v14, 16  ;;  %v343_v26 = vadd.f32 %v7126_v29, %v307_v11  ;;  %v633_v31 = vshrl.u32 %v6099_v6, 16  ;;  %v939_v54 = vld [vmem:[#allocation2 + $0x2c] sm:$0x1] }
  0x46   : > { %v1283_v28 = vor.u32 %v1282_v16, %v1279_v15  ;;  %v636_v32 = vshll.u32 %v6099_v6, 16  ;;  %v641_v33 = vshrl.u32 %v6100_v17, 16  ;;  %v1288_v34 = vrot.slane %v1286_v22, 5  ;;  %v418_v9 = vld [vmem:[#allocation2 + $0x30] sm:$0x1]  ;;  %v6916_v15 = vld [vmem:[%s8857_s1 + $0xa8] sm:$0xff]  }
  0x47   : > { %6448 = vmatpush3.bf16.msra.mxu1 %v6902_v44  ;;  %v1292_v35 = vrot.slane %v1290_v23, 4  ;;  %v1298_v36 = vrot.slane %v1296_v25, 5  ;;  %v644_v38 = vshll.u32 %v6100_v17, 16  ;;  %v635_v40 = vrot.slane %v633_v31, 7  ;;  %v474_v16 = vld [vmem:[#allocation2 + $0x38] sm:$0x1] }
  0x48   : > { %6449 = vmatprep.subr.bf16.mxu1 %v6903_v52  ;;  %v1284_v39 = vrot.slane %v1283_v28, 4  ;;  %v643_v41 = vrot.slane %v641_v33, 7  ;;  %v374_v42 = vmax.f32 %v342_v19, 0.0  ;;  %v375_v45 = vmax.f32 %v343_v26, 0.0 }
  0x49   : > { %v1293_v44 = vor.u32 %v1292_v35, %v1288_v34  ;;  %v6174_v48 = vunpack.c.h.bf16 %v7286_v20  ;;  %v638_v51 = vor.u32 %v636_v32, %v635_v40  ;;  %v639_v52 = vrot.slane %v635_v40, 4  ;;  %v6917_v32 = vld [vmem:[%s8857_s1 + $0xf0] sm:$0xff]   ;;  %v1012_v40 = vld [vmem:[#allocation2 + $0xa8] sm:$0xf] }
  0x4a   : > { %v1289_v50 = vsel %vm7163_vm9, %v1284_v39, %v1288_v34  ;;  %v646_v27 = vor.u32 %v644_v38, %v643_v41  ;;  %v1216_v57 = vld [vmem:[#allocation2 + $0x9c] sm:$0xf]  ;;  %v6121_v60 = vpack.c.bf16 %v374_v42, %v374_v42  ;;  %v6122_v61 = vpack.c.bf16 %v375_v45, %v375_v45 }
  0x4b   : > { %6450 = vmatpush3.bf16.msra.mxu1 %v6906_v0  ;;  %v1294_v56 = vrot.slane %v1293_v44, 4  ;;  %v1217_v58 = vld [vmem:[#allocation2 + $0xa0] sm:$0xf]  ;;  %v286_v62 = vmul.f32 %v6173_v47, %v7119_v24  ;;  %v1218_v63 = vld [vmem:[#allocation2 + $0xa4] sm:$0x1]  ;;  %v1541_v0 = vshrl.u32 %v1216_v57, 16  ;;  %v936_v22 = vsel %vm7171_vm10, %v638_v51, %v935_v53 }
  0x4c   : > { %6451 = vmatprep.subr.bf16.mxu1 %v6907_v4  ;;  %v1544_v1 = vshll.u32 %v1216_v57, 16  ;;  %v1550_v2 = vshll.u32 %v1217_v58, 16  ;;  %v1554_v4 = vshrl.u32 %v1217_v58, 16  ;;  %v1560_v6 = vshll.u32 %v1218_v63, 16  ;;  %937 = vst [vmem:[#allocation2 + $0x24] sm:$0xf] %v936_v22 }
  0x4d   : > { %v1299_v5 = vsel %vm7163_vm9, %v1294_v56, %v1298_v36  ;;  %v647_v7 = vsel %vm7178_vm11, %v639_v52, %v646_v27  ;;  %v648_v8 = vrot.slane %v643_v41, 4  ;;  %v1543_v11 = vrot.slane %v1541_v0, 4  ;;  %v6921_v36 = vld [vmem:[%s8857_s1 + $0xb0] sm:$0xff]  }
  0x4e   : > { %v5813_v10 = vcombine.low %v1289_v50, %v1299_v5  ;;  %v1546_v12 = vrot.slane %v1544_v1, 5  ;;  %v1552_v14 = vrot.slane %v1550_v2, 5  ;;  %938 = vst [vmem:[#allocation2 + $0x28] sm:$0xf] %v647_v7  ;;  %v1556_v17 = vrot.slane %v1554_v4, 4  ;;  %v6905_v50 = vld [vmem:[#allocation2 + $0x9c] sm:$0xff]  }
  0x4f   : > { %6452 = vmatpush3.bf16.msra.mxu1 %v6909_v37  ;;  %v1562_v19 = vrot.slane %v1560_v6, 5  ;;  %v940_v23 = vsel %vm7095_vm3, %v648_v8, %v939_v54  ;;  %v820_v26 = vshrl.u32 %v6121_v60, 16  ;;  %v823_v28 = vshll.u32 %v6121_v60, 16  ;;  %v1016_v41 = vld [vmem:[#allocation2 + $0xb0] sm:$0x1] }
  0x50   : > { %6453 = vmatprep.subr.bf16.mxu1 %v6911_v43  ;;  %4640 = vmatprep.mubr.bf16.mxu0 %v5813_v10  ;;  %v1547_v25 = vor.u32 %v1546_v12, %v1543_v11  ;;  %941 = vst [vmem:[#allocation2 + $0x2c] sm:$0x1] %v940_v23  ;;  %v828_v31 = vshrl.u32 %v6122_v61, 16  ;;  %v1557_v33 = vor.u32 %v1556_v17, %v1552_v14  ;;  %v831_v20 = vshll.u32 %v6122_v61, 16  ;;  %v7330_v43 = vld [vmem:[%s7091_s18 + $0x70] sm:$0xff]   ;;  %v6926_v10 = vld [vmem:[%s8857_s1 + $0x1c0] sm:$0xff]  }
  0x51   : > { %4641 = vmatmul.mubr.bf16.gmra.mrb[8].mxu0 %v6904_v59  ;;  %v287_v34 = vmul.f32 %v6174_v48, %v7119_v24  ;;  %v322_v35 = vadd.f32 %v7126_v29, %v286_v62  ;;  %v822_v38 = vrot.slane %v820_v26, 7  ;;  %v419_v42 = vsel %vm7095_vm3, 0, %v418_v9  ;;  %v6923_v48 = vld [vmem:[%s8857_s1 + $0xf8] sm:$0xff]   ;;  %v451_v17 = vld [vmem:[#allocation2 + $0xb4] sm:$0x1] }
  0x52   : > { %v1548_v37 = vrot.slane %v1547_v25, 4  ;;  %v830_v39 = vrot.slane %v828_v31, 7  ;;  %v1558_v44 = vrot.slane %v1557_v33, 4  ;;  %420 = vst [vmem:[#allocation2 + $0x30] sm:$0x1] %v419_v42  ;;  %v475_v47 = vsel %vm7106_vm4, 0, %v474_v16 }
  0x53   : > { %6454 = vmatpush3.bf16.msra.mxu1 %v6914_v46  ;;  %v323_v45 = vadd.f32 %v7126_v29, %v287_v34  ;;  %v354_v46 = vmax.f32 %v322_v35, 0.0  ;;  %v825_v51 = vor.u32 %v823_v28, %v822_v38  ;;  %v826_v52 = vrot.slane %v822_v38, 4  ;;  %476 = vst [vmem:[#allocation2 + $0x38] sm:$0x1] %v475_v47  ;;  %v6924_v62 = vld [vmem:[%s8857_s1 + $0xb8] sm:$0xff]  }
  0x54   : > { %6455 = vmatprep.subr.bf16.mxu1 %v6915_v55  ;;  %v1553_v49 = vsel %vm7163_vm9, %v1548_v37, %v1552_v14  ;;  %v833_v27 = vor.u32 %v831_v20, %v830_v39  ;;  %v1563_v53 = vsel %vm7163_vm9, %v1558_v44, %v1562_v19  ;;  %v835_v55 = vrot.slane %v830_v39, 4  ;;  %v1186_v63 = vld [vmem:[#allocation2 + $0x24] sm:$0xf]  ;;  %v6929_v11 = vld [vmem:[%s8857_s1 + $0x158] sm:$0xff]  }
  0x55   : > { %v1187_v54 = vld [vmem:[#allocation2 + $0x28] sm:$0xf]  ;;  %v355_v56 = vmax.f32 %v323_v45, 0.0  ;;  %v6101_v57 = vpack.c.bf16 %v354_v46, %v354_v46  ;;  %v5824_v58 = vcombine.low %v1553_v49, %v1563_v53  ;;  %v1013_v1 = vsel %vm7171_vm10, %v825_v51, %v1012_v40  ;;  %6563 = vmatprep.subr.bf16.mxu0 %v6929_v11  ;;  %v6930_v26 = vld [vmem:[%s8857_s1 + $0x118] sm:$0xff]   ;;  %v6306_v49 = vld [vmem:[%s7091_s18 + $0x20] sm:$0xff]  }
  0x56   : > { %v1310_v59 = vshll.u32 %v1187_v54, 16  ;;  %v1314_v60 = vshrl.u32 %v1187_v54, 16  ;;  %v834_v61 = vsel %vm7178_vm11, %v826_v52, %v833_v27  ;;  %v1017_v2 = vsel %vm7095_vm3, %v835_v55, %v1016_v41  ;;  %1014 = vst [vmem:[#allocation2 + $0xa8] sm:$0xf] %v1013_v1  ;;  %6564 = vmatpush3.bf16.msra.mxu0 %v6930_v26  ;;  %v421_v55 = vld [vmem:[#allocation2 + $0x3c] sm:$0x1] }
  0x57   : > { %6456 = vmatpush3.bf16.msra.mxu1 %v6916_v15  ;;  %v1188_v0 = vld [vmem:[#allocation2 + $0x2c] sm:$0x1]  ;;  %1015 = vst [vmem:[#allocation2 + $0xac] sm:$0xf] %v834_v61  ;;  %v6102_v4 = vpack.c.bf16 %v355_v56, %v355_v56  ;;  %v6217_v5 = vunpack.c.l.bf16 %v7330_v43  ;;  %4728 = vmatprep.mubr.bf16.mxu1 %v5824_v58  ;;  %v1301_v6 = vshrl.u32 %v1186_v63, 16  ;;  %v1304_v7 = vshll.u32 %v1186_v63, 16 }
  0x58   : > { %6457 = vmatprep.subr.bf16.mxu1 %v6917_v32  ;;  %v1312_v8 = vrot.slane %v1310_v59, 5  ;;  %v1316_v9 = vrot.slane %v1314_v60, 4  ;;  %1018 = vst [vmem:[#allocation2 + $0xb0] sm:$0x1] %v1017_v2  ;;  %4729 = vmatmul.mubr.bf16.gmra.mrb[4].mxu1 %v6905_v50  ;;  %v1320_v12 = vshll.u32 %v1188_v0, 16  ;;  %v650_v14 = vshrl.u32 %v6101_v57, 16 }
  0x59   : > { %v653_v15 = vshll.u32 %v6101_v57, 16  ;;  %v658_v16 = vshrl.u32 %v6102_v4, 16  ;;  %v1303_v19 = vrot.slane %v1301_v6, 4  ;;  %v1306_v22 = vrot.slane %v1304_v7, 5  ;;  %v942_v33 = vld [vmem:[#allocation2 + $0x30] sm:$0xf] }
  0x5a   : > { %v1317_v23 = vor.u32 %v1316_v9, %v1312_v8  ;;  %v661_v25 = vshll.u32 %v6102_v4, 16  ;;  %v1322_v28 = vrot.slane %v1320_v12, 5  ;;  %v652_v31 = vrot.slane %v650_v14, 7  ;;  %v7386_v4 = vld [vmem:[%s8858_s2 + $0x1] ss:$0 sm:$0xff] }
  0x5b   : > { %6458 = vmatpush3.bf16.msra.mxu1 %v6921_v36  ;;  %v660_v32 = vrot.slane %v658_v16, 7  ;;  %v6218_v20 = vunpack.c.h.bf16 %v7330_v43  ;;  %v1307_v34 = vor.u32 %v1306_v22, %v1303_v19  ;;  %v946_v36 = vld [vmem:[#allocation2 + $0x38] sm:$0x1]  ;;  %v308_v37 = vmul.f32 %v6217_v5, %v7119_v24  ;;  %v7370_v24 = vld [vmem:[%s8858_s2] ss:$0 sm:$0xff] }
  0x5c   : > { %6459 = vmatprep.subr.bf16.mxu1 %v6923_v48  ;;  %v1318_v35 = vrot.slane %v1317_v23, 4  ;;  %v452_v38 = vsel %vm7095_vm3, 0, %v451_v17  ;;  %v655_v39 = vor.u32 %v653_v15, %v652_v31  ;;  %v656_v40 = vrot.slane %v652_v31, 4  ;;  %v507_v48 = vld [vmem:[#allocation2 + $0xbc] sm:$0x1] }
  0x5d   : > { %v663_v41 = vor.u32 %v661_v25, %v660_v32  ;;  %v665_v42 = vrot.slane %v660_v32, 4  ;;  %453 = vst [vmem:[#allocation2 + $0xb4] sm:$0x1] %v452_v38  ;;  %v1308_v44 = vrot.slane %v1307_v34, 4  ;;  %v309_v46 = vmul.f32 %v7370_v24, %v6218_v20  ;;  %v1219_v50 = vld [vmem:[#allocation2 + $0xa8] sm:$0xf] }
  0x5e   : > { %v1323_v43 = vsel %vm7163_vm9, %v1318_v35, %v1322_v28  ;;  %v1220_v45 = vld [vmem:[#allocation2 + $0xac] sm:$0xf]  ;;  %v344_v47 = vadd.f32 %v7126_v29, %v308_v37  ;;  %v943_v54 = vsel %vm7171_vm10, %v655_v39, %v942_v33  ;;  %v1565_v57 = vshrl.u32 %v1219_v50, 16  ;;  %v6912_v29 = vld [vmem:[#allocation2 + $0x24] sm:$0xff]   ;;  %v7391_v11 = vld [vmem:[#allocation2] sm:$0xe] }
  0x5f   : > { %6460 = vmatpush3.bf16.msra.mxu1 %v6924_v62  ;;  %v1221_v51 = vld [vmem:[#allocation2 + $0xb0] sm:$0x1]  ;;  %v1574_v52 = vshll.u32 %v1220_v45, 16  ;;  %v1578_v27 = vshrl.u32 %v1220_v45, 16  ;;  %v664_v53 = vsel %vm7178_vm11, %v656_v40, %v663_v41  ;;  %v1313_v56 = vsel %vm7163_vm9, %v1308_v44, %v1312_v8  ;;  %944 = vst [vmem:[#allocation2 + $0x30] sm:$0xf] %v943_v54 }
  0x60   : > { %6669 = vmatprep.subr.bf16.mxu1 %v6926_v10  ;;  %v1568_v58 = vshll.u32 %v1219_v50, 16  ;;  %v1584_v59 = vshll.u32 %v1221_v51, 16  ;;  %945 = vst [vmem:[#allocation2 + $0x34] sm:$0xf] %v664_v53  ;;  %v5814_v60 = vcombine.low %v1313_v56, %v1323_v43  ;;  %v947_v63 = vsel %vm7095_vm3, %v665_v42, %v946_v36  ;;  %v477_v6 = vld [vmem:[#allocation2 + $0x44] sm:$0x1] }
  0x61   : > { %v1576_v61 = vrot.slane %v1574_v52, 5  ;;  %v1580_v62 = vrot.slane %v1578_v27, 4  ;;  %v1567_v0 = vrot.slane %v1565_v57, 4  ;;  %948 = vst [vmem:[#allocation2 + $0x38] sm:$0x1] %v947_v63  ;;  %v345_v5 = vadd.f32 %v7386_v4, %v309_v46  ;;  %v6913_v38 = vld [vmem:[#allocation2 + $0xa8] sm:$0xff]  }
  0x62   : > { %v1570_v1 = vrot.slane %v1568_v58, 5  ;;  %v1586_v2 = vrot.slane %v1584_v59, 5  ;;  %4648 = vmatprep.mubr.bf16.mxu0 %v5814_v60  ;;  %v376_v8 = vmax.f32 %v344_v47, 0.0  ;;  %v508_v9 = vsel %vm7106_vm4, 0, %v507_v48  ;;  %v6934_v56 = vld [vmem:[%s8857_s1 + $0x160] sm:$0xff]  }
  0x63   : > { %v1581_v7 = vor.u32 %v1580_v62, %v1576_v61  ;;  %v6177_v10 = vunpack.c.l.bf16 %v6306_v49  ;;  %4649 = vmatmul.mubr.bf16.gmra.mrb[12].mxu0 %v6912_v29  ;;  %v377_v14 = vmax.f32 %v345_v5, 0.0  ;;  %509 = vst [vmem:[#allocation2 + $0xbc] sm:$0x1] %v508_v9  ;;  %v6178_v15 = vunpack.c.h.bf16 %v6306_v49  ;;  %6565 = vmatprep.subr.bf16.mxu0 %v6934_v56  ;;  %v6307_v9 = vld [vmem:[%s7091_s18 + $0x28] sm:$0xff]  }
  0x64   : > { %v1571_v12 = vor.u32 %v1570_v1, %v1567_v0  ;;  %v422_v16 = vsel %vm7095_vm3, 0, %v421_v55  ;;  %v6123_v19 = vpack.c.bf16 %v376_v8, %v376_v8  ;;  %v478_v23 = vsel %vm7106_vm4, 0, %v477_v6  ;;  %v1019_v42 = vld [vmem:[#allocation2 + $0xb4] sm:$0xf]  ;;  %v1693_v55 = vld [vmem:[#allocation2 + $0x4] sm:$0xf] }
  0x65   : > { %v1582_v17 = vrot.slane %v1581_v7, 4  ;;  %v288_v22 = vmul.f32 %v7370_v24, %v6177_v10  ;;  %423 = vst [vmem:[#allocation2 + $0x3c] sm:$0x1] %v422_v16  ;;  %v6124_v26 = vpack.c.bf16 %v377_v14, %v377_v14  ;;  %v289_v28 = vmul.f32 %v7370_v24, %v6178_v15  ;;  %479 = vst [vmem:[#allocation2 + $0x44] sm:$0x1] %v478_v23 }
  0x66   : > { %v1572_v25 = vrot.slane %v1571_v12, 4  ;;  %v5827_v31 = vrot.slane %v7391_v11, 9  ;;  %v1189_v33 = vld [vmem:[#allocation2 + $0x30] sm:$0xf]  ;;  %v837_v34 = vshrl.u32 %v6123_v19, 16  ;;  %v840_v35 = vshll.u32 %v6123_v19, 16 }
  0x67   : > { %v1587_v32 = vsel %vm7163_vm9, %v1582_v17, %v1586_v2  ;;  %v1190_v20 = vld [vmem:[#allocation2 + $0x34] sm:$0xf]  ;;  %v324_v36 = vadd.f32 %v7386_v4, %v288_v22  ;;  %v1325_v39 = vshrl.u32 %v1189_v33, 16  ;;  %v1328_v40 = vshll.u32 %v1189_v33, 16  ;;  %v424_v10 = vld [vmem:[#allocation2 + $0x48] sm:$0x1] }
  0x68   : > { %v1577_v37 = vsel %vm7163_vm9, %v1572_v25, %v1576_v61  ;;  %v1334_v41 = vshll.u32 %v1190_v20, 16  ;;  %v1191_v43 = vld [vmem:[#allocation2 + $0x38] sm:$0x1]  ;;  %v1338_v45 = vshrl.u32 %v1190_v20, 16  ;;  %v839_v46 = vrot.slane %v837_v34, 7  ;;  %v6937_v34 = vld [vmem:[%s8857_s1 + $0x120] sm:$0xff]  }
  0x69   : > { %v5825_v44 = vcombine.low %v1577_v37, %v1587_v32  ;;  %v845_v47 = vshrl.u32 %v6124_v26, 16  ;;  %v1327_v48 = vrot.slane %v1325_v39, 4  ;;  %v1330_v49 = vrot.slane %v1328_v40, 5  ;;  %v1694_v61 = vld [vmem:[#allocation2 + $0x8] sm:$0x1]  ;;  %6566 = vmatpush3.bf16.msra.mxu0 %v6937_v34 }
  0x6a   : > { %v1336_v50 = vrot.slane %v1334_v41, 5  ;;  %v1344_v51 = vshll.u32 %v1191_v43, 16  ;;  %v1340_v52 = vrot.slane %v1338_v45, 4  ;;  %v842_v27 = vor.u32 %v840_v35, %v839_v46  ;;  %v1023_v29 = vld [vmem:[#allocation2 + $0xbc] sm:$0x1] }
  0x6b   : > { %4736 = vmatprep.mubr.bf16.mxu1 %v5825_v44  ;;  %v843_v53 = vrot.slane %v839_v46, 4  ;;  %v847_v54 = vrot.slane %v845_v47, 7  ;;  %v1331_v57 = vor.u32 %v1330_v49, %v1327_v48  ;;  %v848_v59 = vshll.u32 %v6124_v26, 16  ;;  %v480_v16 = vld [vmem:[#allocation2 + $0x50] sm:$0x1] }
  0x6c   : > { %4737 = vmatmul.mubr.bf16.gmra.mrb[8].mxu1 %v6913_v38  ;;  %v1346_v58 = vrot.slane %v1344_v51, 5  ;;  %v325_v60 = vadd.f32 %v7386_v4, %v289_v28  ;;  %v1341_v62 = vor.u32 %v1340_v52, %v1336_v50  ;;  %v1020_v0 = vsel %vm7171_vm10, %v842_v27, %v1019_v42  ;;  %v7428_v25 = vld [vmem:[#allocation2 + $0xc] sm:$0xe]  ;;  %v6919_v28 = vld [vmem:[#allocation2 + $0x30] sm:$0xff]   ;;  %v949_v43 = vld [vmem:[#allocation2 + $0x3c] sm:$0xf] }
  0x6d   : > { %v852_v63 = vrot.slane %v847_v54, 4  ;;  %v356_v1 = vmax.f32 %v324_v36, 0.0  ;;  %v1332_v5 = vrot.slane %v1331_v57, 4  ;;  %v850_v6 = vor.u32 %v848_v59, %v847_v54  ;;  %1021 = vst [vmem:[#allocation2 + $0xb4] sm:$0xf] %v1020_v0 }
  0x6e   : > { %v357_v7 = vmax.f32 %v325_v60, 0.0  ;;  %v1793_v8 = vrot.slane %v1693_v55, 5  ;;  %v1342_v11 = vrot.slane %v1341_v62, 4  ;;  %v1796_v15 = vrot.slane %v1694_v61, 5  ;;  %v953_v56 = vld [vmem:[#allocation2 + $0x44] sm:$0x1] }
  0x6f   : > { %v1024_v12 = vsel %vm7095_vm3, %v852_v63, %v1023_v29  ;;  %v6103_v14 = vpack.c.bf16 %v356_v1, %v356_v1  ;;  %v1337_v17 = vsel %vm7163_vm9, %v1332_v5, %v1336_v50  ;;  %v851_v19 = vsel %vm7178_vm11, %v843_v53, %v850_v6  ;;  %v1697_v60 = vld [vmem:[#allocation2 + $0x14] sm:$0x1]  ;;  %v6941_v62 = vld [vmem:[%s8857_s1 + $0x168] sm:$0xff]  }
  0x70   : > { %1025 = vst [vmem:[#allocation2 + $0xbc] sm:$0x1] %v1024_v12  ;;  %v6104_v22 = vpack.c.bf16 %v357_v7, %v357_v7  ;;  %v7426_v23 = vsel %vm7413_vm14, %v5827_v31, %v1793_v8  ;;  %v1347_v26 = vsel %vm7163_vm9, %v1342_v11, %v1346_v58  ;;  %1022 = vst [vmem:[#allocation2 + $0xb8] sm:$0xf] %v851_v19  ;;  %v1795_v20 = vrot.slane %v1793_v8, 4  ;;  %v6308_v7 = vld [vmem:[%s7091_s18 + $0x30] sm:$0xff]  }
  0x71   : > { %v667_v32 = vshrl.u32 %v6103_v14, 16  ;;  %v670_v33 = vshll.u32 %v6103_v14, 16  ;;  %v5815_v35 = vcombine.low %v1337_v17, %v1347_v26  ;;  %v6181_v38 = vunpack.c.l.bf16 %v6307_v9  ;;  %v1696_v31 = vld [vmem:[#allocation2 + $0x10] sm:$0xf]  ;;  %6567 = vmatprep.subr.bf16.mxu0 %v6941_v62  ;;  %v6942_v12 = vld [vmem:[%s8857_s1 + $0x128] sm:$0xff]  }
  0x72   : > { %v675_v36 = vshrl.u32 %v6104_v22, 16  ;;  %v678_v37 = vshll.u32 %v6104_v22, 16  ;;  %v7437_v40 = vsel %vm7413_vm14, %v1795_v20, %v1796_v15  ;;  %v6182_v41 = vunpack.c.h.bf16 %v6307_v9  ;;  %6568 = vmatpush3.bf16.msra.mxu0 %v6942_v12 }
  0x73   : > { %v669_v39 = vrot.slane %v667_v32, 7  ;;  %v425_v42 = vsel %vm7095_vm3, 0, %v424_v10  ;;  %4656 = vmatprep.mubr.bf16.mxu0 %v5815_v35  ;;  %v5843_v45 = vcombine.low %v7426_v23, %v7437_v40  ;;  %v290_v46 = vmul.f32 %v7370_v24, %v6181_v38  ;;  %v7468_v38 = vld [vmem:[%s7091_s18 + $0x38] sm:$0xff]  }
  0x74   : > { %v677_v44 = vrot.slane %v675_v36, 7  ;;  %426 = vst [vmem:[#allocation2 + $0x48] sm:$0x1] %v425_v42  ;;  %v481_v47 = vsel %vm7106_vm4, 0, %v480_v16  ;;  %v1222_v48 = vld [vmem:[#allocation2 + $0xb4] sm:$0xf]  ;;  %4657 = vmatmul.mubr.bf16.gmra.mrb[16].mxu0 %v6919_v28  ;;  %v291_v51 = vmul.f32 %v7370_v24, %v6182_v41  ;;  %v6185_v20 = vunpack.c.l.bf16 %v6308_v7 }
  0x75   : > { %v672_v49 = vor.u32 %v670_v33, %v669_v39  ;;  %v673_v50 = vrot.slane %v669_v39, 4  ;;  %482 = vst [vmem:[#allocation2 + $0x50] sm:$0x1] %v481_v47  ;;  %v5828_v52 = vrot.slane %v7428_v25, 9  ;;  %v1589_v27 = vshrl.u32 %v1222_v48, 16 }
  0x76   : > { %v1592_v53 = vshll.u32 %v1222_v48, 16  ;;  %v680_v54 = vor.u32 %v678_v37, %v677_v44  ;;  %v682_v55 = vrot.slane %v677_v44, 4  ;;  %v326_v59 = vadd.f32 %v7386_v4, %v290_v46 }
  0x77   : > { %v1224_v57 = vld [vmem:[#allocation2 + $0xbc] sm:$0x1]  ;;  %v950_v58 = vsel %vm7171_vm10, %v672_v49, %v949_v43  ;;  %v327_v29 = vadd.f32 %v7386_v4, %v291_v51  ;;  %v1800_v61 = vrot.slane %v1696_v31, 5  ;;  %v1223_v63 = vld [vmem:[#allocation2 + $0xb8] sm:$0xf]  ;;  %v1591_v0 = vrot.slane %v1589_v27, 4 }
  0x78   : > { %v1594_v1 = vrot.slane %v1592_v53, 5  ;;  %v1608_v5 = vshll.u32 %v1224_v57, 16  ;;  %v681_v6 = vsel %vm7178_vm11, %v673_v50, %v680_v54  ;;  %951 = vst [vmem:[#allocation2 + $0x3c] sm:$0xf] %v950_v58  ;;  %v1598_v8 = vshll.u32 %v1223_v63, 16  ;;  %v6920_v43 = vld [vmem:[#allocation2 + $0xb4] sm:$0xff]  }
  0x79   : > { %v1602_v9 = vshrl.u32 %v1223_v63, 16  ;;  %952 = vst [vmem:[#allocation2 + $0x40] sm:$0xf] %v681_v6  ;;  %v954_v10 = vsel %vm7095_vm3, %v682_v55, %v953_v56  ;;  %v358_v11 = vmax.f32 %v326_v59, 0.0  ;;  %v359_v16 = vmax.f32 %v327_v29, 0.0 }
  0x7a   : > { %v1595_v14 = vor.u32 %v1594_v1, %v1591_v0  ;;  %v1610_v15 = vrot.slane %v1608_v5, 5  ;;  %955 = vst [vmem:[#allocation2 + $0x44] sm:$0x1] %v954_v10  ;;  %v7465_v17 = vsel %vm7413_vm14, %v5828_v52, %v1800_v61  ;;  %v1600_v19 = vrot.slane %v1598_v8, 5  ;;  %v427_v29 = vld [vmem:[#allocation2 + $0x54] sm:$0x1] }
  0x7b   : > { %v1604_v22 = vrot.slane %v1602_v9, 4  ;;  %v6105_v25 = vpack.c.bf16 %v358_v11, %v358_v11  ;;  %v1802_v26 = vrot.slane %v1800_v61, 4  ;;  %v6106_v32 = vpack.c.bf16 %v359_v16, %v359_v16  ;;  %v956_v59 = vld [vmem:[#allocation2 + $0x48] sm:$0xf]  ;;  %v6925_v1 = vld [vmem:[#allocation2 + $0xc] sm:$0xff]  }
  0x7c   : > { %v1596_v28 = vrot.slane %v1595_v14, 4  ;;  %v1803_v33 = vrot.slane %v1697_v60, 5  ;;  %v6186_v37 = vunpack.c.h.bf16 %v6308_v7  ;;  %v292_v49 = vmul.f32 %v7370_v24, %v6185_v20  ;;  %v483_v60 = vld [vmem:[#allocation2 + $0x5c] sm:$0x1]  ;;  %v1698_v9 = vld [vmem:[#allocation2 + $0x18] sm:$0xe] }
  0x7d   : > { %v1605_v34 = vor.u32 %v1604_v22, %v1600_v19  ;;  %v684_v35 = vshrl.u32 %v6105_v25, 16  ;;  %v687_v36 = vshll.u32 %v6105_v25, 16  ;;  %v692_v39 = vshrl.u32 %v6106_v32, 16  ;;  %v1699_v10 = vld [vmem:[#allocation2 + $0x1c] sm:$0xf] }
  0x7e   : > { %v1601_v31 = vsel %vm7163_vm9, %v1596_v28, %v1600_v19  ;;  %v695_v41 = vshll.u32 %v6106_v32, 16  ;;  %v7474_v42 = vsel %vm7413_vm14, %v1802_v26, %v1803_v33  ;;  %v293_v27 = vmul.f32 %v7370_v24, %v6186_v37  ;;  %v1700_v19 = vld [vmem:[#allocation2 + $0x20] sm:$0x1] }
  0x7f   : > { %v1606_v44 = vrot.slane %v1605_v34, 4  ;;  %v1192_v46 = vld [vmem:[#allocation2 + $0x3c] sm:$0xf]  ;;  %v686_v47 = vrot.slane %v684_v35, 7  ;;  %v5844_v48 = vcombine.low %v7465_v17, %v7474_v42  ;;  %v6189_v53 = vunpack.c.l.bf16 %v7468_v38 }
  0x80   : > { %v1193_v50 = vld [vmem:[#allocation2 + $0x40] sm:$0xf]  ;;  %v1349_v51 = vshrl.u32 %v1192_v46, 16  ;;  %v1352_v52 = vshll.u32 %v1192_v46, 16  ;;  %v694_v8 = vrot.slane %v692_v39, 7  ;;  %v328_v16 = vadd.f32 %v7386_v4, %v292_v49  ;;  %v6956_v17 = vld [vmem:[%s8857_s1 + $0x138] sm:$0xff]  }
  0x81   : > { %v1611_v54 = vsel %vm7163_vm9, %v1606_v44, %v1610_v15  ;;  %v1194_v55 = vld [vmem:[#allocation2 + $0x44] sm:$0x1]  ;;  %v1358_v56 = vshll.u32 %v1193_v50, 16  ;;  %v1362_v57 = vshrl.u32 %v1193_v50, 16  ;;  %v689_v58 = vor.u32 %v687_v36, %v686_v47  ;;  %v960_v15 = vld [vmem:[#allocation2 + $0x50] sm:$0x1] }
  0x82   : > { %v5826_v61 = vcombine.low %v1601_v31, %v1611_v54  ;;  %v1351_v62 = vrot.slane %v1349_v51, 4  ;;  %v1354_v63 = vrot.slane %v1352_v52, 5  ;;  %v1368_v0 = vshll.u32 %v1194_v55, 16  ;;  %v7498_v49 = vld [vmem:[%s7091_s18 + $0x40] sm:$0xff]   ;;  %v6948_v54 = vld [vmem:[%s8857_s1 + $0x170] sm:$0xff]  }
  0x83   : > { %v1360_v5 = vrot.slane %v1358_v56, 5  ;;  %v1364_v6 = vrot.slane %v1362_v57, 4  ;;  %v690_v7 = vrot.slane %v686_v47, 4  ;;  %v957_v14 = vsel %vm7171_vm10, %v689_v58, %v956_v59  ;;  %v430_v47 = vld [vmem:[#allocation2 + $0x60] sm:$0x1]  ;;  %v6931_v57 = vld [vmem:[#allocation2 + $0x18] sm:$0xff]   ;;  %6569 = vmatprep.subr.bf16.mxu0 %v6948_v54 }
  0x84   : > { %4744 = vmatprep.mubr.bf16.mxu1 %v5826_v61  ;;  %v1355_v11 = vor.u32 %v1354_v63, %v1351_v62  ;;  %v1370_v12 = vrot.slane %v1368_v0, 5  ;;  %v697_v25 = vor.u32 %v695_v41, %v694_v8  ;;  %v699_v26 = vrot.slane %v694_v8, 4  ;;  %958 = vst [vmem:[#allocation2 + $0x48] sm:$0xf] %v957_v14  ;;  %v6927_v41 = vld [vmem:[#allocation2 + $0x3c] sm:$0xff]  }
  0x85   : > { %4745 = vmatmul.mubr.bf16.gmra.mrb[12].mxu1 %v6920_v43  ;;  %v1365_v22 = vor.u32 %v1364_v6, %v1360_v5  ;;  %v329_v28 = vadd.f32 %v7386_v4, %v293_v27  ;;  %v360_v33 = vmax.f32 %v328_v16, 0.0  ;;  %v428_v20 = vsel %vm7095_vm3, 0, %v427_v29  ;;  %v6928_v56 = vld [vmem:[%s8857_s1 + $0x180] sm:$0xff]   ;;  %v6935_v29 = vld [vmem:[%s8857_s1 + $0x1c8] sm:$0xff]  }
  0x86   : > { %v1356_v32 = vrot.slane %v1355_v11, 4  ;;  %4785 = vmatprep.mubr.bf16.mxu1 %v6925_v1  ;;  %v484_v34 = vsel %vm7106_vm4, 0, %v483_v60  ;;  %v698_v36 = vsel %vm7178_vm11, %v690_v7, %v697_v25  ;;  %v961_v37 = vsel %vm7095_vm3, %v699_v26, %v960_v15  ;;  %429 = vst [vmem:[#allocation2 + $0x54] sm:$0x1] %v428_v20  ;;  %v6950_v1 = vld [vmem:[%s8857_s1 + $0x130] sm:$0xff]  }
  0x87   : > { %v1366_v35 = vrot.slane %v1365_v22, 4  ;;  %v361_v31 = vmax.f32 %v329_v28, 0.0  ;;  %485 = vst [vmem:[#allocation2 + $0x5c] sm:$0x1] %v484_v34  ;;  %959 = vst [vmem:[#allocation2 + $0x4c] sm:$0xf] %v698_v36  ;;  %v6107_v44 = vpack.c.bf16 %v360_v33, %v360_v33  ;;  %v6190_v27 = vunpack.c.h.bf16 %v7468_v38  ;;  %6570 = vmatpush3.bf16.msra.mxu0 %v6950_v1 }
  0x88   : > { %v1361_v39 = vsel %vm7163_vm9, %v1356_v32, %v1360_v5  ;;  %962 = vst [vmem:[#allocation2 + $0x50] sm:$0x1] %v961_v37  ;;  %v5829_v43 = vrot.slane %v1698_v9, 9  ;;  %v1807_v46 = vrot.slane %v1699_v10, 5  ;;  %v1810_v52 = vrot.slane %v1700_v19, 5  ;;  %v6944_v22 = vld [vmem:[%s8857_s1 + $0x1d0] sm:$0xff]  }
  0x89   : > { %v1371_v50 = vsel %vm7163_vm9, %v1366_v35, %v1370_v12  ;;  %v6108_v51 = vpack.c.bf16 %v361_v31, %v361_v31  ;;  %v701_v58 = vshrl.u32 %v6107_v44, 16  ;;  %v704_v59 = vshll.u32 %v6107_v44, 16  ;;  %v6938_v12 = vld [vmem:[%s8857_s1 + $0x188] sm:$0xff]   ;;  %v1701_v34 = vld [vmem:[#allocation2 + $0x24] sm:$0xe] }
  0x8a   : > { %v5816_v55 = vcombine.low %v1361_v39, %v1371_v50  ;;  %v7514_v60 = vsel %vm7413_vm14, %v5829_v43, %v1807_v46  ;;  %v1809_v63 = vrot.slane %v1807_v46, 4  ;;  %v294_v0 = vmul.f32 %v7370_v24, %v6189_v53  ;;  %v1702_v35 = vld [vmem:[#allocation2 + $0x28] sm:$0xf]  ;;  %v433_v1 = vld [vmem:[#allocation2 + $0x6c] sm:$0x1] }
  0x8b   : > { %v709_v61 = vshrl.u32 %v6108_v51, 16  ;;  %v712_v62 = vshll.u32 %v6108_v51, 16  ;;  %v1195_v5 = vld [vmem:[#allocation2 + $0x48] sm:$0xf]  ;;  %v703_v6 = vrot.slane %v701_v58, 7  ;;  %v295_v7 = vmul.f32 %v7370_v24, %v6190_v27  ;;  %v6946_v51 = vld [vmem:[%s8857_s1 + $0x190] sm:$0xff]  }
  0x8c   : > { %4664 = vmatprep.mubr.bf16.mxu0 %v5816_v55  ;;  %v431_v8 = vsel %vm7095_vm3, 0, %v430_v47  ;;  %v6193_v9 = vunpack.c.l.bf16 %v7498_v49  ;;  %v1373_v38 = vshrl.u32 %v1195_v5, 16  ;;  %v1376_v53 = vshll.u32 %v1195_v5, 16  ;;  %v6933_v47 = vld [vmem:[#allocation2 + $0x24] sm:$0xff]  }
  0x8d   : > { %4665 = vmatmul.mubr.bf16.gmra.mrb[20].mxu0 %v6927_v41  ;;  %4786 = vmatmul.mubr.bf16.vlgmr.msra.gmra.mrb[16].mxu1 %v5843_v45  ;;  %v711_v10 = vrot.slane %v709_v61, 7  ;;  %v7531_v11 = vsel %vm7413_vm14, %v1809_v63, %v1810_v52  ;;  %432 = vst [vmem:[#allocation2 + $0x60] sm:$0x1] %v431_v8  ;;  %v706_v14 = vor.u32 %v704_v59, %v703_v6  ;;  %v707_v15 = vrot.slane %v703_v6, 4  ;;  %v963_v16 = vld [vmem:[#allocation2 + $0x54] sm:$0xf] }
  0x8e   : > { %6670 = vmatpush3.bf16.msra.mxu1 %v6928_v56  ;;  %4793 = vmatprep.mubr.bf16.mxu1 %v6931_v57  ;;  %v967_v19 = vld [vmem:[#allocation2 + $0x5c] sm:$0x1]  ;;  %v5845_v23 = vcombine.low %v7514_v60, %v7531_v11  ;;  %v330_v40 = vadd.f32 %v7386_v4, %v294_v0  ;;  %v486_v45 = vld [vmem:[#allocation2 + $0x68] sm:$0x1]  ;;  %v1196_v25 = vld [vmem:[#allocation2 + $0x4c] sm:$0xf]  ;;  %v331_v20 = vadd.f32 %v7386_v4, %v295_v7 }
  0x8f   : > { %v1197_v26 = vld [vmem:[#allocation2 + $0x50] sm:$0x1]  ;;  %v1375_v28 = vrot.slane %v1373_v38, 4  ;;  %v1378_v32 = vrot.slane %v1376_v53, 5  ;;  %v714_v33 = vor.u32 %v712_v62, %v711_v10  ;;  %6671 = vmatprep.subr.bf16.mxu1 %v6935_v29  ;;  %v1382_v36 = vshll.u32 %v1196_v25, 16  ;;  %v6952_v29 = vld [vmem:[%s8857_s1 + $0x1d8] sm:$0xff]  }
  0x90   : > { %v1386_v37 = vshrl.u32 %v1196_v25, 16  ;;  %v1392_v31 = vshll.u32 %v1197_v26, 16  ;;  %v964_v39 = vsel %vm7171_vm10, %v706_v14, %v963_v16  ;;  %v7545_v41 = vld [vmem:[#allocation2 + $0x2c] sm:$0x1]  ;;  %v716_v46 = vrot.slane %v711_v10, 4  ;;  %v6954_v6 = vld [vmem:[%s8857_s1 + $0x198] sm:$0xff]  }
  0x91   : > { %v1379_v44 = vor.u32 %v1378_v32, %v1375_v28  ;;  %v715_v43 = vsel %vm7178_vm11, %v707_v15, %v714_v33  ;;  %965 = vst [vmem:[#allocation2 + $0x54] sm:$0xf] %v964_v39  ;;  %v362_v50 = vmax.f32 %v330_v40, 0.0  ;;  %v1384_v52 = vrot.slane %v1382_v36, 5  ;;  %v7560_v5 = vld [vmem:[%s7091_s18 + $0x48] sm:$0xff]   ;;  %v6955_v10 = vld [vmem:[%s8857_s1 + $0x178] sm:$0xff]  }
  0x92   : > { %v1388_v27 = vrot.slane %v1386_v37, 4  ;;  %v1394_v54 = vrot.slane %v1392_v31, 5  ;;  %966 = vst [vmem:[#allocation2 + $0x58] sm:$0xf] %v715_v43  ;;  %6672 = vmatpush3.bf16.msra.mxu1 %v6938_v12  ;;  %v363_v55 = vmax.f32 %v331_v20, 0.0  ;;  %v968_v57 = vsel %vm7095_vm3, %v716_v46, %v967_v19  ;;  %v6932_v42 = vld [vmem:[#allocation2 + $0x48] sm:$0xff]   ;;  %6571 = vmatprep.subr.bf16.mxu0 %v6955_v10 }
  0x93   : > { %v1380_v56 = vrot.slane %v1379_v44, 4  ;;  %v487_v58 = vsel %vm7106_vm4, 0, %v486_v45  ;;  %v6109_v59 = vpack.c.bf16 %v362_v50, %v362_v50  ;;  %6673 = vmatprep.subr.bf16.mxu1 %v6944_v22  ;;  %969 = vst [vmem:[#allocation2 + $0x5c] sm:$0x1] %v968_v57  ;;  %v5830_v63 = vrot.slane %v1701_v34, 9  ;;  %6572 = vmatpush3.bf16.msra.mxu0 %v6956_v17  ;;  %v7610_v60 = vld [vmem:[%s8857_s1 + $0x200] sm:$0xff]  }
  0x94   : > { %v1389_v61 = vor.u32 %v1388_v27, %v1384_v52  ;;  %488 = vst [vmem:[#allocation2 + $0x68] sm:$0x1] %v487_v58  ;;  %v6110_v62 = vpack.c.bf16 %v363_v55, %v363_v55  ;;  %v1814_v0 = vrot.slane %v1702_v35, 5  ;;  %v1817_v53 = vrot.slane %v7545_v41, 5  ;;  %v970_v19 = vld [vmem:[#allocation2 + $0x60] sm:$0xf]  ;;  %6805 = vmatprep.subr.bf16.mxu0 %v7610_v60 }
  0x95   : > { %v1385_v7 = vsel %vm7163_vm9, %v1380_v56, %v1384_v52  ;;  %4794 = vmatmul.mubr.bf16.gmra.mrb[20].mxu1 %v5844_v48  ;;  %v718_v8 = vshrl.u32 %v6109_v59, 16  ;;  %v721_v38 = vshll.u32 %v6109_v59, 16  ;;  %v6194_v45 = vunpack.c.h.bf16 %v7498_v49  ;;  %v6939_v41 = vld [vmem:[#allocation2 + $0x30] sm:$0xff]   ;;  %v6961_v10 = vld [vmem:[%s8857_s1 + $0x1a0] sm:$0xff]  }
  0x96   : > { %v1390_v12 = vrot.slane %v1389_v61, 4  ;;  %4801 = vmatprep.mubr.bf16.mxu1 %v6933_v47  ;;  %v726_v14 = vshrl.u32 %v6110_v62, 16  ;;  %v729_v15 = vshll.u32 %v6110_v62, 16  ;;  %v7576_v16 = vsel %vm7413_vm14, %v5830_v63, %v1814_v0  ;;  %6674 = vmatpush3.bf16.msra.mxu1 %v6946_v51  ;;  %v489_v44 = vld [vmem:[#allocation2 + $0x74] sm:$0x1] }
  0x97   : > { %v720_v48 = vrot.slane %v718_v8, 7  ;;  %v1816_v40 = vrot.slane %v1814_v0, 4  ;;  %v296_v22 = vmul.f32 %v7370_v24, %v6193_v9  ;;  %6675 = vmatprep.subr.bf16.mxu1 %v6952_v29  ;;  %v434_v32 = vsel %vm7095_vm3, 0, %v433_v1  ;;  %v1704_v43 = vld [vmem:[#allocation2 + $0x30] sm:$0xe]  ;;  %v6959_v29 = vld [vmem:[%s8857_s1 + $0x1e0] sm:$0xff]  }
  0x98   : > { %v1395_v25 = vsel %vm7163_vm9, %v1390_v12, %v1394_v54  ;;  %v1198_v26 = vld [vmem:[#allocation2 + $0x54] sm:$0xf]  ;;  %v728_v28 = vrot.slane %v726_v14, 7  ;;  %v6197_v33 = vunpack.c.l.bf16 %v7560_v5  ;;  %435 = vst [vmem:[#allocation2 + $0x6c] sm:$0x1] %v434_v32  ;;  %v297_v0 = vmul.f32 %v7370_v24, %v6194_v45 }
  0x99   : > { %v5817_v20 = vcombine.low %v1385_v7, %v1395_v25  ;;  %v1199_v34 = vld [vmem:[#allocation2 + $0x58] sm:$0xf]  ;;  %v1397_v35 = vshrl.u32 %v1198_v26, 16  ;;  %v1400_v36 = vshll.u32 %v1198_v26, 16  ;;  %v723_v49 = vor.u32 %v721_v38, %v720_v48  ;;  %v1705_v27 = vld [vmem:[#allocation2 + $0x34] sm:$0xf] }
  0x9a   : > { %v1406_v9 = vshll.u32 %v1199_v34, 16  ;;  %v1410_v37 = vshrl.u32 %v1199_v34, 16  ;;  %v724_v31 = vrot.slane %v720_v48, 4  ;;  %v731_v39 = vor.u32 %v729_v15, %v728_v28  ;;  %6676 = vmatpush3.bf16.msra.mxu1 %v6954_v6  ;;  %v1200_v46 = vld [vmem:[#allocation2 + $0x5c] sm:$0x1]  ;;  %v6936_v26 = vld [vmem:[#allocation2 + $0x54] sm:$0xff]  }
  0x9b   : > { %4672 = vmatprep.mubr.bf16.mxu0 %v5817_v20  ;;  %v1399_v47 = vrot.slane %v1397_v35, 4  ;;  %v1402_v50 = vrot.slane %v1400_v36, 5  ;;  %v733_v51 = vrot.slane %v728_v28, 4  ;;  %v971_v52 = vsel %vm7171_vm10, %v723_v49, %v970_v19  ;;  %v1706_v54 = vld [vmem:[#allocation2 + $0x38] sm:$0x1]  ;;  %6677 = vmatprep.subr.bf16.mxu1 %v6959_v29  ;;  %v6943_v15 = vld [vmem:[#allocation2 + $0x3c] sm:$0xff]  }
  0x9c   : > { %4673 = vmatmul.mubr.bf16.gmra.mrb[24].mxu0 %v6932_v42  ;;  %v1408_v55 = vrot.slane %v1406_v9, 5  ;;  %v1412_v56 = vrot.slane %v1410_v37, 4  ;;  %v1416_v57 = vshll.u32 %v1200_v46, 16  ;;  %v732_v58 = vsel %vm7178_vm11, %v724_v31, %v731_v39  ;;  %972 = vst [vmem:[#allocation2 + $0x60] sm:$0xf] %v971_v52  ;;  %v7619_v42 = vld [vmem:[%s7091_s18 + $0x50] sm:$0xff]  }
  0x9d   : > { %v974_v59 = vld [vmem:[#allocation2 + $0x68] sm:$0x1]  ;;  %v1403_v61 = vor.u32 %v1402_v50, %v1399_v47  ;;  %4802 = vmatmul.mubr.bf16.gmra.mrb[24].mxu1 %v5845_v23  ;;  %973 = vst [vmem:[#allocation2 + $0x64] sm:$0xf] %v732_v58  ;;  %v1818_v63 = vsel %vm7413_vm14, %v1816_v40, %v1817_v53  ;;  %v332_v8 = vadd.f32 %v7386_v4, %v296_v22  ;;  %v490_v38 = vsel %vm7106_vm4, 0, %v489_v44 }
  0x9e   : > { %v975_v62 = vsel %vm7095_vm3, %v733_v51, %v974_v59  ;;  %v1413_v1 = vor.u32 %v1412_v56, %v1408_v55  ;;  %v1418_v6 = vrot.slane %v1416_v57, 5  ;;  %4809 = vmatprep.mubr.bf16.mxu1 %v6939_v41  ;;  %v5846_v7 = vcombine.low %v7576_v16, %v1818_v63  ;;  %491 = vst [vmem:[#allocation2 + $0x74] sm:$0x1] %v490_v38  ;;  %v6964_v22 = vld [vmem:[%s8857_s1 + $0x1e8] sm:$0xff]   ;;  %v492_v59 = vld [vmem:[#allocation2 + $0x80] sm:$0x1] }
  0x9f   : > { %976 = vst [vmem:[#allocation2 + $0x68] sm:$0x1] %v975_v62  ;;  %v1404_v11 = vrot.slane %v1403_v61, 4  ;;  %v333_v23 = vadd.f32 %v7386_v4, %v297_v0  ;;  %v5831_v53 = vrot.slane %v1704_v43, 9  ;;  %v364_v14 = vmax.f32 %v332_v8, 0.0  ;;  %6678 = vmatpush3.bf16.msra.mxu1 %v6961_v10  ;;  %v6947_v8 = vld [vmem:[#allocation2 + $0x48] sm:$0xff]  }
  0xa0   : > { %v1414_v12 = vrot.slane %v1413_v1, 4  ;;  %v1821_v16 = vrot.slane %v1705_v27, 5  ;;  %v1824_v17 = vrot.slane %v1706_v54, 5  ;;  %v6198_v40 = vunpack.c.h.bf16 %v7560_v5  ;;  %6679 = vmatprep.subr.bf16.mxu1 %v6964_v22  ;;  %v977_v58 = vld [vmem:[#allocation2 + $0x6c] sm:$0xf] }
  0xa1   : > { %v1409_v48 = vsel %vm7163_vm9, %v1404_v11, %v1408_v55  ;;  %v365_v19 = vmax.f32 %v333_v23, 0.0  ;;  %v298_v45 = vmul.f32 %v7370_v24, %v6197_v33  ;;  %v6111_v28 = vpack.c.bf16 %v364_v14, %v364_v14  ;;  %v1707_v11 = vld [vmem:[#allocation2 + $0x3c] sm:$0xe]  ;;  %v6966_v23 = vld [vmem:[%s8857_s1 + $0x1a8] sm:$0xff]   ;;  %v1708_v22 = vld [vmem:[#allocation2 + $0x40] sm:$0xf] }
  0xa2   : > { %v1419_v25 = vsel %vm7163_vm9, %v1414_v12, %v1418_v6  ;;  %v7633_v32 = vsel %vm7413_vm14, %v5831_v53, %v1821_v16  ;;  %v1823_v20 = vrot.slane %v1821_v16, 4  ;;  %v299_v33 = vmul.f32 %v7370_v24, %v6198_v40  ;;  %v436_v24 = vld [vmem:[#allocation2 + $0x78] sm:$0x1] }
  0xa3   : > { %v5818_v34 = vcombine.low %v1409_v48, %v1419_v25  ;;  %v1201_v35 = vld [vmem:[#allocation2 + $0x60] sm:$0xf]  ;;  %v6112_v5 = vpack.c.bf16 %v365_v19, %v365_v19  ;;  %v334_v36 = vadd.f32 %v7386_v4, %v298_v45  ;;  %v6201_v39 = vunpack.c.l.bf16 %v7619_v42  ;;  %6680 = vmatpush3.bf16.msra.mxu1 %v6966_v23  ;;  %v1709_v25 = vld [vmem:[#allocation2 + $0x44] sm:$0x1] }
  0xa4   : > { %v1202_v49 = vld [vmem:[#allocation2 + $0x64] sm:$0xf]  ;;  %v1421_v9 = vshrl.u32 %v1201_v35, 16  ;;  %v1424_v37 = vshll.u32 %v1201_v35, 16  ;;  %v1825_v31 = vsel %vm7413_vm14, %v1823_v20, %v1824_v17  ;;  %v735_v46 = vshrl.u32 %v6111_v28, 16 }
  0xa5   : > { %4680 = vmatprep.mubr.bf16.mxu0 %v5818_v34  ;;  %v1430_v44 = vshll.u32 %v1202_v49, 16  ;;  %v1434_v43 = vshrl.u32 %v1202_v49, 16  ;;  %4810 = vmatmul.mubr.bf16.gmra.mrb[28].mxu1 %v5846_v7  ;;  %v5847_v47 = vcombine.low %v7633_v32, %v1825_v31  ;;  %v738_v27 = vshll.u32 %v6111_v28, 16  ;;  %v981_v53 = vld [vmem:[#allocation2 + $0x74] sm:$0x1]  ;;  %v6940_v28 = vld [vmem:[#allocation2 + $0x60] sm:$0xff]  }
  0xa6   : > { %v1203_v41 = vld [vmem:[#allocation2 + $0x68] sm:$0x1]  ;;  %4681 = vmatmul.mubr.bf16.gmra.mrb[28].mxu0 %v6936_v26  ;;  %v1423_v50 = vrot.slane %v1421_v9, 4  ;;  %v1426_v51 = vrot.slane %v1424_v37, 5  ;;  %4817 = vmatprep.mubr.bf16.mxu1 %v6943_v15  ;;  %v737_v56 = vrot.slane %v735_v46, 7  ;;  %v743_v57 = vshrl.u32 %v6112_v5, 16 }
  0xa7   : > { %v1440_v52 = vshll.u32 %v1203_v41, 16  ;;  %v1432_v54 = vrot.slane %v1430_v44, 5  ;;  %v1436_v55 = vrot.slane %v1434_v43, 4  ;;  %v746_v62 = vshll.u32 %v6112_v5, 16  ;;  %v439_v35 = vld [vmem:[#allocation2 + $0x84] sm:$0x1] }
  0xa8   : > { %v1427_v29 = vor.u32 %v1426_v51, %v1423_v50  ;;  %v335_v63 = vadd.f32 %v7386_v4, %v299_v33  ;;  %v740_v1 = vor.u32 %v738_v27, %v737_v56  ;;  %v741_v6 = vrot.slane %v737_v56, 4  ;;  %v495_v9 = vld [vmem:[#allocation2 + $0x8c] sm:$0x1]  ;;  %v6969_v37 = vld [vmem:[%s8857_s1 + $0x1f0] sm:$0xff]  }
  0xa9   : > { %v1442_v61 = vrot.slane %v1440_v52, 5  ;;  %v1437_v0 = vor.u32 %v1436_v55, %v1432_v54  ;;  %v745_v7 = vrot.slane %v743_v57, 7  ;;  %v366_v10 = vmax.f32 %v334_v36, 0.0  ;;  %v1710_v52 = vld [vmem:[#allocation2 + $0x48] sm:$0xe]  ;;  %6681 = vmatprep.subr.bf16.mxu1 %v6969_v37  ;;  %v6971_v27 = vld [vmem:[%s8857_s1 + $0x1b0] sm:$0xff]  }
  0xaa   : > { %v1428_v38 = vrot.slane %v1427_v29, 4  ;;  %v367_v12 = vmax.f32 %v335_v63, 0.0  ;;  %v437_v14 = vsel %vm7095_vm3, 0, %v436_v24  ;;  %v978_v17 = vsel %vm7171_vm10, %v740_v1, %v977_v58  ;;  %v7666_v24 = vld [vmem:[%s8858_s2] ss:$0 sm:$0xff]  ;;  %6682 = vmatpush3.bf16.msra.mxu1 %v6971_v27 }
  0xab   : > { %v1438_v15 = vrot.slane %v1437_v0, 4  ;;  %v748_v16 = vor.u32 %v746_v62, %v745_v7  ;;  %v750_v4 = vrot.slane %v745_v7, 4  ;;  %438 = vst [vmem:[#allocation2 + $0x78] sm:$0x1] %v437_v14  ;;  %979 = vst [vmem:[#allocation2 + $0x6c] sm:$0xf] %v978_v17  ;;  %v6113_v40 = vpack.c.bf16 %v366_v10, %v366_v10 }
  0xac   : > { %v1433_v48 = vsel %vm7163_vm9, %v1428_v38, %v1432_v54  ;;  %v493_v19 = vsel %vm7106_vm4, 0, %v492_v59  ;;  %v6114_v45 = vpack.c.bf16 %v367_v12, %v367_v12  ;;  %v5832_v34 = vrot.slane %v1707_v11, 9  ;;  %v7001_v0 = vld [vmem:[%s8858_s2 + $0x1] ss:$0 sm:$0xff]  ;;  %v6951_v7 = vld [vmem:[#allocation2 + $0x54] sm:$0xff]  }
  0xad   : > { %v1443_v26 = vsel %vm7163_vm9, %v1438_v15, %v1442_v61  ;;  %v749_v32 = vsel %vm7178_vm11, %v741_v6, %v748_v16  ;;  %v982_v20 = vsel %vm7095_vm3, %v750_v4, %v981_v53  ;;  %4818 = vmatmul.mubr.bf16.gmra.mrb[32].mxu1 %v5847_v47  ;;  %494 = vst [vmem:[#allocation2 + $0x80] sm:$0x1] %v493_v19  ;;  %v752_v33 = vshrl.u32 %v6113_v40, 16  ;;  %v1711_v61 = vld [vmem:[#allocation2 + $0x4c] sm:$0xf] }
  0xae   : > { %v5819_v5 = vcombine.low %v1433_v48, %v1443_v26  ;;  %980 = vst [vmem:[#allocation2 + $0x70] sm:$0xf] %v749_v32  ;;  %983 = vst [vmem:[#allocation2 + $0x74] sm:$0x1] %v982_v20  ;;  %v755_v36 = vshll.u32 %v6113_v40, 16  ;;  %v760_v49 = vshrl.u32 %v6114_v45, 16  ;;  %4825 = vmatprep.mubr.bf16.mxu1 %v6947_v8  ;;  %v6202_v43 = vunpack.c.h.bf16 %v7619_v42 }
  0xaf   : > { %v763_v31 = vshll.u32 %v6114_v45, 16  ;;  %v1828_v41 = vrot.slane %v1708_v22, 5  ;;  %v1831_v44 = vrot.slane %v1709_v25, 5  ;;  %v754_v46 = vrot.slane %v752_v33, 7  ;;  %v1712_v8 = vld [vmem:[#allocation2 + $0x50] sm:$0x1] }
  0xb0   : > { %4688 = vmatprep.mubr.bf16.mxu0 %v5819_v5  ;;  %v762_v47 = vrot.slane %v760_v49, 7  ;;  %v300_v50 = vmul.f32 %v7666_v24, %v6201_v39  ;;  %v440_v51 = vsel %vm7095_vm3, 0, %v439_v35  ;;  %v301_v56 = vmul.f32 %v7666_v24, %v6202_v43  ;;  %v7692_v35 = vld [vmem:[#allocation2 + $0xc] sm:$0xe]  ;;  %v6974_v49 = vld [vmem:[%s8857_s1 + $0x1f8] sm:$0xff]  }
  0xb1   : > { %4689 = vmatmul.mubr.bf16.gmra.mrb[32].mxu0 %v6940_v28  ;;  %v1829_v54 = vsel %vm7413_vm14, %v5832_v34, %v1828_v41  ;;  %v1830_v55 = vrot.slane %v1828_v41, 4  ;;  %441 = vst [vmem:[#allocation2 + $0x84] sm:$0x1] %v440_v51  ;;  %v496_v42 = vsel %vm7106_vm4, 0, %v495_v9  ;;  %v757_v39 = vor.u32 %v755_v36, %v754_v46  ;;  %6683 = vmatprep.subr.bf16.mxu1 %v6974_v49 }
  0xb2   : > { %v758_v57 = vrot.slane %v754_v46, 4  ;;  %v765_v58 = vor.u32 %v763_v31, %v762_v47  ;;  %v767_v59 = vrot.slane %v762_v47, 4  ;;  %v984_v29 = vld [vmem:[#allocation2 + $0x78] sm:$0xf]  ;;  %497 = vst [vmem:[#allocation2 + $0x8c] sm:$0x1] %v496_v42  ;;  %v336_v1 = vadd.f32 %v7001_v0, %v300_v50 }
  0xb3   : > { %v1204_v62 = vld [vmem:[#allocation2 + $0x6c] sm:$0xf]  ;;  %v1832_v63 = vsel %vm7413_vm14, %v1830_v55, %v1831_v44  ;;  %v337_v6 = vadd.f32 %v7001_v0, %v301_v56  ;;  %v5833_v11 = vrot.slane %v1710_v52, 9  ;;  %v985_v10 = vsel %vm7171_vm10, %v757_v39, %v984_v29  ;;  %v6957_v47 = vld [vmem:[#allocation2 + $0x60] sm:$0xff]   ;;  %v2640_v39 = vld [vmem:[#allocation2 + $0x10] sm:$0xf] }
  0xb4   : > { %v1445_v23 = vshrl.u32 %v1204_v62, 16  ;;  %v1448_v38 = vshll.u32 %v1204_v62, 16  ;;  %v766_v53 = vsel %vm7178_vm11, %v758_v57, %v765_v58  ;;  %v988_v12 = vld [vmem:[#allocation2 + $0x80] sm:$0x1]  ;;  %986 = vst [vmem:[#allocation2 + $0x78] sm:$0xf] %v985_v10  ;;  %v5848_v4 = vcombine.low %v1829_v54, %v1832_v63 }
  0xb5   : > { %v1205_v14 = vld [vmem:[#allocation2 + $0x70] sm:$0xf]  ;;  %v1206_v15 = vld [vmem:[#allocation2 + $0x74] sm:$0x1]  ;;  %987 = vst [vmem:[#allocation2 + $0x7c] sm:$0xf] %v766_v53  ;;  %v989_v16 = vsel %vm7095_vm3, %v767_v59, %v988_v12 }
  0xb6   : > { %v1447_v17 = vrot.slane %v1445_v23, 4  ;;  %v1450_v48 = vrot.slane %v1448_v38, 5  ;;  %v1454_v19 = vshll.u32 %v1205_v14, 16  ;;  %v1458_v40 = vshrl.u32 %v1205_v14, 16  ;;  %990 = vst [vmem:[#allocation2 + $0x80] sm:$0x1] %v989_v16  ;;  %4826 = vmatmul.mubr.bf16.gmra.mrb[36].mxu1 %v5848_v4 }
  0xb7   : > { %v1464_v45 = vshll.u32 %v1206_v15, 16  ;;  %v368_v22 = vmax.f32 %v336_v1, 0.0  ;;  %v369_v25 = vmax.f32 %v337_v6, 0.0  ;;  %v1835_v26 = vrot.slane %v1711_v61, 5  ;;  %4833 = vmatprep.mubr.bf16.mxu1 %v6951_v7  ;;  %v6945_v27 = vld [vmem:[#allocation2 + $0x6c] sm:$0xff]  }
  0xb8   : > { %v1451_v28 = vor.u32 %v1450_v48, %v1447_v17  ;;  %v1456_v32 = vrot.slane %v1454_v19, 5  ;;  %v1460_v20 = vrot.slane %v1458_v40, 4  ;;  %v1838_v34 = vrot.slane %v1712_v8, 5  ;;  %v2641_v57 = vld [vmem:[#allocation2 + $0x14] sm:$0x1]  ;;  %v6976_v17 = vld [vmem:[%s8857_s1 + $0x1b8] sm:$0xff]  }
  0xb9   : > { %v1466_v5 = vrot.slane %v1464_v45, 5  ;;  %v6115_v33 = vpack.c.bf16 %v368_v22, %v368_v22  ;;  %v6116_v36 = vpack.c.bf16 %v369_v25, %v369_v25  ;;  %v1836_v31 = vsel %vm7413_vm14, %v5833_v11, %v1835_v26  ;;  %v1713_v63 = vld [vmem:[#allocation2 + $0x54] sm:$0xe]  ;;  %v1714_v0 = vld [vmem:[#allocation2 + $0x58] sm:$0xf]  ;;  %6684 = vmatpush3.bf16.msra.mxu1 %v6976_v17 }
  0xba   : > { %v1452_v9 = vrot.slane %v1451_v28, 4  ;;  %v1461_v37 = vor.u32 %v1460_v20, %v1456_v32  ;;  %v1837_v41 = vrot.slane %v1835_v26, 4  ;;  %v5891_v50 = vrot.slane %v7692_v35, 9  ;;  %v991_v10 = vld [vmem:[#allocation2 + $0x84] sm:$0xf] }
  0xbb   : > { %v769_v44 = vshrl.u32 %v6115_v33, 16  ;;  %v772_v43 = vshll.u32 %v6115_v33, 16  ;;  %v777_v46 = vshrl.u32 %v6116_v36, 16  ;;  %v1207_v54 = vld [vmem:[#allocation2 + $0x78] sm:$0xf]  ;;  %v780_v56 = vshll.u32 %v6116_v36, 16 }
  0xbc   : > { %v1457_v51 = vsel %vm7163_vm9, %v1452_v9, %v1456_v32  ;;  %v1462_v52 = vrot.slane %v1461_v37, 4  ;;  %v1208_v55 = vld [vmem:[#allocation2 + $0x7c] sm:$0xf]  ;;  %v1839_v42 = vsel %vm7413_vm14, %v1837_v41, %v1838_v34  ;;  %v1469_v59 = vshrl.u32 %v1207_v54, 16  ;;  %v2127_v22 = vld [vmem:[#allocation2 + $0xc] sm:$0xf] }
  0xbd   : > { %v1209_v58 = vld [vmem:[#allocation2 + $0x80] sm:$0x1]  ;;  %v1472_v29 = vshll.u32 %v1207_v54, 16  ;;  %v1478_v61 = vshll.u32 %v1208_v55, 16  ;;  %v1482_v62 = vshrl.u32 %v1208_v55, 16  ;;  %v771_v7 = vrot.slane %v769_v44, 7 }
  0xbe   : > { %v1467_v1 = vsel %vm7163_vm9, %v1462_v52, %v1466_v5  ;;  %v1488_v6 = vshll.u32 %v1209_v58, 16  ;;  %v5849_v8 = vcombine.low %v1836_v31, %v1839_v42  ;;  %v1471_v23 = vrot.slane %v1469_v59, 4  ;;  %v1715_v4 = vld [vmem:[#allocation2 + $0x5c] sm:$0x1]  ;;  %v995_v28 = vld [vmem:[#allocation2 + $0x8c] sm:$0x1] }
  0xbf   : > { %v5820_v11 = vcombine.low %v1457_v51, %v1467_v1  ;;  %v1474_v38 = vrot.slane %v1472_v29, 5  ;;  %v1480_v53 = vrot.slane %v1478_v61, 5  ;;  %v1484_v12 = vrot.slane %v1482_v62, 4  ;;  %v2128_v34 = vld [vmem:[#allocation2 + $0x10] sm:$0xf]  ;;  %v6949_v52 = vld [vmem:[#allocation2 + $0x78] sm:$0xff]  }
  0xc0   : > { %v1490_v14 = vrot.slane %v1488_v6, 5  ;;  %v774_v15 = vor.u32 %v772_v43, %v771_v7  ;;  %v775_v16 = vrot.slane %v771_v7, 4  ;;  %4834 = vmatmul.mubr.bf16.gmra.mrb[40].mxu1 %v5849_v8  ;;  %v779_v19 = vrot.slane %v777_v46, 7  ;;  %v2129_v41 = vld [vmem:[#allocation2 + $0x14] sm:$0x1]  ;;  %v6958_v59 = vld [vmem:[#allocation2 + $0x6c] sm:$0xff]  }
  0xc1   : > { %4696 = vmatprep.mubr.bf16.mxu0 %v5820_v11  ;;  %v1475_v48 = vor.u32 %v1474_v38, %v1471_v23  ;;  %4841 = vmatprep.mubr.bf16.mxu1 %v6957_v47  ;;  %v2737_v40 = vrot.slane %v2640_v39, 5  ;;  %v2740_v45 = vrot.slane %v2641_v57, 5  ;;  %v1485_v25 = vor.u32 %v1484_v12, %v1480_v53  ;;  %v2644_v29 = vld [vmem:[#allocation2 + $0x20] sm:$0x1]  ;;  %v7734_v61 = vld [vmem:[%s7091_s18 + $0x78] sm:$0xff]   ;;  %s208_s18 = scalar_lea.vmem %s8860_s4, %s5760_s9 }
  0xc2   : > { %4697 = vmatmul.mubr.bf16.gmra.mrb[36].mxu0 %v6945_v27  ;;  %v992_v26 = vsel %vm7171_vm10, %v774_v15, %v991_v10  ;;  %v5834_v32 = vrot.slane %v1713_v63, 9  ;;  %v1842_v20 = vrot.slane %v1714_v0, 5  ;;  %v782_v5 = vor.u32 %v780_v56, %v779_v19  ;;  %v2643_v56 = vld [vmem:[#allocation2 + $0x1c] sm:$0xf]  ;;  %v1716_v23 = vld [vmem:[#allocation2 + $0x60] sm:$0xe] }
  0xc3   : > { %v1476_v35 = vrot.slane %v1475_v48, 4  ;;  %v784_v33 = vrot.slane %v779_v19, 4  ;;  %993 = vst [vmem:[#allocation2 + $0x84] sm:$0xf] %v992_v26  ;;  %v7713_v36 = vsel %vm7413_vm14, %v5891_v50, %v2737_v40  ;;  %v1486_v49 = vrot.slane %v1485_v25, 4 }
  0xc4   : > { %v2739_v9 = vrot.slane %v2737_v40, 4  ;;  %v1843_v37 = vsel %vm7413_vm14, %v5834_v32, %v1842_v20  ;;  %v1844_v31 = vrot.slane %v1842_v20, 4  ;;  %v783_v43 = vsel %vm7178_vm11, %v775_v16, %v782_v5  ;;  %v2642_v50 = vld [vmem:[#allocation2 + $0x18] sm:$0xe]  ;;  %v1718_v20 = vld [vmem:[#allocation2 + $0x68] sm:$0x1] }
  0xc5   : > { %v1481_v44 = vsel %vm7163_vm9, %v1476_v35, %v1480_v53  ;;  %v996_v46 = vsel %vm7095_vm3, %v784_v33, %v995_v28  ;;  %v1845_v47 = vrot.slane %v1715_v4, 5  ;;  %v1491_v51 = vsel %vm7163_vm9, %v1486_v49, %v1490_v14  ;;  %994 = vst [vmem:[#allocation2 + $0x88] sm:$0xf] %v783_v43 }
  0xc6   : > { %997 = vst [vmem:[#allocation2 + $0x8c] sm:$0x1] %v996_v46  ;;  %v7727_v27 = vsel %vm7413_vm14, %v2739_v9, %v2740_v45  ;;  %v2176_v54 = vshrl.u32 %v2127_v22, 16  ;;  %v2179_v55 = vshll.u32 %v2127_v22, 16  ;;  %v5821_v42 = vcombine.low %v1481_v44, %v1491_v51  ;;  %v1717_v45 = vld [vmem:[#allocation2 + $0x64] sm:$0xf] }
  0xc7   : > { %v5907_v39 = vcombine.low %v7713_v36, %v7727_v27  ;;  %v1846_v57 = vsel %vm7413_vm14, %v1844_v31, %v1845_v47  ;;  %v2185_v58 = vshll.u32 %v2128_v34, 16  ;;  %v2189_v1 = vshrl.u32 %v2128_v34, 16  ;;  %v2130_v34 = vld [vmem:[#allocation2 + $0x18] sm:$0xf]  ;;  %v2131_v31 = vld [vmem:[#allocation2 + $0x1c] sm:$0xf] }
  0xc8   : > { %v5850_v62 = vcombine.low %v1843_v37, %v1846_v57  ;;  %v2178_v63 = vrot.slane %v2176_v54, 4  ;;  %v2181_v0 = vrot.slane %v2179_v55, 5  ;;  %4704 = vmatprep.mubr.bf16.mxu0 %v5821_v42  ;;  %v2195_v7 = vshll.u32 %v2129_v41, 16  ;;  %v2645_v57 = vld [vmem:[#allocation2 + $0x24] sm:$0xe] }
  0xc9   : > { %v2187_v6 = vrot.slane %v2185_v58, 5  ;;  %v5892_v8 = vrot.slane %v2642_v50, 9  ;;  %v2744_v11 = vrot.slane %v2643_v56, 5  ;;  %v2191_v10 = vrot.slane %v2189_v1, 4  ;;  %v2646_v58 = vld [vmem:[#allocation2 + $0x28] sm:$0xf] }
  0xca   : > { %4705 = vmatmul.mubr.bf16.gmra.mrb[40].mxu0 %v6949_v52  ;;  %v1210_v38 = vld [vmem:[#allocation2 + $0x84] sm:$0xf]  ;;  %4842 = vmatmul.mubr.bf16.gmra.mrb[44].mxu1 %v5850_v62  ;;  %v2182_v53 = vor.u32 %v2181_v0, %v2178_v63  ;;  %v2747_v12 = vrot.slane %v2644_v29, 5  ;;  %v6221_v14 = vunpack.c.l.bf16 %v7734_v61  ;;  %v2197_v4 = vrot.slane %v2195_v7, 5  ;;  %v2132_v52 = vld [vmem:[#allocation2 + $0x20] sm:$0x1] }
  0xcb   : > { %v1493_v15 = vshrl.u32 %v1210_v38, 16  ;;  %v1496_v16 = vshll.u32 %v1210_v38, 16  ;;  %4849 = vmatprep.mubr.bf16.mxu1 %v6958_v59  ;;  %v7739_v17 = vsel %vm7413_vm14, %v5892_v8, %v2744_v11  ;;  %v2192_v19 = vor.u32 %v2191_v10, %v2187_v6  ;;  %v2647_v0 = vld [vmem:[#allocation2 + $0x2c] sm:$0x1]  ;;  %v1722_v36 = vld [vmem:[#allocation2 + $0x78] sm:$0xe] }
  0xcc   : > { %v2183_v48 = vrot.slane %v2182_v53, 4  ;;  %v2746_v40 = vrot.slane %v2744_v11, 4  ;;  %v5835_v22 = vrot.slane %v1716_v23, 9  ;;  %v1211_v25 = vld [vmem:[#allocation2 + $0x88] sm:$0xf]  ;;  %v6222_v35 = vunpack.c.h.bf16 %v7734_v61 }
  0xcd   : > { %v1212_v26 = vld [vmem:[#allocation2 + $0x8c] sm:$0x1]  ;;  %v1495_v28 = vrot.slane %v1493_v15, 4  ;;  %v1498_v32 = vrot.slane %v1496_v16, 5  ;;  %v7743_v5 = vmul.f32 %v7666_v24, %v6221_v14  ;;  %v1502_v33 = vshll.u32 %v1211_v25, 16  ;;  %v6962_v14 = vld [vmem:[#allocation2 + $0x78] sm:$0xff]  }
  0xce   : > { %v1506_v49 = vshrl.u32 %v1211_v25, 16  ;;  %v1512_v9 = vshll.u32 %v1212_v26, 16  ;;  %v2188_v37 = vsel %vm7163_vm9, %v2183_v48, %v2187_v6  ;;  %v2193_v44 = vrot.slane %v2192_v19, 4  ;;  %v1719_v11 = vld [vmem:[#allocation2 + $0x6c] sm:$0xe] }
  0xcf   : > { %v1499_v41 = vor.u32 %v1498_v32, %v1495_v28  ;;  %v7749_v43 = vsel %vm7413_vm14, %v2746_v40, %v2747_v12  ;;  %v1849_v46 = vrot.slane %v1717_v45, 5  ;;  %v1504_v47 = vrot.slane %v1502_v33, 5  ;;  %v1720_v23 = vld [vmem:[#allocation2 + $0x70] sm:$0xf]  ;;  %v1721_v19 = vld [vmem:[#allocation2 + $0x74] sm:$0x1] }
  0xd0   : > { %v1508_v50 = vrot.slane %v1506_v49, 4  ;;  %v1514_v51 = vrot.slane %v1512_v9, 5  ;;  %v5908_v24 = vcombine.low %v7739_v17, %v7749_v43  ;;  %v2198_v55 = vsel %vm7163_vm9, %v2193_v44, %v2197_v4  ;;  %v6953_v45 = vld [vmem:[#allocation2 + $0x84] sm:$0xff]   ;;  %v2135_v44 = vld [vmem:[#allocation2 + $0x2c] sm:$0x1] }
  0xd1   : > { %v1500_v54 = vrot.slane %v1499_v41, 4  ;;  %v1850_v56 = vsel %vm7413_vm14, %v5835_v22, %v1849_v46  ;;  %v1851_v42 = vrot.slane %v1849_v46, 4  ;;  %v7757_v29 = vcombine.low %v2188_v37, %v2198_v55  ;;  %v2133_v28 = vld [vmem:[#allocation2 + $0x24] sm:$0xf]  ;;  %v2134_v49 = vld [vmem:[#allocation2 + $0x28] sm:$0xf] }
  0xd2   : > { %v1509_v59 = vor.u32 %v1508_v50, %v1504_v47  ;;  %v1852_v62 = vrot.slane %v1718_v20, 5  ;;  %v2200_v63 = vshrl.u32 %v2130_v34, 16  ;;  %v2203_v6 = vshll.u32 %v2130_v34, 16  ;;  %v2648_v46 = vld [vmem:[#allocation2 + $0x30] sm:$0xe] }
  0xd3   : > { %v1505_v1 = vsel %vm7163_vm9, %v1500_v54, %v1504_v47  ;;  %v2209_v7 = vshll.u32 %v2131_v31, 16  ;;  %v2213_v8 = vshrl.u32 %v2131_v31, 16  ;;  %v2219_v12 = vshll.u32 %v2132_v52, 16  ;;  %v2649_v54 = vld [vmem:[#allocation2 + $0x34] sm:$0xf] }
  0xd4   : > { %v1510_v38 = vrot.slane %v1509_v59, 4  ;;  %v1853_v53 = vsel %vm7413_vm14, %v1851_v42, %v1852_v62  ;;  %v2202_v10 = vrot.slane %v2200_v63, 4  ;;  %v2205_v16 = vrot.slane %v2203_v6, 5  ;;  %v2650_v55 = vld [vmem:[#allocation2 + $0x38] sm:$0x1] }
  0xd5   : > { %v5851_v15 = vcombine.low %v1850_v56, %v1853_v53  ;;  %v2211_v4 = vrot.slane %v2209_v7, 5  ;;  %v2215_v48 = vrot.slane %v2213_v8, 4  ;;  %v2221_v22 = vrot.slane %v2219_v12, 5  ;;  %v1723_v27 = vld [vmem:[#allocation2 + $0x7c] sm:$0xf] }
  0xd6   : > { %v1515_v40 = vsel %vm7163_vm9, %v1510_v38, %v1514_v51  ;;  %v5893_v25 = vrot.slane %v2645_v57, 9  ;;  %v2751_v26 = vrot.slane %v2646_v58, 5  ;;  %v2206_v20 = vor.u32 %v2205_v16, %v2202_v10  ;;  %v1724_v10 = vld [vmem:[#allocation2 + $0x80] sm:$0x1]  ;;  %v1739_v61 = vld [vmem:[#allocation2 + $0xbc] sm:$0x1] }
  0xd7   : > { %v5822_v32 = vcombine.low %v1505_v1, %v1515_v40  ;;  %4850 = vmatmul.mubr.bf16.gmra.mrb[48].mxu1 %v5851_v15  ;;  %v2216_v34 = vor.u32 %v2215_v48, %v2211_v4  ;;  %v2754_v33 = vrot.slane %v2647_v0, 5  ;;  %v5836_v31 = vrot.slane %v1719_v11, 9  ;;  %v6963_v1 = vld [vmem:[#allocation2 + $0x84] sm:$0xff]  }
  0xd8   : > { %4857 = vmatprep.mubr.bf16.mxu1 %v6962_v14  ;;  %v7767_v9 = vsel %vm7413_vm14, %v5893_v25, %v2751_v26  ;;  %v2753_v37 = vrot.slane %v2751_v26, 4  ;;  %v1856_v41 = vrot.slane %v1720_v23, 5  ;;  %v2207_v47 = vrot.slane %v2206_v20, 4 }
  0xd9   : > { %4712 = vmatprep.mubr.bf16.mxu0 %v5822_v32  ;;  %v2217_v50 = vrot.slane %v2216_v34, 4  ;;  %v1859_v51 = vrot.slane %v1721_v19, 5  ;;  %v2224_v52 = vshrl.u32 %v2133_v28, 16  ;;  %v2227_v58 = vshll.u32 %v2133_v28, 16  ;;  %v6965_v32 = vld [vmem:[%s8857_s1 + $0x208] sm:$0xff]  }
  0xda   : > { %4713 = vmatmul.mubr.bf16.gmra.mrb[44].mxu0 %v6953_v45  ;;  %v7771_v56 = vsel %vm7413_vm14, %v2753_v37, %v2754_v33  ;;  %v1857_v42 = vsel %vm7413_vm14, %v5836_v31, %v1856_v41  ;;  %v1858_v57 = vrot.slane %v1856_v41, 4  ;;  %v2212_v59 = vsel %vm7163_vm9, %v2207_v47, %v2211_v4  ;;  %v2136_v4 = vld [vmem:[#allocation2 + $0x30] sm:$0xf]  ;;  %v2138_v34 = vld [vmem:[#allocation2 + $0x38] sm:$0x1] }
  0xdb   : > { %4946 = vmatprep.mubr.bf16.mxu0 %v5907_v39  ;;  %v2222_v62 = vsel %vm7163_vm9, %v2217_v50, %v2221_v22  ;;  %v5909_v63 = vcombine.low %v7767_v9, %v7771_v56  ;;  %v2226_v0 = vrot.slane %v2224_v52, 4  ;;  %v2229_v8 = vrot.slane %v2227_v58, 5  ;;  %v2137_v22 = vld [vmem:[#allocation2 + $0x34] sm:$0xf]  ;;  %v2651_v33 = vld [vmem:[#allocation2 + $0x3c] sm:$0xe] }
  0xdc   : > { %v7784_v6 = vcombine.low %v2212_v59, %v2222_v62  ;;  %v1860_v7 = vsel %vm7413_vm14, %v1858_v57, %v1859_v51  ;;  %v2233_v11 = vshll.u32 %v2134_v49, 16  ;;  %v2237_v23 = vshrl.u32 %v2134_v49, 16  ;;  %v1726_v59 = vld [vmem:[#allocation2 + $0x88] sm:$0xf]  ;;  %v1727_v62 = vld [vmem:[#allocation2 + $0x8c] sm:$0x1] }
  0xdd   : > { %v5852_v39 = vcombine.low %v1857_v42, %v1860_v7  ;;  %v2243_v38 = vshll.u32 %v2135_v44, 16  ;;  %v5894_v53 = vrot.slane %v2648_v46, 9  ;;  %v2230_v12 = vor.u32 %v2229_v8, %v2226_v0  ;;  %v2652_v44 = vld [vmem:[#allocation2 + $0x40] sm:$0xf]  ;;  %v2653_v46 = vld [vmem:[#allocation2 + $0x44] sm:$0x1] }
  0xde   : > { %v2235_v14 = vrot.slane %v2233_v11, 5  ;;  %v2758_v15 = vrot.slane %v2649_v54, 5  ;;  %v2761_v16 = vrot.slane %v2650_v55, 5  ;;  %v2239_v48 = vrot.slane %v2237_v23, 4  ;;  %v6967_v54 = vld [vmem:[#allocation2 + $0x90] sm:$0xff]   ;;  %v6978_v9 = vld [vmem:[%s8857_s1 + $0x220] sm:$0xff]  }
  0xdf   : > { %4858 = vmatmul.mubr.bf16.gmra.mrb[52].mxu1 %v5852_v39  ;;  %v2245_v19 = vrot.slane %v2243_v38, 5  ;;  %v5837_v40 = vrot.slane %v1722_v36, 9  ;;  %v1863_v45 = vrot.slane %v1723_v27, 5  ;;  %v2231_v25 = vrot.slane %v2230_v12, 4  ;;  %v1725_v55 = vld [vmem:[#allocation2 + $0x84] sm:$0xe] }
  0xe0   : > { %4865 = vmatprep.mubr.bf16.mxu1 %v6963_v1  ;;  %v7790_v26 = vsel %vm7413_vm14, %v5894_v53, %v2758_v15  ;;  %v2760_v28 = vrot.slane %v2758_v15, 4  ;;  %v1866_v20 = vrot.slane %v1724_v10, 5  ;;  %v2240_v49 = vor.u32 %v2239_v48, %v2235_v14  ;;  %v2139_v11 = vld [vmem:[#allocation2 + $0x3c] sm:$0xf]  ;;  %v2140_v27 = vld [vmem:[#allocation2 + $0x40] sm:$0xf] }
  0xe1   : > { %v1864_v37 = vsel %vm7413_vm14, %v5837_v40, %v1863_v45  ;;  %v1865_v31 = vrot.slane %v1863_v45, 4  ;;  %v2248_v41 = vshrl.u32 %v2136_v4, 16  ;;  %v2236_v47 = vsel %vm7163_vm9, %v2231_v25, %v2235_v14 }
  0xe2   : > { %4947 = vmatmul.mubr.bf16.vlgmr.msra.gmra.mrb[48].mxu0 %v7757_v29  ;;  %v7802_v50 = vsel %vm7413_vm14, %v2760_v28, %v2761_v16  ;;  %v2251_v51 = vshll.u32 %v2136_v4, 16  ;;  %v2257_v52 = vshll.u32 %v2137_v22, 16  ;;  %v2241_v42 = vrot.slane %v2240_v49, 4  ;;  %v2141_v16 = vld [vmem:[#allocation2 + $0x44] sm:$0x1] }
  0xe3   : > { %4954 = vmatprep.mubr.bf16.mxu0 %v5908_v24  ;;  %6806 = vmatpush3.bf16.msra.mxu0 %v7610_v60  ;;  %v5910_v29 = vcombine.low %v7790_v26, %v7802_v50  ;;  %v1867_v57 = vsel %vm7413_vm14, %v1865_v31, %v1866_v20  ;;  %v2250_v58 = vrot.slane %v2248_v41, 4  ;;  %v2261_v8 = vshrl.u32 %v2137_v22, 16  ;;  %v6970_v60 = vld [vmem:[%s8857_s1 + $0x210] sm:$0xff]   ;;  %v2654_v4 = vld [vmem:[#allocation2 + $0x48] sm:$0xe]  ;;  %v6975_v22 = vld [vmem:[%s8857_s1 + $0x218] sm:$0xff]  }
  0xe4   : > { %6807 = vmatprep.subr.bf16.mxu0 %v6965_v32  ;;  %v5853_v0 = vcombine.low %v1864_v37, %v1867_v57  ;;  %v2253_v1 = vrot.slane %v2251_v51, 5  ;;  %v2259_v7 = vrot.slane %v2257_v52, 5  ;;  %v2246_v17 = vsel %vm7163_vm9, %v2241_v42, %v2245_v19  ;;  %v2656_v41 = vld [vmem:[#allocation2 + $0x50] sm:$0x1]  ;;  %v1729_v52 = vld [vmem:[#allocation2 + $0x94] sm:$0xf] }
  0xe5   : > { %v2267_v43 = vshll.u32 %v2138_v34, 16  ;;  %v5895_v24 = vrot.slane %v2651_v33, 9  ;;  %v2765_v36 = vrot.slane %v2652_v44, 5  ;;  %v7817_v39 = vcombine.low %v2236_v47, %v2246_v17  ;;  %v2655_v34 = vld [vmem:[#allocation2 + $0x4c] sm:$0xf] }
  0xe6   : > { %v2254_v23 = vor.u32 %v2253_v1, %v2250_v58  ;;  %v2263_v38 = vrot.slane %v2261_v8, 4  ;;  %v2768_v53 = vrot.slane %v2653_v46, 5  ;;  %v5838_v15 = vrot.slane %v1725_v55, 9  ;;  %v1728_v44 = vld [vmem:[#allocation2 + $0x90] sm:$0xe] }
  0xe7   : > { %4866 = vmatmul.mubr.bf16.gmra.mrb[56].mxu1 %v5853_v0  ;;  %v2269_v10 = vrot.slane %v2267_v43, 5  ;;  %6808 = vmatpush3.bf16.msra.mxu0 %v6965_v32  ;;  %v7821_v12 = vsel %vm7413_vm14, %v5895_v24, %v2765_v36  ;;  %v2767_v14 = vrot.slane %v2765_v36, 4  ;;  %v1870_v40 = vrot.slane %v1726_v59, 5  ;;  %v2142_v59 = vld [vmem:[#allocation2 + $0x48] sm:$0xf]  ;;  %v6968_v0 = vld [vmem:[#allocation2 + $0x9c] sm:$0xff]  }
  0xe8   : > { %v2255_v48 = vrot.slane %v2254_v23, 4  ;;  %v2264_v19 = vor.u32 %v2263_v38, %v2259_v7  ;;  %4873 = vmatprep.mubr.bf16.mxu1 %v6967_v54  ;;  %v1873_v45 = vrot.slane %v1727_v62, 5  ;;  %6809 = vmatprep.subr.bf16.mxu0 %v6970_v60  ;;  %v2272_v28 = vshrl.u32 %v2139_v11, 16  ;;  %v1730_v54 = vld [vmem:[#allocation2 + $0x98] sm:$0x1] }
  0xe9   : > { %v7828_v25 = vsel %vm7413_vm14, %v2767_v14, %v2768_v53  ;;  %v2275_v32 = vshll.u32 %v2139_v11, 16  ;;  %v2281_v20 = vshll.u32 %v2140_v27, 16  ;;  %v1871_v31 = vsel %vm7413_vm14, %v5838_v15, %v1870_v40  ;;  %v6981_v14 = vld [vmem:[%s8857_s1 + $0x228] sm:$0xff]  }
  0xea   : > { %4955 = vmatmul.mubr.bf16.gmra.mrb[52].mxu0 %v7784_v6  ;;  %v2260_v33 = vsel %vm7163_vm9, %v2255_v48, %v2259_v7  ;;  %v2265_v49 = vrot.slane %v2264_v19, 4  ;;  %v5911_v37 = vcombine.low %v7821_v12, %v7828_v25  ;;  %v1872_v46 = vrot.slane %v1870_v40, 4  ;;  %v2143_v7 = vld [vmem:[#allocation2 + $0x4c] sm:$0xf]  ;;  %v2657_v40 = vld [vmem:[#allocation2 + $0x54] sm:$0xe] }
  0xeb   : > { %4962 = vmatprep.mubr.bf16.mxu0 %v5909_v63  ;;  %v2274_v47 = vrot.slane %v2272_v28, 4  ;;  %v2277_v51 = vrot.slane %v2275_v32, 5  ;;  %v7840_v6 = vrot.slane %v2281_v20, 5  ;;  %6810 = vmatpush3.bf16.msra.mxu0 %v6970_v60  ;;  %v2285_v42 = vshrl.u32 %v2140_v27, 16  ;;  %v2658_v20 = vld [vmem:[#allocation2 + $0x58] sm:$0xf] }
  0xec   : > { %v2270_v55 = vsel %vm7163_vm9, %v2265_v49, %v2269_v10  ;;  %v2291_v57 = vshll.u32 %v2141_v16, 16  ;;  %v5896_v58 = vrot.slane %v2654_v4, 9  ;;  %6811 = vmatprep.subr.bf16.mxu0 %v6975_v22  ;;  %v1874_v63 = vsel %vm7413_vm14, %v1872_v46, %v1873_v45  ;;  %v2144_v4 = vld [vmem:[#allocation2 + $0x50] sm:$0x1] }
  0xed   : > { %v7847_v56 = vcombine.low %v2260_v33, %v2270_v55  ;;  %v2278_v62 = vor.u32 %v2277_v51, %v2274_v47  ;;  %v2772_v1 = vrot.slane %v2655_v34, 5  ;;  %v5854_v8 = vcombine.low %v1871_v31, %v1874_v63  ;;  %v2659_v34 = vld [vmem:[#allocation2 + $0x5c] sm:$0x1]  ;;  %v6984_v33 = vld [vmem:[%s8857_s1 + $0x230] sm:$0xff]  }
  0xee   : > { %v2287_v11 = vrot.slane %v2285_v42, 4  ;;  %v2293_v60 = vrot.slane %v2291_v57, 5  ;;  %v2775_v17 = vrot.slane %v2656_v41, 5  ;;  %v5839_v27 = vrot.slane %v1728_v44, 9  ;;  %v1731_v44 = vld [vmem:[#allocation2 + $0x9c] sm:$0xe] }
  0xef   : > { %v2279_v43 = vrot.slane %v2278_v62, 4  ;;  %v7853_v24 = vsel %vm7413_vm14, %v5896_v58, %v2772_v1  ;;  %v2774_v36 = vrot.slane %v2772_v1, 4  ;;  %6812 = vmatpush3.bf16.msra.mxu0 %v6975_v22  ;;  %4874 = vmatmul.mubr.bf16.gmra.mrb[60].mxu1 %v5854_v8  ;;  %v1877_v38 = vrot.slane %v1729_v52, 5  ;;  %v1732_v52 = vld [vmem:[#allocation2 + $0xa0] sm:$0xf]  ;;  %v6972_v42 = vld [vmem:[#allocation2 + $0xa8] sm:$0xff]  }
  0xf0   : > { %v2288_v23 = vor.u32 %v2287_v11, %v7840_v6  ;;  %v1880_v53 = vrot.slane %v1730_v54, 5  ;;  %v2296_v10 = vshrl.u32 %v2142_v59, 16  ;;  %6813 = vmatprep.subr.bf16.mxu0 %v6978_v9  ;;  %4881 = vmatprep.mubr.bf16.mxu1 %v6968_v0  ;;  %v2299_v48 = vshll.u32 %v2142_v59, 16  ;;  %v1733_v54 = vld [vmem:[#allocation2 + $0xa4] sm:$0x1] }
  0xf1   : > { %v2284_v15 = vsel %vm7163_vm9, %v2279_v43, %v7840_v6  ;;  %v7864_v16 = vsel %vm7413_vm14, %v2774_v36, %v2775_v17  ;;  %v2305_v19 = vshll.u32 %v2143_v7, 16  ;;  %v1878_v28 = vsel %vm7413_vm14, %v5839_v27, %v1877_v38  ;;  %v2145_v57 = vld [vmem:[#allocation2 + $0x54] sm:$0xf]  ;;  %v2146_v58 = vld [vmem:[#allocation2 + $0x58] sm:$0xf] }
  0xf2   : > { %4963 = vmatmul.mubr.bf16.gmra.mrb[56].mxu0 %v7817_v39  ;;  %v2289_v45 = vrot.slane %v2288_v23, 4  ;;  %v5912_v22 = vcombine.low %v7853_v24, %v7864_v16  ;;  %v1879_v32 = vrot.slane %v1877_v38, 4  ;;  %v2298_v49 = vrot.slane %v2296_v10, 4  ;;  %v2147_v17 = vld [vmem:[#allocation2 + $0x5c] sm:$0x1] }
  0xf3   : > { %4970 = vmatprep.mubr.bf16.mxu0 %v5910_v29  ;;  %v2301_v39 = vrot.slane %v2299_v48, 5  ;;  %v2307_v31 = vrot.slane %v2305_v19, 5  ;;  %v2309_v41 = vshrl.u32 %v2143_v7, 16  ;;  %6814 = vmatpush3.bf16.msra.mxu0 %v6978_v9  ;;  %v2315_v51 = vshll.u32 %v2144_v4, 16  ;;  %v2660_v27 = vld [vmem:[#allocation2 + $0x60] sm:$0xe] }
  0xf4   : > { %v2294_v46 = vsel %vm7163_vm9, %v2289_v45, %v2293_v60  ;;  %v1881_v47 = vsel %vm7413_vm14, %v1879_v32, %v1880_v53  ;;  %v5897_v6 = vrot.slane %v2657_v40, 9  ;;  %6815 = vmatprep.subr.bf16.mxu0 %v6981_v14  ;;  %v2779_v9 = vrot.slane %v2658_v20, 5  ;;  %v6987_v23 = vld [vmem:[%s8857_s1 + $0x238] sm:$0xff]   ;;  %v2662_v4 = vld [vmem:[#allocation2 + $0x68] sm:$0x1] }
  0xf5   : > { %v7881_v55 = vcombine.low %v2284_v15, %v2294_v46  ;;  %v5855_v26 = vcombine.low %v1878_v28, %v1881_v47  ;;  %v2302_v50 = vor.u32 %v2301_v39, %v2298_v49  ;;  %v2311_v29 = vrot.slane %v2309_v41, 4  ;;  %v2661_v15 = vld [vmem:[#allocation2 + $0x64] sm:$0xf]  ;;  %v7002_v24 = vld [vmem:[%s8858_s2] ss:$0 sm:$0xff] }
  0xf6   : > { %v2317_v59 = vrot.slane %v2315_v51, 5  ;;  %v2782_v63 = vrot.slane %v2659_v34, 5  ;;  %v5840_v62 = vrot.slane %v1731_v44, 9  ;;  %v1884_v7 = vrot.slane %v1732_v52, 5  ;;  %v6973_v34 = vld [vmem:[#allocation2 + $0xb4] sm:$0xff]  }
  0xf7   : > { %v2303_v0 = vrot.slane %v2302_v50, 4  ;;  %v2312_v1 = vor.u32 %v2311_v29, %v2307_v31  ;;  %v1887_v8 = vrot.slane %v1733_v54, 5  ;;  %6816 = vmatpush3.bf16.msra.mxu0 %v6981_v14  ;;  %4882 = vmatmul.mubr.bf16.gmra.mrb[64].mxu1 %v5855_v26  ;;  %v7885_v11 = vsel %vm7413_vm14, %v5897_v6, %v2779_v9  ;;  %v1734_v44 = vld [vmem:[#allocation2 + $0xa8] sm:$0xe]  ;;  %v1735_v51 = vld [vmem:[#allocation2 + $0xac] sm:$0xf] }
  0xf8   : > { %v2781_v60 = vrot.slane %v2779_v9, 4  ;;  %v2320_v43 = vshrl.u32 %v2145_v57, 16  ;;  %v2323_v36 = vshll.u32 %v2145_v57, 16  ;;  %6817 = vmatprep.subr.bf16.mxu0 %v6984_v33  ;;  %4889 = vmatprep.mubr.bf16.mxu1 %v6972_v42  ;;  %v1885_v10 = vsel %vm7413_vm14, %v5840_v62, %v1884_v7  ;;  %v1736_v54 = vld [vmem:[#allocation2 + $0xb0] sm:$0x1] }
  0xf9   : > { %v2308_v38 = vsel %vm7163_vm9, %v2303_v0, %v2307_v31  ;;  %v2313_v53 = vrot.slane %v2312_v1, 4  ;;  %v1886_v14 = vrot.slane %v1884_v7, 4  ;;  %v2329_v45 = vshll.u32 %v2146_v58, 16  ;;  %v2150_v1 = vld [vmem:[#allocation2 + $0x68] sm:$0x1] }
  0xfa   : > { %4971 = vmatmul.mubr.bf16.gmra.mrb[60].mxu0 %v7847_v56  ;;  %v7897_v48 = vsel %vm7413_vm14, %v2781_v60, %v2782_v63  ;;  %v2322_v19 = vrot.slane %v2320_v43, 4  ;;  %v2325_v40 = vrot.slane %v2323_v36, 5  ;;  %v2333_v20 = vshrl.u32 %v2146_v58, 16  ;;  %v2148_v58 = vld [vmem:[#allocation2 + $0x60] sm:$0xf] }
  0xfb   : > { %4978 = vmatprep.mubr.bf16.mxu0 %v5911_v37  ;;  %v2318_v28 = vsel %vm7163_vm9, %v2313_v53, %v2317_v59  ;;  %v5913_v32 = vcombine.low %v7885_v11, %v7897_v48  ;;  %v1888_v56 = vsel %vm7413_vm14, %v1886_v14, %v1887_v8  ;;  %6818 = vmatpush3.bf16.msra.mxu0 %v6984_v33  ;;  %v2331_v41 = vrot.slane %v2329_v45, 5  ;;  %v2149_v59 = vld [vmem:[#allocation2 + $0x64] sm:$0xf]  ;;  %v454_v53 = vld [vmem:[#allocation2 + $0xc0] sm:$0x1] }
  0xfc   : > { %v7908_v49 = vcombine.low %v2308_v38, %v2318_v28  ;;  %v5856_v39 = vcombine.low %v1885_v10, %v1888_v56  ;;  %v2326_v31 = vor.u32 %v2325_v40, %v2322_v19  ;;  %6819 = vmatprep.subr.bf16.mxu0 %v6987_v23  ;;  %v2335_v25 = vrot.slane %v2333_v20, 4  ;;  %v2664_v19 = vld [vmem:[#allocation2 + $0x70] sm:$0xf]  ;;  %v2665_v20 = vld [vmem:[#allocation2 + $0x74] sm:$0x1] }
  0xfd   : > { %v2339_v37 = vshll.u32 %v2147_v17, 16  ;;  %v5898_v46 = vrot.slane %v2660_v27, 9  ;;  %v2786_v47 = vrot.slane %v2661_v15, 5  ;;  %v2789_v52 = vrot.slane %v2662_v4, 5 }
  0xfe   : > { %v2327_v6 = vrot.slane %v2326_v31, 4  ;;  %v5841_v26 = vrot.slane %v1734_v44, 9  ;;  %v1891_v50 = vrot.slane %v1735_v51, 5  ;;  %v2336_v33 = vor.u32 %v2335_v25, %v2331_v41  ;;  %v1737_v44 = vld [vmem:[#allocation2 + $0xb4] sm:$0xe] }
  0xff   : > { %v2341_v29 = vrot.slane %v2339_v37, 5  ;;  %v7914_v42 = vsel %vm7413_vm14, %v5898_v46, %v2786_v47  ;;  %v2788_v57 = vrot.slane %v2786_v47, 4  ;;  %6820 = vmatpush3.bf16.msra.mxu0 %v6987_v23  ;;  %4890 = vmatmul.mubr.bf16.gmra.mrb[68].mxu1 %v5856_v39  ;;  %v1894_v0 = vrot.slane %v1736_v54, 5  ;;  %v1738_v25 = vld [vmem:[#allocation2 + $0xb8] sm:$0xf] }
 0x100   : > { %v2332_v9 = vsel %vm7163_vm9, %v2327_v6, %v2331_v41  ;;  %v1892_v63 = vsel %vm7413_vm14, %v5841_v26, %v1891_v50  ;;  %v1893_v62 = vrot.slane %v1891_v50, 4  ;;  %v2337_v7 = vrot.slane %v2336_v33, 4  ;;  %4897 = vmatprep.mubr.bf16.mxu1 %v6973_v34  ;;  %v2151_v50 = vld [vmem:[#allocation2 + $0x6c] sm:$0xf] }
 0x101   : > { %v7910_v12 = vpop.f32.mrb[0].mxu0  ;;  %v7922_v8 = vsel %vm7413_vm14, %v2788_v57, %v2789_v52  ;;  %v2344_v60 = vshrl.u32 %v2148_v58, 16  ;;  %v2347_v17 = vshll.u32 %v2148_v58, 16  ;;  %v2353_v23 = vshll.u32 %v2149_v59, 16 }
 0x102   : > { %v7924_v43 = vpop.f32.mrb[1].mxu0  ;;  %4979 = vmatmul.mubr.bf16.gmra.mrb[64].mxu0 %v7881_v55  ;;  %v5914_v36 = vcombine.low %v7914_v42, %v7922_v8  ;;  %v1895_v27 = vsel %vm7413_vm14, %v1893_v62, %v1894_v0  ;;  %v2357_v38 = vshrl.u32 %v2149_v59, 16  ;;  %v2342_v10 = vsel %vm7163_vm9, %v2337_v7, %v2341_v29  ;;  %v2663_v55 = vld [vmem:[#allocation2 + $0x6c] sm:$0xe] }
 0x103   : > { %4986 = vmatprep.mubr.bf16.mxu0 %v5912_v22  ;;  %v5857_v14 = vcombine.low %v1892_v63, %v1895_v27  ;;  %v2346_v15 = vrot.slane %v2344_v60, 4  ;;  %v2349_v4 = vrot.slane %v2347_v17, 5  ;;  %v7936_v40 = vcombine.low %v2332_v9, %v2342_v10  ;;  %v7938_v34 = vpop.f32.mrb[2].mxu0  ;;  %v7003_v22 = vld [vmem:[%s8858_s2 + $0x1] ss:$0 sm:$0xff] }
 0x104   : > { %v2355_v45 = vrot.slane %v2353_v23, 5  ;;  %v2359_v28 = vrot.slane %v2357_v38, 4  ;;  %v2363_v56 = vshll.u32 %v2150_v1, 16  ;;  %v311_v16 = vmul.f32 %v7002_v24, %v6222_v35  ;;  %v7951_v37 = vpop.f32.mrb[3].mxu0  ;;  %v2152_v38 = vld [vmem:[#allocation2 + $0x70] sm:$0xf] }
 0x105   : > { %v2350_v39 = vor.u32 %v2349_v4, %v2346_v15  ;;  %v346_v31 = vadd.f32 %v7003_v22, %v7743_v5  ;;  %v455_v41 = vsel %vm7095_vm3, 0, %v454_v53  ;;  %v5899_v51 = vrot.slane %v2663_v55, 9  ;;  %v2666_v4 = vld [vmem:[#allocation2 + $0x78] sm:$0xe] }
 0x106   : > { %v2360_v46 = vor.u32 %v2359_v28, %v2355_v45  ;;  %v2365_v47 = vrot.slane %v2363_v56, 5  ;;  %456 = vst [vmem:[#allocation2 + $0xc0] sm:$0x1] %v455_v41  ;;  %v2793_v6 = vrot.slane %v2664_v19, 5  ;;  %v347_v52 = vadd.f32 %v7003_v22, %v311_v16  ;;  %v2667_v19 = vld [vmem:[#allocation2 + $0x7c] sm:$0xf] }
 0x107   : > { %v2351_v35 = vrot.slane %v2350_v39, 4  ;;  %v378_v54 = vmax.f32 %v346_v31, 0.0  ;;  %v2796_v26 = vrot.slane %v2665_v20, 5  ;;  %4898 = vmatmul.mubr.bf16.gmra.mrb[72].mxu1 %v5857_v14  ;;  %v5842_v57 = vrot.slane %v1737_v44, 9 }
 0x108   : > { %v2361_v5 = vrot.slane %v2360_v46, 4  ;;  %v7955_v33 = vsel %vm7413_vm14, %v5899_v51, %v2793_v6  ;;  %v2795_v29 = vrot.slane %v2793_v6, 4  ;;  %v379_v59 = vmax.f32 %v347_v52, 0.0  ;;  %v3073_v46 = vld [vmem:[#allocation2 + $0x1c] sm:$0xf] }
 0x109   : > { %v2356_v58 = vsel %vm7163_vm9, %v2351_v35, %v2355_v45  ;;  %v6125_v9 = vpack.c.bf16 %v378_v54, %v378_v54  ;;  %v1898_v63 = vrot.slane %v1738_v25, 5  ;;  %v1901_v1 = vrot.slane %v1739_v61, 5  ;;  %v2668_v45 = vld [vmem:[#allocation2 + $0x80] sm:$0x1]  ;;  %v3072_v25 = vld [vmem:[#allocation2 + $0x18] sm:$0xf] }
 0x10a   : > { %4987 = vmatmul.mubr.bf16.gmra.mrb[68].mxu0 %v7908_v49  ;;  %v2366_v62 = vsel %vm7163_vm9, %v2361_v5, %v2365_v47  ;;  %v7964_v0 = vsel %vm7413_vm14, %v2795_v29, %v2796_v26  ;;  %v2368_v7 = vshrl.u32 %v2151_v50, 16  ;;  %v6126_v17 = vpack.c.bf16 %v379_v59, %v379_v59  ;;  %v2153_v49 = vld [vmem:[#allocation2 + $0x74] sm:$0x1]  ;;  %v3074_v59 = vld [vmem:[#allocation2 + $0x20] sm:$0x1] }
 0x10b   : > { %4994 = vmatprep.mubr.bf16.mxu0 %v5913_v32  ;;  %v7969_v60 = vcombine.low %v2356_v58, %v2366_v62  ;;  %v854_v27 = vshrl.u32 %v6125_v9, 16  ;;  %v857_v23 = vshll.u32 %v6125_v9, 16  ;;  %v5915_v53 = vcombine.low %v7955_v33, %v7964_v0 }
 0x10c   : > { %v7975_v10 = vsel %vm7413_vm14, %v5842_v57, %v1898_v63  ;;  %v1900_v14 = vrot.slane %v1898_v63, 4  ;;  %v2370_v15 = vrot.slane %v2368_v7, 4  ;;  %v862_v11 = vshrl.u32 %v6126_v17, 16 }
 0x10d   : > { %v856_v55 = vrot.slane %v854_v27, 7  ;;  %v865_v48 = vshll.u32 %v6126_v17, 16  ;;  %v2371_v32 = vshll.u32 %v2151_v50, 16  ;;  %v1026_v28 = vld [vmem:[#allocation2 + $0xc0] sm:$0xf]  ;;  %v2377_v20 = vshll.u32 %v2152_v38, 16 }
 0x10e   : > { %v7979_v56 = vsel %vm7413_vm14, %v1900_v14, %v1901_v1  ;;  %v2381_v39 = vshrl.u32 %v2152_v38, 16  ;;  %v2387_v24 = vshll.u32 %v2153_v49, 16  ;;  %v7983_v41 = vrot.slane %v862_v11, 7  ;;  %v2154_v27 = vld [vmem:[#allocation2 + $0x78] sm:$0xf] }
 0x10f   : > { %v859_v22 = vor.u32 %v857_v23, %v856_v55  ;;  %v860_v31 = vrot.slane %v856_v55, 4  ;;  %v5858_v44 = vcombine.low %v7975_v10, %v7979_v56  ;;  %v2373_v47 = vrot.slane %v2371_v32, 5  ;;  %v2155_v38 = vld [vmem:[#allocation2 + $0x7c] sm:$0xf]  ;;  %v2156_v55 = vld [vmem:[#allocation2 + $0x80] sm:$0x1] }
 0x110   : > { %v2379_v51 = vrot.slane %v2377_v20, 5  ;;  %v2383_v6 = vrot.slane %v2381_v39, 4  ;;  %v2389_v61 = vrot.slane %v2387_v24, 5  ;;  %v867_v35 = vor.u32 %v865_v48, %v7983_v41  ;;  %v2669_v11 = vld [vmem:[#allocation2 + $0x84] sm:$0xe] }
 0x111   : > { %v7981_v16 = vpop.f32.mrb[4].mxu0  ;;  %v1027_v54 = vsel %vm7171_vm10, %v859_v22, %v1026_v28  ;;  %v5900_v26 = vrot.slane %v2666_v4, 9  ;;  %v2374_v50 = vor.u32 %v2373_v47, %v2370_v15  ;;  %v2800_v29 = vrot.slane %v2667_v19, 5  ;;  %v2670_v20 = vld [vmem:[#allocation2 + $0x88] sm:$0xf] }
 0x112   : > { %4995 = vmatmul.mubr.bf16.gmra.mrb[72].mxu0 %v7936_v40  ;;  %1028 = vst [vmem:[#allocation2 + $0xc0] sm:$0xf] %v1027_v54  ;;  %v2384_v5 = vor.u32 %v2383_v6, %v2379_v51  ;;  %v2803_v57 = vrot.slane %v2668_v45, 5  ;;  %v868_v58 = vsel %vm7178_vm11, %v860_v31, %v867_v35  ;;  %v3121_v9 = vshrl.u32 %v3072_v25, 16  ;;  %v2671_v39 = vld [vmem:[#allocation2 + $0x8c] sm:$0x1] }
 0x113   : > { %5002 = vmatprep.mubr.bf16.mxu0 %v5914_v36  ;;  %v3124_v63 = vshll.u32 %v3072_v25, 16  ;;  %v3130_v21 = vshll.u32 %v3073_v46, 16  ;;  %1029 = vst [vmem:[#allocation2 + $0xc4] sm:$0xf] %v868_v58  ;;  %v2375_v40 = vrot.slane %v2374_v50, 4  ;;  %v8001_v7 = vsel %vm7413_vm14, %v5900_v26, %v2800_v29  ;;  %v8021_v54 = vpop.f32.mrb[5].mxu0 }
 0x114   : > { %v2385_v1 = vrot.slane %v2384_v5, 4  ;;  %v2802_v17 = vrot.slane %v2800_v29, 4  ;;  %v3123_v8 = vrot.slane %v3121_v9, 4  ;;  %v3134_v23 = vshrl.u32 %v3073_v46, 16  ;;  %v3075_v24 = vld [vmem:[#allocation2 + $0x24] sm:$0xf] }
 0x115   : > { %v7997_v62 = vpop.f32.mrb[0].mxu1  ;;  %v3126_v30 = vrot.slane %v3124_v63, 5  ;;  %v3132_v36 = vrot.slane %v3130_v21, 5  ;;  %v2380_v49 = vsel %vm7163_vm9, %v2375_v40, %v2379_v51  ;;  %v3140_v4 = vshll.u32 %v3074_v59, 16 }
 0x116   : > { %v8003_v42 = vpop.f32.mrb[1].mxu1  ;;  %v2390_v14 = vsel %vm7163_vm9, %v2385_v1, %v2389_v61  ;;  %v8011_v15 = vsel %vm7413_vm14, %v2802_v17, %v2803_v57  ;;  %v3136_v28 = vrot.slane %v3134_v23, 4  ;;  %v2392_v25 = vshrl.u32 %v2154_v27, 16  ;;  %v3076_v57 = vld [vmem:[#allocation2 + $0x28] sm:$0xf] }
 0x117   : > { %v8013_v48 = vpop.f32.mrb[2].mxu1  ;;  %v8015_v32 = vcombine.low %v2380_v49, %v2390_v14  ;;  %v5916_v19 = vcombine.low %v8001_v7, %v8011_v15  ;;  %v3127_v45 = vor.u32 %v3126_v30, %v3123_v8  ;;  %v3142_v31 = vrot.slane %v3140_v4, 5  ;;  %v3077_v23 = vld [vmem:[#allocation2 + $0x2c] sm:$0x1]  ;;  %v2157_v14 = vld [vmem:[#allocation2 + $0x84] sm:$0xf] }
 0x118   : > { %v8019_v22 = vpop.f32.mrb[3].mxu1  ;;  %v2395_v46 = vshll.u32 %v2154_v27, 16  ;;  %v2401_v47 = vshll.u32 %v2155_v38, 16  ;;  %v3137_v6 = vor.u32 %v3136_v28, %v3132_v36  ;;  %v2405_v61 = vshrl.u32 %v2155_v38, 16  ;;  %v8029_v27 = vpop.f32.mrb[6].mxu0 }
 0x119   : > { %v3128_v51 = vrot.slane %v3127_v45, 4  ;;  %v2411_v35 = vshll.u32 %v2156_v55, 16  ;;  %v2394_v26 = vrot.slane %v2392_v25, 4  ;;  %v5901_v29 = vrot.slane %v2669_v11, 9  ;;  %v2158_v4 = vld [vmem:[#allocation2 + $0x88] sm:$0xf] }
 0x11a   : > { %5003 = vmatmul.mubr.bf16.gmra.mrb[76].mxu0 %v7969_v60  ;;  %v2397_v50 = vrot.slane %v2395_v46, 5  ;;  %v2403_v5 = vrot.slane %v2401_v47, 5  ;;  %v6977_v58 = vld [vmem:[#allocation2 + $0xc0] sm:$0xff]   ;;  %v3138_v9 = vrot.slane %v3137_v6, 4  ;;  %v2407_v63 = vrot.slane %v2405_v61, 4  ;;  %v8050_v61 = vpop.f32.mrb[7].mxu0 }
 0x11b   : > { %5010 = vmatprep.mubr.bf16.mxu0 %v5915_v53  ;;  %v3133_v59 = vsel %vm7163_vm9, %v3128_v51, %v3132_v36  ;;  %v2413_v21 = vrot.slane %v2411_v35, 5  ;;  %v2807_v1 = vrot.slane %v2670_v20, 5  ;;  %v2810_v17 = vrot.slane %v2671_v39, 5  ;;  %4905 = vmatprep.mubr.bf16.mxu1 %v6977_v58  ;;  %v2159_v20 = vld [vmem:[#allocation2 + $0x8c] sm:$0x1] }
 0x11c   : > { %v2398_v40 = vor.u32 %v2397_v50, %v2394_v26  ;;  %v3145_v60 = vshrl.u32 %v3075_v24, 16  ;;  %v3143_v8 = vsel %vm7163_vm9, %v3138_v9, %v3142_v31  ;;  %v2408_v30 = vor.u32 %v2407_v63, %v2403_v5  ;;  %4906 = vmatmul.mubr.bf16.gmra.mrb[76].mxu1 %v5858_v44  ;;  %v2673_v51 = vld [vmem:[#allocation2 + $0x94] sm:$0xf]  ;;  %v2674_v6 = vld [vmem:[#allocation2 + $0x98] sm:$0x1] }
 0x11d   : > { %v3148_v33 = vshll.u32 %v3075_v24, 16  ;;  %v3154_v0 = vshll.u32 %v3076_v57, 16  ;;  %v5939_v53 = vcombine.low %v3133_v59, %v3143_v8  ;;  %v8038_v38 = vsel %vm7413_vm14, %v5901_v29, %v2807_v1  ;;  %v2672_v24 = vld [vmem:[#allocation2 + $0x90] sm:$0xe]  ;;  %v6979_v26 = vld [vmem:[#allocation2 + $0x18] sm:$0xff]  }
 0x11e   : > { %v2399_v36 = vrot.slane %v2398_v40, 4  ;;  %v2809_v49 = vrot.slane %v2807_v1, 4  ;;  %v2409_v55 = vrot.slane %v2408_v30, 4  ;;  %v3147_v11 = vrot.slane %v3145_v60, 4 }
 0x11f   : > { %v3150_v45 = vrot.slane %v3148_v33, 5  ;;  %v3156_v28 = vrot.slane %v3154_v0, 5  ;;  %5107 = vmatprep.mubr.bf16.mxu1 %v5939_v53  ;;  %v3158_v56 = vshrl.u32 %v3076_v57, 16  ;;  %v3164_v44 = vshll.u32 %v3077_v23, 16  ;;  %v3079_v33 = vld [vmem:[#allocation2 + $0x34] sm:$0xf] }
 0x120   : > { %v2404_v39 = vsel %vm7163_vm9, %v2399_v36, %v2403_v5  ;;  %v8044_v10 = vsel %vm7413_vm14, %v2809_v49, %v2810_v17  ;;  %v2414_v31 = vsel %vm7163_vm9, %v2409_v55, %v2413_v21  ;;  %v2416_v47 = vshrl.u32 %v2157_v14, 16  ;;  %v3078_v17 = vld [vmem:[#allocation2 + $0x30] sm:$0xf] }
 0x121   : > { %v5917_v25 = vcombine.low %v8038_v38, %v8044_v10  ;;  %v3151_v46 = vor.u32 %v3150_v45, %v3147_v11  ;;  %v5884_v35 = vcombine.low %v2404_v39, %v2414_v31  ;;  %v3160_v50 = vrot.slane %v3158_v56, 4  ;;  %v2160_v39 = vld [vmem:[#allocation2 + $0x90] sm:$0xf] }
 0x122   : > { %5011 = vmatmul.mubr.bf16.gmra.mrb[80].mxu0 %v8015_v32  ;;  %v3166_v5 = vrot.slane %v3164_v44, 5  ;;  %v2419_v29 = vshll.u32 %v2157_v14, 16  ;;  %v2418_v58 = vrot.slane %v2416_v47, 4  ;;  %v2425_v59 = vshll.u32 %v2158_v4, 16  ;;  %v2161_v47 = vld [vmem:[#allocation2 + $0x94] sm:$0xf] }
 0x123   : > { %5018 = vmatprep.mubr.bf16.mxu0 %v5916_v19  ;;  %v3152_v57 = vrot.slane %v3151_v46, 4  ;;  %v2429_v9 = vshrl.u32 %v2158_v4, 16  ;;  %v3161_v63 = vor.u32 %v3160_v50, %v3156_v28  ;;  %v2435_v40 = vshll.u32 %v2159_v20, 16  ;;  %v3080_v4 = vld [vmem:[#allocation2 + $0x38] sm:$0x1] }
 0x124   : > { %v2421_v21 = vrot.slane %v2419_v29, 5  ;;  %v5902_v1 = vrot.slane %v2672_v24, 9  ;;  %v8056_v60 = vpop.f32.mrb[8].mxu0  ;;  %v2427_v8 = vrot.slane %v2425_v59, 5  ;;  %v2814_v23 = vrot.slane %v2673_v51, 5  ;;  %5108 = vmatmul.mubr.bf16.vlgmr.msra.gmra.mrb[80].mxu1 %v6979_v26  ;;  %v6980_v24 = vld [vmem:[#allocation2 + $0x24] sm:$0xff]  }
 0x125   : > { %v3157_v32 = vsel %vm7163_vm9, %v3152_v57, %v3156_v28  ;;  %v2431_v30 = vrot.slane %v2429_v9, 4  ;;  %v8060_v7 = vpop.f32.mrb[9].mxu0  ;;  %v3162_v15 = vrot.slane %v3161_v63, 4  ;;  %v2437_v0 = vrot.slane %v2435_v40, 5  ;;  %v2675_v40 = vld [vmem:[#allocation2 + $0x9c] sm:$0xe] }
 0x126   : > { %v2422_v19 = vor.u32 %v2421_v21, %v2418_v58  ;;  %v2817_v53 = vrot.slane %v2674_v6, 5  ;;  %v8062_v36 = vpop.f32.mrb[10].mxu0  ;;  %v8066_v49 = vsel %vm7413_vm14, %v5902_v1, %v2814_v23  ;;  %v2816_v14 = vrot.slane %v2814_v23, 4  ;;  %v2676_v1 = vld [vmem:[#allocation2 + $0xa0] sm:$0xf] }
 0x127   : > { %v2432_v38 = vor.u32 %v2431_v30, %v2427_v8  ;;  %v3169_v55 = vshrl.u32 %v3078_v17, 16  ;;  %v3167_v11 = vsel %vm7163_vm9, %v3162_v15, %v3166_v5  ;;  %v3172_v28 = vshll.u32 %v3078_v17, 16  ;;  %v8070_v10 = vpop.f32.mrb[11].mxu0  ;;  %v2162_v5 = vld [vmem:[#allocation2 + $0x98] sm:$0x1] }
 0x128   : > { %v2423_v45 = vrot.slane %v2422_v19, 4  ;;  %v3178_v20 = vshll.u32 %v3079_v33, 16  ;;  %v5940_v56 = vcombine.low %v3157_v32, %v3167_v11  ;;  %v2818_v31 = vsel %vm7413_vm14, %v2816_v14, %v2817_v53  ;;  %v2677_v23 = vld [vmem:[#allocation2 + $0xa4] sm:$0x1] }
 0x129   : > { %v2433_v44 = vrot.slane %v2432_v38, 4  ;;  %v3171_v46 = vrot.slane %v3169_v55, 4  ;;  %v5918_v6 = vcombine.low %v8066_v49, %v2818_v31  ;;  %v3174_v26 = vrot.slane %v3172_v28, 5 }
 0x12a   : > { %5019 = vmatmul.mubr.bf16.gmra.mrb[84].mxu0 %v5884_v35  ;;  %v2428_v51 = vsel %vm7163_vm9, %v2423_v45, %v2427_v8  ;;  %v3180_v50 = vrot.slane %v3178_v20, 5  ;;  %5115 = vmatprep.mubr.bf16.mxu1 %v5940_v56  ;;  %v3182_v57 = vshrl.u32 %v3079_v33, 16  ;;  %v3188_v58 = vshll.u32 %v3080_v4, 16  ;;  %v3082_v4 = vld [vmem:[#allocation2 + $0x40] sm:$0xf] }
 0x12b   : > { %5026 = vmatprep.mubr.bf16.mxu0 %v5917_v25  ;;  %v2438_v29 = vsel %vm7163_vm9, %v2433_v44, %v2437_v0  ;;  %v2440_v59 = vshrl.u32 %v2160_v39, 16  ;;  %v3175_v63 = vor.u32 %v3174_v26, %v3171_v46  ;;  %v2443_v21 = vshll.u32 %v2160_v39, 16  ;;  %v3081_v0 = vld [vmem:[#allocation2 + $0x3c] sm:$0xf]  ;;  %v8079_v55 = vpop.f32.mrb[4].mxu1  ;;  %v6982_v44 = vld [vmem:[#allocation2 + $0x30] sm:$0xff]  }
 0x12c   : > { %v5885_v9 = vcombine.low %v2428_v51, %v2438_v29  ;;  %v2449_v35 = vshll.u32 %v2161_v47, 16  ;;  %v3184_v17 = vrot.slane %v3182_v57, 4  ;;  %v3190_v32 = vrot.slane %v3188_v58, 5  ;;  %5116 = vmatmul.mubr.bf16.gmra.mrb[84].mxu1 %v6980_v24 }
 0x12d   : > { %v2442_v8 = vrot.slane %v2440_v59, 4  ;;  %v2453_v30 = vshrl.u32 %v2161_v47, 16  ;;  %v3176_v25 = vrot.slane %v3175_v63, 4  ;;  %v2445_v15 = vrot.slane %v2443_v21, 5  ;;  %v3083_v47 = vld [vmem:[#allocation2 + $0x44] sm:$0x1] }
 0x12e   : > { %v2451_v19 = vrot.slane %v2449_v35, 5  ;;  %v2459_v53 = vshll.u32 %v2162_v5, 16  ;;  %v3185_v33 = vor.u32 %v3184_v17, %v3180_v50  ;;  %v5903_v49 = vrot.slane %v2675_v40, 9  ;;  %v2163_v59 = vld [vmem:[#allocation2 + $0x9c] sm:$0xf] }
 0x12f   : > { %v2455_v38 = vrot.slane %v2453_v30, 4  ;;  %v2821_v14 = vrot.slane %v2676_v1, 5  ;;  %v3181_v11 = vsel %vm7163_vm9, %v3176_v25, %v3180_v50  ;;  %v2446_v45 = vor.u32 %v2445_v15, %v2442_v8  ;;  %v2164_v40 = vld [vmem:[#allocation2 + $0xa0] sm:$0xf]  ;;  %v8091_v1 = vpop.f32.mrb[5].mxu1 }
 0x130   : > { %v2461_v28 = vrot.slane %v2459_v53, 5  ;;  %v2824_v20 = vrot.slane %v2677_v23, 5  ;;  %v3186_v39 = vrot.slane %v3185_v33, 4  ;;  %v3193_v51 = vshrl.u32 %v3081_v0, 16  ;;  %v2165_v30 = vld [vmem:[#allocation2 + $0xa4] sm:$0x1] }
 0x131   : > { %v2456_v56 = vor.u32 %v2455_v38, %v2451_v19  ;;  %v2822_v24 = vsel %vm7413_vm14, %v5903_v49, %v2821_v14  ;;  %v2823_v31 = vrot.slane %v2821_v14, 4  ;;  %v2447_v46 = vrot.slane %v2446_v45, 4  ;;  %v8095_v23 = vpop.f32.mrb[6].mxu1 }
 0x132   : > { %5027 = vmatmul.mubr.bf16.gmra.mrb[88].mxu0 %v5885_v9  ;;  %v3196_v26 = vshll.u32 %v3081_v0, 16  ;;  %v3202_v5 = vshll.u32 %v3082_v4, 16  ;;  %v3191_v50 = vsel %vm7163_vm9, %v3186_v39, %v3190_v32  ;;  %v3206_v58 = vshrl.u32 %v3082_v4, 16  ;;  %v2678_v4 = vld [vmem:[#allocation2 + $0xa8] sm:$0xe] }
 0x133   : > { %5034 = vmatprep.mubr.bf16.mxu0 %v5918_v6  ;;  %v2457_v29 = vrot.slane %v2456_v56, 4  ;;  %v2825_v57 = vsel %vm7413_vm14, %v2823_v31, %v2824_v20  ;;  %v5941_v63 = vcombine.low %v3181_v11, %v3191_v50  ;;  %v2452_v21 = vsel %vm7163_vm9, %v2447_v46, %v2451_v19  ;;  %v8097_v19 = vpop.f32.mrb[7].mxu1  ;;  %v2679_v11 = vld [vmem:[#allocation2 + $0xac] sm:$0xf]  ;;  %v2680_v56 = vld [vmem:[#allocation2 + $0xb0] sm:$0x1] }
 0x134   : > { %v5919_v9 = vcombine.low %v2822_v24, %v2825_v57  ;;  %v3195_v35 = vrot.slane %v3193_v51, 4  ;;  %v3198_v17 = vrot.slane %v3196_v26, 5  ;;  %v3204_v32 = vrot.slane %v3202_v5, 5  ;;  %v6983_v51 = vld [vmem:[#allocation2 + $0x3c] sm:$0xff]   ;;  %v3084_v26 = vld [vmem:[#allocation2 + $0x48] sm:$0xf] }
 0x135   : > { %v2462_v6 = vsel %vm7163_vm9, %v2457_v29, %v2461_v28  ;;  %v3208_v8 = vrot.slane %v3206_v58, 4  ;;  %5123 = vmatprep.mubr.bf16.mxu1 %v5941_v63  ;;  %v3212_v15 = vshll.u32 %v3083_v47, 16  ;;  %v2464_v53 = vshrl.u32 %v2163_v59, 16  ;;  %v3085_v57 = vld [vmem:[#allocation2 + $0x4c] sm:$0xf] }
 0x136   : > { %v5886_v25 = vcombine.low %v2452_v21, %v2462_v6  ;;  %v2467_v0 = vshll.u32 %v2163_v59, 16  ;;  %5124 = vmatmul.mubr.bf16.gmra.mrb[88].mxu1 %v6982_v44  ;;  %v3199_v33 = vor.u32 %v3198_v17, %v3195_v35  ;;  %v2473_v49 = vshll.u32 %v2164_v40, 16  ;;  %v8099_v58 = vpop.f32.mrb[12].mxu0 }
 0x137   : > { %v3209_v38 = vor.u32 %v3208_v8, %v3204_v32  ;;  %v2477_v14 = vshrl.u32 %v2164_v40, 16  ;;  %v3214_v45 = vrot.slane %v3212_v15, 5  ;;  %v2466_v28 = vrot.slane %v2464_v53, 4  ;;  %v3086_v40 = vld [vmem:[#allocation2 + $0x50] sm:$0x1]  ;;  %v8105_v6 = vpop.f32.mrb[13].mxu0 }
 0x138   : > { %v2469_v20 = vrot.slane %v2467_v0, 5  ;;  %v2483_v39 = vshll.u32 %v2165_v30, 16  ;;  %v3200_v24 = vrot.slane %v3199_v33, 4  ;;  %v2475_v46 = vrot.slane %v2473_v49, 5  ;;  %v2166_v33 = vld [vmem:[#allocation2 + $0xa8] sm:$0xf] }
 0x139   : > { %v3210_v31 = vrot.slane %v3209_v38, 4  ;;  %v2479_v47 = vrot.slane %v2477_v14, 4  ;;  %v5904_v50 = vrot.slane %v2678_v4, 9  ;;  %v2828_v29 = vrot.slane %v2679_v11, 5  ;;  %v2167_v4 = vld [vmem:[#allocation2 + $0xac] sm:$0xf] }
 0x13a   : > { %5035 = vmatmul.mubr.bf16.gmra.mrb[92].mxu0 %v5886_v25  ;;  %v2470_v5 = vor.u32 %v2469_v20, %v2466_v28  ;;  %v2485_v44 = vrot.slane %v2483_v39, 5  ;;  %v3205_v59 = vsel %vm7163_vm9, %v3200_v24, %v3204_v32  ;;  %v2831_v35 = vrot.slane %v2680_v56, 5  ;;  %v2168_v11 = vld [vmem:[#allocation2 + $0xb0] sm:$0x1]  ;;  %v2681_v56 = vld [vmem:[#allocation2 + $0xb4] sm:$0xe] }
 0x13b   : > { %5042 = vmatprep.mubr.bf16.mxu0 %v5919_v9  ;;  %v3215_v63 = vsel %vm7163_vm9, %v3210_v31, %v3214_v45  ;;  %v2480_v21 = vor.u32 %v2479_v47, %v2475_v46  ;;  %v2829_v30 = vsel %vm7413_vm14, %v5904_v50, %v2828_v29  ;;  %v2830_v25 = vrot.slane %v2828_v29, 4  ;;  %v2682_v24 = vld [vmem:[#allocation2 + $0xb8] sm:$0xf] }
 0x13c   : > { %v5942_v17 = vcombine.low %v3205_v59, %v3215_v63  ;;  %v2471_v8 = vrot.slane %v2470_v5, 4  ;;  %v3217_v53 = vshrl.u32 %v3084_v26, 16  ;;  %v3220_v9 = vshll.u32 %v3084_v26, 16  ;;  %v2683_v5 = vld [vmem:[#allocation2 + $0xbc] sm:$0x1] }
 0x13d   : > { %v2481_v15 = vrot.slane %v2480_v21, 4  ;;  %v3226_v0 = vshll.u32 %v3085_v57, 16  ;;  %v2832_v38 = vsel %vm7413_vm14, %v2830_v25, %v2831_v35  ;;  %v3230_v49 = vshrl.u32 %v3085_v57, 16 }
 0x13e   : > { %5131 = vmatprep.mubr.bf16.mxu1 %v5942_v17  ;;  %v2476_v32 = vsel %vm7163_vm9, %v2471_v8, %v2475_v46  ;;  %v3236_v14 = vshll.u32 %v3086_v40, 16  ;;  %v5920_v28 = vcombine.low %v2829_v30, %v2832_v38  ;;  %v3219_v20 = vrot.slane %v3217_v53, 4  ;;  %v3087_v17 = vld [vmem:[#allocation2 + $0x54] sm:$0xf] }
 0x13f   : > { %v2486_v45 = vsel %vm7163_vm9, %v2481_v15, %v2485_v44  ;;  %5132 = vmatmul.mubr.bf16.gmra.mrb[92].mxu1 %v6983_v51  ;;  %v3222_v39 = vrot.slane %v3220_v9, 5  ;;  %v3228_v47 = vrot.slane %v3226_v0, 5  ;;  %v3232_v26 = vrot.slane %v3230_v49, 4  ;;  %v8115_v50 = vpop.f32.mrb[8].mxu1 }
 0x140   : > { %v5887_v31 = vcombine.low %v2476_v32, %v2486_v45  ;;  %v3238_v46 = vrot.slane %v3236_v14, 5  ;;  %v2488_v57 = vshrl.u32 %v2166_v33, 16  ;;  %v2491_v59 = vshll.u32 %v2166_v33, 16  ;;  %v8117_v21 = vpop.f32.mrb[9].mxu1  ;;  %v6985_v33 = vld [vmem:[#allocation2 + $0x48] sm:$0xff]  }
 0x141   : > { %v3223_v29 = vor.u32 %v3222_v39, %v3219_v20  ;;  %v2497_v63 = vshll.u32 %v2167_v4, 16  ;;  %v3233_v51 = vor.u32 %v3232_v26, %v3228_v47  ;;  %v2501_v44 = vshrl.u32 %v2167_v4, 16  ;;  %v8119_v8 = vpop.f32.mrb[10].mxu1  ;;  %v2169_v26 = vld [vmem:[#allocation2 + $0xb4] sm:$0xf] }
 0x142   : > { %5043 = vmatmul.mubr.bf16.gmra.mrb[96].mxu0 %v5887_v31  ;;  %v2507_v35 = vshll.u32 %v2168_v11, 16  ;;  %v5905_v40 = vrot.slane %v2681_v56, 9  ;;  %v2490_v25 = vrot.slane %v2488_v57, 4  ;;  %v2493_v15 = vrot.slane %v2491_v59, 5  ;;  %v3088_v11 = vld [vmem:[#allocation2 + $0x58] sm:$0xf] }
 0x143   : > { %5050 = vmatprep.mubr.bf16.mxu0 %v5920_v28  ;;  %v3224_v30 = vrot.slane %v3223_v29, 4  ;;  %v2499_v53 = vrot.slane %v2497_v63, 5  ;;  %v3234_v9 = vrot.slane %v3233_v51, 4  ;;  %v2503_v0 = vrot.slane %v2501_v44, 4  ;;  %v3089_v31 = vld [vmem:[#allocation2 + $0x5c] sm:$0x1] }
 0x144   : > { %v2509_v32 = vrot.slane %v2507_v35, 5  ;;  %v2835_v38 = vrot.slane %v2682_v24, 5  ;;  %v2494_v14 = vor.u32 %v2493_v15, %v2490_v25  ;;  %v2838_v4 = vrot.slane %v2683_v5, 5  ;;  %v8127_v29 = vpop.f32.mrb[11].mxu1  ;;  %v2170_v63 = vld [vmem:[#allocation2 + $0xb8] sm:$0xf] }
 0x145   : > { %v3229_v49 = vsel %vm7163_vm9, %v3224_v30, %v3228_v47  ;;  %v3241_v45 = vshrl.u32 %v3087_v17, 16  ;;  %v3239_v20 = vsel %vm7163_vm9, %v3234_v9, %v3238_v46  ;;  %v2504_v28 = vor.u32 %v2503_v0, %v2499_v53  ;;  %v8129_v5 = vpop.f32.mrb[14].mxu0  ;;  %v2171_v30 = vld [vmem:[#allocation2 + $0xbc] sm:$0x1] }
 0x146   : > { %v2836_v39 = vsel %vm7413_vm14, %v5905_v40, %v2835_v38  ;;  %v2837_v56 = vrot.slane %v2835_v38, 4  ;;  %v5943_v24 = vcombine.low %v3229_v49, %v3239_v20  ;;  %v2495_v57 = vrot.slane %v2494_v14, 4  ;;  %v8133_v40 = vpop.f32.mrb[15].mxu0 }
 0x147   : > { %v3243_v59 = vrot.slane %v3241_v45, 4  ;;  %v3244_v47 = vshll.u32 %v3087_v17, 16  ;;  %v2505_v51 = vrot.slane %v2504_v28, 4  ;;  %v3250_v44 = vshll.u32 %v3088_v11, 16  ;;  %v510_v17 = vld [vmem:[#allocation2 + $0xc8] sm:$0x1] }
 0x148   : > { %v2839_v46 = vsel %vm7413_vm14, %v2837_v56, %v2838_v4  ;;  %v3254_v35 = vshrl.u32 %v3088_v11, 16  ;;  %5139 = vmatprep.mubr.bf16.mxu1 %v5943_v24  ;;  %v2500_v25 = vsel %vm7163_vm9, %v2495_v57, %v2499_v53  ;;  %v3260_v0 = vshll.u32 %v3089_v31, 16  ;;  %v8139_v45 = vpop.f32.mrb[16].mxu0  ;;  %v2684_v24 = vld [vmem:[#allocation2 + $0xc0] sm:$0xe] }
 0x149   : > { %v5921_v15 = vcombine.low %v2836_v39, %v2839_v46  ;;  %v3246_v9 = vrot.slane %v3244_v47, 5  ;;  %v2510_v38 = vsel %vm7163_vm9, %v2505_v51, %v2509_v32  ;;  %5140 = vmatmul.mubr.bf16.gmra.mrb[96].mxu1 %v6985_v33  ;;  %v3252_v49 = vrot.slane %v3250_v44, 5  ;;  %v2685_v31 = vld [vmem:[#allocation2 + $0xc4] sm:$0xf]  ;;  %v8141_v47 = vpop.f32.mrb[17].mxu0 }
 0x14a   : > { %v3256_v14 = vrot.slane %v3254_v35, 4  ;;  %v2512_v4 = vshrl.u32 %v2169_v26, 16  ;;  %v5888_v11 = vcombine.low %v2500_v25, %v2510_v38  ;;  %v3262_v28 = vrot.slane %v3260_v0, 5  ;;  %v3090_v44 = vld [vmem:[#allocation2 + $0x60] sm:$0xf]  ;;  %v6986_v38 = vld [vmem:[#allocation2 + $0x54] sm:$0xff]  }
 0x14b   : > { %v3247_v20 = vor.u32 %v3246_v9, %v3243_v59  ;;  %v2515_v56 = vshll.u32 %v2169_v26, 16  ;;  %v2521_v39 = vshll.u32 %v2170_v63, 16  ;;  %v2525_v57 = vshrl.u32 %v2170_v63, 16 }
 0x14c   : > { %v3257_v52 = vor.u32 %v3256_v14, %v3252_v49  ;;  %v2514_v53 = vrot.slane %v2512_v4, 4  ;;  %5051 = vmatmul.mubr.bf16.gmra.mrb[100].mxu0 %v5888_v11  ;;  %v2531_v51 = vshll.u32 %v2171_v30, 16  ;;  %v511_v46 = vsel %vm7106_vm4, 0, %v510_v17  ;;  %v3091_v4 = vld [vmem:[#allocation2 + $0x64] sm:$0xf] }
 0x14d   : > { %v3248_v32 = vrot.slane %v3247_v20, 4  ;;  %v2517_v33 = vrot.slane %v2515_v56, 5  ;;  %5058 = vmatprep.mubr.bf16.mxu0 %v5921_v15  ;;  %v2523_v35 = vrot.slane %v2521_v39, 5  ;;  %v2527_v26 = vrot.slane %v2525_v57, 4  ;;  %512 = vst [vmem:[#allocation2 + $0xc8] sm:$0x1] %v511_v46 }
 0x14e   : > { %v3258_v59 = vrot.slane %v3257_v52, 4  ;;  %v5906_v25 = vrot.slane %v2684_v24, 9  ;;  %v2533_v0 = vrot.slane %v2531_v51, 5  ;;  %v2842_v14 = vrot.slane %v2685_v31, 5  ;;  %v3092_v17 = vld [vmem:[#allocation2 + $0x68] sm:$0x1] }
 0x14f   : > { %v3253_v63 = vsel %vm7163_vm9, %v3248_v32, %v3252_v49  ;;  %v2518_v9 = vor.u32 %v2517_v33, %v2514_v53  ;;  %v2528_v11 = vor.u32 %v2527_v26, %v2523_v35  ;;  %v3265_v20 = vshrl.u32 %v3090_v44, 16  ;;  %v2172_v52 = vld [vmem:[#allocation2 + $0xc0] sm:$0xf]  ;;  %v2173_v46 = vld [vmem:[#allocation2 + $0xc4] sm:$0xf] }
 0x150   : > { %v3263_v30 = vsel %vm7163_vm9, %v3258_v59, %v3262_v28  ;;  %v3268_v15 = vshll.u32 %v3090_v44, 16  ;;  %v8151_v24 = vsel %vm7413_vm14, %v5906_v25, %v2842_v14  ;;  %v8153_v49 = vrot.slane %v2842_v14, 4  ;;  %v8157_v59 = vpop.f32.mrb[18].mxu0 }
 0x151   : > { %v5944_v56 = vcombine.low %v3253_v63, %v3263_v30  ;;  %v2519_v39 = vrot.slane %v2518_v9, 4  ;;  %v2529_v53 = vrot.slane %v2528_v11, 4  ;;  %v3267_v57 = vrot.slane %v3265_v20, 4 }
 0x152   : > { %v3270_v31 = vrot.slane %v3268_v15, 5  ;;  %v3274_v32 = vshll.u32 %v3091_v4, 16  ;;  %v3278_v33 = vshrl.u32 %v3091_v4, 16  ;;  %v3284_v51 = vshll.u32 %v3092_v17, 16 }
 0x153   : > { %5147 = vmatprep.mubr.bf16.mxu1 %v5944_v56  ;;  %v2524_v28 = vsel %vm7163_vm9, %v2519_v39, %v2523_v35  ;;  %v2536_v44 = vshrl.u32 %v2172_v52, 16  ;;  %v2534_v26 = vsel %vm7163_vm9, %v2529_v53, %v2533_v0  ;;  %v2539_v9 = vshll.u32 %v2172_v52, 16  ;;  %v8161_v56 = vpop.f32.mrb[19].mxu0  ;;  %v3093_v0 = vld [vmem:[#allocation2 + $0x6c] sm:$0xf] }
 0x154   : > { %5148 = vmatmul.mubr.bf16.gmra.mrb[100].mxu1 %v6986_v38  ;;  %v3271_v25 = vor.u32 %v3270_v31, %v3267_v57  ;;  %v3276_v63 = vrot.slane %v3274_v32, 5  ;;  %v5889_v14 = vcombine.low %v2524_v28, %v2534_v26  ;;  %v1030_v30 = vld [vmem:[#allocation2 + $0xc8] sm:$0x1]  ;;  %v3280_v11 = vrot.slane %v3278_v33, 4  ;;  %v6988_v26 = vld [vmem:[#allocation2 + $0x60] sm:$0xff]  }
 0x155   : > { %v3286_v20 = vrot.slane %v3284_v51, 5  ;;  %v2538_v15 = vrot.slane %v2536_v44, 4  ;;  %v8875_v35 = vrot.slane %v7983_v41, 4  ;;  %v2541_v39 = vrot.slane %v2539_v9, 5  ;;  %v3094_v41 = vld [vmem:[#allocation2 + $0x70] sm:$0xf] }
 0x156   : > { %v3272_v17 = vrot.slane %v3271_v25, 4  ;;  %v2545_v18 = vshll.u32 %v2173_v46, 16  ;;  %5059 = vmatmul.mubr.bf16.gmra.mrb[104].mxu0 %v5889_v14  ;;  %v3281_v38 = vor.u32 %v3280_v11, %v3276_v63  ;;  %v2549_v52 = vshrl.u32 %v2173_v46, 16  ;;  %v3095_v51 = vld [vmem:[#allocation2 + $0x74] sm:$0x1] }
 0x157   : > { %v1031_v4 = vsel %vm7095_vm3, %v8875_v35, %v1030_v30  ;;  %v8169_v53 = vadd.f32 %v7924_v43, %v7910_v12  ;;  %v8173_v57 = vadd.f32 %v7951_v37, %v7938_v34  ;;  %v2542_v32 = vor.u32 %v2541_v39, %v2538_v15  ;;  %v3584_v46 = vld [vmem:[#allocation2 + $0x18] sm:$0xe]  ;;  %v3585_v25 = vld [vmem:[#allocation2 + $0x1c] sm:$0xf] }
 0x158   : > { %1032 = vst [vmem:[#allocation2 + $0xc8] sm:$0x1] %v1031_v4  ;;  %v3277_v31 = vsel %vm7163_vm9, %v3272_v17, %v3276_v63  ;;  %v8177_v28 = vrot.slane %v2545_v18, 5  ;;  %v8181_v33 = vadd.f32 %v8003_v42, %v7997_v62  ;;  %v8183_v44 = vpop.f32.mrb[12].mxu1  ;;  %v3282_v12 = vrot.slane %v3281_v38, 4 }
 0x159   : > { %v2551_v43 = vrot.slane %v2549_v52, 4  ;;  %v8187_v34 = vadd.f32 %v8019_v22, %v8013_v48  ;;  %v3289_v37 = vshrl.u32 %v3093_v0, 16  ;;  %v3586_v63 = vld [vmem:[#allocation2 + $0x20] sm:$0x1]  ;;  %v8189_v18 = vpop.f32.mrb[13].mxu1  ;;  %v2543_v9 = vrot.slane %v2542_v32, 4 }
 0x15a   : > { %8876 = vst [vmem:[#allocation5_spill] sm:$0xff] %v8181_v33  ;;  %v3292_v14 = vshll.u32 %v3093_v0, 16  ;;  %v3298_v62 = vshll.u32 %v3094_v41, 16  ;;  %v3302_v42 = vshrl.u32 %v3094_v41, 16  ;;  %v3287_v30 = vsel %vm7163_vm9, %v3282_v12, %v3286_v20  ;;  %v3587_v4 = vld [vmem:[#allocation2 + $0x24] sm:$0xe] }
 0x15b   : > { %8877 = vst [vmem:[#allocation6_spill] sm:$0xff] %v8187_v34  ;;  %v2552_v11 = vor.u32 %v2551_v43, %v8177_v28  ;;  %v3291_v15 = vrot.slane %v3289_v37, 4  ;;  %v3308_v35 = vshll.u32 %v3095_v51, 16  ;;  %v3588_v17 = vld [vmem:[#allocation2 + $0x28] sm:$0xf]  ;;  %v5945_v48 = vcombine.low %v3277_v31, %v3287_v30  ;;  %v8197_v0 = vpop.f32.mrb[14].mxu1 }
 0x15c   : > { %v2548_v22 = vsel %vm7163_vm9, %v2543_v9, %v8177_v28  ;;  %v3294_v39 = vrot.slane %v3292_v14, 5  ;;  %v3300_v38 = vrot.slane %v3298_v62, 5  ;;  %v3589_v52 = vld [vmem:[#allocation2 + $0x2c] sm:$0x1]  ;;  %v3304_v32 = vrot.slane %v3302_v42, 4  ;;  %v8199_v12 = vpop.f32.mrb[15].mxu1 }
 0x15d   : > { %v2553_v41 = vrot.slane %v2552_v11, 4  ;;  %v3310_v34 = vrot.slane %v3308_v35, 5  ;;  %v5955_v20 = vrot.slane %v3584_v46, 9  ;;  %5155 = vmatprep.mubr.bf16.mxu1 %v5945_v48  ;;  %v3682_v31 = vrot.slane %v3585_v25, 5 }
 0x15e   : > { %v3295_v37 = vor.u32 %v3294_v39, %v3291_v15  ;;  %v3685_v30 = vrot.slane %v3586_v63, 5  ;;  %v8203_v28 = vadd.f32 %v8021_v54, %v7981_v16  ;;  %5156 = vmatmul.mubr.bf16.gmra.mrb[104].mxu1 %v6988_v26  ;;  %v3305_v62 = vor.u32 %v3304_v32, %v3300_v38  ;;  %v6989_v54 = vld [vmem:[#allocation2 + $0x6c] sm:$0xff]  }
 0x15f   : > { %v2686_v43 = vld [vmem:[#allocation2 + $0xc8] sm:$0x1]  ;;  %v5956_v11 = vrot.slane %v3587_v4, 9  ;;  %v3683_v46 = vsel %vm7413_vm14, %v5955_v20, %v3682_v31  ;;  %v3684_v35 = vrot.slane %v3682_v31, 4  ;;  %v3689_v33 = vrot.slane %v3588_v17, 5 }
 0x160   : > { %v2174_v51 = vld [vmem:[#allocation2 + $0xc8] sm:$0x1]  ;;  %v2845_v9 = vrot.slane %v2686_v43, 5  ;;  %v3296_v42 = vrot.slane %v3295_v37, 4  ;;  %v8207_v48 = vpop.f32.mrb[16].mxu1  ;;  %v3306_v16 = vrot.slane %v3305_v62, 4 }
 0x161   : > { %v2555_v14 = vshll.u32 %v2174_v51, 16  ;;  %v3692_v15 = vrot.slane %v3589_v52, 5  ;;  %v8212_v39 = vpop.f32.mrb[17].mxu1  ;;  %v3686_v17 = vsel %vm7413_vm14, %v3684_v35, %v3685_v30  ;;  %v8221_v32 = vsel %vm7413_vm14, %v5956_v11, %v3689_v33  ;;  %v3096_v20 = vld [vmem:[#allocation2 + $0x78] sm:$0xf] }
 0x162   : > { %v2846_v25 = vsel %vm7413_vm14, %v8153_v49, %v2845_v9  ;;  %v3301_v4 = vsel %vm7163_vm9, %v3296_v42, %v3300_v38  ;;  %v3097_v49 = vld [vmem:[#allocation2 + $0x7c] sm:$0xf]  ;;  %v3098_v43 = vld [vmem:[#allocation2 + $0x80] sm:$0x1]  ;;  %v3311_v51 = vsel %vm7163_vm9, %v3306_v16, %v3310_v34  ;;  %v3691_v37 = vrot.slane %v3689_v33, 4  ;;  %v8227_v31 = vpop.f32.mrb[18].mxu1 }
 0x163   : > { %v2557_v63 = vrot.slane %v2555_v14, 5  ;;  %v5922_v26 = vcombine.low %v8151_v24, %v2846_v25  ;;  %v5971_v24 = vcombine.low %v3683_v46, %v3686_v17  ;;  %v5946_v30 = vcombine.low %v3301_v4, %v3311_v51  ;;  %v3590_v62 = vld [vmem:[#allocation2 + $0x30] sm:$0xe]  ;;  %v3592_v11 = vld [vmem:[#allocation2 + $0x38] sm:$0x1]  ;;  %v8243_v35 = vpop.f32.mrb[19].mxu1 }
 0x164   : > { %v8231_v9 = vadd.f32 %v8050_v61, %v8029_v27  ;;  %v8235_v14 = vadd.f32 %v8091_v1, %v8079_v55  ;;  %v3693_v34 = vsel %vm7413_vm14, %v3691_v37, %v3692_v15  ;;  %v8241_v33 = vadd.f32 %v8097_v19, %v8095_v23  ;;  %v3593_v46 = vld [vmem:[#allocation2 + $0x3c] sm:$0xe]  ;;  %v8245_v27 = vpop.f32.mrb[20].mxu0  ;;  %v3595_v4 = vld [vmem:[#allocation2 + $0x44] sm:$0x1] }
 0x165   : > { %v2558_v52 = vsel %vm7163_vm9, %v2553_v41, %v2557_v63  ;;  %5066 = vmatprep.mubr.bf16.mxu0 %v5922_v26  ;;  %v3591_v41 = vld [vmem:[#allocation2 + $0x34] sm:$0xf]  ;;  %v3316_v42 = vshll.u32 %v3096_v20, 16  ;;  %5163 = vmatprep.mubr.bf16.mxu1 %v5946_v30  ;;  %v5972_v61 = vcombine.low %v8221_v32, %v3693_v34  ;;  %v3322_v55 = vshll.u32 %v3097_v49, 16  ;;  %v3594_v63 = vld [vmem:[#allocation2 + $0x40] sm:$0xf] }
 0x166   : > { %v5890_v38 = vcombine.low %v2548_v22, %v2558_v52  ;;  %8878 = vst [vmem:[#allocation7_spill] sm:$0xff] %v8235_v14  ;;  %8879 = vst [vmem:[#allocation8_spill] sm:$0xff] %v8241_v33  ;;  %v3313_v22 = vshrl.u32 %v3096_v20, 16  ;;  %v3326_v1 = vshrl.u32 %v3097_v49, 16  ;;  %v3332_v25 = vshll.u32 %v3098_v43, 16  ;;  %v8248_v16 = vpop.f32.mrb[21].mxu0  ;;  %5164 = vmatmul.mubr.bf16.gmra.mrb[108].mxu1 %v6989_v54 }
 0x167   : > { %v3318_v19 = vrot.slane %v3316_v42, 5  ;;  %v5957_v15 = vrot.slane %v3590_v62, 9  ;;  %v3696_v26 = vrot.slane %v3591_v41, 5  ;;  %v3324_v17 = vrot.slane %v3322_v55, 5  ;;  %v3100_v30 = vld [vmem:[#allocation2 + $0x88] sm:$0xf] }
 0x168   : > { %5067 = vmatmul.mubr.bf16.gmra.mrb[108].mxu0 %v5890_v38  ;;  %v3315_v23 = vrot.slane %v3313_v22, 4  ;;  %v3328_v20 = vrot.slane %v3326_v1, 4  ;;  %v3334_v52 = vrot.slane %v3332_v25, 5  ;;  %v3699_v51 = vrot.slane %v3592_v11, 5  ;;  %v3099_v38 = vld [vmem:[#allocation2 + $0x84] sm:$0xf] }
 0x169   : > { %6821 = vmatprep.mubr.bf16.mxu0 %v5971_v24  ;;  %v3697_v32 = vsel %vm7413_vm14, %v5957_v15, %v3696_v26  ;;  %v3698_v49 = vrot.slane %v3696_v26, 4  ;;  %v5958_v43 = vrot.slane %v3593_v46, 9  ;;  %v3703_v24 = vrot.slane %v3594_v63, 5  ;;  %v3101_v46 = vld [vmem:[#allocation2 + $0x8c] sm:$0x1]  ;;  %v8266_v1 = vpop.f32.mrb[22].mxu0 }
 0x16a   : > { %v3319_v37 = vor.u32 %v3318_v19, %v3315_v23  ;;  %v3329_v34 = vor.u32 %v3328_v20, %v3324_v17  ;;  %v3706_v54 = vrot.slane %v3595_v4, 5  ;;  %v8254_v62 = vadd.f32 %v8060_v7, %v8056_v60  ;;  %v3596_v55 = vld [vmem:[#allocation2 + $0x48] sm:$0xe]  ;;  %v3597_v23 = vld [vmem:[#allocation2 + $0x4c] sm:$0xf]  ;;  %v8272_v15 = vpop.f32.mrb[23].mxu0 }
 0x16b   : > { %v3700_v22 = vsel %vm7413_vm14, %v3698_v49, %v3699_v51  ;;  %v8260_v11 = vadd.f32 %v8070_v10, %v8062_v36  ;;  %v8264_v42 = vadd.f32 %v8117_v21, %v8115_v50  ;;  %v8270_v60 = vsel %vm7413_vm14, %v5958_v43, %v3703_v24  ;;  %v3598_v19 = vld [vmem:[#allocation2 + $0x50] sm:$0x1]  ;;  %v8274_v36 = vpop.f32.mrb[20].mxu1  ;;  %v3599_v4 = vld [vmem:[#allocation2 + $0x54] sm:$0xe] }
 0x16c   : > { %v3320_v41 = vrot.slane %v3319_v37, 4  ;;  %v3330_v25 = vrot.slane %v3329_v34, 4  ;;  %v5973_v63 = vcombine.low %v3697_v32, %v3700_v22  ;;  %v3705_v7 = vrot.slane %v3703_v24, 4  ;;  %v8282_v20 = vpop.f32.mrb[21].mxu1  ;;  %v6990_v37 = vld [vmem:[#allocation2 + $0x78] sm:$0xff]  }
 0x16d   : > { %8880 = vst [vmem:[#allocation9_spill] sm:$0xff] %v8264_v42  ;;  %v8280_v50 = vadd.f32 %v8127_v29, %v8119_v8  ;;  %v3337_v21 = vshrl.u32 %v3099_v38, 16  ;;  %v3340_v26 = vshll.u32 %v3099_v38, 16  ;;  %v3346_v49 = vshll.u32 %v3100_v30, 16  ;;  %v8288_v34 = vpop.f32.mrb[22].mxu1 }
 0x16e   : > { %v3325_v10 = vsel %vm7163_vm9, %v3320_v41, %v3324_v17  ;;  %v3335_v51 = vsel %vm7163_vm9, %v3330_v25, %v3334_v52  ;;  %v3707_v32 = vsel %vm7413_vm14, %v3705_v7, %v3706_v54  ;;  %v3350_v43 = vshrl.u32 %v3100_v30, 16  ;;  %v3600_v17 = vld [vmem:[#allocation2 + $0x58] sm:$0xf]  ;;  %v3601_v41 = vld [vmem:[#allocation2 + $0x5c] sm:$0x1] }
 0x16f   : > { %8881 = vst [vmem:[#allocation10_spill] sm:$0xff] %v8280_v50  ;;  %v5947_v8 = vcombine.low %v3325_v10, %v3335_v51  ;;  %v5974_v29 = vcombine.low %v8270_v60, %v3707_v32  ;;  %v3339_v38 = vrot.slane %v3337_v21, 4  ;;  %v3342_v24 = vrot.slane %v3340_v26, 5  ;;  %v8293_v22 = vpop.f32.mrb[24].mxu0  ;;  %v3102_v10 = vld [vmem:[#allocation2 + $0x90] sm:$0xf] }
 0x170   : > { %6822 = vmatmul.mubr.bf16.vlgmr.msra.gmra.mrb[112].mxu0 %v5972_v61  ;;  %v8291_v61 = vpop.f32.mrb[23].mxu1  ;;  %v3348_v52 = vrot.slane %v3346_v49, 5  ;;  %v3352_v25 = vrot.slane %v3350_v43, 4  ;;  %v3356_v50 = vshll.u32 %v3101_v46, 16  ;;  %v5959_v54 = vrot.slane %v3596_v55, 9 }
 0x171   : > { %6825 = vmatprep.mubr.bf16.mxu0 %v5973_v63  ;;  %5171 = vmatprep.mubr.bf16.mxu1 %v5947_v8  ;;  %v3343_v30 = vor.u32 %v3342_v24, %v3339_v38  ;;  %v3710_v7 = vrot.slane %v3597_v23, 5  ;;  %v3713_v42 = vrot.slane %v3598_v19, 5  ;;  %v5960_v33 = vrot.slane %v3599_v4, 9  ;;  %v8295_v63 = vpop.f32.mrb[25].mxu0  ;;  %v3103_v32 = vld [vmem:[#allocation2 + $0x94] sm:$0xf] }
 0x172   : > { %5172 = vmatmul.mubr.bf16.gmra.mrb[112].mxu1 %v6990_v37  ;;  %v3353_v60 = vor.u32 %v3352_v25, %v3348_v52  ;;  %v3358_v21 = vrot.slane %v3356_v50, 5  ;;  %v3717_v26 = vrot.slane %v3600_v17, 5  ;;  %v3720_v51 = vrot.slane %v3601_v41, 5  ;;  %v8297_v14 = vpop.f32.mrb[26].mxu0  ;;  %v6991_v4 = vld [vmem:[#allocation2 + $0x84] sm:$0xff]  }
 0x173   : > { %v3344_v49 = vrot.slane %v3343_v30, 4  ;;  %v3711_v46 = vsel %vm7413_vm14, %v5959_v54, %v3710_v7  ;;  %v3712_v55 = vrot.slane %v3710_v7, 4  ;;  %v8303_v23 = vadd.f32 %v8105_v6, %v8099_v58  ;;  %v3104_v17 = vld [vmem:[#allocation2 + $0x98] sm:$0x1]  ;;  %v3602_v8 = vld [vmem:[#allocation2 + $0x60] sm:$0xe] }
 0x174   : > { %v3354_v19 = vrot.slane %v3353_v60, 4  ;;  %v8307_v37 = vsel %vm7413_vm14, %v5960_v33, %v3717_v26  ;;  %v3719_v50 = vrot.slane %v3717_v26, 4  ;;  %v8311_v43 = vadd.f32 %v8133_v40, %v8129_v5  ;;  %v3603_v24 = vld [vmem:[#allocation2 + $0x64] sm:$0xf]  ;;  %v3604_v41 = vld [vmem:[#allocation2 + $0x68] sm:$0x1] }
 0x175   : > { %v3349_v38 = vsel %vm7163_vm9, %v3344_v49, %v3348_v52  ;;  %v3714_v58 = vsel %vm7413_vm14, %v3712_v55, %v3713_v42  ;;  %v8319_v6 = vadd.f32 %v8189_v18, %v8183_v44  ;;  %v8323_v33 = vadd.f32 %v8199_v12, %v8197_v0  ;;  %v8325_v5 = vpop.f32.mrb[27].mxu0  ;;  %v8327_v40 = vpop.f32.mrb[24].mxu1  ;;  %v3605_v18 = vld [vmem:[#allocation2 + $0x6c] sm:$0xe]  ;;  %v3606_v54 = vld [vmem:[#allocation2 + $0x70] sm:$0xf] }
 0x176   : > { %v3359_v52 = vsel %vm7163_vm9, %v3354_v19, %v3358_v21  ;;  %v5975_v25 = vcombine.low %v3711_v46, %v3714_v58  ;;  %v3721_v42 = vsel %vm7413_vm14, %v3719_v50, %v3720_v51  ;;  %v3361_v44 = vshrl.u32 %v3102_v10, 16  ;;  %v8333_v30 = vpop.f32.mrb[25].mxu1  ;;  %v3607_v26 = vld [vmem:[#allocation2 + $0x74] sm:$0x1] }
 0x177   : > { %8882 = vst [vmem:[#allocation11_spill] sm:$0xff] %v8319_v6  ;;  %8883 = vst [vmem:[#allocation12_spill] sm:$0xff] %v8323_v33  ;;  %v5948_v0 = vcombine.low %v3349_v38, %v3359_v52  ;;  %v5976_v12 = vcombine.low %v8307_v37, %v3721_v42  ;;  %v3364_v7 = vshll.u32 %v3102_v10, 16  ;;  %v3370_v60 = vshll.u32 %v3103_v32, 16  ;;  %v8336_v49 = vpop.f32.mrb[26].mxu1 }
 0x178   : > { %6826 = vmatmul.mubr.bf16.gmra.mrb[116].mxu0 %v5974_v29  ;;  %v3363_v29 = vrot.slane %v3361_v44, 4  ;;  %v3374_v21 = vshrl.u32 %v3103_v32, 16  ;;  %v3380_v46 = vshll.u32 %v3104_v17, 16  ;;  %v5961_v55 = vrot.slane %v3602_v8, 9  ;;  %v8338_v19 = vpop.f32.mrb[27].mxu1 }
 0x179   : > { %6829 = vmatprep.mubr.bf16.mxu0 %v5975_v25  ;;  %5179 = vmatprep.mubr.bf16.mxu1 %v5948_v0  ;;  %v3366_v51 = vrot.slane %v3364_v7, 5  ;;  %v3372_v50 = vrot.slane %v3370_v60, 5  ;;  %v3724_v58 = vrot.slane %v3603_v24, 5  ;;  %v3727_v33 = vrot.slane %v3604_v41, 5  ;;  %v3105_v42 = vld [vmem:[#allocation2 + $0x9c] sm:$0xf] }
 0x17a   : > { %5180 = vmatmul.mubr.bf16.gmra.mrb[116].mxu1 %v6991_v4  ;;  %v3376_v38 = vrot.slane %v3374_v21, 4  ;;  %v3382_v37 = vrot.slane %v3380_v46, 5  ;;  %v5962_v10 = vrot.slane %v3605_v18, 9  ;;  %v3731_v52 = vrot.slane %v3606_v54, 5  ;;  %v3106_v8 = vld [vmem:[#allocation2 + $0xa0] sm:$0xf] }
 0x17b   : > { %v3367_v6 = vor.u32 %v3366_v51, %v3363_v29  ;;  %v3725_v25 = vsel %vm7413_vm14, %v5961_v55, %v3724_v58  ;;  %v3726_v32 = vrot.slane %v3724_v58, 4  ;;  %v3734_v17 = vrot.slane %v3607_v26, 5  ;;  %v8342_v44 = vpop.f32.mrb[28].mxu0  ;;  %v8344_v0 = vpop.f32.mrb[28].mxu1  ;;  %v3107_v18 = vld [vmem:[#allocation2 + $0xa4] sm:$0x1] }
 0x17c   : > { %v3377_v7 = vor.u32 %v3376_v38, %v3372_v50  ;;  %v8348_v4 = vsel %vm7413_vm14, %v5962_v10, %v3731_v52  ;;  %v3733_v24 = vrot.slane %v3731_v52, 4  ;;  %v8352_v41 = vadd.f32 %v8141_v47, %v8139_v45  ;;  %v8354_v54 = vpop.f32.mrb[29].mxu0  ;;  %v3608_v46 = vld [vmem:[#allocation2 + $0x78] sm:$0xe]  ;;  %v3609_v55 = vld [vmem:[#allocation2 + $0x7c] sm:$0xf] }
 0x17d   : > { %v3368_v60 = vrot.slane %v3367_v6, 4  ;;  %v3728_v26 = vsel %vm7413_vm14, %v3726_v32, %v3727_v33  ;;  %v8360_v29 = vadd.f32 %v8161_v56, %v8157_v59  ;;  %v6463_v21 = vadd.f32 %v8212_v39, %v8207_v48  ;;  %v8364_v51 = vpop.f32.mrb[30].mxu0  ;;  %v3610_v58 = vld [vmem:[#allocation2 + $0x80] sm:$0x1]  ;;  %v8372_v59 = vpop.f32.mrb[29].mxu1 }
 0x17e   : > { %v3378_v45 = vrot.slane %v3377_v7, 4  ;;  %v5977_v47 = vcombine.low %v3725_v25, %v3728_v26  ;;  %v3735_v6 = vsel %vm7413_vm14, %v3733_v24, %v3734_v17  ;;  %v6466_v33 = vadd.f32 %v8243_v35, %v8227_v31  ;;  %v8370_v38 = vpop.f32.mrb[31].mxu0  ;;  %v3611_v10 = vld [vmem:[#allocation2 + $0x84] sm:$0xe]  ;;  %v3612_v52 = vld [vmem:[#allocation2 + $0x88] sm:$0xf] }
 0x17f   : > { %8884 = vst [vmem:[#allocation13_spill] sm:$0xff] %v8360_v29  ;;  %v3373_v56 = vsel %vm7163_vm9, %v3368_v60, %v3372_v50  ;;  %v5978_v48 = vcombine.low %v8348_v4, %v3735_v6  ;;  %v8378_v39 = vadd.f32 %v6463_v21, %v8169_v53  ;;  %v8380_v25 = vpop.f32.mrb[30].mxu1  ;;  %v6992_v35 = vld [vmem:[#allocation2 + $0x90] sm:$0xff]   ;;  %v3388_v17 = vshll.u32 %v3105_v42, 16 }
 0x180   : > { %6830 = vmatmul.mubr.bf16.gmra.mrb[120].mxu0 %v5976_v12  ;;  %v3385_v12 = vshrl.u32 %v3105_v42, 16  ;;  %v3383_v31 = vsel %vm7163_vm9, %v3378_v45, %v3382_v37  ;;  %v8385_v32 = vadd.f32 %v6466_v33, %v8173_v57  ;;  %v3394_v50 = vshll.u32 %v3106_v8, 16  ;;  %v8387_v7 = vpop.f32.mrb[31].mxu1  ;;  %v3613_v37 = vld [vmem:[#allocation2 + $0x8c] sm:$0x1] }
 0x181   : > { %8885 = vst [vmem:[#allocation14_spill] sm:$0xff] %v8378_v39  ;;  %6833 = vmatprep.mubr.bf16.mxu0 %v5977_v47  ;;  %v5949_v4 = vcombine.low %v3373_v56, %v3383_v31  ;;  %v3398_v24 = vshrl.u32 %v3106_v8, 16  ;;  %v3404_v60 = vshll.u32 %v3107_v18, 16  ;;  %v8389_v26 = vpop.f32.mrb[32].mxu1  ;;  %v3390_v21 = vrot.slane %v3388_v17, 5 }
 0x182   : > { %8886 = vst [vmem:[#allocation15_spill] sm:$0xff] %v8385_v32  ;;  %v3387_v53 = vrot.slane %v3385_v12, 4  ;;  %v3396_v6 = vrot.slane %v3394_v50, 5  ;;  %v5963_v39 = vrot.slane %v3608_v46, 9  ;;  %v3738_v29 = vrot.slane %v3609_v55, 5  ;;  %v8395_v31 = vpop.f32.mrb[33].mxu1 }
 0x183   : > { %5187 = vmatprep.mubr.bf16.mxu1 %v5949_v4  ;;  %v3400_v45 = vrot.slane %v3398_v24, 4  ;;  %v3406_v47 = vrot.slane %v3404_v60, 5  ;;  %v3741_v57 = vrot.slane %v3610_v58, 5  ;;  %v5964_v33 = vrot.slane %v3611_v10, 9  ;;  %v3108_v10 = vld [vmem:[#allocation2 + $0xa8] sm:$0xf] }
 0x184   : > { %5188 = vmatmul.mubr.bf16.gmra.mrb[120].mxu1 %v6992_v35  ;;  %v3391_v42 = vor.u32 %v3390_v21, %v3387_v53  ;;  %v3739_v56 = vsel %vm7413_vm14, %v5963_v39, %v3738_v29  ;;  %v3740_v12 = vrot.slane %v3738_v29, 4  ;;  %v3745_v8 = vrot.slane %v3612_v52, 5  ;;  %v8393_v18 = vpop.f32.mrb[32].mxu0  ;;  %v3109_v35 = vld [vmem:[#allocation2 + $0xac] sm:$0xf]  ;;  %v6993_v24 = vld [vmem:[#allocation2 + $0x9c] sm:$0xff]  }
 0x185   : > { %v3401_v17 = vor.u32 %v3400_v45, %v3396_v6  ;;  %v3748_v46 = vrot.slane %v3613_v37, 5  ;;  %v8399_v55 = vadd.f32 %v8248_v16, %v8245_v27  ;;  %v8403_v58 = vadd.f32 %v8272_v15, %v8266_v1  ;;  %v8405_v50 = vpop.f32.mrb[33].mxu0  ;;  %v3110_v53 = vld [vmem:[#allocation2 + $0xb0] sm:$0x1]  ;;  %v8413_v16 = vpop.f32.mrb[34].mxu1 }
 0x186   : > { %v3392_v29 = vrot.slane %v3391_v42, 4  ;;  %v3742_v39 = vsel %vm7413_vm14, %v3740_v12, %v3741_v57  ;;  %v3746_v52 = vsel %vm7413_vm14, %v5964_v33, %v3745_v8  ;;  %v3747_v4 = vrot.slane %v3745_v8, 4  ;;  %v8411_v27 = vpop.f32.mrb[34].mxu0  ;;  %v3614_v21 = vld [vmem:[#allocation2 + $0x90] sm:$0xe]  ;;  %v8421_v45 = vpop.f32.mrb[35].mxu1 }
 0x187   : > { %8887 = vst [vmem:[#allocation16_spill] sm:$0xff] %v8403_v58  ;;  %v3402_v1 = vrot.slane %v3401_v17, 4  ;;  %v5979_v15 = vcombine.low %v3739_v56, %v3742_v39  ;;  %v6469_v60 = vadd.f32 %v8282_v20, %v8274_v36  ;;  %v8419_v37 = vpop.f32.mrb[35].mxu0  ;;  %v3409_v42 = vshrl.u32 %v3108_v10, 16  ;;  %v3615_v12 = vld [vmem:[#allocation2 + $0x94] sm:$0xf] }
 0x188   : > { %6834 = vmatmul.mubr.bf16.gmra.mrb[124].mxu0 %v5978_v48  ;;  %v6472_v48 = vadd.f32 %v8291_v61, %v8288_v34  ;;  %v3397_v57 = vsel %vm7163_vm9, %v3392_v29, %v3396_v6  ;;  %v3749_v33 = vsel %vm7413_vm14, %v3747_v4, %v3748_v46  ;;  %v3412_v56 = vshll.u32 %v3108_v10, 16  ;;  %v3616_v8 = vld [vmem:[#allocation2 + $0x98] sm:$0x1]  ;;  %v3617_v17 = vld [vmem:[#allocation2 + $0x9c] sm:$0xe]  ;;  %v8891_v3 = vld [vmem:[#allocation14_spill] sm:$0xff] }
 0x189   : > { %v3407_v36 = vsel %vm7163_vm9, %v3402_v1, %v3406_v47  ;;  %6837 = vmatprep.mubr.bf16.mxu0 %v5979_v15  ;;  %v5980_v20 = vcombine.low %v3746_v52, %v3749_v33  ;;  %v8430_v34 = vadd.f32 %v6469_v60, %v8203_v28  ;;  %v3618_v6 = vld [vmem:[#allocation2 + $0xa0] sm:$0xf]  ;;  %v3411_v39 = vrot.slane %v3409_v42, 4  ;;  %v3619_v10 = vld [vmem:[#allocation2 + $0xa4] sm:$0x1]  ;;  %v8435_v32 = vpop.f32.mrb[36].mxu1 }
 0x18a   : > { %v8433_v61 = vadd.f32 %v6472_v48, %v8231_v9  ;;  %v5950_v29 = vcombine.low %v3397_v57, %v3407_v36  ;;  %v3414_v46 = vrot.slane %v3412_v56, 5  ;;  %v3418_v4 = vshll.u32 %v3109_v35, 16  ;;  %v8437_v15 = vpop.f32.mrb[37].mxu1 }
 0x18b   : > { %v3422_v58 = vshrl.u32 %v3109_v35, 16  ;;  %v3428_v47 = vshll.u32 %v3110_v53, 16  ;;  %v5965_v1 = vrot.slane %v3614_v21, 9  ;;  %v3752_v52 = vrot.slane %v3615_v12, 5  ;;  %v8439_v33 = vpop.f32.mrb[38].mxu1 }
 0x18c   : > { %5195 = vmatprep.mubr.bf16.mxu1 %v5950_v29  ;;  %v3415_v28 = vor.u32 %v3414_v46, %v3411_v39  ;;  %v3420_v9 = vrot.slane %v3418_v4, 5  ;;  %v3755_v60 = vrot.slane %v3616_v8, 5  ;;  %v5966_v48 = vrot.slane %v3617_v17, 9  ;;  %v8443_v35 = vpop.f32.mrb[39].mxu1  ;;  %v3111_v8 = vld [vmem:[#allocation2 + $0xb4] sm:$0xf] }
 0x18d   : > { %5196 = vmatmul.mubr.bf16.gmra.mrb[124].mxu1 %v6993_v24  ;;  %v3424_v57 = vrot.slane %v3422_v58, 4  ;;  %v3430_v42 = vrot.slane %v3428_v47, 5  ;;  %v3753_v56 = vsel %vm7413_vm14, %v5965_v1, %v3752_v52  ;;  %v3754_v36 = vrot.slane %v3752_v52, 4  ;;  %v3113_v4 = vld [vmem:[#allocation2 + $0xbc] sm:$0x1] }
 0x18e   : > { %v3416_v53 = vrot.slane %v3415_v28, 4  ;;  %v3759_v21 = vrot.slane %v3618_v6, 5  ;;  %v3762_v12 = vrot.slane %v3619_v10, 5  ;;  %v8447_v29 = vadd.f32 %v8295_v63, %v8293_v22  ;;  %v3620_v1 = vld [vmem:[#allocation2 + $0xa8] sm:$0xe] }
 0x18f   : > { %v3425_v17 = vor.u32 %v3424_v57, %v3420_v9  ;;  %v3756_v58 = vsel %vm7413_vm14, %v3754_v36, %v3755_v60  ;;  %v8453_v24 = vadd.f32 %v8325_v5, %v8297_v14  ;;  %v6475_v39 = vadd.f32 %v8333_v30, %v8327_v40  ;;  %v3621_v40 = vld [vmem:[#allocation2 + $0xac] sm:$0xf]  ;;  %v3624_v36 = vld [vmem:[#allocation2 + $0xb8] sm:$0xf] }
 0x190   : > { %6838 = vmatmul.mubr.bf16.gmra.mrb[128].mxu0 %v5980_v20  ;;  %v3112_v20 = vld [vmem:[#allocation2 + $0xb8] sm:$0xf]  ;;  %v3421_v6 = vsel %vm7163_vm9, %v3416_v53, %v3420_v9  ;;  %v5981_v46 = vcombine.low %v3753_v56, %v3756_v58  ;;  %v3760_v22 = vsel %vm7413_vm14, %v5966_v48, %v3759_v21  ;;  %v3761_v63 = vrot.slane %v3759_v21, 4  ;;  %v6994_v30 = vld [vmem:[#allocation2 + $0xa8] sm:$0xff]   ;;  %v3622_v48 = vld [vmem:[#allocation2 + $0xb0] sm:$0x1] }
 0x191   : > { %v3426_v10 = vrot.slane %v3425_v17, 4  ;;  %v8462_v47 = vadd.f32 %v6475_v39, %v8254_v62  ;;  %v6478_v14 = vadd.f32 %v8338_v19, %v8336_v49  ;;  %v3433_v5 = vshrl.u32 %v3111_v8, 16  ;;  %v3623_v19 = vld [vmem:[#allocation2 + $0xb4] sm:$0xe] }
 0x192   : > { %6841 = vmatprep.mubr.bf16.mxu0 %v5981_v46  ;;  %v3763_v52 = vsel %vm7413_vm14, %v3761_v63, %v3762_v12  ;;  %v3436_v28 = vshll.u32 %v3111_v8, 16  ;;  %v3442_v9 = vshll.u32 %v3112_v20, 16  ;;  %v3446_v60 = vshrl.u32 %v3112_v20, 16  ;;  %v3625_v8 = vld [vmem:[#allocation2 + $0xbc] sm:$0x1] }
 0x193   : > { %v3431_v57 = vsel %vm7163_vm9, %v3426_v10, %v3430_v42  ;;  %v5982_v62 = vcombine.low %v3760_v22, %v3763_v52  ;;  %v8471_v56 = vadd.f32 %v6478_v14, %v8260_v11  ;;  %v3435_v49 = vrot.slane %v3433_v5, 4  ;;  %v8473_v53 = vpop.f32.mrb[40].mxu1 }
 0x194   : > { %v5951_v21 = vcombine.low %v3421_v6, %v3431_v57  ;;  %v3438_v17 = vrot.slane %v3436_v28, 5  ;;  %v3444_v58 = vrot.slane %v3442_v9, 5  ;;  %v3448_v12 = vrot.slane %v3446_v60, 4  ;;  %v8475_v39 = vpop.f32.mrb[41].mxu1 }
 0x195   : > { %v3452_v20 = vshll.u32 %v3113_v4, 16  ;;  %v5967_v46 = vrot.slane %v3620_v1, 9  ;;  %v3766_v63 = vrot.slane %v3621_v40, 5  ;;  %v3769_v42 = vrot.slane %v3622_v48, 5  ;;  %v8477_v22 = vpop.f32.mrb[36].mxu0  ;;  %v8479_v11 = vpop.f32.mrb[42].mxu1 }
 0x196   : > { %5203 = vmatprep.mubr.bf16.mxu1 %v5951_v21  ;;  %v3439_v10 = vor.u32 %v3438_v17, %v3435_v49  ;;  %v3449_v14 = vor.u32 %v3448_v12, %v3444_v58  ;;  %v5968_v5 = vrot.slane %v3623_v19, 9  ;;  %v3773_v6 = vrot.slane %v3624_v36, 5  ;;  %v8481_v52 = vpop.f32.mrb[37].mxu0  ;;  %v8483_v28 = vpop.f32.mrb[43].mxu1  ;;  %v3114_v12 = vld [vmem:[#allocation2 + $0xc0] sm:$0xf] }
 0x197   : > { %5204 = vmatmul.mubr.bf16.gmra.mrb[128].mxu1 %v6994_v30  ;;  %v3454_v9 = vrot.slane %v3452_v20, 5  ;;  %v3767_v4 = vsel %vm7413_vm14, %v5967_v46, %v3766_v63  ;;  %v3768_v1 = vrot.slane %v3766_v63, 4  ;;  %v3776_v40 = vrot.slane %v3625_v8, 5  ;;  %v8487_v60 = vpop.f32.mrb[38].mxu0  ;;  %v3115_v8 = vld [vmem:[#allocation2 + $0xc4] sm:$0xf] }
 0x198   : > { %6842 = vmatmul.mubr.bf16.gmra.mrb[132].mxu0 %v5982_v62  ;;  %v3440_v48 = vrot.slane %v3439_v10, 4  ;;  %v3450_v57 = vrot.slane %v3449_v14, 4  ;;  %v3774_v62 = vsel %vm7413_vm14, %v5968_v5, %v3773_v6  ;;  %v3775_v49 = vrot.slane %v3773_v6, 4  ;;  %v8491_v19 = vpop.f32.mrb[39].mxu0  ;;  %v3627_v14 = vld [vmem:[#allocation2 + $0xc4] sm:$0xf] }
 0x199   : > { %v3770_v36 = vsel %vm7413_vm14, %v3768_v1, %v3769_v42  ;;  %v8497_v30 = vadd.f32 %v8354_v54, %v8342_v44  ;;  %v8501_v21 = vadd.f32 %v8370_v38, %v8364_v51  ;;  %v6481_v17 = vadd.f32 %v8372_v59, %v8344_v0  ;;  %v6995_v42 = vld [vmem:[#allocation2 + $0xb4] sm:$0xff]   ;;  %v3116_v54 = vld [vmem:[#allocation2 + $0xc8] sm:$0x1]  ;;  %v3626_v59 = vld [vmem:[#allocation2 + $0xc0] sm:$0xe] }
 0x19a   : > { %v3445_v20 = vsel %vm7163_vm9, %v3440_v48, %v3444_v58  ;;  %v3455_v46 = vsel %vm7163_vm9, %v3450_v57, %v3454_v9  ;;  %v5983_v63 = vcombine.low %v3767_v4, %v3770_v36  ;;  %v3777_v44 = vsel %vm7413_vm14, %v3775_v49, %v3776_v40  ;;  %v3628_v58 = vld [vmem:[#allocation2 + $0xc8] sm:$0x1]  ;;  %v513_v1 = vld [vmem:[#allocation2 + $0xd4] sm:$0x1] }
 0x19b   : > { %v5952_v10 = vcombine.low %v3445_v20, %v3455_v46  ;;  %v5984_v51 = vcombine.low %v3774_v62, %v3777_v44  ;;  %v8512_v38 = vadd.f32 %v6481_v17, %v8303_v23  ;;  %v6484_v0 = vadd.f32 %v8387_v7, %v8380_v25  ;;  %v8527_v7 = vld [vmem:[#allocation2 + $0xd0] sm:$0xf] }
 0x19c   : > { %6845 = vmatprep.mubr.bf16.mxu0 %v5983_v63  ;;  %v3457_v5 = vshrl.u32 %v3114_v12, 16  ;;  %v3460_v6 = vshll.u32 %v3114_v12, 16  ;;  %v3466_v9 = vshll.u32 %v3115_v8, 16  ;;  %v3470_v4 = vshrl.u32 %v3115_v8, 16 }
 0x19d   : > { %5211 = vmatprep.mubr.bf16.mxu1 %v5952_v10  ;;  %v8517_v40 = vadd.f32 %v6484_v0, %v8311_v43  ;;  %v3476_v48 = vshll.u32 %v3116_v54, 16  ;;  %v8521_v23 = vadd.f32 %v8405_v50, %v8393_v18  ;;  %v8525_v25 = vadd.f32 %v8419_v37, %v8411_v27  ;;  %v6409_v57 = vpop.f32.mrb[40].mxu0  ;;  %v6503_v62 = vpop.f32.mrb[44].mxu1  ;;  %v3629_v43 = vld [vmem:[#allocation2 + $0xcc] sm:$0xe] }
 0x19e   : > { %v3459_v49 = vrot.slane %v3457_v5, 4  ;;  %v3462_v36 = vrot.slane %v3460_v6, 5  ;;  %v3468_v17 = vrot.slane %v3466_v9, 5  ;;  %v3472_v12 = vrot.slane %v3470_v4, 4  ;;  %v6410_v8 = vpop.f32.mrb[41].mxu0  ;;  %v6504_v20 = vpop.f32.mrb[45].mxu1 }
 0x19f   : > { %5212 = vmatmul.mubr.bf16.gmra.mrb[132].mxu1 %v6995_v42  ;;  %v3478_v46 = vrot.slane %v3476_v48, 5  ;;  %v5969_v18 = vrot.slane %v3626_v59, 9  ;;  %v3780_v50 = vrot.slane %v3627_v14, 5  ;;  %v3783_v63 = vrot.slane %v3628_v58, 5  ;;  %v6412_v44 = vpop.f32.mrb[42].mxu0  ;;  %v6506_v27 = vpop.f32.mrb[46].mxu1 }
 0x1a0   : > { %6846 = vmatmul.mubr.bf16.gmra.mrb[136].mxu0 %v5984_v51  ;;  %v3463_v37 = vor.u32 %v3462_v36, %v3459_v49  ;;  %v3473_v54 = vor.u32 %v3472_v12, %v3468_v17  ;;  %v6487_v10 = vadd.f32 %v8395_v31, %v8389_v26  ;;  %v514_v0 = vsel %vm7106_vm4, 0, %v513_v1  ;;  %v457_v5 = vld [vmem:[#allocation2 + $0xcc] sm:$0x1]  ;;  %v6413_v6 = vpop.f32.mrb[43].mxu0  ;;  %v6507_v9 = vpop.f32.mrb[47].mxu1 }
 0x1a1   : > { %v3781_v42 = vsel %vm7413_vm14, %v5969_v18, %v3780_v50  ;;  %v3782_v4 = vrot.slane %v3780_v50, 4  ;;  %515 = vst [vmem:[#allocation2 + $0xd4] sm:$0x1] %v514_v0  ;;  %v3787_v59 = vrot.slane %v8527_v7, 5  ;;  %v6490_v26 = vadd.f32 %v8421_v45, %v8413_v16  ;;  %v3118_v31 = vld [vmem:[#allocation2 + $0xd0] sm:$0xf] }
 0x1a2   : > { %v3464_v14 = vrot.slane %v3463_v37, 4  ;;  %v3474_v58 = vrot.slane %v3473_v54, 4  ;;  %v8537_v48 = vadd.f32 %v6487_v10, %v8352_v41  ;;  %v5970_v49 = vrot.slane %v3629_v43, 9  ;;  %v6996_v41 = vld [vmem:[#allocation2 + $0xc0] sm:$0xff]  }
 0x1a3   : > { %v3784_v1 = vsel %vm7413_vm14, %v3782_v4, %v3783_v63  ;;  %v3789_v36 = vrot.slane %v3787_v59, 4  ;;  %v458_v12 = vsel %vm7095_vm3, 0, %v457_v5  ;;  %v8889_v37 = vld [vmem:[#allocation13_spill] sm:$0xff]  ;;  %v3490_v45 = vshll.u32 %v3118_v31, 16 }
 0x1a4   : > { %v3469_v7 = vsel %vm7163_vm9, %v3464_v14, %v3468_v17  ;;  %v3479_v18 = vsel %vm7163_vm9, %v3474_v58, %v3478_v46  ;;  %v5985_v50 = vcombine.low %v3781_v42, %v3784_v1  ;;  %v8550_v54 = vadd.f32 %v6490_v26, %v8889_v37  ;;  %459 = vst [vmem:[#allocation2 + $0xcc] sm:$0x1] %v458_v12 }
 0x1a5   : > { %v5953_v16 = vcombine.low %v3469_v7, %v3479_v18  ;;  %v3494_v63 = vshrl.u32 %v3118_v31, 16  ;;  %v8554_v43 = vadd.f32 %v8481_v52, %v8477_v22  ;;  %v8558_v13 = vadd.f32 %v8491_v19, %v8487_v60 }
 0x1a6   : > { %6849 = vmatprep.mubr.bf16.mxu0 %v5985_v50  ;;  %v6493_v17 = vadd.f32 %v8437_v15, %v8435_v32  ;;  %v6496_v46 = vadd.f32 %v8443_v35, %v8439_v33  ;;  %v8564_v10 = vadd.f32 %v6410_v8, %v6409_v57  ;;  %v3492_v51 = vrot.slane %v3490_v45, 5  ;;  %v8890_v32 = vld [vmem:[#allocation16_spill] sm:$0xff] }
 0x1a7   : > { %5219 = vmatprep.mubr.bf16.mxu1 %v5953_v16  ;;  %v3496_v0 = vrot.slane %v3494_v63, 4  ;;  %v8566_v5 = vadd.f32 %v6413_v6, %v6412_v44  ;;  %v6499_v22 = vadd.f32 %v8475_v39, %v8473_v53  ;;  %v6502_v33 = vadd.f32 %v8483_v28, %v8479_v11 }
 0x1a8   : > { %5220 = vmatmul.mubr.bf16.gmra.mrb[136].mxu1 %v6996_v41  ;;  %v3631_v52 = vld [vmem:[#allocation2 + $0xd4] sm:$0x1]  ;;  %v8571_v19 = vadd.f32 %v6493_v17, %v8399_v55  ;;  %v8574_v15 = vadd.f32 %v6496_v46, %v8890_v32  ;;  %v6505_v35 = vadd.f32 %v6504_v20, %v6503_v62  ;;  %v3788_v57 = vsel %vm7413_vm14, %v5970_v49, %v3787_v59 }
 0x1a9   : > { %v3119_v60 = vld [vmem:[#allocation2 + $0xd4] sm:$0x1]  ;;  %v3790_v8 = vrot.slane %v3631_v52, 5  ;;  %v3497_v44 = vor.u32 %v3496_v0, %v3492_v51  ;;  %v8581_v53 = vadd.f32 %v6499_v22, %v8447_v29  ;;  %v8584_v6 = vadd.f32 %v6502_v33, %v8453_v24 }
 0x1aa   : > { %v3500_v39 = vshll.u32 %v3119_v60, 16  ;;  %v8587_v55 = vadd.f32 %v6505_v35, %v8497_v30  ;;  %v6508_v42 = vadd.f32 %v6507_v9, %v6506_v27  ;;  %v6509_v4 = vpop.f32.mrb[48].mxu1 }
 0x1ab   : > { %v3791_v11 = vsel %vm7413_vm14, %v3789_v36, %v3790_v8  ;;  %v3117_v28 = vld [vmem:[#allocation2 + $0xcc] sm:$0xf]  ;;  %v6510_v29 = vpop.f32.mrb[49].mxu1  ;;  %v3498_v1 = vrot.slane %v3497_v44, 4 }
 0x1ac   : > { %v5986_v62 = vcombine.low %v3788_v57, %v3791_v11  ;;  %v3481_v20 = vshrl.u32 %v3117_v28, 16  ;;  %v3484_v59 = vshll.u32 %v3117_v28, 16  ;;  %v8592_v14 = vadd.f32 %v6508_v42, %v8501_v21  ;;  %v6512_v24 = vpop.f32.mrb[50].mxu1  ;;  %v6997_v46 = vld [vmem:[#allocation2 + $0xcc] sm:$0xff]  }
 0x1ad   : > { %v6415_v58 = vpop.f32.mrb[44].mxu0  ;;  %v6511_v26 = vadd.f32 %v6510_v29, %v6509_v4  ;;  %v3502_v27 = vrot.slane %v3500_v39, 5  ;;  %v6513_v49 = vpop.f32.mrb[51].mxu1  ;;  %v8892_v4 = vld [vmem:[#allocation15_spill] sm:$0xff] }
 0x1ae   : > { %6850 = vmatmul.mubr.bf16.gmra.mrb[140].mxu0 %v5986_v62  ;;  %v3483_v31 = vrot.slane %v3481_v20, 4  ;;  %v3486_v30 = vrot.slane %v3484_v59, 5  ;;  %v6416_v9 = vpop.f32.mrb[45].mxu0  ;;  %v6514_v7 = vadd.f32 %v6513_v49, %v6512_v24 }
 0x1af   : > { %v6417_v2 = vadd.f32 %v6416_v9, %v6415_v58  ;;  %v6418_v36 = vpop.f32.mrb[46].mxu0  ;;  %v8595_v12 = vadd.f32 %v6511_v26, %v8521_v23  ;;  %v3503_v16 = vsel %vm7163_vm9, %v3498_v1, %v3502_v27 }
 0x1b0   : > { %v3487_v18 = vor.u32 %v3486_v30, %v3483_v31  ;;  %v6419_v21 = vpop.f32.mrb[47].mxu0  ;;  %v8598_v50 = vadd.f32 %v6514_v7, %v8525_v25 }
 0x1b1   : > { %v6420_v41 = vadd.f32 %v6419_v21, %v6418_v36 }
 0x1b2   : > { %v3488_v37 = vrot.slane %v3487_v18, 4  ;;  %v6515_v45 = vpop.f32.mrb[52].mxu1 }
 0x1b3   : > { %v6516_v63 = vpop.f32.mrb[53].mxu1 }
 0x1b4   : > { %v3493_v17 = vsel %vm7163_vm9, %v3488_v37, %v3492_v51  ;;  %v6517_v0 = vadd.f32 %v6516_v63, %v6515_v45  ;;  %v6518_v23 = vpop.f32.mrb[54].mxu1 }
 0x1b5   : > { %v5954_v22 = vcombine.low %v3493_v17, %v3503_v16  ;;  %v6573_v52 = vpop.f32.mrb[48].mxu0  ;;  %v6519_v60 = vpop.f32.mrb[55].mxu1 }
 0x1b6   : > { %v6574_v32 = vpop.f32.mrb[49].mxu0  ;;  %v8605_v33 = vadd.f32 %v6517_v0, %v8554_v43  ;;  %v6520_v25 = vadd.f32 %v6519_v60, %v6518_v23 }
 0x1b7   : > { %5227 = vmatprep.mubr.bf16.mxu1 %v5954_v22  ;;  %v6575_v35 = vadd.f32 %v6574_v32, %v6573_v52  ;;  %v6576_v57 = vpop.f32.mrb[50].mxu0 }
 0x1b8   : > { %5228 = vmatmul.mubr.bf16.gmra.mrb[140].mxu1 %v6997_v46  ;;  %v6577_v8 = vpop.f32.mrb[51].mxu0  ;;  %v8608_v44 = vadd.f32 %v6520_v25, %v8558_v13 }
 0x1b9   : > { %v8611_v51 = vadd.f32 %v6575_v35, %v8891_v3  ;;  %v6578_v39 = vadd.f32 %v6577_v8, %v6576_v57  ;;  %v8893_v8 = vld [vmem:[#allocation5_spill] sm:$0xff] }
 0x1ba   : > { %v6521_v42 = vpop.f32.mrb[56].mxu1 }
 0x1bb   : > { %v8614_v11 = vadd.f32 %v6578_v39, %v8892_v4  ;;  %v6522_v28 = vpop.f32.mrb[57].mxu1 }
 0x1bc   : > { %v6523_v43 = vadd.f32 %v6522_v28, %v6521_v42  ;;  %v6524_v62 = vpop.f32.mrb[58].mxu1 }
 0x1bd   : > { %v6579_v20 = vpop.f32.mrb[52].mxu0  ;;  %v6525_v59 = vpop.f32.mrb[59].mxu1 }
 0x1be   : > { %v6580_v29 = vpop.f32.mrb[53].mxu0  ;;  %v8617_v58 = vadd.f32 %v6523_v43, %v8564_v10  ;;  %v6526_v26 = vadd.f32 %v6525_v59, %v6524_v62 }
 0x1bf   : > { %v6581_v13 = vadd.f32 %v6580_v29, %v6579_v20  ;;  %v6582_v24 = vpop.f32.mrb[54].mxu0 }
 0x1c0   : > { %v6583_v31 = vpop.f32.mrb[55].mxu0  ;;  %v8620_v30 = vadd.f32 %v6526_v26, %v8566_v5 }
 0x1c1   : > { %v8623_v1 = vadd.f32 %v6581_v13, %v8430_v34  ;;  %v6584_v27 = vadd.f32 %v6583_v31, %v6582_v24 }
 0x1c2   : > { %v6527_v49 = vpop.f32.mrb[60].mxu1 }
 0x1c3   : > { %v8626_v9 = vadd.f32 %v6584_v27, %v8433_v61  ;;  %v6528_v36 = vpop.f32.mrb[61].mxu1  ;;  %v8895_v27 = vld [vmem:[#allocation7_spill] sm:$0xff] }
 0x1c4   : > { %v6529_v18 = vadd.f32 %v6528_v36, %v6527_v49  ;;  %v6530_v10 = vpop.f32.mrb[62].mxu1 }
 0x1c5   : > { %v6585_v7 = vpop.f32.mrb[56].mxu0  ;;  %v6531_v37 = vpop.f32.mrb[63].mxu1 }
 0x1c6   : > { %v6586_v21 = vpop.f32.mrb[57].mxu0  ;;  %v8628_v63 = vadd.f32 %v6529_v18, %v6417_v2  ;;  %v6532_v5 = vadd.f32 %v6531_v37, %v6530_v10 }
 0x1c7   : > { %v6587_v16 = vadd.f32 %v6586_v21, %v6585_v7  ;;  %v6588_v45 = vpop.f32.mrb[58].mxu0 }
 0x1c8   : > { %v6589_v17 = vpop.f32.mrb[59].mxu0  ;;  %v8633_v0 = vadd.f32 %v6532_v5, %v6420_v41 }
 0x1c9   : > { %v8631_v34 = vadd.f32 %v6587_v16, %v8462_v47  ;;  %v6590_v46 = vadd.f32 %v6589_v17, %v6588_v45 }
 0x1ca   : > { %v6533_v23 = vpop.f32.mrb[64].mxu1 }
 0x1cb   : > { %v8636_v61 = vadd.f32 %v6590_v46, %v8471_v56  ;;  %v6534_v22 = vpop.f32.mrb[65].mxu1  ;;  %v8894_v56 = vld [vmem:[#allocation6_spill] sm:$0xff] }
 0x1cc   : > { %v6535_v60 = vadd.f32 %v6534_v22, %v6533_v23  ;;  %v6536_v32 = vpop.f32.mrb[66].mxu1 }
 0x1cd   : > { %v6591_v52 = vpop.f32.mrb[60].mxu0  ;;  %v6537_v35 = vpop.f32.mrb[67].mxu1 }
 0x1ce   : > { %v6592_v25 = vpop.f32.mrb[61].mxu0  ;;  %v8639_v3 = vadd.f32 %v6535_v60, %v8893_v8  ;;  %v6538_v47 = vadd.f32 %v6537_v35, %v6536_v32  ;;  %v8897_v60 = vld [vmem:[#allocation9_spill] sm:$0xff] }
 0x1cf   : > { %v6593_v2 = vadd.f32 %v6592_v25, %v6591_v52  ;;  %v6594_v57 = vpop.f32.mrb[62].mxu0 }
 0x1d0   : > { %v6595_v39 = vpop.f32.mrb[63].mxu0  ;;  %v8645_v4 = vadd.f32 %v6538_v47, %v8894_v56 }
 0x1d1   : > { %v8642_v41 = vadd.f32 %v6593_v2, %v8512_v38  ;;  %v6596_v42 = vadd.f32 %v6595_v39, %v6594_v57 }
 0x1d2   : > { %v6539_v43 = vpop.f32.mrb[68].mxu1 }
 0x1d3   : > { %v8648_v28 = vadd.f32 %v6596_v42, %v8517_v40  ;;  %v6540_v62 = vpop.f32.mrb[69].mxu1  ;;  %v8896_v40 = vld [vmem:[#allocation8_spill] sm:$0xff] }
 0x1d4   : > { %v6541_v59 = vadd.f32 %v6540_v62, %v6539_v43  ;;  %v6542_v29 = vpop.f32.mrb[70].mxu1 }
 0x1d5   : > { %v6597_v20 = vpop.f32.mrb[64].mxu0  ;;  %v6543_v13 = vpop.f32.mrb[71].mxu1 }
 0x1d6   : > { %v6598_v26 = vpop.f32.mrb[65].mxu0  ;;  %v8651_v49 = vadd.f32 %v6541_v59, %v8895_v27  ;;  %v6544_v38 = vadd.f32 %v6543_v13, %v6542_v29 }
 0x1d7   : > { %v6599_v24 = vadd.f32 %v6598_v26, %v6597_v20  ;;  %v6600_v31 = vpop.f32.mrb[66].mxu0 }
 0x1d8   : > { %v6601_v36 = vpop.f32.mrb[67].mxu0  ;;  %v8657_v10 = vadd.f32 %v6544_v38, %v8896_v40 }
 0x1d9   : > { %v8654_v7 = vadd.f32 %v6599_v24, %v8537_v48  ;;  %v6602_v18 = vadd.f32 %v6601_v36, %v6600_v31 }
 0x1da   : > { %v6545_v37 = vpop.f32.mrb[72].mxu1 }
 0x1db   : > { %v8660_v21 = vadd.f32 %v6602_v18, %v8550_v54  ;;  %v6546_v16 = vpop.f32.mrb[73].mxu1  ;;  %v8898_v54 = vld [vmem:[#allocation10_spill] sm:$0xff] }
 0x1dc   : > { %v6547_v5 = vadd.f32 %v6546_v16, %v6545_v37  ;;  %v6548_v17 = vpop.f32.mrb[74].mxu1 }
 0x1dd   : > { %v6603_v45 = vpop.f32.mrb[68].mxu0  ;;  %v6549_v23 = vpop.f32.mrb[75].mxu1 }
 0x1de   : > { %v6604_v46 = vpop.f32.mrb[69].mxu0  ;;  %v8663_v32 = vadd.f32 %v6547_v5, %v8897_v60  ;;  %v6550_v48 = vadd.f32 %v6549_v23, %v6548_v17  ;;  %v8900_v23 = vld [vmem:[#allocation12_spill] sm:$0xff] }
 0x1df   : > { %v6605_v22 = vadd.f32 %v6604_v46, %v6603_v45  ;;  %v6606_v52 = vpop.f32.mrb[70].mxu0 }
 0x1e0   : > { %v6607_v25 = vpop.f32.mrb[71].mxu0  ;;  %v8669_v57 = vadd.f32 %v6550_v48, %v8898_v54 }
 0x1e1   : > { %v8666_v35 = vadd.f32 %v6605_v22, %v8571_v19  ;;  %v6608_v2 = vadd.f32 %v6607_v25, %v6606_v52 }
 0x1e3   : > { %v8672_v8 = vadd.f32 %v6608_v2, %v8574_v15 }
 0x1e5   : > { %v6609_v47 = vpop.f32.mrb[72].mxu0 }
 0x1e6   : > { %v6610_v39 = vpop.f32.mrb[73].mxu0 }
 0x1e7   : > { %v6611_v42 = vadd.f32 %v6610_v39, %v6609_v47  ;;  %v6612_v56 = vpop.f32.mrb[74].mxu0 }
 0x1e8   : > { %v6613_v43 = vpop.f32.mrb[75].mxu0 }
 0x1e9   : > { %v8675_v62 = vadd.f32 %v6611_v42, %v8581_v53  ;;  %v6614_v20 = vadd.f32 %v6613_v43, %v6612_v56 }
 0x1eb   : > { %v8678_v59 = vadd.f32 %v6614_v20, %v8584_v6  ;;  %v8899_v6 = vld [vmem:[#allocation11_spill] sm:$0xff] }
 0x1ed   : > { %v6615_v19 = vpop.f32.mrb[76].mxu0 }
 0x1ee   : > { %v6616_v29 = vpop.f32.mrb[77].mxu0 }
 0x1ef   : > { %v6617_v26 = vadd.f32 %v6616_v29, %v6615_v19  ;;  %v6618_v13 = vpop.f32.mrb[78].mxu0  ;;  %v6551_v27 = vpop.f32.mrb[76].mxu1 }
 0x1f0   : > { %v6619_v24 = vpop.f32.mrb[79].mxu0  ;;  %v6552_v38 = vpop.f32.mrb[77].mxu1 }
 0x1f1   : > { %v8681_v15 = vadd.f32 %v6617_v26, %v8587_v55  ;;  %v6620_v31 = vadd.f32 %v6619_v24, %v6618_v13  ;;  %v6553_v53 = vadd.f32 %v6552_v38, %v6551_v27  ;;  %v6554_v18 = vpop.f32.mrb[78].mxu1 }
 0x1f2   : > { %v6555_v40 = vpop.f32.mrb[79].mxu1 }
 0x1f3   : > { %v8684_v36 = vadd.f32 %v6620_v31, %v8592_v14  ;;  %v8687_v16 = vadd.f32 %v6553_v53, %v8899_v6  ;;  %v6556_v45 = vadd.f32 %v6555_v40, %v6554_v18 }
 0x1f5   : > { %v6621_v37 = vpop.f32.mrb[80].mxu0  ;;  %v8690_v55 = vadd.f32 %v6556_v45, %v8900_v23 }
 0x1f6   : > { %v6622_v5 = vpop.f32.mrb[81].mxu0 }
 0x1f7   : > { %v6623_v17 = vadd.f32 %v6622_v5, %v6621_v37  ;;  %v6624_v46 = vpop.f32.mrb[82].mxu0  ;;  %v6685_v60 = vpop.f32.mrb[80].mxu1 }
 0x1f8   : > { %v6625_v22 = vpop.f32.mrb[83].mxu0  ;;  %v6686_v48 = vpop.f32.mrb[81].mxu1 }
 0x1f9   : > { %v8693_v52 = vadd.f32 %v6623_v17, %v8595_v12  ;;  %v6626_v14 = vadd.f32 %v6625_v22, %v6624_v46  ;;  %v6687_v2 = vadd.f32 %v6686_v48, %v6685_v60  ;;  %v6688_v54 = vpop.f32.mrb[82].mxu1 }
 0x1fa   : > { %v6689_v47 = vpop.f32.mrb[83].mxu1 }
 0x1fb   : > { %v8696_v25 = vadd.f32 %v6626_v14, %v8598_v50  ;;  %v6690_v42 = vadd.f32 %v6689_v47, %v6688_v54  ;;  %v8699_v56 = vadd.f32 %v6687_v2, %v8611_v51 }
 0x1fd   : > { %v6627_v39 = vpop.f32.mrb[84].mxu0  ;;  %v8702_v12 = vadd.f32 %v6690_v42, %v8614_v11 }
 0x1fe   : > { %v6628_v43 = vpop.f32.mrb[85].mxu0 }
 0x1ff   : > { %v6629_v20 = vadd.f32 %v6628_v43, %v6627_v39  ;;  %v6630_v19 = vpop.f32.mrb[86].mxu0  ;;  %v6691_v13 = vpop.f32.mrb[84].mxu1 }
 0x200   : > { %v6631_v29 = vpop.f32.mrb[87].mxu0  ;;  %v6692_v24 = vpop.f32.mrb[85].mxu1 }
 0x201   : > { %v8705_v26 = vadd.f32 %v6629_v20, %v8605_v33  ;;  %v6632_v50 = vadd.f32 %v6631_v29, %v6630_v19  ;;  %v6693_v27 = vadd.f32 %v6692_v24, %v6691_v13  ;;  %v6694_v38 = vpop.f32.mrb[86].mxu1 }
 0x202   : > { %v6695_v51 = vpop.f32.mrb[87].mxu1 }
 0x203   : > { %v8708_v31 = vadd.f32 %v6632_v50, %v8608_v44  ;;  %v6696_v18 = vadd.f32 %v6695_v51, %v6694_v38  ;;  %v8711_v40 = vadd.f32 %v6693_v27, %v8623_v1 }
 0x205   : > { %v6633_v53 = vpop.f32.mrb[88].mxu0  ;;  %v8714_v33 = vadd.f32 %v6696_v18, %v8626_v9 }
 0x206   : > { %v6634_v11 = vpop.f32.mrb[89].mxu0 }
 0x207   : > { %v6635_v37 = vadd.f32 %v6634_v11, %v6633_v53  ;;  %v6636_v6 = vpop.f32.mrb[90].mxu0 }
 0x208   : > { %v6637_v45 = vpop.f32.mrb[91].mxu0 }
 0x209   : > { %v8717_v5 = vadd.f32 %v6635_v37, %v8617_v58  ;;  %v6638_v44 = vadd.f32 %v6637_v45, %v6636_v6  ;;  %v6697_v17 = vpop.f32.mrb[88].mxu1 }
 0x20a   : > { %v6698_v23 = vpop.f32.mrb[89].mxu1 }
 0x20b   : > { %v8720_v46 = vadd.f32 %v6638_v44, %v8620_v30  ;;  %v6699_v22 = vadd.f32 %v6698_v23, %v6697_v17  ;;  %v6700_v14 = vpop.f32.mrb[90].mxu1 }
 0x20c   : > { %v6701_v60 = vpop.f32.mrb[91].mxu1 }
 0x20d   : > { %v6639_v1 = vpop.f32.mrb[92].mxu0  ;;  %v6702_v2 = vadd.f32 %v6701_v60, %v6700_v14  ;;  %v8723_v54 = vadd.f32 %v6699_v22, %v8631_v34 }
 0x20e   : > { %v6640_v48 = vpop.f32.mrb[93].mxu0 }
 0x20f   : > { %v6641_v9 = vadd.f32 %v6640_v48, %v6639_v1  ;;  %v6642_v47 = vpop.f32.mrb[94].mxu0  ;;  %v8726_v58 = vadd.f32 %v6702_v2, %v8636_v61 }
 0x210   : > { %v6643_v39 = vpop.f32.mrb[95].mxu0 }
 0x211   : > { %v8729_v42 = vadd.f32 %v6641_v9, %v8628_v63  ;;  %v6644_v30 = vadd.f32 %v6643_v39, %v6642_v47 }
 0x212   : > { %v6703_v43 = vpop.f32.mrb[92].mxu1 }
 0x213   : > { %v8732_v20 = vadd.f32 %v6644_v30, %v8633_v0  ;;  %v6704_v19 = vpop.f32.mrb[93].mxu1 }
 0x214   : > { %v6705_v29 = vadd.f32 %v6704_v19, %v6703_v43  ;;  %v6706_v50 = vpop.f32.mrb[94].mxu1 }
 0x215   : > { %v6645_v13 = vpop.f32.mrb[96].mxu0  ;;  %v6707_v34 = vpop.f32.mrb[95].mxu1 }
 0x216   : > { %v6646_v24 = vpop.f32.mrb[97].mxu0  ;;  %v6708_v27 = vadd.f32 %v6707_v34, %v6706_v50  ;;  %v8735_v38 = vadd.f32 %v6705_v29, %v8642_v41 }
 0x217   : > { %v6647_v61 = vadd.f32 %v6646_v24, %v6645_v13  ;;  %v6648_v51 = vpop.f32.mrb[98].mxu0 }
 0x218   : > { %v6649_v53 = vpop.f32.mrb[99].mxu0  ;;  %v8738_v63 = vadd.f32 %v6708_v27, %v8648_v28 }
 0x219   : > { %v8741_v18 = vadd.f32 %v6647_v61, %v8639_v3  ;;  %v6650_v0 = vadd.f32 %v6649_v53, %v6648_v51 }
 0x21b   : > { %v8744_v11 = vadd.f32 %v6650_v0, %v8645_v4 }
 0x21c   : > { %v6709_v37 = vpop.f32.mrb[96].mxu1 }
 0x21d   : > { %v6710_v6 = vpop.f32.mrb[97].mxu1 }
 0x21e   : > { %v6711_v45 = vadd.f32 %v6710_v6, %v6709_v37  ;;  %v6712_v44 = vpop.f32.mrb[98].mxu1 }
 0x21f   : > { %v6651_v17 = vpop.f32.mrb[100].mxu0  ;;  %v6713_v41 = vpop.f32.mrb[99].mxu1 }
 0x220   : > { %v6652_v23 = vpop.f32.mrb[101].mxu0  ;;  %v6714_v22 = vadd.f32 %v6713_v41, %v6712_v44  ;;  %v8747_v14 = vadd.f32 %v6711_v45, %v8654_v7 }
 0x221   : > { %v6653_v28 = vadd.f32 %v6652_v23, %v6651_v17  ;;  %v6654_v1 = vpop.f32.mrb[102].mxu0 }
 0x222   : > { %v6655_v60 = vpop.f32.mrb[103].mxu0  ;;  %v8750_v3 = vadd.f32 %v6714_v22, %v8660_v21 }
 0x223   : > { %v8753_v4 = vadd.f32 %v6653_v28, %v8651_v49  ;;  %v6656_v48 = vadd.f32 %v6655_v60, %v6654_v1 }
 0x225   : > { %v8756_v2 = vadd.f32 %v6656_v48, %v8657_v10 }
 0x227   : > { %v6715_v9 = vpop.f32.mrb[100].mxu1 }
 0x228   : > { %v6716_v47 = vpop.f32.mrb[101].mxu1 }
 0x229   : > { %v6717_v39 = vadd.f32 %v6716_v47, %v6715_v9  ;;  %v6718_v30 = vpop.f32.mrb[102].mxu1  ;;  %v6657_v43 = vpop.f32.mrb[104].mxu0 }
 0x22a   : > { %v6719_v7 = vpop.f32.mrb[103].mxu1  ;;  %v6658_v19 = vpop.f32.mrb[105].mxu0 }
 0x22b   : > { %v6720_v29 = vadd.f32 %v6719_v7, %v6718_v30  ;;  %v8759_v50 = vadd.f32 %v6717_v39, %v8666_v35  ;;  %v6659_v21 = vadd.f32 %v6658_v19, %v6657_v43  ;;  %v6660_v13 = vpop.f32.mrb[106].mxu0 }
 0x22c   : > { %v6661_v34 = vpop.f32.mrb[107].mxu0 }
 0x22d   : > { %v8762_v49 = vadd.f32 %v6720_v29, %v8672_v8  ;;  %v8765_v10 = vadd.f32 %v6659_v21, %v8663_v32  ;;  %v6662_v24 = vadd.f32 %v6661_v34, %v6660_v13 }
 0x22f   : > { %v8768_v27 = vadd.f32 %v6662_v24, %v8669_v57 }
 0x231   : > { %v6721_v61 = vpop.f32.mrb[104].mxu1 }
 0x232   : > { %v6722_v51 = vpop.f32.mrb[105].mxu1 }
 0x233   : > { %v6723_v53 = vadd.f32 %v6722_v51, %v6721_v61  ;;  %v6724_v0 = vpop.f32.mrb[106].mxu1 }
 0x234   : > { %v6725_v37 = vpop.f32.mrb[107].mxu1 }
 0x235   : > { %v6726_v35 = vadd.f32 %v6725_v37, %v6724_v0  ;;  %v8771_v6 = vadd.f32 %v6723_v53, %v8675_v62 }
 0x237   : > { %v8774_v45 = vadd.f32 %v6726_v35, %v8678_v59 }
 0x239   : > { %v6727_v32 = vpop.f32.mrb[108].mxu1 }
 0x23a   : > { %v6728_v23 = vpop.f32.mrb[109].mxu1 }
 0x23b   : > { %v6663_v8 = vpop.f32.mrb[108].mxu0  ;;  %v6729_v22 = vadd.f32 %v6728_v23, %v6727_v32  ;;  %v6730_v28 = vpop.f32.mrb[110].mxu1 }
 0x23c   : > { %v6664_v44 = vpop.f32.mrb[109].mxu0  ;;  %v6731_v48 = vpop.f32.mrb[111].mxu1 }
 0x23d   : > { %v6665_v17 = vadd.f32 %v6664_v44, %v6663_v8  ;;  %v6666_v41 = vpop.f32.mrb[110].mxu0  ;;  %v6732_v62 = vadd.f32 %v6731_v48, %v6730_v28  ;;  %v8780_v9 = vadd.f32 %v6729_v22, %v8681_v15 }
 0x23e   : > { %v6667_v57 = vpop.f32.mrb[111].mxu0 }
 0x23f   : > { %v8777_v1 = vadd.f32 %v6665_v17, %v8687_v16  ;;  %v6668_v60 = vadd.f32 %v6667_v57, %v6666_v41  ;;  %v8786_v47 = vadd.f32 %v6732_v62, %v8684_v36 }
 0x241   : > { %v8783_v59 = vadd.f32 %v6668_v60, %v8690_v55 }
 0x243   : > { %v6823_v39 = vpop.f32.mrb[112].mxu0 }
 0x244   : > { %v5279_v30 = vadd.f32 %v6823_v39, %v8711_v40  ;;  %v5270_v43 = vpop.f32.mrb[113].mxu0 }
 0x245   : > { %v5271_v7 = vadd.f32 %v5270_v43, %v8699_v56  ;;  %v6824_v16 = vpop.f32.mrb[114].mxu0  ;;  %v6733_v36 = vpop.f32.mrb[112].mxu1 }
 0x246   : > { %v5282_v19 = vadd.f32 %v6824_v16, %v8714_v33  ;;  %v5273_v29 = vpop.f32.mrb[115].mxu0  ;;  %v6734_v21 = vpop.f32.mrb[113].mxu1  ;;  %v5437_v61 = vmul.f32 %v5279_v30, %v5279_v30 }
 0x247   : > { %v5274_v15 = vadd.f32 %v5273_v29, %v8702_v12  ;;  %v5435_v55 = vmul.f32 %v5271_v7, %v5271_v7  ;;  %v6735_v24 = vadd.f32 %v6734_v21, %v6733_v36  ;;  %v6736_v33 = vpop.f32.mrb[114].mxu1 }
 0x248   : > { %v6231_v40 = vpack.c.bf16 %v5282_v19, %v5279_v30  ;;  %v6737_v51 = vpop.f32.mrb[115].mxu1  ;;  %v5438_v12 = vmul.f32 %v5282_v19, %v5282_v19 }
 0x249   : > { %v5397_v13 = vadd.f32 %v5274_v15, %v5271_v7  ;;  %v5436_v56 = vmul.f32 %v5274_v15, %v5274_v15  ;;  %v6226_v34 = vpack.c.bf16 %v5274_v15, %v5271_v7  ;;  %v6738_v35 = vadd.f32 %v6737_v51, %v6736_v33 }
 0x24a   : > { %6318 = vst [vmem:[%s8796_s26 + $0x8] sm:$0xff] %v6231_v40   ;;  %v8802_v8 = vadd.f32 %v6735_v24, %v8693_v52 }
 0x24b   : > { %v5398_v53 = vadd.f32 %v5397_v13, %v5279_v30  ;;  %v5467_v0 = vadd.f32 %v5436_v56, %v5435_v55  ;;  %6227 = vst [vmem:[%s8796_s26] sm:$0xff] %v6226_v34   ;;  %v6827_v37 = vpop.f32.mrb[116].mxu0  ;;  %v8807_v22 = vadd.f32 %v6738_v35, %v8696_v25 }
 0x24c   : > { %v5295_v44 = vadd.f32 %v6827_v37, %v8735_v38  ;;  %v5286_v32 = vpop.f32.mrb[117].mxu0 }
 0x24d   : > { %v5468_v17 = vadd.f32 %v5467_v0, %v5437_v61  ;;  %v5287_v41 = vadd.f32 %v5286_v32, %v8723_v54  ;;  %v5399_v23 = vadd.f32 %v5398_v53, %v5282_v19  ;;  %v6828_v57 = vpop.f32.mrb[118].mxu0  ;;  %v6739_v38 = vpop.f32.mrb[116].mxu1 }
 0x24e   : > { %v5298_v28 = vadd.f32 %v6828_v57, %v8738_v63  ;;  %v5289_v60 = vpop.f32.mrb[119].mxu0  ;;  %v6740_v43 = vpop.f32.mrb[117].mxu1  ;;  %v5441_v36 = vmul.f32 %v5295_v44, %v5295_v44 }
 0x24f   : > { %v5400_v48 = vadd.f32 %v5399_v23, %v5287_v41  ;;  %v5439_v62 = vmul.f32 %v5287_v41, %v5287_v41  ;;  %v5469_v52 = vadd.f32 %v5468_v17, %v5438_v12  ;;  %v5290_v39 = vadd.f32 %v5289_v60, %v8726_v58  ;;  %v6742_v29 = vpop.f32.mrb[118].mxu1 }
 0x250   : > { %v6241_v30 = vpack.c.bf16 %v5298_v28, %v5295_v44  ;;  %v6741_v25 = vadd.f32 %v6740_v43, %v6739_v38  ;;  %v6743_v15 = vpop.f32.mrb[119].mxu1  ;;  %v5442_v13 = vmul.f32 %v5298_v28, %v5298_v28 }
 0x251   : > { %v5470_v7 = vadd.f32 %v5469_v52, %v5439_v62  ;;  %v5401_v54 = vadd.f32 %v5400_v48, %v5290_v39  ;;  %v5440_v16 = vmul.f32 %v5290_v39, %v5290_v39  ;;  %v6236_v19 = vpack.c.bf16 %v5290_v39, %v5287_v41 }
 0x252   : > { %6320 = vst [vmem:[%s8796_s26 + $0x18] sm:$0xff] %v6241_v30   ;;  %v6744_v21 = vadd.f32 %v6743_v15, %v6742_v29  ;;  %v5182_v34 = vadd.f32 %v6741_v25, %v8705_v26 }
 0x253   : > { %v5402_v63 = vadd.f32 %v5401_v54, %v5295_v44  ;;  %v5471_v55 = vadd.f32 %v5470_v7, %v5440_v16  ;;  %6319 = vst [vmem:[%s8796_s26 + $0x10] sm:$0xff] %v6236_v19   ;;  %v6831_v40 = vpop.f32.mrb[120].mxu0 }
 0x254   : > { %v5311_v58 = vadd.f32 %v6831_v40, %v8759_v50  ;;  %v5302_v56 = vpop.f32.mrb[121].mxu0  ;;  %v5185_v53 = vadd.f32 %v6744_v21, %v8708_v31 }
 0x255   : > { %v5472_v24 = vadd.f32 %v5471_v55, %v5441_v36  ;;  %v5303_v33 = vadd.f32 %v5302_v56, %v8747_v14  ;;  %v5403_v61 = vadd.f32 %v5402_v63, %v5298_v28  ;;  %v6832_v51 = vpop.f32.mrb[122].mxu0 }
 0x256   : > { %v5314_v0 = vadd.f32 %v6832_v51, %v8762_v49  ;;  %v5305_v37 = vpop.f32.mrb[123].mxu0  ;;  %v5445_v28 = vmul.f32 %v5311_v58, %v5311_v58 }
 0x257   : > { %v5404_v35 = vadd.f32 %v5403_v61, %v5303_v33  ;;  %v5443_v12 = vmul.f32 %v5303_v33, %v5303_v33  ;;  %v5473_v44 = vadd.f32 %v5472_v24, %v5442_v13  ;;  %v5306_v50 = vadd.f32 %v5305_v37, %v8750_v3  ;;  %v6745_v14 = vpop.f32.mrb[120].mxu1 }
 0x258   : > { %v6251_v32 = vpack.c.bf16 %v5314_v0, %v5311_v58  ;;  %v6746_v57 = vpop.f32.mrb[121].mxu1  ;;  %v5446_v52 = vmul.f32 %v5314_v0, %v5314_v0 }
 0x259   : > { %v5474_v17 = vadd.f32 %v5473_v44, %v5443_v12  ;;  %v5405_v26 = vadd.f32 %v5404_v35, %v5306_v50  ;;  %v5444_v41 = vmul.f32 %v5306_v50, %v5306_v50  ;;  %v6246_v23 = vpack.c.bf16 %v5306_v50, %v5303_v33  ;;  %v6748_v62 = vpop.f32.mrb[122].mxu1 }
 0x25a   : > { %6322 = vst [vmem:[%s8796_s26 + $0x28] sm:$0xff] %v6251_v32   ;;  %v6747_v48 = vadd.f32 %v6746_v57, %v6745_v14  ;;  %v6749_v3 = vpop.f32.mrb[123].mxu1 }
 0x25b   : > { %v5406_v60 = vadd.f32 %v5405_v26, %v5311_v58  ;;  %v5475_v31 = vadd.f32 %v5474_v17, %v5444_v41  ;;  %6321 = vst [vmem:[%s8796_s26 + $0x20] sm:$0xff] %v6246_v23   ;;  %v6835_v49 = vpop.f32.mrb[124].mxu0  ;;  %v6750_v16 = vadd.f32 %v6749_v3, %v6748_v62 }
 0x25c   : > { %v5327_v39 = vadd.f32 %v6835_v49, %v8780_v9  ;;  %v5318_v38 = vpop.f32.mrb[125].mxu0  ;;  %v5190_v25 = vadd.f32 %v6747_v48, %v8717_v5 }
 0x25d   : > { %v5476_v30 = vadd.f32 %v5475_v31, %v5445_v28  ;;  %v5319_v43 = vadd.f32 %v5318_v38, %v8771_v6  ;;  %v5407_v7 = vadd.f32 %v5406_v60, %v5314_v0  ;;  %v6836_v54 = vpop.f32.mrb[126].mxu0  ;;  %v5193_v40 = vadd.f32 %v6750_v16, %v8720_v46 }
 0x25e   : > { %v5330_v19 = vadd.f32 %v6836_v54, %v8786_v47  ;;  %v5321_v29 = vpop.f32.mrb[127].mxu0  ;;  %v5449_v24 = vmul.f32 %v5327_v39, %v5327_v39 }
 0x25f   : > { %v5408_v15 = vadd.f32 %v5407_v7, %v5319_v43  ;;  %v5447_v36 = vmul.f32 %v5319_v43, %v5319_v43  ;;  %v5477_v63 = vadd.f32 %v5476_v30, %v5446_v52  ;;  %v5322_v9 = vadd.f32 %v5321_v29, %v8774_v45 }
 0x260   : > { %v6261_v55 = vpack.c.bf16 %v5330_v19, %v5327_v39  ;;  %v6751_v56 = vpop.f32.mrb[124].mxu1  ;;  %v5450_v45 = vmul.f32 %v5330_v19, %v5330_v19 }
 0x261   : > { %v5478_v21 = vadd.f32 %v5477_v63, %v5447_v36  ;;  %v5409_v6 = vadd.f32 %v5408_v15, %v5322_v9  ;;  %v5448_v13 = vmul.f32 %v5322_v9, %v5322_v9  ;;  %v6256_v58 = vpack.c.bf16 %v5322_v9, %v5319_v43  ;;  %v6752_v61 = vpop.f32.mrb[125].mxu1 }
 0x262   : > { %6324 = vst [vmem:[%s8796_s26 + $0x38] sm:$0xff] %v6261_v55   ;;  %v6753_v0 = vadd.f32 %v6752_v61, %v6751_v56  ;;  %v6754_v35 = vpop.f32.mrb[126].mxu1 }
 0x263   : > { %v5410_v47 = vadd.f32 %v5409_v6, %v5327_v39  ;;  %v5479_v33 = vadd.f32 %v5478_v21, %v5448_v13  ;;  %6323 = vst [vmem:[%s8796_s26 + $0x30] sm:$0xff] %v6256_v58   ;;  %v6839_v5 = vpop.f32.mrb[128].mxu0  ;;  %v6755_v32 = vpop.f32.mrb[127].mxu1 }
 0x264   : > { %v5343_v51 = vadd.f32 %v6839_v5, %v5182_v34  ;;  %v5334_v37 = vpop.f32.mrb[129].mxu0  ;;  %v6756_v26 = vadd.f32 %v6755_v32, %v6754_v35  ;;  %v5198_v23 = vadd.f32 %v6753_v0, %v8729_v42 }
 0x265   : > { %v5480_v12 = vadd.f32 %v5479_v33, %v5449_v24  ;;  %v5335_v46 = vadd.f32 %v5334_v37, %v8802_v8  ;;  %v5411_v44 = vadd.f32 %v5410_v47, %v5330_v19  ;;  %v6840_v50 = vpop.f32.mrb[130].mxu0 }
 0x266   : > { %v5346_v17 = vadd.f32 %v6840_v50, %v5185_v53  ;;  %v5337_v41 = vpop.f32.mrb[131].mxu0  ;;  %v5201_v31 = vadd.f32 %v6756_v26, %v8732_v20  ;;  %v5453_v52 = vmul.f32 %v5343_v51, %v5343_v51 }
 0x267   : > { %v5412_v14 = vadd.f32 %v5411_v44, %v5335_v46  ;;  %v5451_v57 = vmul.f32 %v5335_v46, %v5335_v46  ;;  %v5481_v34 = vadd.f32 %v5480_v12, %v5450_v45  ;;  %v5338_v28 = vadd.f32 %v5337_v41, %v8807_v22 }
 0x268   : > { %v6271_v60 = vpack.c.bf16 %v5346_v17, %v5343_v51  ;;  %v5454_v43 = vmul.f32 %v5346_v17, %v5346_v17 }
 0x269   : > { %v5482_v49 = vadd.f32 %v5481_v34, %v5451_v57  ;;  %v5413_v8 = vadd.f32 %v5412_v14, %v5338_v28  ;;  %v5452_v48 = vmul.f32 %v5338_v28, %v5338_v28  ;;  %v6266_v62 = vpack.c.bf16 %v5338_v28, %v5335_v46 }
 0x26a   : > { %6326 = vst [vmem:[%s8796_s26 + $0x48] sm:$0xff] %v6271_v60   ;;  %v6757_v3 = vpop.f32.mrb[128].mxu1 }
 0x26b   : > { %v5414_v53 = vadd.f32 %v5413_v8, %v5343_v51  ;;  %v5483_v39 = vadd.f32 %v5482_v49, %v5452_v48  ;;  %6325 = vst [vmem:[%s8796_s26 + $0x40] sm:$0xff] %v6266_v62   ;;  %v6843_v38 = vpop.f32.mrb[132].mxu0  ;;  %v6758_v54 = vpop.f32.mrb[129].mxu1 }
 0x26c   : > { %v5359_v42 = vadd.f32 %v6843_v38, %v5198_v23  ;;  %v5350_v30 = vpop.f32.mrb[133].mxu0  ;;  %v6759_v20 = vadd.f32 %v6758_v54, %v6757_v3  ;;  %v6760_v29 = vpop.f32.mrb[130].mxu1 }
 0x26d   : > { %v5484_v7 = vadd.f32 %v5483_v39, %v5453_v52  ;;  %v5351_v22 = vadd.f32 %v5350_v30, %v5190_v25  ;;  %v5415_v16 = vadd.f32 %v5414_v53, %v5346_v17  ;;  %v6844_v19 = vpop.f32.mrb[134].mxu0  ;;  %v6761_v21 = vpop.f32.mrb[131].mxu1 }
 0x26e   : > { %v5362_v15 = vadd.f32 %v6844_v19, %v5201_v31  ;;  %v5353_v36 = vpop.f32.mrb[135].mxu0  ;;  %v6762_v58 = vadd.f32 %v6761_v21, %v6760_v29  ;;  %v5206_v56 = vadd.f32 %v6759_v20, %v8741_v18  ;;  %v5457_v61 = vmul.f32 %v5359_v42, %v5359_v42 }
 0x26f   : > { %v5416_v63 = vadd.f32 %v5415_v16, %v5351_v22  ;;  %v5455_v9 = vmul.f32 %v5351_v22, %v5351_v22  ;;  %v5485_v55 = vadd.f32 %v5484_v7, %v5454_v43  ;;  %v5354_v6 = vadd.f32 %v5353_v36, %v5193_v40 }
 0x270   : > { %v6281_v13 = vpack.c.bf16 %v5362_v15, %v5359_v42  ;;  %v5209_v5 = vadd.f32 %v6762_v58, %v8744_v11  ;;  %v5458_v12 = vmul.f32 %v5362_v15, %v5362_v15 }
 0x271   : > { %v5486_v24 = vadd.f32 %v5485_v55, %v5455_v9  ;;  %v5417_v47 = vadd.f32 %v5416_v63, %v5354_v6  ;;  %v5456_v25 = vmul.f32 %v5354_v6, %v5354_v6  ;;  %v6276_v33 = vpack.c.bf16 %v5354_v6, %v5351_v22 }
 0x272   : > { %6328 = vst [vmem:[%s8796_s26 + $0x58] sm:$0xff] %v6281_v13   ;;  %v6763_v35 = vpop.f32.mrb[132].mxu1 }
 0x273   : > { %v5418_v51 = vadd.f32 %v5417_v47, %v5359_v42  ;;  %v5487_v0 = vadd.f32 %v5486_v24, %v5456_v25  ;;  %6327 = vst [vmem:[%s8796_s26 + $0x50] sm:$0xff] %v6276_v33   ;;  %v6847_v37 = vpop.f32.mrb[136].mxu0  ;;  %v6764_v46 = vpop.f32.mrb[133].mxu1 }
 0x274   : > { %v5366_v45 = vpop.f32.mrb[137].mxu0  ;;  %v6765_v32 = vadd.f32 %v6764_v46, %v6763_v35  ;;  %v6766_v17 = vpop.f32.mrb[134].mxu1 }
 0x275   : > { %v5488_v40 = vadd.f32 %v5487_v0, %v5457_v61  ;;  %v5367_v44 = vadd.f32 %v5366_v45, %v5206_v56  ;;  %v5419_v50 = vadd.f32 %v5418_v51, %v5362_v15  ;;  %v6848_v18 = vpop.f32.mrb[138].mxu0  ;;  %v6767_v14 = vpop.f32.mrb[135].mxu1 }
 0x276   : > { %v5369_v26 = vpop.f32.mrb[139].mxu0  ;;  %v5214_v34 = vadd.f32 %v6765_v32, %v8753_v4  ;;  %v6768_v28 = vadd.f32 %v6767_v14, %v6766_v17 }
 0x277   : > { %v5420_v41 = vadd.f32 %v5419_v50, %v5367_v44  ;;  %v5459_v23 = vmul.f32 %v5367_v44, %v5367_v44  ;;  %v5489_v11 = vadd.f32 %v5488_v40, %v5458_v12  ;;  %v5370_v57 = vadd.f32 %v5369_v26, %v5209_v5 }
 0x278   : > { %v5375_v48 = vadd.f32 %v6847_v37, %v5214_v34  ;;  %v5217_v62 = vadd.f32 %v6768_v28, %v8756_v2 }
 0x279   : > { %v5490_v60 = vadd.f32 %v5489_v11, %v5459_v23  ;;  %v5421_v31 = vadd.f32 %v5420_v41, %v5370_v57  ;;  %v5460_v49 = vmul.f32 %v5370_v57, %v5370_v57  ;;  %v6286_v8 = vpack.c.bf16 %v5370_v57, %v5367_v44 }
 0x27a   : > { %v5461_v53 = vmul.f32 %v5375_v48, %v5375_v48  ;;  %v5378_v39 = vadd.f32 %v6848_v18, %v5217_v62 }
 0x27b   : > { %v5491_v52 = vadd.f32 %v5490_v60, %v5460_v49  ;;  %6329 = vst [vmem:[%s8796_s26 + $0x60] sm:$0xff] %v6286_v8   ;;  %v5422_v38 = vadd.f32 %v5421_v31, %v5375_v48  ;;  %v6769_v3 = vpop.f32.mrb[136].mxu1 }
 0x27c   : > { %v5462_v42 = vmul.f32 %v5378_v39, %v5378_v39  ;;  %v6291_v30 = vpack.c.bf16 %v5378_v39, %v5375_v48  ;;  %v6770_v7 = vpop.f32.mrb[137].mxu1 }
 0x27d   : > { %v5492_v43 = vadd.f32 %v5491_v52, %v5461_v53  ;;  %v5423_v4 = vadd.f32 %v5422_v38, %v5378_v39  ;;  %v6771_v54 = vadd.f32 %v6770_v7, %v6769_v3  ;;  %v6772_v22 = vpop.f32.mrb[138].mxu1 }
 0x27e   : > { %6330 = vst [vmem:[%s8796_s26 + $0x68] sm:$0xff] %v6291_v30   ;;  %v6773_v16 = vpop.f32.mrb[139].mxu1 }
 0x27f   : > { %v5493_v19 = vadd.f32 %v5492_v43, %v5462_v42  ;;  %v6774_v20 = vadd.f32 %v6773_v16, %v6772_v22  ;;  %v5222_v2 = vadd.f32 %v6771_v54, %v8765_v10 }
 0x281   : > { %v6851_v29 = vpop.f32.mrb[140].mxu0  ;;  %v5225_v15 = vadd.f32 %v6774_v20, %v8768_v27 }
 0x282   : > { %v5382_v36 = vpop.f32.mrb[141].mxu0 }
 0x283   : > { %v5383_v63 = vadd.f32 %v5382_v36, %v5222_v2  ;;  %v6852_v9 = vpop.f32.mrb[142].mxu0 }
 0x284   : > { %v5385_v55 = vpop.f32.mrb[143].mxu0 }
 0x285   : > { %v5424_v21 = vadd.f32 %v5423_v4, %v5383_v63  ;;  %v5463_v6 = vmul.f32 %v5383_v63, %v5383_v63  ;;  %v5386_v13 = vadd.f32 %v5385_v55, %v5225_v15 }
 0x287   : > { %v5494_v58 = vadd.f32 %v5493_v19, %v5463_v6  ;;  %v5425_v56 = vadd.f32 %v5424_v21, %v5386_v13  ;;  %v5464_v24 = vmul.f32 %v5386_v13, %v5386_v13  ;;  %v6296_v47 = vpack.c.bf16 %v5386_v13, %v5383_v63 }
 0x289   : > { %v5495_v25 = vadd.f32 %v5494_v58, %v5464_v24  ;;  %6331 = vst [vmem:[%s8796_s26 + $0x70] sm:$0xff] %v6296_v47  }
 0x28b   : > { %v6775_v33 = vpop.f32.mrb[140].mxu1 }
 0x28c   : > { %v6776_v5 = vpop.f32.mrb[141].mxu1 }
 0x28d   : > { %v6777_v61 = vadd.f32 %v6776_v5, %v6775_v33  ;;  %v6778_v10 = vpop.f32.mrb[142].mxu1 }
 0x28e   : > { %v6779_v51 = vpop.f32.mrb[143].mxu1 }
 0x28f   : > { %v5230_v27 = vadd.f32 %v6777_v61, %v8777_v1  ;;  %v6780_v0 = vadd.f32 %v6779_v51, %v6778_v10 }
 0x291   : > { %v5391_v37 = vadd.f32 %v6851_v29, %v5230_v27  ;;  %v5233_v35 = vadd.f32 %v6780_v0, %v8783_v59 }
 0x293   : > { %v5426_v45 = vadd.f32 %v5425_v56, %v5391_v37  ;;  %v5465_v12 = vmul.f32 %v5391_v37, %v5391_v37  ;;  %v5394_v40 = vadd.f32 %v6852_v9, %v5233_v35 }
 0x295   : > { %v5496_v46 = vadd.f32 %v5495_v25, %v5465_v12  ;;  %v5427_v44 = vadd.f32 %v5426_v45, %v5394_v40  ;;  %v5466_v50 = vmul.f32 %v5394_v40, %v5394_v40  ;;  %v6301_v18 = vpack.c.bf16 %v5394_v40, %v5391_v37 }
 0x297   : > { %v5428_v32 = vrot.slane %v5427_v44, 4  ;;  %v5497_v17 = vadd.f32 %v5496_v46, %v5466_v50  ;;  %6332 = vst [vmem:[%s8796_s26 + $0x78] sm:$0xff] %v6301_v18  }
 0x299   : > { %v5429_v26 = vadd.f32 %v5428_v32, %v5427_v44  ;;  %v5498_v41 = vrot.slane %v5497_v17, 4 }
 0x29b   : > { %v5430_v23 = vrot.slane %v5429_v26, 2  ;;  %v5499_v11 = vadd.f32 %v5498_v41, %v5497_v17 }
 0x29d   : > { %v5431_v1 = vadd.f32 %v5430_v23, %v5429_v26  ;;  %v5500_v14 = vrot.slane %v5499_v11, 2 }
 0x29f   : > { %v5432_v57 = vrot.slane %v5431_v1, 1  ;;  %v5501_v34 = vadd.f32 %v5500_v14, %v5499_v11 }
 0x2a1   : > { %v5433_v59 = vadd.f32 %v5432_v57, %v5431_v1  ;;  %v5502_v28 = vrot.slane %v5501_v34, 1 }
 0x2a3   : > { %5434 = vst [vmem:[%s208_s18] sm:$0x1] %v5433_v59  ;;  %v5503_v60 = vadd.f32 %v5502_v28, %v5501_v34 }
 0x2a5   : > { %5504 = vst [vmem:[%s208_s18 + $0x1] sm:$0x1] %v5503_v60 }
 0x2a6 PF: > { %s15_s15 = sadd.s32 1, %s7010_s15  }
 0x2a7   : > { %p12_p4 = scmp.ge.s32.totalorder %s15_s15, 4  }
 0x2a9   :  { %14 = sbr.rel (!%p12_p4) target bundleno = 1 (0x1), region = 77 }

</bundles_post_ra>
